<compile_context>
chip_gen: v7x
topology: tpu7x:2x2x1
jax: 0.10.0
libtpu: 0.0.40
codegen_flags: <defaults>
</compile_context>

<pallas_src>
import functools

import jax
import jax.numpy as jnp
from jax import lax
from jax.experimental import pallas as pl
from jax.experimental.pallas import tpu as pltpu


# ----------------------------------------------------------------------------
# Compiler params (generation-aware VMEM limit)
# ----------------------------------------------------------------------------
@functools.lru_cache(maxsize=None)
def _vmem_limit_bytes():
    try:
        cap = int(pltpu.get_tpu_info().vmem_capacity_bytes)
    except Exception:
        cap = 64 * 1024 * 1024          # conservative fallback (v7x-sized)
    # ~3/4 of physical, capped at 100 MiB -> 48 MiB on v7x, 96 MiB on v5e/v6e.
    return max(32 * 1024 * 1024, min(cap * 3 // 4, 100 * 1024 * 1024))


def _compiler_params():
    return pltpu.CompilerParams(dimension_semantics=("parallel",),
                                vmem_limit_bytes=_vmem_limit_bytes())


# ----------------------------------------------------------------------------
# Kernel 1: [optional BN+ReLU prologue] + conv (shifted matmuls) + BN stats
# ----------------------------------------------------------------------------
def _conv_bn_kernel(*refs, stride, pad, fuse_bn_relu):
    """One image per grid step.

    refs (in order):
      x_ref     : (H, W, Cin)        bf16   input image (raw previous layer)
      w_ref     : (Kh, Kw, Cin, Co)  bf16   conv weight
      [aff_ref] : (2, Cin)           f32    [scale; shift] for fused BN+ReLU
      raw_ref   : (Ho, Wo, Co)       bf16   raw (pre-BN) conv output
      stats_ref : (2, Co)            f32    per-image [sum; sum_of_squares]
      xpad_ref  : (Hp*Wp, Cin)       bf16   VMEM scratch (padded, flattened)
    """
    if fuse_bn_relu:
        x_ref, w_ref, aff_ref, raw_ref, stats_ref, xpad_ref = refs
    else:
        x_ref, w_ref, raw_ref, stats_ref, xpad_ref = refs
        aff_ref = None

    h, w, cin = x_ref.shape
    kh_n, kw_n, _, cout = w_ref.shape
    hp, wp = h + 2 * pad, w + 2 * pad
    ho = (hp - kh_n) // stride + 1
    wo = (wp - kw_n) // stride + 1
    m = (ho - 1) * wp + wo            # flat output rows (incl. garbage cols)

    # ---- prologue: previous layer's BN + ReLU, fused (f32 math) -------------
    xv = x_ref[...]
    if fuse_bn_relu:
        a = aff_ref[...]                                   # (2, Cin) f32
        xv = jnp.maximum(xv.astype(jnp.float32) * a[0] + a[1], 0.0)
    xv = xv.astype(jnp.bfloat16)

    # ---- assemble padded, row-flattened image in VMEM (in-kernel padding) ---
    if pad == 0:
        xpad_ref[...] = xv.reshape(hp * wp, cin)
    else:
        xpad_ref[...] = jnp.zeros((hp * wp, cin), jnp.bfloat16)
        for r in range(h):                                 # static, unrolled
            xpad_ref[pl.ds((r + pad) * wp + pad, w), :] = xv[r]

    # ---- Kh*Kw shifted matmuls: contiguous bf16 slices, f32 accumulation ----
    # No casts / reshapes between taps (MXU-friendly accumulation).
    acc = jnp.zeros((m, cout), jnp.float32)
    for kh in range(kh_n):
        for kw in range(kw_n):
            start = kh * wp + kw
            if stride == 1:
                lhs = xpad_ref[pl.ds(start, m), :]
            else:
                lhs = xpad_ref[pl.ds(start, m, stride), :]
            acc = acc + jnp.dot(lhs, w_ref[kh, kw],
                                preferred_element_type=jnp.float32)

    # ---- extract valid (Ho, Wo) window; emit bf16 raw + f32 partial stats ---
    if ho * wp > m:
        acc = jnp.concatenate(
            [acc, jnp.zeros((ho * wp - m, cout), jnp.float32)], axis=0)
    valid = acc.reshape(ho, wp, cout)[:, :wo, :]           # f32
    raw_ref[...] = valid.astype(raw_ref.dtype)
    s0 = jnp.sum(valid, axis=(0, 1), keepdims=True).reshape(1, cout)
    s1 = jnp.sum(valid * valid, axis=(0, 1), keepdims=True).reshape(1, cout)
    stats_ref[...] = jnp.concatenate([s0, s1], axis=0)     # single (2,Co) store


def conv_bn(x_nhwc, w_kkio, *, stride, pad, aff=None):
    """x_nhwc: (N,H,W,Cin) bf16;  w_kkio: (Kh,Kw,Cin,Co) bf16;  aff: (2,Cin) f32."""
    n, h, w, cin = x_nhwc.shape
    kh, kw, cin_w, cout = w_kkio.shape
    assert cin_w == cin
    hp, wp = h + 2 * pad, w + 2 * pad
    ho = (hp - kh) // stride + 1
    wo = (wp - kw) // stride + 1

    kernel = functools.partial(_conv_bn_kernel, stride=stride, pad=pad,
                               fuse_bn_relu=aff is not None)

    in_specs = [
        pl.BlockSpec((None, h, w, cin), lambda i: (i, 0, 0, 0)),
        pl.BlockSpec((kh, kw, cin, cout), lambda i: (0, 0, 0, 0)),
    ]
    args = [x_nhwc, w_kkio]
    if aff is not None:
        in_specs.append(pl.BlockSpec((2, cin), lambda i: (0, 0)))
        args.append(aff)

    flops = 2 * n * ho * wo * kh * kw * cin * cout
    bytes_accessed = (x_nhwc.size * 2 + w_kkio.size * 2
                      + n * ho * wo * cout * 2 + n * 2 * cout * 4)

    return pl.pallas_call(
        kernel,
        out_shape=(jax.ShapeDtypeStruct((n, ho, wo, cout), jnp.bfloat16),
                   jax.ShapeDtypeStruct((n, 2, cout), jnp.float32)),
        grid=(n,),
        in_specs=in_specs,
        out_specs=(
            pl.BlockSpec((None, ho, wo, cout), lambda i: (i, 0, 0, 0)),
            pl.BlockSpec((None, 2, cout), lambda i: (i, 0, 0)),
        ),
        scratch_shapes=[pltpu.VMEM((hp * wp, cin), jnp.bfloat16)],
        compiler_params=_compiler_params(),
        cost_estimate=pl.CostEstimate(flops=int(flops), transcendentals=0,
                                      bytes_accessed=int(bytes_accessed)),
    )(*args)


# ----------------------------------------------------------------------------
# Kernel 2: fused epilogue  BN(main) [+ BN(shortcut)] + residual add + ReLU
# ----------------------------------------------------------------------------
def _epilogue_kernel(*refs, has_res_aff):
    if has_res_aff:
        raw_ref, res_ref, am_ref, ar_ref, out_ref = refs
    else:
        raw_ref, res_ref, am_ref, out_ref = refs
        ar_ref = None
    am = am_ref[...]
    y = raw_ref[...].astype(jnp.float32) * am[0] + am[1]
    r = res_ref[...].astype(jnp.float32)
    if has_res_aff:
        ar = ar_ref[...]
        r = r * ar[0] + ar[1]
    out_ref[...] = jnp.maximum(y + r, 0.0).astype(out_ref.dtype)


def bn_add_relu(raw, res, aff_main, aff_res=None):
    n, ho, wo, c = raw.shape
    kernel = functools.partial(_epilogue_kernel, has_res_aff=aff_res is not None)
    in_specs = [
        pl.BlockSpec((None, ho, wo, c), lambda i: (i, 0, 0, 0)),
        pl.BlockSpec((None, ho, wo, c), lambda i: (i, 0, 0, 0)),
        pl.BlockSpec((2, c), lambda i: (0, 0)),
    ]
    args = [raw, res, aff_main]
    if aff_res is not None:
        in_specs.append(pl.BlockSpec((2, c), lambda i: (0, 0)))
        args.append(aff_res)
    return pl.pallas_call(
        kernel,
        out_shape=jax.ShapeDtypeStruct((n, ho, wo, c), jnp.float32),
        grid=(n,),
        in_specs=in_specs,
        out_specs=pl.BlockSpec((None, ho, wo, c), lambda i: (i, 0, 0, 0)),
        compiler_params=_compiler_params(),
    )(*args)


# ----------------------------------------------------------------------------
# JAX glue: weight / affine prep and the BasicBlock dataflow
# ----------------------------------------------------------------------------
def _prep_w(w_oihw):
    # (Co, Cin, Kh, Kw) -> (Kh, Kw, Cin, Co) bf16
    return jnp.transpose(w_oihw, (2, 3, 1, 0)).astype(jnp.bfloat16)


def _affine_from_stats(stats, gamma, beta, count, eps):
    # stats: (N, 2, C) partial sums -> per-channel (2, C) [scale; shift].
    # NOTE: E[x^2]-mean^2 variance (clamped); fine at these count scales.
    s = jnp.sum(stats, axis=0)
    mean = s[0] / count
    var = jnp.maximum(s[1] / count - mean * mean, 0.0)      # biased variance
    scale = gamma.astype(jnp.float32) * lax.rsqrt(var + eps)
    shift = beta.astype(jnp.float32) - mean * scale
    return jnp.stack([scale, shift], axis=0)                # (2, C) f32


def basic_block_forward(x_nchw, params, stride=1, eps=1e-5):
    """Pallas implementation of BasicBlock.forward (training-mode BatchNorm)."""
    n, cin, h, w = x_nchw.shape
    cout = params["w1"].shape[0]
    x_nhwc = jnp.transpose(x_nchw, (0, 2, 3, 1)).astype(jnp.bfloat16)

    # conv1 (3x3, stride, pad=1) + BN partial stats
    raw1, st1 = conv_bn(x_nhwc, _prep_w(params["w1"]), stride=stride, pad=1)
    _, ho, wo, _ = raw1.shape
    count = n * ho * wo
    aff1 = _affine_from_stats(st1, params["g1"], params["b1"], count, eps)

    # conv2 (3x3, stride 1, pad=1) with BN1+ReLU fused into its prologue
    raw2, st2 = conv_bn(raw1, _prep_w(params["w2"]), stride=1, pad=1, aff=aff1)
    aff2 = _affine_from_stats(st2, params["g2"], params["b2"], count, eps)

    # shortcut branch + fused epilogue (BN2 [+ BN_s] + add + ReLU)
    if stride != 1 or cin != cout:
        raws, sts = conv_bn(x_nhwc, _prep_w(params["ws"]), stride=stride, pad=0)
        affs = _affine_from_stats(sts, params["gs"], params["bs"], count, eps)
        out = bn_add_relu(raw2, raws, aff2, affs)
    else:
        out = bn_add_relu(raw2, x_nhwc, aff2)        # identity residual (bf16)

    return jnp.transpose(out, (0, 3, 1, 2))          # NHWC -> NCHW, f32


# ----------------------------------------------------------------------------
# Pure-JAX references (PyTorch training-mode semantics) for verification
# ----------------------------------------------------------------------------
def _ref_forward(x, params, stride=1, eps=1e-5, conv_dtype=jnp.float32):
    def conv(v, wgt, s, pad):
        return lax.conv_general_dilated(
            v.astype(conv_dtype), wgt.astype(conv_dtype), (s, s),
            [(pad, pad), (pad, pad)],
            dimension_numbers=("NCHW", "OIHW", "NCHW"),
            preferred_element_type=jnp.float32)

    def bn(v, g, b):
        m = jnp.mean(v, axis=(0, 2, 3), keepdims=True)
        var = jnp.mean((v - m) ** 2, axis=(0, 2, 3), keepdims=True)
        xhat = (v - m) * lax.rsqrt(var + eps)
        return xhat * g.reshape(1, -1, 1, 1) + b.reshape(1, -1, 1, 1)

    cin, cout = x.shape[1], params["w1"].shape[0]
    y = jax.nn.relu(bn(conv(x, params["w1"], stride, 1),
                       params["g1"], params["b1"]))
    y = bn(conv(y, params["w2"], 1, 1), params["g2"], params["b2"])
    if stride != 1 or cin != cout:
        sc = bn(conv(x, params["ws"], stride, 0), params["gs"], params["bs"])
    else:
        sc = x
    return jax.nn.relu(y + sc)


# ----------------------------------------------------------------------------
if __name__ == "__main__":
    # in_channels=4, out_channels=8, stride=1 -> projection shortcut active.
    N, Cin, Cout, H, W, STRIDE = 2, 4, 8, 16, 16, 1

    key = jax.random.PRNGKey(0)
    ks = jax.random.split(key, 10)
    params = {
        "w1": 0.1 * jax.random.normal(ks[0], (Cout, Cin, 3, 3), jnp.float32),
        "g1": 1.0 + 0.1 * jax.random.normal(ks[1], (Cout,), jnp.float32),
        "b1": 0.1 * jax.random.normal(ks[2], (Cout,), jnp.float32),
        "w2": 0.1 * jax.random.normal(ks[3], (Cout, Cout, 3, 3), jnp.float32),
        "g2": 1.0 + 0.1 * jax.random.normal(ks[4], (Cout,), jnp.float32),
        "b2": 0.1 * jax.random.normal(ks[5], (Cout,), jnp.float32),
        "ws": 0.1 * jax.random.normal(ks[6], (Cout, Cin, 1, 1), jnp.float32),
        "gs": 1.0 + 0.1 * jax.random.normal(ks[7], (Cout,), jnp.float32),
        "bs": 0.1 * jax.random.normal(ks[8], (Cout,), jnp.float32),
    }
    x = jax.random.normal(ks[9], (N, Cin, H, W), jnp.float32)

    fwd = jax.jit(basic_block_forward, static_argnames=("stride",))
    out = jax.block_until_ready(fwd(x, params, stride=STRIDE))
    assert out.shape == (N, Cout, H, W)

    # Accuracy contract: bf16 MXU operands and bf16 raw intermediates,
    # f32 accumulation / BN statistics.
    ref_bf16 = jax.block_until_ready(
        _ref_forward(x, params, stride=STRIDE, conv_dtype=jnp.bfloat16))
    err_b = float(jnp.max(jnp.abs(out - ref_bf16)))
    assert jnp.allclose(out, ref_bf16, atol=7.5e-2, rtol=7.5e-2), (
        f"mismatch vs bf16-conv reference, max abs diff = {err_b}")

    ref_f32 = jax.block_until_ready(
        _ref_forward(x, params, stride=STRIDE, conv_dtype=jnp.float32))
    err_f = float(jnp.max(jnp.abs(out - ref_f32)))
    assert jnp.allclose(out, ref_f32, atol=1.5e-1, rtol=1.5e-1), (
        f"mismatch vs f32 reference, max abs diff = {err_f}")

    print("KERNEL_OK")
</pallas_src>

<mosaic_0001>
module attributes {stable_mosaic.version = 11 : i64} {
  func.func @_conv_bn_kernel(%arg0: i32, %arg1: memref<1x16x16x4xbf16, #tpu.memory_space<vmem>>, %arg2: memref<3x3x4x8xbf16, #tpu.memory_space<vmem>>, %arg3: memref<1x16x16x8xbf16, #tpu.memory_space<vmem>>, %arg4: memref<1x2x8xf32, #tpu.memory_space<vmem>>, %arg5: memref<324x4xbf16, #tpu.memory_space<vmem>>) attributes {dimension_semantics = [#tpu.dimension_semantics<parallel>], iteration_bounds = array<i64: 2>, scalar_prefetch = 0 : i64, scratch_operands = 1 : i64, tpu.core_type = #tpu.core_type<tc>, window_params = [{transform_indices = @transform_0, window_bounds = array<i64: 1, 16, 16, 4>}, {pipeline_mode = #tpu.pipeline_mode<synchronous>, transform_indices = @transform_1, window_bounds = array<i64: 3, 3, 4, 8>}, {transform_indices = @transform_2, window_bounds = array<i64: 1, 16, 16, 8>}, {transform_indices = @transform_3, window_bounds = array<i64: 1, 2, 8>}]} {
    %c0 = arith.constant 0 : index
    %c0_0 = arith.constant 0 : index
    %c0_1 = arith.constant 0 : index
    %c0_2 = arith.constant 0 : index
    %0 = vector.load %arg1[%c0, %c0_0, %c0_1, %c0_2] : memref<1x16x16x4xbf16, #tpu.memory_space<vmem>>, vector<1x16x16x4xbf16>
    %1 = vector.shape_cast %0 : vector<1x16x16x4xbf16> to vector<16x16x4xbf16>
    %cst = arith.constant 0.000000e+00 : bf16
    %2 = vector.broadcast %cst : bf16 to vector<324x4xbf16>
    %c0_3 = arith.constant 0 : index
    %c0_4 = arith.constant 0 : index
    %3 = vector.load %arg5[%c0_3, %c0_4] : memref<324x4xbf16, #tpu.memory_space<vmem>>, vector<324x4xbf16>
    tpu.vector_store %arg5[%c0_3, %c0_4], %2 {strides = array<i32>} : memref<324x4xbf16, #tpu.memory_space<vmem>>, vector<324x4xbf16>,
    %4 = vector.extract_strided_slice %1 {offsets = [0, 0, 0], sizes = [1, 16, 4], strides = [1, 1, 1]} : vector<16x16x4xbf16> to vector<1x16x4xbf16>
    %5 = vector.shape_cast %4 : vector<1x16x4xbf16> to vector<16x4xbf16>
    %c19 = arith.constant 19 : index
    %c0_5 = arith.constant 0 : index
    %6 = vector.load %arg5[%c19, %c0_5] : memref<324x4xbf16, #tpu.memory_space<vmem>>, vector<16x4xbf16>
    tpu.vector_store %arg5[%c19, %c0_5], %5 {strides = array<i32>} : memref<324x4xbf16, #tpu.memory_space<vmem>>, vector<16x4xbf16>,
    %7 = vector.extract_strided_slice %1 {offsets = [1, 0, 0], sizes = [1, 16, 4], strides = [1, 1, 1]} : vector<16x16x4xbf16> to vector<1x16x4xbf16>
    %8 = vector.shape_cast %7 : vector<1x16x4xbf16> to vector<16x4xbf16>
    %c37 = arith.constant 37 : index
    %c0_6 = arith.constant 0 : index
    %9 = vector.load %arg5[%c37, %c0_6] : memref<324x4xbf16, #tpu.memory_space<vmem>>, vector<16x4xbf16>
    tpu.vector_store %arg5[%c37, %c0_6], %8 {strides = array<i32>} : memref<324x4xbf16, #tpu.memory_space<vmem>>, vector<16x4xbf16>,
    %10 = vector.extract_strided_slice %1 {offsets = [2, 0, 0], sizes = [1, 16, 4], strides = [1, 1, 1]} : vector<16x16x4xbf16> to vector<1x16x4xbf16>
    %11 = vector.shape_cast %10 : vector<1x16x4xbf16> to vector<16x4xbf16>
    %c55 = arith.constant 55 : index
    %c0_7 = arith.constant 0 : index
    %12 = vector.load %arg5[%c55, %c0_7] : memref<324x4xbf16, #tpu.memory_space<vmem>>, vector<16x4xbf16>
    tpu.vector_store %arg5[%c55, %c0_7], %11 {strides = array<i32>} : memref<324x4xbf16, #tpu.memory_space<vmem>>, vector<16x4xbf16>,
    %13 = vector.extract_strided_slice %1 {offsets = [3, 0, 0], sizes = [1, 16, 4], strides = [1, 1, 1]} : vector<16x16x4xbf16> to vector<1x16x4xbf16>
    %14 = vector.shape_cast %13 : vector<1x16x4xbf16> to vector<16x4xbf16>
    %c73 = arith.constant 73 : index
    %c0_8 = arith.constant 0 : index
    %15 = vector.load %arg5[%c73, %c0_8] : memref<324x4xbf16, #tpu.memory_space<vmem>>, vector<16x4xbf16>
    tpu.vector_store %arg5[%c73, %c0_8], %14 {strides = array<i32>} : memref<324x4xbf16, #tpu.memory_space<vmem>>, vector<16x4xbf16>,
    %16 = vector.extract_strided_slice %1 {offsets = [4, 0, 0], sizes = [1, 16, 4], strides = [1, 1, 1]} : vector<16x16x4xbf16> to vector<1x16x4xbf16>
    %17 = vector.shape_cast %16 : vector<1x16x4xbf16> to vector<16x4xbf16>
    %c91 = arith.constant 91 : index
    %c0_9 = arith.constant 0 : index
    %18 = vector.load %arg5[%c91, %c0_9] : memref<324x4xbf16, #tpu.memory_space<vmem>>, vector<16x4xbf16>
    tpu.vector_store %arg5[%c91, %c0_9], %17 {strides = array<i32>} : memref<324x4xbf16, #tpu.memory_space<vmem>>, vector<16x4xbf16>,
    %19 = vector.extract_strided_slice %1 {offsets = [5, 0, 0], sizes = [1, 16, 4], strides = [1, 1, 1]} : vector<16x16x4xbf16> to vector<1x16x4xbf16>
    %20 = vector.shape_cast %19 : vector<1x16x4xbf16> to vector<16x4xbf16>
    %c109 = arith.constant 109 : index
    %c0_10 = arith.constant 0 : index
    %21 = vector.load %arg5[%c109, %c0_10] : memref<324x4xbf16, #tpu.memory_space<vmem>>, vector<16x4xbf16>
    tpu.vector_store %arg5[%c109, %c0_10], %20 {strides = array<i32>} : memref<324x4xbf16, #tpu.memory_space<vmem>>, vector<16x4xbf16>,
    %22 = vector.extract_strided_slice %1 {offsets = [6, 0, 0], sizes = [1, 16, 4], strides = [1, 1, 1]} : vector<16x16x4xbf16> to vector<1x16x4xbf16>
    %23 = vector.shape_cast %22 : vector<1x16x4xbf16> to vector<16x4xbf16>
    %c127 = arith.constant 127 : index
    %c0_11 = arith.constant 0 : index
    %24 = vector.load %arg5[%c127, %c0_11] : memref<324x4xbf16, #tpu.memory_space<vmem>>, vector<16x4xbf16>
    tpu.vector_store %arg5[%c127, %c0_11], %23 {strides = array<i32>} : memref<324x4xbf16, #tpu.memory_space<vmem>>, vector<16x4xbf16>,
    %25 = vector.extract_strided_slice %1 {offsets = [7, 0, 0], sizes = [1, 16, 4], strides = [1, 1, 1]} : vector<16x16x4xbf16> to vector<1x16x4xbf16>
    %26 = vector.shape_cast %25 : vector<1x16x4xbf16> to vector<16x4xbf16>
    %c145 = arith.constant 145 : index
    %c0_12 = arith.constant 0 : index
    %27 = vector.load %arg5[%c145, %c0_12] : memref<324x4xbf16, #tpu.memory_space<vmem>>, vector<16x4xbf16>
    tpu.vector_store %arg5[%c145, %c0_12], %26 {strides = array<i32>} : memref<324x4xbf16, #tpu.memory_space<vmem>>, vector<16x4xbf16>,
    %28 = vector.extract_strided_slice %1 {offsets = [8, 0, 0], sizes = [1, 16, 4], strides = [1, 1, 1]} : vector<16x16x4xbf16> to vector<1x16x4xbf16>
    %29 = vector.shape_cast %28 : vector<1x16x4xbf16> to vector<16x4xbf16>
    %c163 = arith.constant 163 : index
    %c0_13 = arith.constant 0 : index
    %30 = vector.load %arg5[%c163, %c0_13] : memref<324x4xbf16, #tpu.memory_space<vmem>>, vector<16x4xbf16>
    tpu.vector_store %arg5[%c163, %c0_13], %29 {strides = array<i32>} : memref<324x4xbf16, #tpu.memory_space<vmem>>, vector<16x4xbf16>,
    %31 = vector.extract_strided_slice %1 {offsets = [9, 0, 0], sizes = [1, 16, 4], strides = [1, 1, 1]} : vector<16x16x4xbf16> to vector<1x16x4xbf16>
    %32 = vector.shape_cast %31 : vector<1x16x4xbf16> to vector<16x4xbf16>
    %c181 = arith.constant 181 : index
    %c0_14 = arith.constant 0 : index
    %33 = vector.load %arg5[%c181, %c0_14] : memref<324x4xbf16, #tpu.memory_space<vmem>>, vector<16x4xbf16>
    tpu.vector_store %arg5[%c181, %c0_14], %32 {strides = array<i32>} : memref<324x4xbf16, #tpu.memory_space<vmem>>, vector<16x4xbf16>,
    %34 = vector.extract_strided_slice %1 {offsets = [10, 0, 0], sizes = [1, 16, 4], strides = [1, 1, 1]} : vector<16x16x4xbf16> to vector<1x16x4xbf16>
    %35 = vector.shape_cast %34 : vector<1x16x4xbf16> to vector<16x4xbf16>
    %c199 = arith.constant 199 : index
    %c0_15 = arith.constant 0 : index
    %36 = vector.load %arg5[%c199, %c0_15] : memref<324x4xbf16, #tpu.memory_space<vmem>>, vector<16x4xbf16>
    tpu.vector_store %arg5[%c199, %c0_15], %35 {strides = array<i32>} : memref<324x4xbf16, #tpu.memory_space<vmem>>, vector<16x4xbf16>,
    %37 = vector.extract_strided_slice %1 {offsets = [11, 0, 0], sizes = [1, 16, 4], strides = [1, 1, 1]} : vector<16x16x4xbf16> to vector<1x16x4xbf16>
    %38 = vector.shape_cast %37 : vector<1x16x4xbf16> to vector<16x4xbf16>
    %c217 = arith.constant 217 : index
    %c0_16 = arith.constant 0 : index
    %39 = vector.load %arg5[%c217, %c0_16] : memref<324x4xbf16, #tpu.memory_space<vmem>>, vector<16x4xbf16>
    tpu.vector_store %arg5[%c217, %c0_16], %38 {strides = array<i32>} : memref<324x4xbf16, #tpu.memory_space<vmem>>, vector<16x4xbf16>,
    %40 = vector.extract_strided_slice %1 {offsets = [12, 0, 0], sizes = [1, 16, 4], strides = [1, 1, 1]} : vector<16x16x4xbf16> to vector<1x16x4xbf16>
    %41 = vector.shape_cast %40 : vector<1x16x4xbf16> to vector<16x4xbf16>
    %c235 = arith.constant 235 : index
    %c0_17 = arith.constant 0 : index
    %42 = vector.load %arg5[%c235, %c0_17] : memref<324x4xbf16, #tpu.memory_space<vmem>>, vector<16x4xbf16>
    tpu.vector_store %arg5[%c235, %c0_17], %41 {strides = array<i32>} : memref<324x4xbf16, #tpu.memory_space<vmem>>, vector<16x4xbf16>,
    %43 = vector.extract_strided_slice %1 {offsets = [13, 0, 0], sizes = [1, 16, 4], strides = [1, 1, 1]} : vector<16x16x4xbf16> to vector<1x16x4xbf16>
    %44 = vector.shape_cast %43 : vector<1x16x4xbf16> to vector<16x4xbf16>
    %c253 = arith.constant 253 : index
    %c0_18 = arith.constant 0 : index
    %45 = vector.load %arg5[%c253, %c0_18] : memref<324x4xbf16, #tpu.memory_space<vmem>>, vector<16x4xbf16>
    tpu.vector_store %arg5[%c253, %c0_18], %44 {strides = array<i32>} : memref<324x4xbf16, #tpu.memory_space<vmem>>, vector<16x4xbf16>,
    %46 = vector.extract_strided_slice %1 {offsets = [14, 0, 0], sizes = [1, 16, 4], strides = [1, 1, 1]} : vector<16x16x4xbf16> to vector<1x16x4xbf16>
    %47 = vector.shape_cast %46 : vector<1x16x4xbf16> to vector<16x4xbf16>
    %c271 = arith.constant 271 : index
    %c0_19 = arith.constant 0 : index
    %48 = vector.load %arg5[%c271, %c0_19] : memref<324x4xbf16, #tpu.memory_space<vmem>>, vector<16x4xbf16>
    tpu.vector_store %arg5[%c271, %c0_19], %47 {strides = array<i32>} : memref<324x4xbf16, #tpu.memory_space<vmem>>, vector<16x4xbf16>,
    %49 = vector.extract_strided_slice %1 {offsets = [15, 0, 0], sizes = [1, 16, 4], strides = [1, 1, 1]} : vector<16x16x4xbf16> to vector<1x16x4xbf16>
    %50 = vector.shape_cast %49 : vector<1x16x4xbf16> to vector<16x4xbf16>
    %c289 = arith.constant 289 : index
    %c0_20 = arith.constant 0 : index
    %51 = vector.load %arg5[%c289, %c0_20] : memref<324x4xbf16, #tpu.memory_space<vmem>>, vector<16x4xbf16>
    tpu.vector_store %arg5[%c289, %c0_20], %50 {strides = array<i32>} : memref<324x4xbf16, #tpu.memory_space<vmem>>, vector<16x4xbf16>,
    %cst_21 = arith.constant 0.000000e+00 : f32
    %52 = vector.broadcast %cst_21 : f32 to vector<286x8xf32>
    %c0_22 = arith.constant 0 : index
    %c0_23 = arith.constant 0 : index
    %53 = vector.load %arg5[%c0_22, %c0_23] : memref<324x4xbf16, #tpu.memory_space<vmem>>, vector<286x4xbf16>
    %c0_24 = arith.constant 0 : index
    %c0_25 = arith.constant 0 : index
    %c0_26 = arith.constant 0 : index
    %c0_27 = arith.constant 0 : index
    %54 = vector.load %arg2[%c0_24, %c0_25, %c0_26, %c0_27] : memref<3x3x4x8xbf16, #tpu.memory_space<vmem>>, vector<1x1x4x8xbf16>
    %55 = vector.shape_cast %54 : vector<1x1x4x8xbf16> to vector<4x8xbf16>
    %cst_28 = arith.constant dense<0.000000e+00> : vector<286x8xf32>
    %56 = tpu.matmul %53, %55, %cst_28 {dimension_numbers = #tpu.dot_dimension_numbers<[1], [0], [0], [1], [0, 0, 1, 1], [], []>} : vector<286x4xbf16>, vector<4x8xbf16>, vector<286x8xf32> -> vector<286x8xf32>
    %57 = arith.addf %52, %56 : vector<286x8xf32>
    %c1 = arith.constant 1 : index
    %c0_29 = arith.constant 0 : index
    %58 = vector.load %arg5[%c1, %c0_29] : memref<324x4xbf16, #tpu.memory_space<vmem>>, vector<286x4xbf16>
    %c0_30 = arith.constant 0 : index
    %c1_31 = arith.constant 1 : index
    %c0_32 = arith.constant 0 : index
    %c0_33 = arith.constant 0 : index
    %59 = vector.load %arg2[%c0_30, %c1_31, %c0_32, %c0_33] : memref<3x3x4x8xbf16, #tpu.memory_space<vmem>>, vector<1x1x4x8xbf16>
    %60 = vector.shape_cast %59 : vector<1x1x4x8xbf16> to vector<4x8xbf16>
    %cst_34 = arith.constant dense<0.000000e+00> : vector<286x8xf32>
    %61 = tpu.matmul %58, %60, %cst_34 {dimension_numbers = #tpu.dot_dimension_numbers<[1], [0], [0], [1], [0, 0, 1, 1], [], []>} : vector<286x4xbf16>, vector<4x8xbf16>, vector<286x8xf32> -> vector<286x8xf32>
    %62 = arith.addf %57, %61 : vector<286x8xf32>
    %c2 = arith.constant 2 : index
    %c0_35 = arith.constant 0 : index
    %63 = vector.load %arg5[%c2, %c0_35] : memref<324x4xbf16, #tpu.memory_space<vmem>>, vector<286x4xbf16>
    %c0_36 = arith.constant 0 : index
    %c2_37 = arith.constant 2 : index
    %c0_38 = arith.constant 0 : index
    %c0_39 = arith.constant 0 : index
    %64 = vector.load %arg2[%c0_36, %c2_37, %c0_38, %c0_39] : memref<3x3x4x8xbf16, #tpu.memory_space<vmem>>, vector<1x1x4x8xbf16>
    %65 = vector.shape_cast %64 : vector<1x1x4x8xbf16> to vector<4x8xbf16>
    %cst_40 = arith.constant dense<0.000000e+00> : vector<286x8xf32>
    %66 = tpu.matmul %63, %65, %cst_40 {dimension_numbers = #tpu.dot_dimension_numbers<[1], [0], [0], [1], [0, 0, 1, 1], [], []>} : vector<286x4xbf16>, vector<4x8xbf16>, vector<286x8xf32> -> vector<286x8xf32>
    %67 = arith.addf %62, %66 : vector<286x8xf32>
    %c18 = arith.constant 18 : index
    %c0_41 = arith.constant 0 : index
    %68 = vector.load %arg5[%c18, %c0_41] : memref<324x4xbf16, #tpu.memory_space<vmem>>, vector<286x4xbf16>
    %c1_42 = arith.constant 1 : index
    %c0_43 = arith.constant 0 : index
    %c0_44 = arith.constant 0 : index
    %c0_45 = arith.constant 0 : index
    %69 = vector.load %arg2[%c1_42, %c0_43, %c0_44, %c0_45] : memref<3x3x4x8xbf16, #tpu.memory_space<vmem>>, vector<1x1x4x8xbf16>
    %70 = vector.shape_cast %69 : vector<1x1x4x8xbf16> to vector<4x8xbf16>
    %cst_46 = arith.constant dense<0.000000e+00> : vector<286x8xf32>
    %71 = tpu.matmul %68, %70, %cst_46 {dimension_numbers = #tpu.dot_dimension_numbers<[1], [0], [0], [1], [0, 0, 1, 1], [], []>} : vector<286x4xbf16>, vector<4x8xbf16>, vector<286x8xf32> -> vector<286x8xf32>
    %72 = arith.addf %67, %71 : vector<286x8xf32>
    %c19_47 = arith.constant 19 : index
    %c0_48 = arith.constant 0 : index
    %73 = vector.load %arg5[%c19_47, %c0_48] : memref<324x4xbf16, #tpu.memory_space<vmem>>, vector<286x4xbf16>
    %c1_49 = arith.constant 1 : index
    %c1_50 = arith.constant 1 : index
    %c0_51 = arith.constant 0 : index
    %c0_52 = arith.constant 0 : index
    %74 = vector.load %arg2[%c1_49, %c1_50, %c0_51, %c0_52] : memref<3x3x4x8xbf16, #tpu.memory_space<vmem>>, vector<1x1x4x8xbf16>
    %75 = vector.shape_cast %74 : vector<1x1x4x8xbf16> to vector<4x8xbf16>
    %cst_53 = arith.constant dense<0.000000e+00> : vector<286x8xf32>
    %76 = tpu.matmul %73, %75, %cst_53 {dimension_numbers = #tpu.dot_dimension_numbers<[1], [0], [0], [1], [0, 0, 1, 1], [], []>} : vector<286x4xbf16>, vector<4x8xbf16>, vector<286x8xf32> -> vector<286x8xf32>
    %77 = arith.addf %72, %76 : vector<286x8xf32>
    %c20 = arith.constant 20 : index
    %c0_54 = arith.constant 0 : index
    %78 = vector.load %arg5[%c20, %c0_54] : memref<324x4xbf16, #tpu.memory_space<vmem>>, vector<286x4xbf16>
    %c1_55 = arith.constant 1 : index
    %c2_56 = arith.constant 2 : index
    %c0_57 = arith.constant 0 : index
    %c0_58 = arith.constant 0 : index
    %79 = vector.load %arg2[%c1_55, %c2_56, %c0_57, %c0_58] : memref<3x3x4x8xbf16, #tpu.memory_space<vmem>>, vector<1x1x4x8xbf16>
    %80 = vector.shape_cast %79 : vector<1x1x4x8xbf16> to vector<4x8xbf16>
    %cst_59 = arith.constant dense<0.000000e+00> : vector<286x8xf32>
    %81 = tpu.matmul %78, %80, %cst_59 {dimension_numbers = #tpu.dot_dimension_numbers<[1], [0], [0], [1], [0, 0, 1, 1], [], []>} : vector<286x4xbf16>, vector<4x8xbf16>, vector<286x8xf32> -> vector<286x8xf32>
    %82 = arith.addf %77, %81 : vector<286x8xf32>
    %c36 = arith.constant 36 : index
    %c0_60 = arith.constant 0 : index
    %83 = vector.load %arg5[%c36, %c0_60] : memref<324x4xbf16, #tpu.memory_space<vmem>>, vector<286x4xbf16>
    %c2_61 = arith.constant 2 : index
    %c0_62 = arith.constant 0 : index
    %c0_63 = arith.constant 0 : index
    %c0_64 = arith.constant 0 : index
    %84 = vector.load %arg2[%c2_61, %c0_62, %c0_63, %c0_64] : memref<3x3x4x8xbf16, #tpu.memory_space<vmem>>, vector<1x1x4x8xbf16>
    %85 = vector.shape_cast %84 : vector<1x1x4x8xbf16> to vector<4x8xbf16>
    %cst_65 = arith.constant dense<0.000000e+00> : vector<286x8xf32>
    %86 = tpu.matmul %83, %85, %cst_65 {dimension_numbers = #tpu.dot_dimension_numbers<[1], [0], [0], [1], [0, 0, 1, 1], [], []>} : vector<286x4xbf16>, vector<4x8xbf16>, vector<286x8xf32> -> vector<286x8xf32>
    %87 = arith.addf %82, %86 : vector<286x8xf32>
    %c37_66 = arith.constant 37 : index
    %c0_67 = arith.constant 0 : index
    %88 = vector.load %arg5[%c37_66, %c0_67] : memref<324x4xbf16, #tpu.memory_space<vmem>>, vector<286x4xbf16>
    %c2_68 = arith.constant 2 : index
    %c1_69 = arith.constant 1 : index
    %c0_70 = arith.constant 0 : index
    %c0_71 = arith.constant 0 : index
    %89 = vector.load %arg2[%c2_68, %c1_69, %c0_70, %c0_71] : memref<3x3x4x8xbf16, #tpu.memory_space<vmem>>, vector<1x1x4x8xbf16>
    %90 = vector.shape_cast %89 : vector<1x1x4x8xbf16> to vector<4x8xbf16>
    %cst_72 = arith.constant dense<0.000000e+00> : vector<286x8xf32>
    %91 = tpu.matmul %88, %90, %cst_72 {dimension_numbers = #tpu.dot_dimension_numbers<[1], [0], [0], [1], [0, 0, 1, 1], [], []>} : vector<286x4xbf16>, vector<4x8xbf16>, vector<286x8xf32> -> vector<286x8xf32>
    %92 = arith.addf %87, %91 : vector<286x8xf32>
    %c38 = arith.constant 38 : index
    %c0_73 = arith.constant 0 : index
    %93 = vector.load %arg5[%c38, %c0_73] : memref<324x4xbf16, #tpu.memory_space<vmem>>, vector<286x4xbf16>
    %c2_74 = arith.constant 2 : index
    %c2_75 = arith.constant 2 : index
    %c0_76 = arith.constant 0 : index
    %c0_77 = arith.constant 0 : index
    %94 = vector.load %arg2[%c2_74, %c2_75, %c0_76, %c0_77] : memref<3x3x4x8xbf16, #tpu.memory_space<vmem>>, vector<1x1x4x8xbf16>
    %95 = vector.shape_cast %94 : vector<1x1x4x8xbf16> to vector<4x8xbf16>
    %cst_78 = arith.constant dense<0.000000e+00> : vector<286x8xf32>
    %96 = tpu.matmul %93, %95, %cst_78 {dimension_numbers = #tpu.dot_dimension_numbers<[1], [0], [0], [1], [0, 0, 1, 1], [], []>} : vector<286x4xbf16>, vector<4x8xbf16>, vector<286x8xf32> -> vector<286x8xf32>
    %97 = arith.addf %92, %96 : vector<286x8xf32>
    %cst_79 = arith.constant 0.000000e+00 : f32
    %98 = vector.broadcast %cst_79 : f32 to vector<2x8xf32>
    %99 = tpu.concatenate %97, %98 in 0 : vector<286x8xf32>, vector<2x8xf32> -> vector<288x8xf32>
    %100 = vector.shape_cast %99 : vector<288x8xf32> to vector<16x18x8xf32>
    %101 = vector.extract_strided_slice %100 {offsets = [0, 0, 0], sizes = [16, 16, 8], strides = [1, 1, 1]} : vector<16x18x8xf32> to vector<16x16x8xf32>
    %102 = arith.truncf %101 : vector<16x16x8xf32> to vector<16x16x8xbf16>
    %c0_80 = arith.constant 0 : index
    %c0_81 = arith.constant 0 : index
    %c0_82 = arith.constant 0 : index
    %c0_83 = arith.constant 0 : index
    %103 = vector.load %arg3[%c0_80, %c0_81, %c0_82, %c0_83] : memref<1x16x16x8xbf16, #tpu.memory_space<vmem>>, vector<1x16x16x8xbf16>
    %104 = vector.shape_cast %103 : vector<1x16x16x8xbf16> to vector<16x16x8xbf16>
    %105 = vector.shape_cast %102 : vector<16x16x8xbf16> to vector<1x16x16x8xbf16>
    tpu.vector_store %arg3[%c0_80, %c0_81, %c0_82, %c0_83], %105 {strides = array<i32>} : memref<1x16x16x8xbf16, #tpu.memory_space<vmem>>, vector<1x16x16x8xbf16>,
    %cst_84 = arith.constant dense<0.000000e+00> : vector<8xf32>
    %106 = vector.multi_reduction <add>, %101, %cst_84 [0, 1] : vector<16x16x8xf32> to vector<8xf32>
    %107 = vector.shape_cast %106 : vector<8xf32> to vector<1x1x8xf32>
    %108 = vector.shape_cast %107 : vector<1x1x8xf32> to vector<1x8xf32>
    %109 = arith.mulf %101, %101 : vector<16x16x8xf32>
    %cst_85 = arith.constant dense<0.000000e+00> : vector<8xf32>
    %110 = vector.multi_reduction <add>, %109, %cst_85 [0, 1] : vector<16x16x8xf32> to vector<8xf32>
    %111 = vector.shape_cast %110 : vector<8xf32> to vector<1x1x8xf32>
    %112 = vector.shape_cast %111 : vector<1x1x8xf32> to vector<1x8xf32>
    %113 = tpu.concatenate %108, %112 in 0 : vector<1x8xf32>, vector<1x8xf32> -> vector<2x8xf32>
    %c0_86 = arith.constant 0 : index
    %c0_87 = arith.constant 0 : index
    %c0_88 = arith.constant 0 : index
    %114 = vector.load %arg4[%c0_86, %c0_87, %c0_88] : memref<1x2x8xf32, #tpu.memory_space<vmem>>, vector<1x2x8xf32>
    %115 = vector.shape_cast %114 : vector<1x2x8xf32> to vector<2x8xf32>
    %116 = vector.shape_cast %113 : vector<2x8xf32> to vector<1x2x8xf32>
    tpu.vector_store %arg4[%c0_86, %c0_87, %c0_88], %116 {strides = array<i32>} : memref<1x2x8xf32, #tpu.memory_space<vmem>>, vector<1x2x8xf32>,
    return
  }
  func.func @transform_0(%arg0: i32) -> (i32, i32, i32, i32) {
    %c0_i32 = arith.constant 0 : i32
    %c0_i32_0 = arith.constant 0 : i32
    %c0_i32_1 = arith.constant 0 : i32
    %c0_i32_2 = arith.constant 0 : i32
    return %arg0, %c0_i32, %c0_i32_0, %c0_i32_1 : i32, i32, i32, i32
  }
  func.func @transform_1(%arg0: i32) -> (i32, i32, i32, i32) {
    %c0_i32 = arith.constant 0 : i32
    %c0_i32_0 = arith.constant 0 : i32
    %c0_i32_1 = arith.constant 0 : i32
    %c0_i32_2 = arith.constant 0 : i32
    %c0_i32_3 = arith.constant 0 : i32
    return %c0_i32, %c0_i32_0, %c0_i32_1, %c0_i32_2 : i32, i32, i32, i32
  }
  func.func @transform_2(%arg0: i32) -> (i32, i32, i32, i32) {
    %c0_i32 = arith.constant 0 : i32
    %c0_i32_0 = arith.constant 0 : i32
    %c0_i32_1 = arith.constant 0 : i32
    %c0_i32_2 = arith.constant 0 : i32
    return %arg0, %c0_i32, %c0_i32_0, %c0_i32_1 : i32, i32, i32, i32
  }
  func.func @transform_3(%arg0: i32) -> (i32, i32, i32) {
    %c0_i32 = arith.constant 0 : i32
    %c0_i32_0 = arith.constant 0 : i32
    %c0_i32_1 = arith.constant 0 : i32
    return %arg0, %c0_i32, %c0_i32_0 : i32, i32, i32
  }
}

module attributes {stable_mosaic.version = 11 : i64} {
  func.func @_conv_bn_kernel(%arg0: i32, %arg1: memref<1x16x16x4xbf16, #tpu.memory_space<vmem>>, %arg2: memref<1x1x4x8xbf16, #tpu.memory_space<vmem>>, %arg3: memref<1x16x16x8xbf16, #tpu.memory_space<vmem>>, %arg4: memref<1x2x8xf32, #tpu.memory_space<vmem>>, %arg5: memref<256x4xbf16, #tpu.memory_space<vmem>>) attributes {dimension_semantics = [#tpu.dimension_semantics<parallel>], iteration_bounds = array<i64: 2>, scalar_prefetch = 0 : i64, scratch_operands = 1 : i64, tpu.core_type = #tpu.core_type<tc>, window_params = [{transform_indices = @transform_0, window_bounds = array<i64: 1, 16, 16, 4>}, {pipeline_mode = #tpu.pipeline_mode<synchronous>, transform_indices = @transform_1, window_bounds = array<i64: 1, 1, 4, 8>}, {transform_indices = @transform_2, window_bounds = array<i64: 1, 16, 16, 8>}, {transform_indices = @transform_3, window_bounds = array<i64: 1, 2, 8>}]} {
    %c0 = arith.constant 0 : index
    %c0_0 = arith.constant 0 : index
    %c0_1 = arith.constant 0 : index
    %c0_2 = arith.constant 0 : index
    %0 = vector.load %arg1[%c0, %c0_0, %c0_1, %c0_2] : memref<1x16x16x4xbf16, #tpu.memory_space<vmem>>, vector<1x16x16x4xbf16>
    %1 = vector.shape_cast %0 : vector<1x16x16x4xbf16> to vector<16x16x4xbf16>
    %2 = vector.shape_cast %1 : vector<16x16x4xbf16> to vector<256x4xbf16>
    %c0_3 = arith.constant 0 : index
    %c0_4 = arith.constant 0 : index
    %3 = vector.load %arg5[%c0_3, %c0_4] : memref<256x4xbf16, #tpu.memory_space<vmem>>, vector<256x4xbf16>
    tpu.vector_store %arg5[%c0_3, %c0_4], %2 {strides = array<i32>} : memref<256x4xbf16, #tpu.memory_space<vmem>>, vector<256x4xbf16>,
    %cst = arith.constant 0.000000e+00 : f32
    %4 = vector.broadcast %cst : f32 to vector<256x8xf32>
    %c0_5 = arith.constant 0 : index
    %c0_6 = arith.constant 0 : index
    %5 = vector.load %arg5[%c0_5, %c0_6] : memref<256x4xbf16, #tpu.memory_space<vmem>>, vector<256x4xbf16>
    %c0_7 = arith.constant 0 : index
    %c0_8 = arith.constant 0 : index
    %c0_9 = arith.constant 0 : index
    %c0_10 = arith.constant 0 : index
    %6 = vector.load %arg2[%c0_7, %c0_8, %c0_9, %c0_10] : memref<1x1x4x8xbf16, #tpu.memory_space<vmem>>, vector<1x1x4x8xbf16>
    %7 = vector.shape_cast %6 : vector<1x1x4x8xbf16> to vector<4x8xbf16>
    %cst_11 = arith.constant dense<0.000000e+00> : vector<256x8xf32>
    %8 = tpu.matmul %5, %7, %cst_11 {dimension_numbers = #tpu.dot_dimension_numbers<[1], [0], [0], [1], [0, 0, 1, 1], [], []>} : vector<256x4xbf16>, vector<4x8xbf16>, vector<256x8xf32> -> vector<256x8xf32>
    %9 = arith.addf %4, %8 : vector<256x8xf32>
    %10 = vector.shape_cast %9 : vector<256x8xf32> to vector<16x16x8xf32>
    %11 = arith.truncf %10 : vector<16x16x8xf32> to vector<16x16x8xbf16>
    %c0_12 = arith.constant 0 : index
    %c0_13 = arith.constant 0 : index
    %c0_14 = arith.constant 0 : index
    %c0_15 = arith.constant 0 : index
    %12 = vector.load %arg3[%c0_12, %c0_13, %c0_14, %c0_15] : memref<1x16x16x8xbf16, #tpu.memory_space<vmem>>, vector<1x16x16x8xbf16>
    %13 = vector.shape_cast %12 : vector<1x16x16x8xbf16> to vector<16x16x8xbf16>
    %14 = vector.shape_cast %11 : vector<16x16x8xbf16> to vector<1x16x16x8xbf16>
    tpu.vector_store %arg3[%c0_12, %c0_13, %c0_14, %c0_15], %14 {strides = array<i32>} : memref<1x16x16x8xbf16, #tpu.memory_space<vmem>>, vector<1x16x16x8xbf16>,
    %cst_16 = arith.constant dense<0.000000e+00> : vector<8xf32>
    %15 = vector.multi_reduction <add>, %10, %cst_16 [0, 1] : vector<16x16x8xf32> to vector<8xf32>
    %16 = vector.shape_cast %15 : vector<8xf32> to vector<1x1x8xf32>
    %17 = vector.shape_cast %16 : vector<1x1x8xf32> to vector<1x8xf32>
    %18 = arith.mulf %10, %10 : vector<16x16x8xf32>
    %cst_17 = arith.constant dense<0.000000e+00> : vector<8xf32>
    %19 = vector.multi_reduction <add>, %18, %cst_17 [0, 1] : vector<16x16x8xf32> to vector<8xf32>
    %20 = vector.shape_cast %19 : vector<8xf32> to vector<1x1x8xf32>
    %21 = vector.shape_cast %20 : vector<1x1x8xf32> to vector<1x8xf32>
    %22 = tpu.concatenate %17, %21 in 0 : vector<1x8xf32>, vector<1x8xf32> -> vector<2x8xf32>
    %c0_18 = arith.constant 0 : index
    %c0_19 = arith.constant 0 : index
    %c0_20 = arith.constant 0 : index
    %23 = vector.load %arg4[%c0_18, %c0_19, %c0_20] : memref<1x2x8xf32, #tpu.memory_space<vmem>>, vector<1x2x8xf32>
    %24 = vector.shape_cast %23 : vector<1x2x8xf32> to vector<2x8xf32>
    %25 = vector.shape_cast %22 : vector<2x8xf32> to vector<1x2x8xf32>
    tpu.vector_store %arg4[%c0_18, %c0_19, %c0_20], %25 {strides = array<i32>} : memref<1x2x8xf32, #tpu.memory_space<vmem>>, vector<1x2x8xf32>,
    return
  }
  func.func @transform_0(%arg0: i32) -> (i32, i32, i32, i32) {
    %c0_i32 = arith.constant 0 : i32
    %c0_i32_0 = arith.constant 0 : i32
    %c0_i32_1 = arith.constant 0 : i32
    %c0_i32_2 = arith.constant 0 : i32
    return %arg0, %c0_i32, %c0_i32_0, %c0_i32_1 : i32, i32, i32, i32
  }
  func.func @transform_1(%arg0: i32) -> (i32, i32, i32, i32) {
    %c0_i32 = arith.constant 0 : i32
    %c0_i32_0 = arith.constant 0 : i32
    %c0_i32_1 = arith.constant 0 : i32
    %c0_i32_2 = arith.constant 0 : i32
    %c0_i32_3 = arith.constant 0 : i32
    return %c0_i32, %c0_i32_0, %c0_i32_1, %c0_i32_2 : i32, i32, i32, i32
  }
  func.func @transform_2(%arg0: i32) -> (i32, i32, i32, i32) {
    %c0_i32 = arith.constant 0 : i32
    %c0_i32_0 = arith.constant 0 : i32
    %c0_i32_1 = arith.constant 0 : i32
    %c0_i32_2 = arith.constant 0 : i32
    return %arg0, %c0_i32, %c0_i32_0, %c0_i32_1 : i32, i32, i32, i32
  }
  func.func @transform_3(%arg0: i32) -> (i32, i32, i32) {
    %c0_i32 = arith.constant 0 : i32
    %c0_i32_0 = arith.constant 0 : i32
    %c0_i32_1 = arith.constant 0 : i32
    return %arg0, %c0_i32, %c0_i32_0 : i32, i32, i32
  }
}

module attributes {stable_mosaic.version = 11 : i64} {
  func.func @_conv_bn_kernel(%arg0: i32, %arg1: memref<1x16x16x8xbf16, #tpu.memory_space<vmem>>, %arg2: memref<3x3x8x8xbf16, #tpu.memory_space<vmem>>, %arg3: memref<2x8xf32, #tpu.memory_space<vmem>>, %arg4: memref<1x16x16x8xbf16, #tpu.memory_space<vmem>>, %arg5: memref<1x2x8xf32, #tpu.memory_space<vmem>>, %arg6: memref<324x8xbf16, #tpu.memory_space<vmem>>) attributes {dimension_semantics = [#tpu.dimension_semantics<parallel>], iteration_bounds = array<i64: 2>, scalar_prefetch = 0 : i64, scratch_operands = 1 : i64, tpu.core_type = #tpu.core_type<tc>, window_params = [{transform_indices = @transform_0, window_bounds = array<i64: 1, 16, 16, 8>}, {pipeline_mode = #tpu.pipeline_mode<synchronous>, transform_indices = @transform_1, window_bounds = array<i64: 3, 3, 8, 8>}, {pipeline_mode = #tpu.pipeline_mode<synchronous>, transform_indices = @transform_2, window_bounds = array<i64: 2, 8>}, {transform_indices = @transform_3, window_bounds = array<i64: 1, 16, 16, 8>}, {transform_indices = @transform_4, window_bounds = array<i64: 1, 2, 8>}]} {
    %c0 = arith.constant 0 : index
    %c0_0 = arith.constant 0 : index
    %c0_1 = arith.constant 0 : index
    %c0_2 = arith.constant 0 : index
    %0 = vector.load %arg1[%c0, %c0_0, %c0_1, %c0_2] : memref<1x16x16x8xbf16, #tpu.memory_space<vmem>>, vector<1x16x16x8xbf16>
    %1 = vector.shape_cast %0 : vector<1x16x16x8xbf16> to vector<16x16x8xbf16>
    %c0_3 = arith.constant 0 : index
    %c0_4 = arith.constant 0 : index
    %2 = vector.load %arg3[%c0_3, %c0_4] : memref<2x8xf32, #tpu.memory_space<vmem>>, vector<2x8xf32>
    %3 = arith.extf %1 : vector<16x16x8xbf16> to vector<16x16x8xf32>
    %4 = vector.extract_strided_slice %2 {offsets = [0, 0], sizes = [1, 8], strides = [1, 1]} : vector<2x8xf32> to vector<1x8xf32>
    %5 = vector.shape_cast %4 : vector<1x8xf32> to vector<8xf32>
    %6 = vector.shape_cast %5 : vector<8xf32> to vector<1x1x8xf32>
    %7 = vector.broadcast %6 : vector<1x1x8xf32> to vector<16x16x8xf32>
    %8 = arith.mulf %3, %7 : vector<16x16x8xf32>
    %9 = vector.extract_strided_slice %2 {offsets = [1, 0], sizes = [1, 8], strides = [1, 1]} : vector<2x8xf32> to vector<1x8xf32>
    %10 = vector.shape_cast %9 : vector<1x8xf32> to vector<8xf32>
    %11 = vector.shape_cast %10 : vector<8xf32> to vector<1x1x8xf32>
    %12 = vector.broadcast %11 : vector<1x1x8xf32> to vector<16x16x8xf32>
    %13 = arith.addf %8, %12 : vector<16x16x8xf32>
    %cst = arith.constant 0.000000e+00 : f32
    %14 = vector.broadcast %cst : f32 to vector<16x16x8xf32>
    %15 = arith.maximumf %13, %14 : vector<16x16x8xf32>
    %16 = arith.truncf %15 : vector<16x16x8xf32> to vector<16x16x8xbf16>
    %cst_5 = arith.constant 0.000000e+00 : bf16
    %17 = vector.broadcast %cst_5 : bf16 to vector<324x8xbf16>
    %c0_6 = arith.constant 0 : index
    %c0_7 = arith.constant 0 : index
    %18 = vector.load %arg6[%c0_6, %c0_7] : memref<324x8xbf16, #tpu.memory_space<vmem>>, vector<324x8xbf16>
    tpu.vector_store %arg6[%c0_6, %c0_7], %17 {strides = array<i32>} : memref<324x8xbf16, #tpu.memory_space<vmem>>, vector<324x8xbf16>,
    %19 = vector.extract_strided_slice %16 {offsets = [0, 0, 0], sizes = [1, 16, 8], strides = [1, 1, 1]} : vector<16x16x8xbf16> to vector<1x16x8xbf16>
    %20 = vector.shape_cast %19 : vector<1x16x8xbf16> to vector<16x8xbf16>
    %c19 = arith.constant 19 : index
    %c0_8 = arith.constant 0 : index
    %21 = vector.load %arg6[%c19, %c0_8] : memref<324x8xbf16, #tpu.memory_space<vmem>>, vector<16x8xbf16>
    tpu.vector_store %arg6[%c19, %c0_8], %20 {strides = array<i32>} : memref<324x8xbf16, #tpu.memory_space<vmem>>, vector<16x8xbf16>,
    %22 = vector.extract_strided_slice %16 {offsets = [1, 0, 0], sizes = [1, 16, 8], strides = [1, 1, 1]} : vector<16x16x8xbf16> to vector<1x16x8xbf16>
    %23 = vector.shape_cast %22 : vector<1x16x8xbf16> to vector<16x8xbf16>
    %c37 = arith.constant 37 : index
    %c0_9 = arith.constant 0 : index
    %24 = vector.load %arg6[%c37, %c0_9] : memref<324x8xbf16, #tpu.memory_space<vmem>>, vector<16x8xbf16>
    tpu.vector_store %arg6[%c37, %c0_9], %23 {strides = array<i32>} : memref<324x8xbf16, #tpu.memory_space<vmem>>, vector<16x8xbf16>,
    %25 = vector.extract_strided_slice %16 {offsets = [2, 0, 0], sizes = [1, 16, 8], strides = [1, 1, 1]} : vector<16x16x8xbf16> to vector<1x16x8xbf16>
    %26 = vector.shape_cast %25 : vector<1x16x8xbf16> to vector<16x8xbf16>
    %c55 = arith.constant 55 : index
    %c0_10 = arith.constant 0 : index
    %27 = vector.load %arg6[%c55, %c0_10] : memref<324x8xbf16, #tpu.memory_space<vmem>>, vector<16x8xbf16>
    tpu.vector_store %arg6[%c55, %c0_10], %26 {strides = array<i32>} : memref<324x8xbf16, #tpu.memory_space<vmem>>, vector<16x8xbf16>,
    %28 = vector.extract_strided_slice %16 {offsets = [3, 0, 0], sizes = [1, 16, 8], strides = [1, 1, 1]} : vector<16x16x8xbf16> to vector<1x16x8xbf16>
    %29 = vector.shape_cast %28 : vector<1x16x8xbf16> to vector<16x8xbf16>
    %c73 = arith.constant 73 : index
    %c0_11 = arith.constant 0 : index
    %30 = vector.load %arg6[%c73, %c0_11] : memref<324x8xbf16, #tpu.memory_space<vmem>>, vector<16x8xbf16>
    tpu.vector_store %arg6[%c73, %c0_11], %29 {strides = array<i32>} : memref<324x8xbf16, #tpu.memory_space<vmem>>, vector<16x8xbf16>,
    %31 = vector.extract_strided_slice %16 {offsets = [4, 0, 0], sizes = [1, 16, 8], strides = [1, 1, 1]} : vector<16x16x8xbf16> to vector<1x16x8xbf16>
    %32 = vector.shape_cast %31 : vector<1x16x8xbf16> to vector<16x8xbf16>
    %c91 = arith.constant 91 : index
    %c0_12 = arith.constant 0 : index
    %33 = vector.load %arg6[%c91, %c0_12] : memref<324x8xbf16, #tpu.memory_space<vmem>>, vector<16x8xbf16>
    tpu.vector_store %arg6[%c91, %c0_12], %32 {strides = array<i32>} : memref<324x8xbf16, #tpu.memory_space<vmem>>, vector<16x8xbf16>,
    %34 = vector.extract_strided_slice %16 {offsets = [5, 0, 0], sizes = [1, 16, 8], strides = [1, 1, 1]} : vector<16x16x8xbf16> to vector<1x16x8xbf16>
    %35 = vector.shape_cast %34 : vector<1x16x8xbf16> to vector<16x8xbf16>
    %c109 = arith.constant 109 : index
    %c0_13 = arith.constant 0 : index
    %36 = vector.load %arg6[%c109, %c0_13] : memref<324x8xbf16, #tpu.memory_space<vmem>>, vector<16x8xbf16>
    tpu.vector_store %arg6[%c109, %c0_13], %35 {strides = array<i32>} : memref<324x8xbf16, #tpu.memory_space<vmem>>, vector<16x8xbf16>,
    %37 = vector.extract_strided_slice %16 {offsets = [6, 0, 0], sizes = [1, 16, 8], strides = [1, 1, 1]} : vector<16x16x8xbf16> to vector<1x16x8xbf16>
    %38 = vector.shape_cast %37 : vector<1x16x8xbf16> to vector<16x8xbf16>
    %c127 = arith.constant 127 : index
    %c0_14 = arith.constant 0 : index
    %39 = vector.load %arg6[%c127, %c0_14] : memref<324x8xbf16, #tpu.memory_space<vmem>>, vector<16x8xbf16>
    tpu.vector_store %arg6[%c127, %c0_14], %38 {strides = array<i32>} : memref<324x8xbf16, #tpu.memory_space<vmem>>, vector<16x8xbf16>,
    %40 = vector.extract_strided_slice %16 {offsets = [7, 0, 0], sizes = [1, 16, 8], strides = [1, 1, 1]} : vector<16x16x8xbf16> to vector<1x16x8xbf16>
    %41 = vector.shape_cast %40 : vector<1x16x8xbf16> to vector<16x8xbf16>
    %c145 = arith.constant 145 : index
    %c0_15 = arith.constant 0 : index
    %42 = vector.load %arg6[%c145, %c0_15] : memref<324x8xbf16, #tpu.memory_space<vmem>>, vector<16x8xbf16>
    tpu.vector_store %arg6[%c145, %c0_15], %41 {strides = array<i32>} : memref<324x8xbf16, #tpu.memory_space<vmem>>, vector<16x8xbf16>,
    %43 = vector.extract_strided_slice %16 {offsets = [8, 0, 0], sizes = [1, 16, 8], strides = [1, 1, 1]} : vector<16x16x8xbf16> to vector<1x16x8xbf16>
    %44 = vector.shape_cast %43 : vector<1x16x8xbf16> to vector<16x8xbf16>
    %c163 = arith.constant 163 : index
    %c0_16 = arith.constant 0 : index
    %45 = vector.load %arg6[%c163, %c0_16] : memref<324x8xbf16, #tpu.memory_space<vmem>>, vector<16x8xbf16>
    tpu.vector_store %arg6[%c163, %c0_16], %44 {strides = array<i32>} : memref<324x8xbf16, #tpu.memory_space<vmem>>, vector<16x8xbf16>,
    %46 = vector.extract_strided_slice %16 {offsets = [9, 0, 0], sizes = [1, 16, 8], strides = [1, 1, 1]} : vector<16x16x8xbf16> to vector<1x16x8xbf16>
    %47 = vector.shape_cast %46 : vector<1x16x8xbf16> to vector<16x8xbf16>
    %c181 = arith.constant 181 : index
    %c0_17 = arith.constant 0 : index
    %48 = vector.load %arg6[%c181, %c0_17] : memref<324x8xbf16, #tpu.memory_space<vmem>>, vector<16x8xbf16>
    tpu.vector_store %arg6[%c181, %c0_17], %47 {strides = array<i32>} : memref<324x8xbf16, #tpu.memory_space<vmem>>, vector<16x8xbf16>,
    %49 = vector.extract_strided_slice %16 {offsets = [10, 0, 0], sizes = [1, 16, 8], strides = [1, 1, 1]} : vector<16x16x8xbf16> to vector<1x16x8xbf16>
    %50 = vector.shape_cast %49 : vector<1x16x8xbf16> to vector<16x8xbf16>
    %c199 = arith.constant 199 : index
    %c0_18 = arith.constant 0 : index
    %51 = vector.load %arg6[%c199, %c0_18] : memref<324x8xbf16, #tpu.memory_space<vmem>>, vector<16x8xbf16>
    tpu.vector_store %arg6[%c199, %c0_18], %50 {strides = array<i32>} : memref<324x8xbf16, #tpu.memory_space<vmem>>, vector<16x8xbf16>,
    %52 = vector.extract_strided_slice %16 {offsets = [11, 0, 0], sizes = [1, 16, 8], strides = [1, 1, 1]} : vector<16x16x8xbf16> to vector<1x16x8xbf16>
    %53 = vector.shape_cast %52 : vector<1x16x8xbf16> to vector<16x8xbf16>
    %c217 = arith.constant 217 : index
    %c0_19 = arith.constant 0 : index
    %54 = vector.load %arg6[%c217, %c0_19] : memref<324x8xbf16, #tpu.memory_space<vmem>>, vector<16x8xbf16>
    tpu.vector_store %arg6[%c217, %c0_19], %53 {strides = array<i32>} : memref<324x8xbf16, #tpu.memory_space<vmem>>, vector<16x8xbf16>,
    %55 = vector.extract_strided_slice %16 {offsets = [12, 0, 0], sizes = [1, 16, 8], strides = [1, 1, 1]} : vector<16x16x8xbf16> to vector<1x16x8xbf16>
    %56 = vector.shape_cast %55 : vector<1x16x8xbf16> to vector<16x8xbf16>
    %c235 = arith.constant 235 : index
    %c0_20 = arith.constant 0 : index
    %57 = vector.load %arg6[%c235, %c0_20] : memref<324x8xbf16, #tpu.memory_space<vmem>>, vector<16x8xbf16>
    tpu.vector_store %arg6[%c235, %c0_20], %56 {strides = array<i32>} : memref<324x8xbf16, #tpu.memory_space<vmem>>, vector<16x8xbf16>,
    %58 = vector.extract_strided_slice %16 {offsets = [13, 0, 0], sizes = [1, 16, 8], strides = [1, 1, 1]} : vector<16x16x8xbf16> to vector<1x16x8xbf16>
    %59 = vector.shape_cast %58 : vector<1x16x8xbf16> to vector<16x8xbf16>
    %c253 = arith.constant 253 : index
    %c0_21 = arith.constant 0 : index
    %60 = vector.load %arg6[%c253, %c0_21] : memref<324x8xbf16, #tpu.memory_space<vmem>>, vector<16x8xbf16>
    tpu.vector_store %arg6[%c253, %c0_21], %59 {strides = array<i32>} : memref<324x8xbf16, #tpu.memory_space<vmem>>, vector<16x8xbf16>,
    %61 = vector.extract_strided_slice %16 {offsets = [14, 0, 0], sizes = [1, 16, 8], strides = [1, 1, 1]} : vector<16x16x8xbf16> to vector<1x16x8xbf16>
    %62 = vector.shape_cast %61 : vector<1x16x8xbf16> to vector<16x8xbf16>
    %c271 = arith.constant 271 : index
    %c0_22 = arith.constant 0 : index
    %63 = vector.load %arg6[%c271, %c0_22] : memref<324x8xbf16, #tpu.memory_space<vmem>>, vector<16x8xbf16>
    tpu.vector_store %arg6[%c271, %c0_22], %62 {strides = array<i32>} : memref<324x8xbf16, #tpu.memory_space<vmem>>, vector<16x8xbf16>,
    %64 = vector.extract_strided_slice %16 {offsets = [15, 0, 0], sizes = [1, 16, 8], strides = [1, 1, 1]} : vector<16x16x8xbf16> to vector<1x16x8xbf16>
    %65 = vector.shape_cast %64 : vector<1x16x8xbf16> to vector<16x8xbf16>
    %c289 = arith.constant 289 : index
    %c0_23 = arith.constant 0 : index
    %66 = vector.load %arg6[%c289, %c0_23] : memref<324x8xbf16, #tpu.memory_space<vmem>>, vector<16x8xbf16>
    tpu.vector_store %arg6[%c289, %c0_23], %65 {strides = array<i32>} : memref<324x8xbf16, #tpu.memory_space<vmem>>, vector<16x8xbf16>,
    %cst_24 = arith.constant 0.000000e+00 : f32
    %67 = vector.broadcast %cst_24 : f32 to vector<286x8xf32>
    %c0_25 = arith.constant 0 : index
    %c0_26 = arith.constant 0 : index
    %68 = vector.load %arg6[%c0_25, %c0_26] : memref<324x8xbf16, #tpu.memory_space<vmem>>, vector<286x8xbf16>
    %c0_27 = arith.constant 0 : index
    %c0_28 = arith.constant 0 : index
    %c0_29 = arith.constant 0 : index
    %c0_30 = arith.constant 0 : index
    %69 = vector.load %arg2[%c0_27, %c0_28, %c0_29, %c0_30] : memref<3x3x8x8xbf16, #tpu.memory_space<vmem>>, vector<1x1x8x8xbf16>
    %70 = vector.shape_cast %69 : vector<1x1x8x8xbf16> to vector<8x8xbf16>
    %cst_31 = arith.constant dense<0.000000e+00> : vector<286x8xf32>
    %71 = tpu.matmul %68, %70, %cst_31 {dimension_numbers = #tpu.dot_dimension_numbers<[1], [0], [0], [1], [0, 0, 1, 1], [], []>} : vector<286x8xbf16>, vector<8x8xbf16>, vector<286x8xf32> -> vector<286x8xf32>
    %72 = arith.addf %67, %71 : vector<286x8xf32>
    %c1 = arith.constant 1 : index
    %c0_32 = arith.constant 0 : index
    %73 = vector.load %arg6[%c1, %c0_32] : memref<324x8xbf16, #tpu.memory_space<vmem>>, vector<286x8xbf16>
    %c0_33 = arith.constant 0 : index
    %c1_34 = arith.constant 1 : index
    %c0_35 = arith.constant 0 : index
    %c0_36 = arith.constant 0 : index
    %74 = vector.load %arg2[%c0_33, %c1_34, %c0_35, %c0_36] : memref<3x3x8x8xbf16, #tpu.memory_space<vmem>>, vector<1x1x8x8xbf16>
    %75 = vector.shape_cast %74 : vector<1x1x8x8xbf16> to vector<8x8xbf16>
    %cst_37 = arith.constant dense<0.000000e+00> : vector<286x8xf32>
    %76 = tpu.matmul %73, %75, %cst_37 {dimension_numbers = #tpu.dot_dimension_numbers<[1], [0], [0], [1], [0, 0, 1, 1], [], []>} : vector<286x8xbf16>, vector<8x8xbf16>, vector<286x8xf32> -> vector<286x8xf32>
    %77 = arith.addf %72, %76 : vector<286x8xf32>
    %c2 = arith.constant 2 : index
    %c0_38 = arith.constant 0 : index
    %78 = vector.load %arg6[%c2, %c0_38] : memref<324x8xbf16, #tpu.memory_space<vmem>>, vector<286x8xbf16>
    %c0_39 = arith.constant 0 : index
    %c2_40 = arith.constant 2 : index
    %c0_41 = arith.constant 0 : index
    %c0_42 = arith.constant 0 : index
    %79 = vector.load %arg2[%c0_39, %c2_40, %c0_41, %c0_42] : memref<3x3x8x8xbf16, #tpu.memory_space<vmem>>, vector<1x1x8x8xbf16>
    %80 = vector.shape_cast %79 : vector<1x1x8x8xbf16> to vector<8x8xbf16>
    %cst_43 = arith.constant dense<0.000000e+00> : vector<286x8xf32>
    %81 = tpu.matmul %78, %80, %cst_43 {dimension_numbers = #tpu.dot_dimension_numbers<[1], [0], [0], [1], [0, 0, 1, 1], [], []>} : vector<286x8xbf16>, vector<8x8xbf16>, vector<286x8xf32> -> vector<286x8xf32>
    %82 = arith.addf %77, %81 : vector<286x8xf32>
    %c18 = arith.constant 18 : index
    %c0_44 = arith.constant 0 : index
    %83 = vector.load %arg6[%c18, %c0_44] : memref<324x8xbf16, #tpu.memory_space<vmem>>, vector<286x8xbf16>
    %c1_45 = arith.constant 1 : index
    %c0_46 = arith.constant 0 : index
    %c0_47 = arith.constant 0 : index
    %c0_48 = arith.constant 0 : index
    %84 = vector.load %arg2[%c1_45, %c0_46, %c0_47, %c0_48] : memref<3x3x8x8xbf16, #tpu.memory_space<vmem>>, vector<1x1x8x8xbf16>
    %85 = vector.shape_cast %84 : vector<1x1x8x8xbf16> to vector<8x8xbf16>
    %cst_49 = arith.constant dense<0.000000e+00> : vector<286x8xf32>
    %86 = tpu.matmul %83, %85, %cst_49 {dimension_numbers = #tpu.dot_dimension_numbers<[1], [0], [0], [1], [0, 0, 1, 1], [], []>} : vector<286x8xbf16>, vector<8x8xbf16>, vector<286x8xf32> -> vector<286x8xf32>
    %87 = arith.addf %82, %86 : vector<286x8xf32>
    %c19_50 = arith.constant 19 : index
    %c0_51 = arith.constant 0 : index
    %88 = vector.load %arg6[%c19_50, %c0_51] : memref<324x8xbf16, #tpu.memory_space<vmem>>, vector<286x8xbf16>
    %c1_52 = arith.constant 1 : index
    %c1_53 = arith.constant 1 : index
    %c0_54 = arith.constant 0 : index
    %c0_55 = arith.constant 0 : index
    %89 = vector.load %arg2[%c1_52, %c1_53, %c0_54, %c0_55] : memref<3x3x8x8xbf16, #tpu.memory_space<vmem>>, vector<1x1x8x8xbf16>
    %90 = vector.shape_cast %89 : vector<1x1x8x8xbf16> to vector<8x8xbf16>
    %cst_56 = arith.constant dense<0.000000e+00> : vector<286x8xf32>
    %91 = tpu.matmul %88, %90, %cst_56 {dimension_numbers = #tpu.dot_dimension_numbers<[1], [0], [0], [1], [0, 0, 1, 1], [], []>} : vector<286x8xbf16>, vector<8x8xbf16>, vector<286x8xf32> -> vector<286x8xf32>
    %92 = arith.addf %87, %91 : vector<286x8xf32>
    %c20 = arith.constant 20 : index
    %c0_57 = arith.constant 0 : index
    %93 = vector.load %arg6[%c20, %c0_57] : memref<324x8xbf16, #tpu.memory_space<vmem>>, vector<286x8xbf16>
    %c1_58 = arith.constant 1 : index
    %c2_59 = arith.constant 2 : index
    %c0_60 = arith.constant 0 : index
    %c0_61 = arith.constant 0 : index
    %94 = vector.load %arg2[%c1_58, %c2_59, %c0_60, %c0_61] : memref<3x3x8x8xbf16, #tpu.memory_space<vmem>>, vector<1x1x8x8xbf16>
    %95 = vector.shape_cast %94 : vector<1x1x8x8xbf16> to vector<8x8xbf16>
    %cst_62 = arith.constant dense<0.000000e+00> : vector<286x8xf32>
    %96 = tpu.matmul %93, %95, %cst_62 {dimension_numbers = #tpu.dot_dimension_numbers<[1], [0], [0], [1], [0, 0, 1, 1], [], []>} : vector<286x8xbf16>, vector<8x8xbf16>, vector<286x8xf32> -> vector<286x8xf32>
    %97 = arith.addf %92, %96 : vector<286x8xf32>
    %c36 = arith.constant 36 : index
    %c0_63 = arith.constant 0 : index
    %98 = vector.load %arg6[%c36, %c0_63] : memref<324x8xbf16, #tpu.memory_space<vmem>>, vector<286x8xbf16>
    %c2_64 = arith.constant 2 : index
    %c0_65 = arith.constant 0 : index
    %c0_66 = arith.constant 0 : index
    %c0_67 = arith.constant 0 : index
    %99 = vector.load %arg2[%c2_64, %c0_65, %c0_66, %c0_67] : memref<3x3x8x8xbf16, #tpu.memory_space<vmem>>, vector<1x1x8x8xbf16>
    %100 = vector.shape_cast %99 : vector<1x1x8x8xbf16> to vector<8x8xbf16>
    %cst_68 = arith.constant dense<0.000000e+00> : vector<286x8xf32>
    %101 = tpu.matmul %98, %100, %cst_68 {dimension_numbers = #tpu.dot_dimension_numbers<[1], [0], [0], [1], [0, 0, 1, 1], [], []>} : vector<286x8xbf16>, vector<8x8xbf16>, vector<286x8xf32> -> vector<286x8xf32>
    %102 = arith.addf %97, %101 : vector<286x8xf32>
    %c37_69 = arith.constant 37 : index
    %c0_70 = arith.constant 0 : index
    %103 = vector.load %arg6[%c37_69, %c0_70] : memref<324x8xbf16, #tpu.memory_space<vmem>>, vector<286x8xbf16>
    %c2_71 = arith.constant 2 : index
    %c1_72 = arith.constant 1 : index
    %c0_73 = arith.constant 0 : index
    %c0_74 = arith.constant 0 : index
    %104 = vector.load %arg2[%c2_71, %c1_72, %c0_73, %c0_74] : memref<3x3x8x8xbf16, #tpu.memory_space<vmem>>, vector<1x1x8x8xbf16>
    %105 = vector.shape_cast %104 : vector<1x1x8x8xbf16> to vector<8x8xbf16>
    %cst_75 = arith.constant dense<0.000000e+00> : vector<286x8xf32>
    %106 = tpu.matmul %103, %105, %cst_75 {dimension_numbers = #tpu.dot_dimension_numbers<[1], [0], [0], [1], [0, 0, 1, 1], [], []>} : vector<286x8xbf16>, vector<8x8xbf16>, vector<286x8xf32> -> vector<286x8xf32>
    %107 = arith.addf %102, %106 : vector<286x8xf32>
    %c38 = arith.constant 38 : index
    %c0_76 = arith.constant 0 : index
    %108 = vector.load %arg6[%c38, %c0_76] : memref<324x8xbf16, #tpu.memory_space<vmem>>, vector<286x8xbf16>
    %c2_77 = arith.constant 2 : index
    %c2_78 = arith.constant 2 : index
    %c0_79 = arith.constant 0 : index
    %c0_80 = arith.constant 0 : index
    %109 = vector.load %arg2[%c2_77, %c2_78, %c0_79, %c0_80] : memref<3x3x8x8xbf16, #tpu.memory_space<vmem>>, vector<1x1x8x8xbf16>
    %110 = vector.shape_cast %109 : vector<1x1x8x8xbf16> to vector<8x8xbf16>
    %cst_81 = arith.constant dense<0.000000e+00> : vector<286x8xf32>
    %111 = tpu.matmul %108, %110, %cst_81 {dimension_numbers = #tpu.dot_dimension_numbers<[1], [0], [0], [1], [0, 0, 1, 1], [], []>} : vector<286x8xbf16>, vector<8x8xbf16>, vector<286x8xf32> -> vector<286x8xf32>
    %112 = arith.addf %107, %111 : vector<286x8xf32>
    %cst_82 = arith.constant 0.000000e+00 : f32
    %113 = vector.broadcast %cst_82 : f32 to vector<2x8xf32>
    %114 = tpu.concatenate %112, %113 in 0 : vector<286x8xf32>, vector<2x8xf32> -> vector<288x8xf32>
    %115 = vector.shape_cast %114 : vector<288x8xf32> to vector<16x18x8xf32>
    %116 = vector.extract_strided_slice %115 {offsets = [0, 0, 0], sizes = [16, 16, 8], strides = [1, 1, 1]} : vector<16x18x8xf32> to vector<16x16x8xf32>
    %117 = arith.truncf %116 : vector<16x16x8xf32> to vector<16x16x8xbf16>
    %c0_83 = arith.constant 0 : index
    %c0_84 = arith.constant 0 : index
    %c0_85 = arith.constant 0 : index
    %c0_86 = arith.constant 0 : index
    %118 = vector.load %arg4[%c0_83, %c0_84, %c0_85, %c0_86] : memref<1x16x16x8xbf16, #tpu.memory_space<vmem>>, vector<1x16x16x8xbf16>
    %119 = vector.shape_cast %118 : vector<1x16x16x8xbf16> to vector<16x16x8xbf16>
    %120 = vector.shape_cast %117 : vector<16x16x8xbf16> to vector<1x16x16x8xbf16>
    tpu.vector_store %arg4[%c0_83, %c0_84, %c0_85, %c0_86], %120 {strides = array<i32>} : memref<1x16x16x8xbf16, #tpu.memory_space<vmem>>, vector<1x16x16x8xbf16>,
    %cst_87 = arith.constant dense<0.000000e+00> : vector<8xf32>
    %121 = vector.multi_reduction <add>, %116, %cst_87 [0, 1] : vector<16x16x8xf32> to vector<8xf32>
    %122 = vector.shape_cast %121 : vector<8xf32> to vector<1x1x8xf32>
    %123 = vector.shape_cast %122 : vector<1x1x8xf32> to vector<1x8xf32>
    %124 = arith.mulf %116, %116 : vector<16x16x8xf32>
    %cst_88 = arith.constant dense<0.000000e+00> : vector<8xf32>
    %125 = vector.multi_reduction <add>, %124, %cst_88 [0, 1] : vector<16x16x8xf32> to vector<8xf32>
    %126 = vector.shape_cast %125 : vector<8xf32> to vector<1x1x8xf32>
    %127 = vector.shape_cast %126 : vector<1x1x8xf32> to vector<1x8xf32>
    %128 = tpu.concatenate %123, %127 in 0 : vector<1x8xf32>, vector<1x8xf32> -> vector<2x8xf32>
    %c0_89 = arith.constant 0 : index
    %c0_90 = arith.constant 0 : index
    %c0_91 = arith.constant 0 : index
    %129 = vector.load %arg5[%c0_89, %c0_90, %c0_91] : memref<1x2x8xf32, #tpu.memory_space<vmem>>, vector<1x2x8xf32>
    %130 = vector.shape_cast %129 : vector<1x2x8xf32> to vector<2x8xf32>
    %131 = vector.shape_cast %128 : vector<2x8xf32> to vector<1x2x8xf32>
    tpu.vector_store %arg5[%c0_89, %c0_90, %c0_91], %131 {strides = array<i32>} : memref<1x2x8xf32, #tpu.memory_space<vmem>>, vector<1x2x8xf32>,
    return
  }
  func.func @transform_0(%arg0: i32) -> (i32, i32, i32, i32) {
    %c0_i32 = arith.constant 0 : i32
    %c0_i32_0 = arith.constant 0 : i32
    %c0_i32_1 = arith.constant 0 : i32
    %c0_i32_2 = arith.constant 0 : i32
    return %arg0, %c0_i32, %c0_i32_0, %c0_i32_1 : i32, i32, i32, i32
  }
  func.func @transform_1(%arg0: i32) -> (i32, i32, i32, i32) {
    %c0_i32 = arith.constant 0 : i32
    %c0_i32_0 = arith.constant 0 : i32
    %c0_i32_1 = arith.constant 0 : i32
    %c0_i32_2 = arith.constant 0 : i32
    %c0_i32_3 = arith.constant 0 : i32
    return %c0_i32, %c0_i32_0, %c0_i32_1, %c0_i32_2 : i32, i32, i32, i32
  }
  func.func @transform_2(%arg0: i32) -> (i32, i32) {
    %c0_i32 = arith.constant 0 : i32
    %c0_i32_0 = arith.constant 0 : i32
    %c0_i32_1 = arith.constant 0 : i32
    return %c0_i32, %c0_i32_0 : i32, i32
  }
  func.func @transform_3(%arg0: i32) -> (i32, i32, i32, i32) {
    %c0_i32 = arith.constant 0 : i32
    %c0_i32_0 = arith.constant 0 : i32
    %c0_i32_1 = arith.constant 0 : i32
    %c0_i32_2 = arith.constant 0 : i32
    return %arg0, %c0_i32, %c0_i32_0, %c0_i32_1 : i32, i32, i32, i32
  }
  func.func @transform_4(%arg0: i32) -> (i32, i32, i32) {
    %c0_i32 = arith.constant 0 : i32
    %c0_i32_0 = arith.constant 0 : i32
    %c0_i32_1 = arith.constant 0 : i32
    return %arg0, %c0_i32, %c0_i32_0 : i32, i32, i32
  }
}

module attributes {stable_mosaic.version = 11 : i64} {
  func.func @_epilogue_kernel(%arg0: i32, %arg1: memref<1x16x16x8xbf16, #tpu.memory_space<vmem>>, %arg2: memref<1x16x16x8xbf16, #tpu.memory_space<vmem>>, %arg3: memref<2x8xf32, #tpu.memory_space<vmem>>, %arg4: memref<2x8xf32, #tpu.memory_space<vmem>>, %arg5: memref<1x16x16x8xf32, #tpu.memory_space<vmem>>) attributes {dimension_semantics = [#tpu.dimension_semantics<parallel>], iteration_bounds = array<i64: 2>, scalar_prefetch = 0 : i64, scratch_operands = 0 : i64, tpu.core_type = #tpu.core_type<tc>, window_params = [{transform_indices = @transform_0, window_bounds = array<i64: 1, 16, 16, 8>}, {transform_indices = @transform_1, window_bounds = array<i64: 1, 16, 16, 8>}, {pipeline_mode = #tpu.pipeline_mode<synchronous>, transform_indices = @transform_2, window_bounds = array<i64: 2, 8>}, {pipeline_mode = #tpu.pipeline_mode<synchronous>, transform_indices = @transform_3, window_bounds = array<i64: 2, 8>}, {transform_indices = @transform_4, window_bounds = array<i64: 1, 16, 16, 8>}]} {
    %c0 = arith.constant 0 : index
    %c0_0 = arith.constant 0 : index
    %0 = vector.load %arg3[%c0, %c0_0] : memref<2x8xf32, #tpu.memory_space<vmem>>, vector<2x8xf32>
    %c0_1 = arith.constant 0 : index
    %c0_2 = arith.constant 0 : index
    %c0_3 = arith.constant 0 : index
    %c0_4 = arith.constant 0 : index
    %1 = vector.load %arg1[%c0_1, %c0_2, %c0_3, %c0_4] : memref<1x16x16x8xbf16, #tpu.memory_space<vmem>>, vector<1x16x16x8xbf16>
    %2 = vector.shape_cast %1 : vector<1x16x16x8xbf16> to vector<16x16x8xbf16>
    %3 = arith.extf %2 : vector<16x16x8xbf16> to vector<16x16x8xf32>
    %4 = vector.extract_strided_slice %0 {offsets = [0, 0], sizes = [1, 8], strides = [1, 1]} : vector<2x8xf32> to vector<1x8xf32>
    %5 = vector.shape_cast %4 : vector<1x8xf32> to vector<8xf32>
    %6 = vector.shape_cast %5 : vector<8xf32> to vector<1x1x8xf32>
    %7 = vector.broadcast %6 : vector<1x1x8xf32> to vector<16x16x8xf32>
    %8 = arith.mulf %3, %7 : vector<16x16x8xf32>
    %9 = vector.extract_strided_slice %0 {offsets = [1, 0], sizes = [1, 8], strides = [1, 1]} : vector<2x8xf32> to vector<1x8xf32>
    %10 = vector.shape_cast %9 : vector<1x8xf32> to vector<8xf32>
    %11 = vector.shape_cast %10 : vector<8xf32> to vector<1x1x8xf32>
    %12 = vector.broadcast %11 : vector<1x1x8xf32> to vector<16x16x8xf32>
    %13 = arith.addf %8, %12 : vector<16x16x8xf32>
    %c0_5 = arith.constant 0 : index
    %c0_6 = arith.constant 0 : index
    %c0_7 = arith.constant 0 : index
    %c0_8 = arith.constant 0 : index
    %14 = vector.load %arg2[%c0_5, %c0_6, %c0_7, %c0_8] : memref<1x16x16x8xbf16, #tpu.memory_space<vmem>>, vector<1x16x16x8xbf16>
    %15 = vector.shape_cast %14 : vector<1x16x16x8xbf16> to vector<16x16x8xbf16>
    %16 = arith.extf %15 : vector<16x16x8xbf16> to vector<16x16x8xf32>
    %c0_9 = arith.constant 0 : index
    %c0_10 = arith.constant 0 : index
    %17 = vector.load %arg4[%c0_9, %c0_10] : memref<2x8xf32, #tpu.memory_space<vmem>>, vector<2x8xf32>
    %18 = vector.extract_strided_slice %17 {offsets = [0, 0], sizes = [1, 8], strides = [1, 1]} : vector<2x8xf32> to vector<1x8xf32>
    %19 = vector.shape_cast %18 : vector<1x8xf32> to vector<8xf32>
    %20 = vector.shape_cast %19 : vector<8xf32> to vector<1x1x8xf32>
    %21 = vector.broadcast %20 : vector<1x1x8xf32> to vector<16x16x8xf32>
    %22 = arith.mulf %16, %21 : vector<16x16x8xf32>
    %23 = vector.extract_strided_slice %17 {offsets = [1, 0], sizes = [1, 8], strides = [1, 1]} : vector<2x8xf32> to vector<1x8xf32>
    %24 = vector.shape_cast %23 : vector<1x8xf32> to vector<8xf32>
    %25 = vector.shape_cast %24 : vector<8xf32> to vector<1x1x8xf32>
    %26 = vector.broadcast %25 : vector<1x1x8xf32> to vector<16x16x8xf32>
    %27 = arith.addf %22, %26 : vector<16x16x8xf32>
    %28 = arith.addf %13, %27 : vector<16x16x8xf32>
    %cst = arith.constant 0.000000e+00 : f32
    %29 = vector.broadcast %cst : f32 to vector<16x16x8xf32>
    %30 = arith.maximumf %28, %29 : vector<16x16x8xf32>
    %c0_11 = arith.constant 0 : index
    %c0_12 = arith.constant 0 : index
    %c0_13 = arith.constant 0 : index
    %c0_14 = arith.constant 0 : index
    %31 = vector.load %arg5[%c0_11, %c0_12, %c0_13, %c0_14] : memref<1x16x16x8xf32, #tpu.memory_space<vmem>>, vector<1x16x16x8xf32>
    %32 = vector.shape_cast %31 : vector<1x16x16x8xf32> to vector<16x16x8xf32>
    %33 = vector.shape_cast %30 : vector<16x16x8xf32> to vector<1x16x16x8xf32>
    tpu.vector_store %arg5[%c0_11, %c0_12, %c0_13, %c0_14], %33 {strides = array<i32>} : memref<1x16x16x8xf32, #tpu.memory_space<vmem>>, vector<1x16x16x8xf32>,
    return
  }
  func.func @transform_0(%arg0: i32) -> (i32, i32, i32, i32) {
    %c0_i32 = arith.constant 0 : i32
    %c0_i32_0 = arith.constant 0 : i32
    %c0_i32_1 = arith.constant 0 : i32
    %c0_i32_2 = arith.constant 0 : i32
    return %arg0, %c0_i32, %c0_i32_0, %c0_i32_1 : i32, i32, i32, i32
  }
  func.func @transform_1(%arg0: i32) -> (i32, i32, i32, i32) {
    %c0_i32 = arith.constant 0 : i32
    %c0_i32_0 = arith.constant 0 : i32
    %c0_i32_1 = arith.constant 0 : i32
    %c0_i32_2 = arith.constant 0 : i32
    return %arg0, %c0_i32, %c0_i32_0, %c0_i32_1 : i32, i32, i32, i32
  }
  func.func @transform_2(%arg0: i32) -> (i32, i32) {
    %c0_i32 = arith.constant 0 : i32
    %c0_i32_0 = arith.constant 0 : i32
    %c0_i32_1 = arith.constant 0 : i32
    return %c0_i32, %c0_i32_0 : i32, i32
  }
  func.func @transform_3(%arg0: i32) -> (i32, i32) {
    %c0_i32 = arith.constant 0 : i32
    %c0_i32_0 = arith.constant 0 : i32
    %c0_i32_1 = arith.constant 0 : i32
    return %c0_i32, %c0_i32_0 : i32, i32
  }
  func.func @transform_4(%arg0: i32) -> (i32, i32, i32, i32) {
    %c0_i32 = arith.constant 0 : i32
    %c0_i32_0 = arith.constant 0 : i32
    %c0_i32_1 = arith.constant 0 : i32
    %c0_i32_2 = arith.constant 0 : i32
    return %arg0, %c0_i32, %c0_i32_0, %c0_i32_1 : i32, i32, i32, i32
  }
}

</mosaic_0001>

<bundles_post_ra>
// kernel: basic_block_forward.6
= control target key start
LH: loop header
LB: loop body
LE: loop exit
PB: predicated region body
PF: predicated region fallthrough
CT: control target
= control target key end

     0   :  { %s1197_s12 = smov 0   ;;  %s1520_s0 = inlined_call_operand.vmem [shape: bf16[2,16,16,4], index: 0, kind: input, shape index: {}]   ;;  %s1521_s1 = inlined_call_operand.vmem [shape: bf16[1,1,4,8], index: 1, kind: input, shape index: {}]   ;;  %s1522_s2 = inlined_call_operand.vmem [shape: bf16[2,16,16,8], index: 2, kind: output, shape index: {0}]   ;;  %s1523_s3 = inlined_call_operand.vmem [shape: f32[2,2,8], index: 3, kind: output, shape index: {1}]  }
   0x1 LB: > { %s980_s13 = sadd.s32 4294967295, %s1175_s12   ;;  %p984_p0 = scmp.ge.s32.totalorder %s1175_s12, 1  ;;  %s1175_s12 = sphi %s1197_s12, %s14_s12  }
   0x2   : > { %p140_p1 = scmp.lt.s32.totalorder %s1175_s12, 3 }
   0x4   : > { %p141_p2 = pnand %p984_p0, %p140_p1 }
   0x5   : > { %v344_v0 = vld [vmem:[%s1521_s1] sm:$0x3] (!%p141_p2)  ;;  %vm393_vm0 = vcmask (!%p141_p2), 1041408   ;;  %p168_p3 = scmp.lt.s32.totalorder (!%p141_p2), %s980_s13, 1  ;;  %vm311_vm1 = vcmask (!%p141_p2), 31744   ;;  %vm686_vm2 = vcmask (!%p141_p2), 60416  }
   0x6   : > { %144 = sbr.rel (%p141_p2) target bundleno = 320 (0x140), region = 28  ;;  %1143 = vmatprep.subr.msk.bf16.mxu0 (!%p141_p2), %vm393_vm0, %v344_v0  ;;  %v395_v1 = vsel (!%p141_p2), %vm393_vm0, %v344_v0, 0  ;;  %1144 = vmatprep.subr.msk.bf16.mxu1 (!%p141_p2), %vm393_vm0, %v344_v0  ;;  %vm719_vm3 = vcmask (!%p141_p2), 64512   ;;  %vm890_vm4 = vcmask (!%p141_p2), 1040384   ;;  %vm892_vm5 = vcmask (!%p141_p2), 58368  }
   0x7   : > { %1108 = vmatpush3.bf16.msra.mxu0 (!%p141_p2), %v395_v1  ;;  %1142 = vmatpush3.bf16.msra.mxu1 (!%p141_p2), %v395_v1 }
   0xd   : > { %s1525_s13 = smov (!%p168_p3, %s980_s13), 1 }
   0xe   : > { %s1056_s16 = sshll.u32 %s1525_s13, 7  ;;  %s989_s23 = sshll.u32 %s1525_s13, 1 }
   0xf   : > { %s1216_s19 = scalar_lea.vmem %s1520_s0, %s1056_s16  ;;  %s1271_s22 = scalar_lea.vmem %s1522_s2, %s1056_s16 }
  0x10   : > { %v1153_v2 = vld [vmem:[%s1216_s19] sm:$0xff]   ;;  %v1154_v3 = vld [vmem:[%s1216_s19 + $0x8] sm:$0xff]   ;;  %v1155_v4 = vld [vmem:[%s1216_s19 + $0x10] sm:$0xff]   ;;  %s181_s26 = scalar_lea.vmem %s1523_s3, %s989_s23 }
  0x11   : > { %312 = vst.msk [vmem:[#allocation2] sm:$0xff] %vm311_vm1, %v1153_v2  ;;  %313 = vst.msk [vmem:[#allocation2 + $0x8] sm:$0xff] %vm311_vm1, %v1154_v3  ;;  %v1156_v5 = vld [vmem:[%s1216_s19 + $0x18] sm:$0xff]   ;;  %v1157_v6 = vld [vmem:[%s1216_s19 + $0x20] sm:$0xff]  }
  0x12   : > { %314 = vst.msk [vmem:[#allocation2 + $0x10] sm:$0xff] %vm311_vm1, %v1155_v4  ;;  %315 = vst.msk [vmem:[#allocation2 + $0x18] sm:$0xff] %vm311_vm1, %v1156_v5  ;;  %v1158_v7 = vld [vmem:[%s1216_s19 + $0x28] sm:$0xff]   ;;  %v1159_v8 = vld [vmem:[%s1216_s19 + $0x30] sm:$0xff]  }
  0x13   : > { %316 = vst.msk [vmem:[#allocation2 + $0x20] sm:$0xff] %vm311_vm1, %v1157_v6  ;;  %317 = vst.msk [vmem:[#allocation2 + $0x28] sm:$0xff] %vm311_vm1, %v1158_v7  ;;  %v1160_v9 = vld [vmem:[%s1216_s19 + $0x38] sm:$0xff]   ;;  %v1161_v10 = vld [vmem:[%s1216_s19 + $0x40] sm:$0xff]  }
  0x14   : > { %318 = vst.msk [vmem:[#allocation2 + $0x30] sm:$0xff] %vm311_vm1, %v1159_v8  ;;  %319 = vst.msk [vmem:[#allocation2 + $0x38] sm:$0xff] %vm311_vm1, %v1160_v9  ;;  %v1162_v13 = vld [vmem:[%s1216_s19 + $0x48] sm:$0xff]   ;;  %v1163_v15 = vld [vmem:[%s1216_s19 + $0x50] sm:$0xff]  }
  0x15   : > { %320 = vst.msk [vmem:[#allocation2 + $0x40] sm:$0xff] %vm311_vm1, %v1161_v10  ;;  %321 = vst.msk [vmem:[#allocation2 + $0x48] sm:$0xff] %vm311_vm1, %v1162_v13  ;;  %v1164_v16 = vld [vmem:[%s1216_s19 + $0x58] sm:$0xff]   ;;  %v1165_v17 = vld [vmem:[%s1216_s19 + $0x60] sm:$0xff]  }
  0x16   : > { %322 = vst.msk [vmem:[#allocation2 + $0x50] sm:$0xff] %vm311_vm1, %v1163_v15  ;;  %323 = vst.msk [vmem:[#allocation2 + $0x58] sm:$0xff] %vm311_vm1, %v1164_v16  ;;  %v1166_v20 = vld [vmem:[%s1216_s19 + $0x68] sm:$0xff]   ;;  %v1167_v22 = vld [vmem:[%s1216_s19 + $0x70] sm:$0xff]  }
  0x17   : > { %324 = vst.msk [vmem:[#allocation2 + $0x60] sm:$0xff] %vm311_vm1, %v1165_v17  ;;  %325 = vst.msk [vmem:[#allocation2 + $0x68] sm:$0xff] %vm311_vm1, %v1166_v20  ;;  %v1168_v23 = vld [vmem:[%s1216_s19 + $0x78] sm:$0xff]  }
  0x18   : > { %v328_v11 = vld [vmem:[#allocation2] sm:$0xff]  ;;  %v329_v12 = vld [vmem:[#allocation2 + $0x8] sm:$0xff]  ;;  %326 = vst.msk [vmem:[#allocation2 + $0x70] sm:$0xff] %vm311_vm1, %v1167_v22  ;;  %327 = vst.msk [vmem:[#allocation2 + $0x78] sm:$0xff] %vm311_vm1, %v1168_v23 }
  0x19   : > { %1109 = vmatprep.mubr.msk.bf16.mxu0 %vm311_vm1, %v328_v11  ;;  %v330_v14 = vld [vmem:[#allocation2 + $0x10] sm:$0xff]  ;;  %v331_v18 = vld [vmem:[#allocation2 + $0x18] sm:$0xff] }
  0x1a   : > { %1110 = vmatmul.mubr.msk.bf16.vlgmr.msra.gmra.mrb[0].mxu0 %vm311_vm1, %v329_v12  ;;  %v332_v19 = vld [vmem:[#allocation2 + $0x20] sm:$0xff]  ;;  %v333_v26 = vld [vmem:[#allocation2 + $0x28] sm:$0xff] }
  0x1b   : > { %1113 = vmatprep.mubr.msk.bf16.mxu0 %vm311_vm1, %v330_v14  ;;  %v334_v27 = vld [vmem:[#allocation2 + $0x30] sm:$0xff]  ;;  %v335_v30 = vld [vmem:[#allocation2 + $0x38] sm:$0xff] }
  0x1c   : > { %v336_v21 = vld [vmem:[#allocation2 + $0x40] sm:$0xff]  ;;  %v337_v24 = vld [vmem:[#allocation2 + $0x48] sm:$0xff] }
  0x1d   : > { %1125 = vmatprep.mubr.msk.bf16.mxu1 %vm311_vm1, %v336_v21  ;;  %v338_v25 = vld [vmem:[#allocation2 + $0x50] sm:$0xff]  ;;  %v339_v28 = vld [vmem:[#allocation2 + $0x58] sm:$0xff] }
  0x1e   : > { %1126 = vmatmul.mubr.msk.bf16.vlgmr.msra.gmra.mrb[0].mxu1 %vm311_vm1, %v337_v24  ;;  %v340_v29 = vld [vmem:[#allocation2 + $0x60] sm:$0xff]  ;;  %v341_v31 = vld [vmem:[#allocation2 + $0x68] sm:$0xff] }
  0x1f   : > { %1129 = vmatprep.mubr.msk.bf16.mxu1 %vm311_vm1, %v338_v25  ;;  %v342_v32 = vld [vmem:[#allocation2 + $0x70] sm:$0xff]  ;;  %v343_v33 = vld [vmem:[#allocation2 + $0x78] sm:$0xff] }
  0x22   : > { %1114 = vmatmul.mubr.msk.bf16.gmra.mrb[4].mxu0 %vm311_vm1, %v331_v18 }
  0x23   : > { %1117 = vmatprep.mubr.msk.bf16.mxu0 %vm311_vm1, %v332_v19 }
  0x26   : > { %1130 = vmatmul.mubr.msk.bf16.gmra.mrb[4].mxu1 %vm311_vm1, %v339_v28 }
  0x27   : > { %1133 = vmatprep.mubr.msk.bf16.mxu1 %vm311_vm1, %v340_v29 }
  0x2a   : > { %1118 = vmatmul.mubr.msk.bf16.gmra.mrb[8].mxu0 %vm311_vm1, %v333_v26 }
  0x2b   : > { %1121 = vmatprep.mubr.msk.bf16.mxu0 %vm311_vm1, %v334_v27 }
  0x2e   : > { %1134 = vmatmul.mubr.msk.bf16.gmra.mrb[8].mxu1 %vm311_vm1, %v341_v31 }
  0x2f   : > { %1137 = vmatprep.mubr.msk.bf16.mxu1 %vm311_vm1, %v342_v32 }
  0x32   : > { %1122 = vmatmul.mubr.msk.bf16.gmra.mrb[12].mxu0 %vm311_vm1, %v335_v30 }
  0x36   : > { %1138 = vmatmul.mubr.msk.bf16.gmra.mrb[12].mxu1 %vm311_vm1, %v343_v33 }
  0xed   : > { %v1111_v34 = vpop.f32.mrb[0].mxu0 }
  0xee   : > { %v1060_v35 = vpack.c.bf16 %v1111_v34, %v1111_v34  ;;  %v431_v36 = vpop.f32.mrb[1].mxu0  ;;  %v791_v40 = vmul.f32 %v1111_v34, %v1111_v34  ;;  %v723_v49 = vsel %vm719_vm3, %v1111_v34, 0.0 }
  0xef   : > { %v1058_v37 = vpack.c.bf16 %v431_v36, %v431_v36  ;;  %v789_v38 = vmul.f32 %v431_v36, %v431_v36  ;;  %v1112_v39 = vpop.f32.mrb[2].mxu0  ;;  %v720_v43 = vsel %vm719_vm3, %v431_v36, 0.0 }
  0xf0   : > { %689 = vst.msk [vmem:[%s1271_s22 + $0x8] sm:$0xf] %vm686_vm2, %v1060_v35  ;;  %v1061_v41 = vpack.c.bf16 %v1112_v39, %v1112_v39  ;;  %v434_v42 = vpop.f32.mrb[3].mxu0  ;;  %v792_v47 = vmul.f32 %v1112_v39, %v1112_v39  ;;  %v824_v54 = vsel %vm719_vm3, %v791_v40, 0.0  ;;  %v725_v56 = vsel %vm719_vm3, %v1112_v39, 0.0 }
  0xf1   : > { %687 = vst.msk [vmem:[%s1271_s22] sm:$0xf] %vm686_vm2, %v1058_v37  ;;  %v1059_v44 = vpack.c.bf16 %v434_v42, %v434_v42  ;;  %v721_v45 = vsel %vm719_vm3, %v434_v42, 0.0  ;;  %v790_v46 = vmul.f32 %v434_v42, %v434_v42  ;;  %v821_v50 = vsel %vm719_vm3, %v789_v38, 0.0  ;;  %v1289_v61 = vpop.f32.mrb[0].mxu1 }
  0xf2   : > { %690 = vst.msk [vmem:[%s1271_s22 + $0xc] sm:$0xf] %vm686_vm2, %v1061_v41  ;;  %v722_v48 = vadd.f32 %v721_v45, %v720_v43  ;;  %v826_v57 = vsel %vm719_vm3, %v792_v47, 0.0  ;;  %v1292_v3 = vpop.f32.mrb[1].mxu1  ;;  %v1076_v16 = vpack.c.bf16 %v1289_v61, %v1289_v61 }
  0xf3   : > { %688 = vst.msk [vmem:[%s1271_s22 + $0x4] sm:$0xf] %vm686_vm2, %v1059_v44  ;;  %v822_v51 = vsel %vm719_vm3, %v790_v46, 0.0  ;;  %v1296_v7 = vpop.f32.mrb[2].mxu1  ;;  %v1074_v21 = vpack.c.bf16 %v1292_v3, %v1292_v3 }
  0xf4   : > { %v724_v52 = vadd.f32 %v723_v49, %v722_v48  ;;  %v823_v53 = vadd.f32 %v822_v51, %v821_v50  ;;  %v1301_v12 = vpop.f32.mrb[3].mxu1  ;;  %705 = vst.msk [vmem:[%s1271_s22 + $0x48] sm:$0xf] %vm686_vm2, %v1076_v16  ;;  %v1077_v25 = vpack.c.bf16 %v1296_v7, %v1296_v7 }
  0xf5   : > { %v1115_v55 = vpop.f32.mrb[4].mxu0  ;;  %703 = vst.msk [vmem:[%s1271_s22 + $0x40] sm:$0xf] %vm686_vm2, %v1074_v21 }
  0xf6   : > { %v825_v58 = vadd.f32 %v824_v54, %v823_v53  ;;  %v1064_v59 = vpack.c.bf16 %v1115_v55, %v1115_v55  ;;  %v447_v60 = vpop.f32.mrb[5].mxu0  ;;  %v726_v63 = vadd.f32 %v725_v56, %v724_v52  ;;  %v795_v8 = vmul.f32 %v1115_v55, %v1115_v55  ;;  %706 = vst.msk [vmem:[%s1271_s22 + $0x4c] sm:$0xf] %vm686_vm2, %v1077_v25 }
  0xf7   : > { %v1062_v62 = vpack.c.bf16 %v447_v60, %v447_v60  ;;  %v727_v0 = vsel %vm719_vm3, %v447_v60, 0.0  ;;  %v793_v1 = vmul.f32 %v447_v60, %v447_v60  ;;  %v1116_v2 = vpop.f32.mrb[6].mxu0  ;;  %v731_v18 = vsel %vm719_vm3, %v1115_v55, 0.0 }
  0xf8   : > { %693 = vst.msk [vmem:[%s1271_s22 + $0x18] sm:$0xf] %vm686_vm2, %v1064_v59  ;;  %v827_v4 = vadd.f32 %v826_v57, %v825_v58  ;;  %v1065_v5 = vpack.c.bf16 %v1116_v2, %v1116_v2  ;;  %v450_v6 = vpop.f32.mrb[7].mxu0  ;;  %v728_v9 = vadd.f32 %v727_v0, %v726_v63  ;;  %v796_v19 = vmul.f32 %v1116_v2, %v1116_v2 }
  0xf9   : > { %691 = vst.msk [vmem:[%s1271_s22 + $0x10] sm:$0xf] %vm686_vm2, %v1062_v62  ;;  %v828_v10 = vsel %vm719_vm3, %v793_v1, 0.0  ;;  %v1063_v11 = vpack.c.bf16 %v450_v6, %v450_v6  ;;  %v729_v14 = vsel %vm719_vm3, %v450_v6, 0.0  ;;  %v794_v15 = vmul.f32 %v450_v6, %v450_v6  ;;  %v1322_v30 = vpop.f32.mrb[4].mxu1 }
  0xfa   : > { %v829_v13 = vadd.f32 %v828_v10, %v827_v4  ;;  %694 = vst.msk [vmem:[%s1271_s22 + $0x1c] sm:$0xf] %vm686_vm2, %v1065_v5  ;;  %v730_v17 = vadd.f32 %v729_v14, %v728_v9  ;;  %v832_v26 = vsel %vm719_vm3, %v795_v8, 0.0  ;;  %v733_v27 = vsel %vm719_vm3, %v1116_v2, 0.0  ;;  %v1327_v36 = vpop.f32.mrb[5].mxu1 }
  0xfb   : > { %692 = vst.msk [vmem:[%s1271_s22 + $0x14] sm:$0xf] %vm686_vm2, %v1063_v11  ;;  %v830_v20 = vsel %vm719_vm3, %v794_v15, 0.0  ;;  %v834_v37 = vsel %vm719_vm3, %v796_v19, 0.0  ;;  %v1332_v41 = vpop.f32.mrb[6].mxu1  ;;  %v1075_v55 = vpack.c.bf16 %v1301_v12, %v1301_v12  ;;  %v1080_v59 = vpack.c.bf16 %v1322_v30, %v1322_v30 }
  0xfc   : > { %v732_v22 = vadd.f32 %v731_v18, %v730_v17  ;;  %v831_v23 = vadd.f32 %v830_v20, %v829_v13  ;;  %v1336_v45 = vpop.f32.mrb[7].mxu1 }
  0xfd   : > { %v1119_v24 = vpop.f32.mrb[8].mxu0  ;;  %704 = vst.msk [vmem:[%s1271_s22 + $0x44] sm:$0xf] %vm686_vm2, %v1075_v55  ;;  %709 = vst.msk [vmem:[%s1271_s22 + $0x58] sm:$0xf] %vm686_vm2, %v1080_v59  ;;  %v753_v55 = vsel %vm719_vm3, %v1301_v12, 0.0 }
  0xfe   : > { %v1068_v28 = vpack.c.bf16 %v1119_v24, %v1119_v24  ;;  %v463_v29 = vpop.f32.mrb[9].mxu0  ;;  %v833_v31 = vadd.f32 %v832_v26, %v831_v23  ;;  %v734_v33 = vadd.f32 %v733_v27, %v732_v22  ;;  %v799_v46 = vmul.f32 %v1119_v24, %v1119_v24 }
  0xff   : > { %v1066_v32 = vpack.c.bf16 %v463_v29, %v463_v29  ;;  %v735_v34 = vsel %vm719_vm3, %v463_v29, 0.0  ;;  %v1120_v35 = vpop.f32.mrb[10].mxu0  ;;  %v797_v38 = vmul.f32 %v463_v29, %v463_v29  ;;  %v739_v52 = vsel %vm719_vm3, %v1119_v24, 0.0 }
 0x100   : > { %697 = vst.msk [vmem:[%s1271_s22 + $0x28] sm:$0xf] %vm686_vm2, %v1068_v28  ;;  %v1069_v39 = vpack.c.bf16 %v1120_v35, %v1120_v35  ;;  %v466_v40 = vpop.f32.mrb[11].mxu0  ;;  %v736_v42 = vadd.f32 %v735_v34, %v734_v33  ;;  %v835_v43 = vadd.f32 %v834_v37, %v833_v31  ;;  %v800_v53 = vmul.f32 %v1120_v35, %v1120_v35 }
 0x101   : > { %695 = vst.msk [vmem:[%s1271_s22 + $0x20] sm:$0xf] %vm686_vm2, %v1066_v32  ;;  %v1067_v44 = vpack.c.bf16 %v466_v40, %v466_v40  ;;  %v836_v47 = vsel %vm719_vm3, %v797_v38, 0.0  ;;  %v737_v48 = vsel %vm719_vm3, %v466_v40, 0.0  ;;  %v798_v49 = vmul.f32 %v466_v40, %v466_v40  ;;  %v1354_v1 = vpop.f32.mrb[8].mxu1 }
 0x102   : > { %698 = vst.msk [vmem:[%s1271_s22 + $0x2c] sm:$0xf] %vm686_vm2, %v1069_v39  ;;  %v837_v50 = vadd.f32 %v836_v47, %v835_v43  ;;  %v738_v51 = vadd.f32 %v737_v48, %v736_v42  ;;  %v840_v60 = vsel %vm719_vm3, %v799_v46, 0.0  ;;  %v741_v62 = vsel %vm719_vm3, %v1120_v35, 0.0  ;;  %v1359_v9 = vpop.f32.mrb[9].mxu1 }
 0x103   : > { %696 = vst.msk [vmem:[%s1271_s22 + $0x24] sm:$0xf] %vm686_vm2, %v1067_v44  ;;  %v838_v54 = vsel %vm719_vm3, %v798_v49, 0.0  ;;  %v842_v10 = vsel %vm719_vm3, %v800_v53, 0.0  ;;  %v1364_v15 = vpop.f32.mrb[10].mxu1  ;;  %v805_v26 = vmul.f32 %v1292_v3, %v1292_v3  ;;  %v1078_v31 = vpack.c.bf16 %v1327_v36, %v1327_v36 }
 0x104   : > { %v740_v56 = vadd.f32 %v739_v52, %v738_v51  ;;  %v839_v57 = vadd.f32 %v838_v54, %v837_v50  ;;  %v1368_v19 = vpop.f32.mrb[11].mxu1  ;;  %v1081_v34 = vpack.c.bf16 %v1332_v41, %v1332_v41  ;;  %v751_v38 = vsel %vm719_vm3, %v1292_v3, 0.0 }
 0x105   : > { %v1123_v58 = vpop.f32.mrb[12].mxu0  ;;  %707 = vst.msk [vmem:[%s1271_s22 + $0x50] sm:$0xf] %vm686_vm2, %v1078_v31  ;;  %v1079_v39 = vpack.c.bf16 %v1336_v45, %v1336_v45  ;;  %v852_v47 = vsel %vm719_vm3, %v805_v26, 0.0  ;;  %v806_v3 = vmul.f32 %v1301_v12, %v1301_v12  ;;  %v1084_v48 = vpack.c.bf16 %v1354_v1, %v1354_v1 }
 0x106   : > { %v1072_v63 = vpack.c.bf16 %v1123_v58, %v1123_v58  ;;  %v479_v0 = vpop.f32.mrb[13].mxu0  ;;  %v841_v2 = vadd.f32 %v840_v60, %v839_v57  ;;  %v742_v5 = vadd.f32 %v741_v62, %v740_v56  ;;  %v803_v20 = vmul.f32 %v1123_v58, %v1123_v58  ;;  %710 = vst.msk [vmem:[%s1271_s22 + $0x5c] sm:$0xf] %vm686_vm2, %v1081_v34 }
 0x107   : > { %v1070_v4 = vpack.c.bf16 %v479_v0, %v479_v0  ;;  %v743_v6 = vsel %vm719_vm3, %v479_v0, 0.0  ;;  %v1124_v8 = vpop.f32.mrb[14].mxu0  ;;  %v801_v11 = vmul.f32 %v479_v0, %v479_v0  ;;  %v747_v27 = vsel %vm719_vm3, %v1123_v58, 0.0  ;;  %708 = vst.msk [vmem:[%s1271_s22 + $0x54] sm:$0xf] %vm686_vm2, %v1079_v39 }
 0x108   : > { %701 = vst.msk [vmem:[%s1271_s22 + $0x38] sm:$0xf] %vm686_vm2, %v1072_v63  ;;  %v1073_v13 = vpack.c.bf16 %v1124_v8, %v1124_v8  ;;  %v482_v14 = vpop.f32.mrb[15].mxu0  ;;  %v744_v16 = vadd.f32 %v743_v6, %v742_v5  ;;  %v843_v17 = vadd.f32 %v842_v10, %v841_v2  ;;  %v804_v28 = vmul.f32 %v1124_v8, %v1124_v8 }
 0x109   : > { %699 = vst.msk [vmem:[%s1271_s22 + $0x30] sm:$0xf] %vm686_vm2, %v1070_v4  ;;  %v1071_v18 = vpack.c.bf16 %v482_v14, %v482_v14  ;;  %v844_v21 = vsel %vm719_vm3, %v801_v11, 0.0  ;;  %v745_v22 = vsel %vm719_vm3, %v482_v14, 0.0  ;;  %v802_v23 = vmul.f32 %v482_v14, %v482_v14  ;;  %v1392_v40 = vpop.f32.mrb[12].mxu1 }
 0x10a   : > { %702 = vst.msk [vmem:[%s1271_s22 + $0x3c] sm:$0xf] %vm686_vm2, %v1073_v13  ;;  %v845_v24 = vadd.f32 %v844_v21, %v843_v17  ;;  %v746_v25 = vadd.f32 %v745_v22, %v744_v16  ;;  %v848_v35 = vsel %vm719_vm3, %v803_v20, 0.0  ;;  %v749_v37 = vsel %vm719_vm3, %v1124_v8, 0.0  ;;  %v1396_v44 = vpop.f32.mrb[13].mxu1 }
 0x10b   : > { %700 = vst.msk [vmem:[%s1271_s22 + $0x34] sm:$0xf] %vm686_vm2, %v1071_v18  ;;  %v846_v29 = vsel %vm719_vm3, %v802_v23, 0.0  ;;  %v850_v46 = vsel %vm719_vm3, %v804_v28, 0.0  ;;  %v1406_v49 = vpop.f32.mrb[14].mxu1  ;;  %v1082_v52 = vpack.c.bf16 %v1359_v9, %v1359_v9  ;;  %v807_v54 = vmul.f32 %v1289_v61, %v1289_v61 }
 0x10c   : > { %v748_v32 = vadd.f32 %v747_v27, %v746_v25  ;;  %v847_v33 = vadd.f32 %v846_v29, %v845_v24  ;;  %v1410_v53 = vpop.f32.mrb[15].mxu1  ;;  %713 = vst.msk [vmem:[%s1271_s22 + $0x68] sm:$0xf] %vm686_vm2, %v1084_v48  ;;  %v1085_v56 = vpack.c.bf16 %v1364_v15, %v1364_v15  ;;  %v755_v57 = vsel %vm719_vm3, %v1289_v61, 0.0 }
 0x10d   : > { %711 = vst.msk [vmem:[%s1271_s22 + $0x60] sm:$0xf] %vm686_vm2, %v1082_v52  ;;  %v808_v60 = vmul.f32 %v1296_v7, %v1296_v7  ;;  %v854_v62 = vsel %vm719_vm3, %v806_v3, 0.0  ;;  %v809_v12 = vmul.f32 %v1327_v36, %v1327_v36  ;;  %v1083_v63 = vpack.c.bf16 %v1368_v19, %v1368_v19 }
 0x10e   : > { %v849_v42 = vadd.f32 %v848_v35, %v847_v33  ;;  %v750_v43 = vadd.f32 %v749_v37, %v748_v32  ;;  %714 = vst.msk [vmem:[%s1271_s22 + $0x6c] sm:$0xf] %vm686_vm2, %v1085_v56  ;;  %v1088_v2 = vpack.c.bf16 %v1392_v40, %v1392_v40  ;;  %v856_v4 = vsel %vm719_vm3, %v807_v54, 0.0 }
 0x10f   : > { %v757_v5 = vsel %vm719_vm3, %v1296_v7, 0.0  ;;  %v759_v6 = vsel %vm719_vm3, %v1327_v36, 0.0  ;;  %712 = vst.msk [vmem:[%s1271_s22 + $0x64] sm:$0xf] %vm686_vm2, %v1083_v63  ;;  %v1086_v8 = vpack.c.bf16 %v1396_v44, %v1396_v44  ;;  %v858_v13 = vsel %vm719_vm3, %v808_v60, 0.0 }
 0x110   : > { %v752_v50 = vadd.f32 %v751_v38, %v750_v43  ;;  %v851_v51 = vadd.f32 %v850_v46, %v849_v42  ;;  %717 = vst.msk [vmem:[%s1271_s22 + $0x78] sm:$0xf] %vm686_vm2, %v1088_v2  ;;  %v860_v14 = vsel %vm719_vm3, %v809_v12, 0.0  ;;  %v810_v7 = vmul.f32 %v1336_v45, %v1336_v45 }
 0x111   : > { %715 = vst.msk [vmem:[%s1271_s22 + $0x70] sm:$0xf] %vm686_vm2, %v1086_v8  ;;  %v1089_v36 = vpack.c.bf16 %v1406_v49, %v1406_v49  ;;  %v1087_v18 = vpack.c.bf16 %v1410_v53, %v1410_v53  ;;  %v811_v20 = vmul.f32 %v1322_v30, %v1322_v30  ;;  %v761_v21 = vsel %vm719_vm3, %v1336_v45, 0.0 }
 0x112   : > { %v853_v58 = vadd.f32 %v852_v47, %v851_v51  ;;  %v754_v59 = vadd.f32 %v753_v55, %v752_v50  ;;  %v763_v24 = vsel %vm719_vm3, %v1322_v30, 0.0  ;;  %v812_v25 = vmul.f32 %v1332_v41, %v1332_v41 }
 0x113   : > { %718 = vst.msk [vmem:[%s1271_s22 + $0x7c] sm:$0xf] %vm686_vm2, %v1089_v36  ;;  %716 = vst.msk [vmem:[%s1271_s22 + $0x74] sm:$0xf] %vm686_vm2, %v1087_v18  ;;  %v862_v26 = vsel %vm719_vm3, %v810_v7, 0.0  ;;  %v813_v27 = vmul.f32 %v1359_v9, %v1359_v9  ;;  %v864_v45 = vsel %vm719_vm3, %v811_v20, 0.0  ;;  %v814_v37 = vmul.f32 %v1368_v19, %v1368_v19 }
 0x114   : > { %v756_v61 = vadd.f32 %v755_v57, %v754_v59  ;;  %v855_v0 = vadd.f32 %v854_v62, %v853_v58  ;;  %v765_v31 = vsel %vm719_vm3, %v1332_v41, 0.0  ;;  %v767_v32 = vsel %vm719_vm3, %v1359_v9, 0.0 }
 0x115   : > { %v866_v34 = vsel %vm719_vm3, %v812_v25, 0.0  ;;  %v868_v35 = vsel %vm719_vm3, %v813_v27, 0.0  ;;  %v815_v42 = vmul.f32 %v1354_v1, %v1354_v1  ;;  %v769_v41 = vsel %vm719_vm3, %v1368_v19, 0.0 }
 0x116   : > { %v857_v10 = vadd.f32 %v856_v4, %v855_v0  ;;  %v758_v11 = vadd.f32 %v757_v5, %v756_v61  ;;  %v771_v9 = vsel %vm719_vm3, %v1354_v1, 0.0  ;;  %v816_v47 = vmul.f32 %v1364_v15, %v1364_v15 }
 0x117   : > { %v870_v3 = vsel %vm719_vm3, %v814_v37, 0.0  ;;  %v817_v48 = vmul.f32 %v1396_v44, %v1396_v44  ;;  %v872_v52 = vsel %vm719_vm3, %v815_v42, 0.0  ;;  %v773_v19 = vsel %vm719_vm3, %v1364_v15, 0.0 }
 0x118   : > { %v760_v16 = vadd.f32 %v759_v6, %v758_v11  ;;  %v859_v17 = vadd.f32 %v858_v13, %v857_v10  ;;  %v775_v54 = vsel %vm719_vm3, %v1396_v44, 0.0  ;;  %v874_v56 = vsel %vm719_vm3, %v816_v47, 0.0 }
 0x119   : > { %v876_v57 = vsel %vm719_vm3, %v817_v48, 0.0  ;;  %v818_v58 = vmul.f32 %v1410_v53, %v1410_v53  ;;  %v819_v62 = vmul.f32 %v1392_v40, %v1392_v40  ;;  %v777_v15 = vsel %vm719_vm3, %v1410_v53, 0.0 }
 0x11a   : > { %v861_v22 = vadd.f32 %v860_v14, %v859_v17  ;;  %v762_v23 = vadd.f32 %v761_v21, %v760_v16  ;;  %v779_v44 = vsel %vm719_vm3, %v1392_v40, 0.0  ;;  %v820_v61 = vmul.f32 %v1406_v49, %v1406_v49 }
 0x11b   : > { %v878_v0 = vsel %vm719_vm3, %v818_v58, 0.0  ;;  %v880_v5 = vsel %vm719_vm3, %v819_v62, 0.0  ;;  %v781_v6 = vsel %vm719_vm3, %v1406_v49, 0.0 }
 0x11c   : > { %v764_v28 = vadd.f32 %v763_v24, %v762_v23  ;;  %v863_v29 = vadd.f32 %v862_v26, %v861_v22  ;;  %v882_v10 = vsel %vm719_vm3, %v820_v61, 0.0 }
 0x11e   : > { %v865_v33 = vadd.f32 %v864_v45, %v863_v29  ;;  %v766_v30 = vadd.f32 %v765_v31, %v764_v28 }
 0x120   : > { %v768_v38 = vadd.f32 %v767_v32, %v766_v30  ;;  %v867_v39 = vadd.f32 %v866_v34, %v865_v33 }
 0x122   : > { %v869_v43 = vadd.f32 %v868_v35, %v867_v39  ;;  %v770_v46 = vadd.f32 %v769_v41, %v768_v38 }
 0x124   : > { %v772_v50 = vadd.f32 %v771_v9, %v770_v46  ;;  %v871_v51 = vadd.f32 %v870_v3, %v869_v43 }
 0x126   : > { %v873_v55 = vadd.f32 %v872_v52, %v871_v51  ;;  %v774_v1 = vadd.f32 %v773_v19, %v772_v50 }
 0x128   : > { %v776_v59 = vadd.f32 %v775_v54, %v774_v1  ;;  %v875_v60 = vadd.f32 %v874_v56, %v873_v55 }
 0x12a   : > { %v877_v12 = vadd.f32 %v876_v57, %v875_v60  ;;  %v778_v63 = vadd.f32 %v777_v15, %v776_v59 }
 0x12c   : > { %v780_v2 = vadd.f32 %v779_v44, %v778_v63  ;;  %v879_v4 = vadd.f32 %v878_v0, %v877_v12 }
 0x12e   : > { %v782_v8 = vadd.f32 %v781_v6, %v780_v2  ;;  %v881_v53 = vadd.f32 %v880_v5, %v879_v4 }
 0x130   : > { %v783_v11 = vrot.slane %v782_v8, 4  ;;  %v883_v13 = vadd.f32 %v882_v10, %v881_v53 }
 0x132   : > { %v784_v40 = vadd.f32 %v783_v11, %v782_v8  ;;  %v884_v14 = vrot.slane %v883_v13, 4 }
 0x134   : > { %v785_v7 = vrot.slane %v784_v40, 2  ;;  %v885_v36 = vadd.f32 %v884_v14, %v883_v13 }
 0x136   : > { %v786_v16 = vadd.f32 %v785_v7, %v784_v40  ;;  %v886_v17 = vrot.slane %v885_v36, 2 }
 0x138   : > { %v787_v18 = vrot.slane %v786_v16, 1  ;;  %v887_v20 = vadd.f32 %v886_v17, %v885_v36 }
 0x13a   : > { %v888_v21 = vrot.slane %v887_v20, 1  ;;  %v788_v49 = vadd.f32 %v787_v18, %v786_v16 }
 0x13c   : > { %v889_v22 = vadd.f32 %v888_v21, %v887_v20 }
 0x13e   : > { %v891_v23 = vsel %vm890_vm4, %v788_v49, %v889_v22 }
 0x13f   : > { %893 = vst.msk [vmem:[%s181_s26] sm:$0x3] %vm892_vm5, %v891_v23 }
 0x140 PF: > { %s14_s12 = sadd.s32 1, %s1175_s12  }
 0x141   : > { %p11_p4 = scmp.ge.s32.totalorder %s14_s12, 4  }
 0x143   :  { %13 = sbr.rel (!%p11_p4) target bundleno = 1 (0x1), region = 70 }

// kernel: basic_block_forward.7
= control target key start
LH: loop header
LB: loop body
LE: loop exit
PB: predicated region body
PF: predicated region fallthrough
CT: control target
= control target key end

     0   :  { %s871_s15 = smov 0   ;;  %s1139_s0 = inlined_call_operand.vmem [shape: bf16[2,16,16,8], index: 0, kind: input, shape index: {}]   ;;  %s1140_s1 = inlined_call_operand.vmem [shape: bf16[2,16,16,8], index: 1, kind: input, shape index: {}]   ;;  %s1141_s2 = inlined_call_operand.vmem [shape: f32[2,8], index: 2, kind: input, shape index: {}]   ;;  %s1142_s3 = inlined_call_operand.vmem [shape: f32[2,8], index: 3, kind: input, shape index: {}]   ;;  %s1143_s4 = inlined_call_operand.vmem [shape: f32[2,16,16,8], index: 4, kind: output, shape index: {}]  }
   0x1 LB: > { %s656_s16 = sadd.s32 4294967295, %s844_s15   ;;  %p660_p0 = scmp.ge.s32.totalorder %s844_s15, 1  ;;  %s844_s15 = sphi %s871_s15, %s14_s15  }
   0x2   : > { %p172_p1 = scmp.lt.s32.totalorder %s844_s15, 3 }
   0x4   : > { %p173_p2 = pnand %p660_p0, %p172_p1 }
   0x5   : > { %p203_p3 = scmp.lt.s32.totalorder (!%p173_p2), %s656_s16, 1  ;;  %v283_v0 = vlaneseq (!%p173_p2)  ;;  %v218_v2 = vld [vmem:[%s1141_s2] sm:$0x3] (!%p173_p2)  ;;  %vm556_vm0 = vcmask (!%p173_p2), 64512  }
   0x6   : > { %176 = sbr.rel (%p173_p2) target bundleno = 88 (0x58), region = 36  ;;  %v419_v3 = vld [vmem:[%s1142_s3] sm:$0x3] (!%p173_p2) }
   0x7   : > { %v284_v1 = vshrl.u32 (!%p173_p2), %v283_v0, 7 }
   0x9   : > { %v285_v4 = vsub.s32 (!%p173_p2), 0, %v284_v1  ;;  %v321_v5 = vsub.s32 (!%p173_p2), 1, %v284_v1 }
   0xb   : > { %v899_v7 = vrot.slane (!%p173_p2), %v218_v2, %v285_v4  ;;  %v901_v8 = vrot.slane (!%p173_p2), %v218_v2, %v321_v5  ;;  %v904_v10 = vrot.slane (!%p173_p2), %v419_v3, %v285_v4  ;;  %v906_v11 = vrot.slane (!%p173_p2), %v419_v3, %v321_v5 }
   0xd   : > { %s1145_s16 = smov (!%p203_p3, %s656_s16), 1 }
   0xe   : > { %s669_s21 = sshll.u32 %s1145_s16, 7  ;;  %s671_s28 = sshll.u32 %s1145_s16, 8 }
   0xf   : > { %s891_s24 = scalar_lea.vmem %s1139_s0, %s669_s21  ;;  %s896_s27 = scalar_lea.vmem %s1140_s1, %s669_s21 }
  0x10   : > { %v673_v6 = vld [vmem:[%s891_s24] sm:$0xff]   ;;  %v800_v12 = vld [vmem:[%s891_s24 + $0x8] sm:$0xff]   ;;  %v801_v30 = vld [vmem:[%s891_s24 + $0x10] sm:$0xff]   ;;  %s932_s5 = scalar_lea.vmem %s1143_s4, %s671_s28 }
  0x11   : > { %v737_v9 = vld [vmem:[%s896_s27] sm:$0xff]   ;;  %v674_v13 = vunpack.c.l.bf16 %v673_v6  ;;  %v675_v15 = vunpack.c.h.bf16 %v673_v6  ;;  %v815_v17 = vld [vmem:[%s896_s27 + $0x8] sm:$0xff]   ;;  %v678_v18 = vunpack.c.l.bf16 %v800_v12  ;;  %v679_v20 = vunpack.c.h.bf16 %v800_v12  ;;  %v816_v31 = vld [vmem:[%s896_s27 + $0x10] sm:$0xff]  }
  0x12   : > { %v738_v14 = vunpack.c.l.bf16 %v737_v9  ;;  %v739_v16 = vunpack.c.h.bf16 %v737_v9  ;;  %v742_v19 = vunpack.c.l.bf16 %v815_v17  ;;  %v743_v21 = vunpack.c.h.bf16 %v815_v17  ;;  %v802_v48 = vld [vmem:[%s891_s24 + $0x18] sm:$0xff]   ;;  %v803_v58 = vld [vmem:[%s891_s24 + $0x20] sm:$0xff]  }
  0x13   : > { %v287_v22 = vmul.f32 %v674_v13, %v899_v7  ;;  %v288_v24 = vmul.f32 %v675_v15, %v899_v7  ;;  %v289_v26 = vmul.f32 %v678_v18, %v899_v7  ;;  %v290_v28 = vmul.f32 %v679_v20, %v899_v7  ;;  %v817_v49 = vld [vmem:[%s896_s27 + $0x18] sm:$0xff]   ;;  %v818_v63 = vld [vmem:[%s896_s27 + $0x20] sm:$0xff]   ;;  %v804_v20 = vld [vmem:[%s891_s24 + $0x28] sm:$0xff]  }
  0x14   : > { %v424_v23 = vmul.f32 %v738_v14, %v904_v10  ;;  %v425_v25 = vmul.f32 %v739_v16, %v904_v10  ;;  %v426_v27 = vmul.f32 %v742_v19, %v904_v10  ;;  %v427_v29 = vmul.f32 %v743_v21, %v904_v10  ;;  %v819_v21 = vld [vmem:[%s896_s27 + $0x28] sm:$0xff]  }
  0x15   : > { %v323_v32 = vadd.f32 %v901_v8, %v287_v22  ;;  %v324_v34 = vadd.f32 %v901_v8, %v288_v24  ;;  %v325_v36 = vadd.f32 %v901_v8, %v289_v26  ;;  %v326_v38 = vadd.f32 %v901_v8, %v290_v28 }
  0x16   : > { %v460_v33 = vadd.f32 %v906_v11, %v424_v23  ;;  %v461_v35 = vadd.f32 %v906_v11, %v425_v25  ;;  %v462_v37 = vadd.f32 %v906_v11, %v426_v27  ;;  %v463_v39 = vadd.f32 %v906_v11, %v427_v29 }
  0x17   : > { %v682_v42 = vunpack.c.l.bf16 %v801_v30  ;;  %v746_v43 = vunpack.c.l.bf16 %v816_v31  ;;  %v683_v46 = vunpack.c.h.bf16 %v801_v30  ;;  %v747_v47 = vunpack.c.h.bf16 %v816_v31 }
  0x18   : > { %v492_v40 = vadd.f32 %v460_v33, %v323_v32  ;;  %v493_v41 = vadd.f32 %v461_v35, %v324_v34  ;;  %v494_v44 = vadd.f32 %v462_v37, %v325_v36  ;;  %v495_v45 = vadd.f32 %v463_v39, %v326_v38  ;;  %v805_v38 = vld [vmem:[%s891_s24 + $0x30] sm:$0xff]  }
  0x19   : > { %v291_v52 = vmul.f32 %v682_v42, %v899_v7  ;;  %v428_v53 = vmul.f32 %v746_v43, %v904_v10  ;;  %v292_v56 = vmul.f32 %v683_v46, %v899_v7  ;;  %v429_v57 = vmul.f32 %v747_v47, %v904_v10  ;;  %v820_v43 = vld [vmem:[%s896_s27 + $0x30] sm:$0xff]  }
  0x1a   : > { %v524_v50 = vmax.f32 %v492_v40, 0.0  ;;  %v525_v51 = vmax.f32 %v493_v41, 0.0  ;;  %v526_v54 = vmax.f32 %v494_v44, 0.0  ;;  %v527_v55 = vmax.f32 %v495_v45, 0.0 }
  0x1b   : > { %v327_v59 = vadd.f32 %v901_v8, %v291_v52  ;;  %v464_v60 = vadd.f32 %v906_v11, %v428_v53  ;;  %v686_v61 = vunpack.c.l.bf16 %v802_v48  ;;  %v750_v62 = vunpack.c.l.bf16 %v817_v49  ;;  %v806_v52 = vld [vmem:[%s891_s24 + $0x38] sm:$0xff]  }
  0x1c   : > { %557 = vst.msk [vmem:[%s932_s5] sm:$0xff] %vm556_vm0, %v524_v50  ;;  %558 = vst.msk [vmem:[%s932_s5 + $0x8] sm:$0xff] %vm556_vm0, %v525_v51  ;;  %v328_v0 = vadd.f32 %v901_v8, %v292_v56  ;;  %v465_v1 = vadd.f32 %v906_v11, %v429_v57  ;;  %v687_v2 = vunpack.c.h.bf16 %v802_v48  ;;  %v751_v3 = vunpack.c.h.bf16 %v817_v49 }
  0x1d   : > { %559 = vst.msk [vmem:[%s932_s5 + $0x10] sm:$0xff] %vm556_vm0, %v526_v54  ;;  %560 = vst.msk [vmem:[%s932_s5 + $0x18] sm:$0xff] %vm556_vm0, %v527_v55  ;;  %v496_v4 = vadd.f32 %v464_v60, %v327_v59  ;;  %v293_v5 = vmul.f32 %v686_v61, %v899_v7  ;;  %v430_v6 = vmul.f32 %v750_v62, %v904_v10  ;;  %v690_v9 = vunpack.c.l.bf16 %v803_v58  ;;  %v821_v61 = vld [vmem:[%s896_s27 + $0x38] sm:$0xff]  }
  0x1e   : > { %v497_v12 = vadd.f32 %v465_v1, %v328_v0  ;;  %v294_v13 = vmul.f32 %v687_v2, %v899_v7  ;;  %v431_v14 = vmul.f32 %v751_v3, %v904_v10  ;;  %v754_v15 = vunpack.c.l.bf16 %v818_v63 }
  0x1f   : > { %v528_v16 = vmax.f32 %v496_v4, 0.0  ;;  %v329_v17 = vadd.f32 %v901_v8, %v293_v5  ;;  %v466_v18 = vadd.f32 %v906_v11, %v430_v6  ;;  %v295_v19 = vmul.f32 %v690_v9, %v899_v7 }
  0x20   : > { %v529_v22 = vmax.f32 %v497_v12, 0.0  ;;  %v330_v23 = vadd.f32 %v901_v8, %v294_v13  ;;  %v467_v24 = vadd.f32 %v906_v11, %v431_v14  ;;  %v432_v25 = vmul.f32 %v754_v15, %v904_v10  ;;  %v807_v14 = vld [vmem:[%s891_s24 + $0x40] sm:$0xff]  }
  0x21   : > { %561 = vst.msk [vmem:[%s932_s5 + $0x20] sm:$0xff] %vm556_vm0, %v528_v16  ;;  %v498_v26 = vadd.f32 %v466_v18, %v329_v17  ;;  %v331_v27 = vadd.f32 %v901_v8, %v295_v19  ;;  %v691_v28 = vunpack.c.h.bf16 %v803_v58  ;;  %v755_v29 = vunpack.c.h.bf16 %v818_v63  ;;  %v822_v19 = vld [vmem:[%s896_s27 + $0x40] sm:$0xff]  }
  0x22   : > { %562 = vst.msk [vmem:[%s932_s5 + $0x28] sm:$0xff] %vm556_vm0, %v529_v22  ;;  %v499_v30 = vadd.f32 %v467_v24, %v330_v23  ;;  %v468_v31 = vadd.f32 %v906_v11, %v432_v25  ;;  %v694_v32 = vunpack.c.l.bf16 %v804_v20  ;;  %v758_v33 = vunpack.c.l.bf16 %v819_v21 }
  0x23   : > { %v530_v34 = vmax.f32 %v498_v26, 0.0  ;;  %v296_v35 = vmul.f32 %v691_v28, %v899_v7  ;;  %v433_v36 = vmul.f32 %v755_v29, %v904_v10  ;;  %v695_v37 = vunpack.c.h.bf16 %v804_v20 }
  0x24   : > { %v531_v39 = vmax.f32 %v499_v30, 0.0  ;;  %v500_v40 = vadd.f32 %v468_v31, %v331_v27  ;;  %v297_v41 = vmul.f32 %v694_v32, %v899_v7  ;;  %v434_v42 = vmul.f32 %v758_v33, %v904_v10  ;;  %v808_v32 = vld [vmem:[%s891_s24 + $0x48] sm:$0xff]  }
  0x25   : > { %563 = vst.msk [vmem:[%s932_s5 + $0x30] sm:$0xff] %vm556_vm0, %v530_v34  ;;  %v332_v44 = vadd.f32 %v901_v8, %v296_v35  ;;  %v469_v45 = vadd.f32 %v906_v11, %v433_v36  ;;  %v298_v46 = vmul.f32 %v695_v37, %v899_v7  ;;  %v759_v47 = vunpack.c.h.bf16 %v819_v21  ;;  %v823_v33 = vld [vmem:[%s896_s27 + $0x48] sm:$0xff]  }
  0x26   : > { %564 = vst.msk [vmem:[%s932_s5 + $0x38] sm:$0xff] %vm556_vm0, %v531_v39  ;;  %v532_v48 = vmax.f32 %v500_v40, 0.0  ;;  %v333_v49 = vadd.f32 %v901_v8, %v297_v41  ;;  %v470_v50 = vadd.f32 %v906_v11, %v434_v42  ;;  %v698_v51 = vunpack.c.l.bf16 %v805_v38 }
  0x27   : > { %v501_v53 = vadd.f32 %v469_v45, %v332_v44  ;;  %v334_v54 = vadd.f32 %v901_v8, %v298_v46  ;;  %v435_v55 = vmul.f32 %v759_v47, %v904_v10  ;;  %v762_v56 = vunpack.c.l.bf16 %v820_v43  ;;  %v809_v46 = vld [vmem:[%s891_s24 + $0x50] sm:$0xff]  }
  0x28   : > { %565 = vst.msk [vmem:[%s932_s5 + $0x40] sm:$0xff] %vm556_vm0, %v532_v48  ;;  %v502_v57 = vadd.f32 %v470_v50, %v333_v49  ;;  %v299_v58 = vmul.f32 %v698_v51, %v899_v7  ;;  %v699_v59 = vunpack.c.h.bf16 %v805_v38  ;;  %v763_v60 = vunpack.c.h.bf16 %v820_v43  ;;  %v824_v51 = vld [vmem:[%s896_s27 + $0x50] sm:$0xff]  }
  0x29   : > { %v533_v62 = vmax.f32 %v501_v53, 0.0  ;;  %v471_v63 = vadd.f32 %v906_v11, %v435_v55  ;;  %v436_v0 = vmul.f32 %v762_v56, %v904_v10  ;;  %v702_v1 = vunpack.c.l.bf16 %v806_v52 }
  0x2a   : > { %v534_v2 = vmax.f32 %v502_v57, 0.0  ;;  %v335_v3 = vadd.f32 %v901_v8, %v299_v58  ;;  %v300_v4 = vmul.f32 %v699_v59, %v899_v7  ;;  %v437_v5 = vmul.f32 %v763_v60, %v904_v10 }
  0x2b   : > { %566 = vst.msk [vmem:[%s932_s5 + $0x48] sm:$0xff] %vm556_vm0, %v533_v62  ;;  %v503_v6 = vadd.f32 %v471_v63, %v334_v54  ;;  %v472_v9 = vadd.f32 %v906_v11, %v436_v0  ;;  %v301_v12 = vmul.f32 %v702_v1, %v899_v7  ;;  %v766_v13 = vunpack.c.l.bf16 %v821_v61 }
  0x2c   : > { %567 = vst.msk [vmem:[%s932_s5 + $0x50] sm:$0xff] %vm556_vm0, %v534_v2  ;;  %v336_v15 = vadd.f32 %v901_v8, %v300_v4  ;;  %v473_v16 = vadd.f32 %v906_v11, %v437_v5  ;;  %v703_v17 = vunpack.c.h.bf16 %v806_v52  ;;  %v767_v18 = vunpack.c.h.bf16 %v821_v61  ;;  %v810_v4 = vld [vmem:[%s891_s24 + $0x58] sm:$0xff]  }
  0x2d   : > { %v535_v20 = vmax.f32 %v503_v6, 0.0  ;;  %v504_v21 = vadd.f32 %v472_v9, %v335_v3  ;;  %v337_v22 = vadd.f32 %v901_v8, %v301_v12  ;;  %v438_v23 = vmul.f32 %v766_v13, %v904_v10  ;;  %v825_v13 = vld [vmem:[%s896_s27 + $0x58] sm:$0xff]  }
  0x2e   : > { %v505_v24 = vadd.f32 %v473_v16, %v336_v15  ;;  %v302_v25 = vmul.f32 %v703_v17, %v899_v7  ;;  %v439_v26 = vmul.f32 %v767_v18, %v904_v10  ;;  %v706_v27 = vunpack.c.l.bf16 %v807_v14 }
  0x2f   : > { %568 = vst.msk [vmem:[%s932_s5 + $0x58] sm:$0xff] %vm556_vm0, %v535_v20  ;;  %v536_v28 = vmax.f32 %v504_v21, 0.0  ;;  %v474_v29 = vadd.f32 %v906_v11, %v438_v23  ;;  %v770_v30 = vunpack.c.l.bf16 %v822_v19  ;;  %v707_v31 = vunpack.c.h.bf16 %v807_v14 }
  0x30   : > { %v537_v34 = vmax.f32 %v505_v24, 0.0  ;;  %v338_v35 = vadd.f32 %v901_v8, %v302_v25  ;;  %v475_v36 = vadd.f32 %v906_v11, %v439_v26  ;;  %v303_v37 = vmul.f32 %v706_v27, %v899_v7  ;;  %v811_v26 = vld [vmem:[%s891_s24 + $0x60] sm:$0xff]  }
  0x31   : > { %569 = vst.msk [vmem:[%s932_s5 + $0x60] sm:$0xff] %vm556_vm0, %v536_v28  ;;  %v506_v38 = vadd.f32 %v474_v29, %v337_v22  ;;  %v440_v39 = vmul.f32 %v770_v30, %v904_v10  ;;  %v304_v40 = vmul.f32 %v707_v31, %v899_v7  ;;  %v771_v41 = vunpack.c.h.bf16 %v822_v19  ;;  %v826_v31 = vld [vmem:[%s896_s27 + $0x60] sm:$0xff]  }
  0x32   : > { %570 = vst.msk [vmem:[%s932_s5 + $0x68] sm:$0xff] %vm556_vm0, %v537_v34  ;;  %v507_v42 = vadd.f32 %v475_v36, %v338_v35  ;;  %v339_v43 = vadd.f32 %v901_v8, %v303_v37  ;;  %v710_v44 = vunpack.c.l.bf16 %v808_v32  ;;  %v774_v45 = vunpack.c.l.bf16 %v823_v33 }
  0x33   : > { %v538_v47 = vmax.f32 %v506_v38, 0.0  ;;  %v476_v48 = vadd.f32 %v906_v11, %v440_v39  ;;  %v340_v49 = vadd.f32 %v901_v8, %v304_v40  ;;  %v441_v50 = vmul.f32 %v771_v41, %v904_v10  ;;  %v812_v40 = vld [vmem:[%s891_s24 + $0x68] sm:$0xff]  }
  0x34   : > { %v539_v52 = vmax.f32 %v507_v42, 0.0  ;;  %v305_v53 = vmul.f32 %v710_v44, %v899_v7  ;;  %v442_v54 = vmul.f32 %v774_v45, %v904_v10  ;;  %v711_v55 = vunpack.c.h.bf16 %v808_v32 }
  0x35   : > { %571 = vst.msk [vmem:[%s932_s5 + $0x70] sm:$0xff] %vm556_vm0, %v538_v47  ;;  %v508_v56 = vadd.f32 %v476_v48, %v339_v43  ;;  %v477_v57 = vadd.f32 %v906_v11, %v441_v50  ;;  %v775_v58 = vunpack.c.h.bf16 %v823_v33  ;;  %v714_v59 = vunpack.c.l.bf16 %v809_v46 }
  0x36   : > { %572 = vst.msk [vmem:[%s932_s5 + $0x78] sm:$0xff] %vm556_vm0, %v539_v52  ;;  %v341_v60 = vadd.f32 %v901_v8, %v305_v53  ;;  %v478_v61 = vadd.f32 %v906_v11, %v442_v54  ;;  %v306_v62 = vmul.f32 %v711_v55, %v899_v7  ;;  %v778_v63 = vunpack.c.l.bf16 %v824_v51 }
  0x37   : > { %v540_v0 = vmax.f32 %v508_v56, 0.0  ;;  %v509_v1 = vadd.f32 %v477_v57, %v340_v49  ;;  %v443_v2 = vmul.f32 %v775_v58, %v904_v10  ;;  %v307_v3 = vmul.f32 %v714_v59, %v899_v7  ;;  %v827_v49 = vld [vmem:[%s896_s27 + $0x68] sm:$0xff]  }
  0x38   : > { %v510_v5 = vadd.f32 %v478_v61, %v341_v60  ;;  %v342_v6 = vadd.f32 %v901_v8, %v306_v62  ;;  %v444_v9 = vmul.f32 %v778_v63, %v904_v10  ;;  %v715_v12 = vunpack.c.h.bf16 %v809_v46  ;;  %v813_v62 = vld [vmem:[%s891_s24 + $0x70] sm:$0xff]  }
  0x39   : > { %573 = vst.msk [vmem:[%s932_s5 + $0x80] sm:$0xff] %vm556_vm0, %v540_v0  ;;  %v541_v14 = vmax.f32 %v509_v1, 0.0  ;;  %v479_v15 = vadd.f32 %v906_v11, %v443_v2  ;;  %v343_v16 = vadd.f32 %v901_v8, %v307_v3  ;;  %v779_v17 = vunpack.c.h.bf16 %v824_v51  ;;  %v828_v63 = vld [vmem:[%s896_s27 + $0x70] sm:$0xff]  }
  0x3a   : > { %v542_v18 = vmax.f32 %v510_v5, 0.0  ;;  %v480_v19 = vadd.f32 %v906_v11, %v444_v9  ;;  %v308_v20 = vmul.f32 %v715_v12, %v899_v7  ;;  %v718_v21 = vunpack.c.l.bf16 %v810_v4 }
  0x3b   : > { %574 = vst.msk [vmem:[%s932_s5 + $0x88] sm:$0xff] %vm556_vm0, %v541_v14  ;;  %v511_v22 = vadd.f32 %v479_v15, %v342_v6  ;;  %v445_v23 = vmul.f32 %v779_v17, %v904_v10  ;;  %v782_v24 = vunpack.c.l.bf16 %v825_v13  ;;  %v719_v25 = vunpack.c.h.bf16 %v810_v4 }
  0x3c   : > { %575 = vst.msk [vmem:[%s932_s5 + $0x90] sm:$0xff] %vm556_vm0, %v542_v18  ;;  %v512_v27 = vadd.f32 %v480_v19, %v343_v16  ;;  %v344_v28 = vadd.f32 %v901_v8, %v308_v20  ;;  %v309_v29 = vmul.f32 %v718_v21, %v899_v7  ;;  %v783_v30 = vunpack.c.h.bf16 %v825_v13  ;;  %v814_v20 = vld [vmem:[%s891_s24 + $0x78] sm:$0xff]  }
  0x3d   : > { %v543_v32 = vmax.f32 %v511_v22, 0.0  ;;  %v481_v33 = vadd.f32 %v906_v11, %v445_v23  ;;  %v446_v34 = vmul.f32 %v782_v24, %v904_v10  ;;  %v310_v35 = vmul.f32 %v719_v25, %v899_v7  ;;  %v829_v21 = vld [vmem:[%s896_s27 + $0x78] sm:$0xff]  }
  0x3e   : > { %v544_v36 = vmax.f32 %v512_v27, 0.0  ;;  %v345_v37 = vadd.f32 %v901_v8, %v309_v29  ;;  %v447_v38 = vmul.f32 %v783_v30, %v904_v10  ;;  %v722_v39 = vunpack.c.l.bf16 %v811_v26 }
  0x3f   : > { %576 = vst.msk [vmem:[%s932_s5 + $0x98] sm:$0xff] %vm556_vm0, %v543_v32  ;;  %v513_v41 = vadd.f32 %v481_v33, %v344_v28  ;;  %v482_v42 = vadd.f32 %v906_v11, %v446_v34  ;;  %v346_v43 = vadd.f32 %v901_v8, %v310_v35  ;;  %v786_v44 = vunpack.c.l.bf16 %v826_v31 }
  0x40   : > { %577 = vst.msk [vmem:[%s932_s5 + $0xa0] sm:$0xff] %vm556_vm0, %v544_v36  ;;  %v483_v45 = vadd.f32 %v906_v11, %v447_v38  ;;  %v311_v46 = vmul.f32 %v722_v39, %v899_v7  ;;  %v723_v47 = vunpack.c.h.bf16 %v811_v26  ;;  %v787_v48 = vunpack.c.h.bf16 %v826_v31 }
  0x41   : > { %v545_v50 = vmax.f32 %v513_v41, 0.0  ;;  %v514_v51 = vadd.f32 %v482_v42, %v345_v37  ;;  %v448_v52 = vmul.f32 %v786_v44, %v904_v10  ;;  %v726_v53 = vunpack.c.l.bf16 %v812_v40 }
  0x42   : > { %v515_v54 = vadd.f32 %v483_v45, %v346_v43  ;;  %v347_v55 = vadd.f32 %v901_v8, %v311_v46  ;;  %v312_v56 = vmul.f32 %v723_v47, %v899_v7  ;;  %v449_v57 = vmul.f32 %v787_v48, %v904_v10 }
  0x43   : > { %578 = vst.msk [vmem:[%s932_s5 + $0xa8] sm:$0xff] %vm556_vm0, %v545_v50  ;;  %v546_v58 = vmax.f32 %v514_v51, 0.0  ;;  %v484_v59 = vadd.f32 %v906_v11, %v448_v52  ;;  %v313_v60 = vmul.f32 %v726_v53, %v899_v7  ;;  %v790_v61 = vunpack.c.l.bf16 %v827_v49 }
  0x44   : > { %v547_v0 = vmax.f32 %v515_v54, 0.0  ;;  %v348_v1 = vadd.f32 %v901_v8, %v312_v56  ;;  %v485_v2 = vadd.f32 %v906_v11, %v449_v57  ;;  %v727_v3 = vunpack.c.h.bf16 %v812_v40 }
  0x45   : > { %579 = vst.msk [vmem:[%s932_s5 + $0xb0] sm:$0xff] %vm556_vm0, %v546_v58  ;;  %v516_v4 = vadd.f32 %v484_v59, %v347_v55  ;;  %v349_v5 = vadd.f32 %v901_v8, %v313_v60  ;;  %v450_v6 = vmul.f32 %v790_v61, %v904_v10  ;;  %v791_v9 = vunpack.c.h.bf16 %v827_v49 }
  0x46   : > { %580 = vst.msk [vmem:[%s932_s5 + $0xb8] sm:$0xff] %vm556_vm0, %v547_v0  ;;  %v517_v12 = vadd.f32 %v485_v2, %v348_v1  ;;  %v314_v13 = vmul.f32 %v727_v3, %v899_v7  ;;  %v730_v14 = vunpack.c.l.bf16 %v813_v62  ;;  %v794_v15 = vunpack.c.l.bf16 %v828_v63 }
  0x47   : > { %v548_v16 = vmax.f32 %v516_v4, 0.0  ;;  %v486_v17 = vadd.f32 %v906_v11, %v450_v6  ;;  %v451_v18 = vmul.f32 %v791_v9, %v904_v10  ;;  %v731_v19 = vunpack.c.h.bf16 %v813_v62 }
  0x48   : > { %v549_v22 = vmax.f32 %v517_v12, 0.0  ;;  %v350_v23 = vadd.f32 %v901_v8, %v314_v13  ;;  %v315_v24 = vmul.f32 %v730_v14, %v899_v7  ;;  %v452_v25 = vmul.f32 %v794_v15, %v904_v10 }
  0x49   : > { %581 = vst.msk [vmem:[%s932_s5 + $0xc0] sm:$0xff] %vm556_vm0, %v548_v16  ;;  %v518_v26 = vadd.f32 %v486_v17, %v349_v5  ;;  %v487_v27 = vadd.f32 %v906_v11, %v451_v18  ;;  %v316_v28 = vmul.f32 %v731_v19, %v899_v7  ;;  %v795_v29 = vunpack.c.h.bf16 %v828_v63 }
  0x4a   : > { %582 = vst.msk [vmem:[%s932_s5 + $0xc8] sm:$0xff] %vm556_vm0, %v549_v22  ;;  %v351_v30 = vadd.f32 %v901_v8, %v315_v24  ;;  %v488_v31 = vadd.f32 %v906_v11, %v452_v25  ;;  %v734_v32 = vunpack.c.l.bf16 %v814_v20  ;;  %v798_v33 = vunpack.c.l.bf16 %v829_v21 }
  0x4b   : > { %v550_v34 = vmax.f32 %v518_v26, 0.0  ;;  %v519_v35 = vadd.f32 %v487_v27, %v350_v23  ;;  %v352_v36 = vadd.f32 %v901_v8, %v316_v28  ;;  %v453_v37 = vmul.f32 %v795_v29, %v904_v10 }
  0x4c   : > { %v520_v38 = vadd.f32 %v488_v31, %v351_v30  ;;  %v317_v39 = vmul.f32 %v734_v32, %v899_v7  ;;  %v454_v40 = vmul.f32 %v798_v33, %v904_v10  ;;  %v735_v41 = vunpack.c.h.bf16 %v814_v20 }
  0x4d   : > { %583 = vst.msk [vmem:[%s932_s5 + $0xd0] sm:$0xff] %vm556_vm0, %v550_v34  ;;  %v551_v42 = vmax.f32 %v519_v35, 0.0  ;;  %v489_v43 = vadd.f32 %v906_v11, %v453_v37  ;;  %v799_v44 = vunpack.c.h.bf16 %v829_v21 }
  0x4e   : > { %v552_v45 = vmax.f32 %v520_v38, 0.0  ;;  %v353_v46 = vadd.f32 %v901_v8, %v317_v39  ;;  %v490_v47 = vadd.f32 %v906_v11, %v454_v40  ;;  %v318_v48 = vmul.f32 %v735_v41, %v899_v7 }
  0x4f   : > { %584 = vst.msk [vmem:[%s932_s5 + $0xd8] sm:$0xff] %vm556_vm0, %v551_v42  ;;  %v521_v49 = vadd.f32 %v489_v43, %v352_v36  ;;  %v455_v50 = vmul.f32 %v799_v44, %v904_v10 }
  0x50   : > { %585 = vst.msk [vmem:[%s932_s5 + $0xe0] sm:$0xff] %vm556_vm0, %v552_v45  ;;  %v522_v51 = vadd.f32 %v490_v47, %v353_v46  ;;  %v354_v52 = vadd.f32 %v901_v8, %v318_v48 }
  0x51   : > { %v553_v53 = vmax.f32 %v521_v49, 0.0  ;;  %v491_v54 = vadd.f32 %v906_v11, %v455_v50 }
  0x52   : > { %v554_v55 = vmax.f32 %v522_v51, 0.0 }
  0x53   : > { %586 = vst.msk [vmem:[%s932_s5 + $0xe8] sm:$0xff] %vm556_vm0, %v553_v53  ;;  %v523_v56 = vadd.f32 %v491_v54, %v354_v52 }
  0x54   : > { %587 = vst.msk [vmem:[%s932_s5 + $0xf0] sm:$0xff] %vm556_vm0, %v554_v55 }
  0x55   : > { %v555_v7 = vmax.f32 %v523_v56, 0.0 }
  0x57   : > { %588 = vst.msk [vmem:[%s932_s5 + $0xf8] sm:$0xff] %vm556_vm0, %v555_v7 }
  0x58 PF: > { %s14_s15 = sadd.s32 1, %s844_s15  }
  0x59   : > { %p11_p4 = scmp.ge.s32.totalorder %s14_s15, 4  }
  0x5b   :  { %13 = sbr.rel (!%p11_p4) target bundleno = 1 (0x1), region = 69 }

// kernel: basic_block_forward.4
= control target key start
LH: loop header
LB: loop body
LE: loop exit
PB: predicated region body
PF: predicated region fallthrough
CT: control target
= control target key end

     0   :  { %s8139_s12 = smov 0   ;;  %s9850_s0 = inlined_call_operand.vmem [shape: bf16[2,16,16,4], index: 0, kind: input, shape index: {}]   ;;  %s9851_s1 = inlined_call_operand.vmem [shape: bf16[3,3,4,8], index: 1, kind: input, shape index: {}]   ;;  %s9852_s2 = inlined_call_operand.vmem [shape: bf16[2,16,16,8], index: 2, kind: output, shape index: {0}]   ;;  %s9853_s3 = inlined_call_operand.vmem [shape: f32[2,2,8], index: 3, kind: output, shape index: {1}]  }
   0x1 LB: > { %s6871_s13 = sadd.s32 4294967295, %s8115_s12   ;;  %p6875_p0 = scmp.ge.s32.totalorder %s8115_s12, 1  ;;  %s8115_s12 = sphi %s8139_s12, %s14_s12  }
   0x2   : > { %p140_p1 = scmp.lt.s32.totalorder %s8115_s12, 3 }
   0x4   : > { %p141_p2 = pnand %p6875_p0, %p140_p1 }
   0x6   : > { %144 = sbr.rel (%p141_p2) target bundleno = 789 (0x315), region = 28 }
   0xd   : > { %v6881_v0 = vld [vmem:[%s9851_s1 + $0x2] sm:$0x3]  ;;  %vm9854_vm0 = vcmask 1041408   ;;  %v6994_v1 = vld [vmem:[%s9851_s1 + $0x8] sm:$0x3]  ;;  %p168_p3 = scmp.lt.s32.totalorder %s6871_s13, 1 }
   0xe   : > { %8001 = vmatprep.subr.msk.bf16.mxu1 %vm9854_vm0, %v6881_v0  ;;  %8005 = vmatprep.subr.msk.bf16.mxu0 %vm9854_vm0, %v6994_v1  ;;  %v1076_v2 = vsel %vm9854_vm0, %v6881_v0, 0  ;;  %v8157_v3 = vsel %vm9854_vm0, %v6994_v1, 0  ;;  %vm9855_vm1 = vcmask 27648   ;;  %v8162_v4 = vld [vmem:[%s9851_s1 + $0xa] sm:$0x3]  ;;  %v8117_v5 = vmov 0  }
   0xf   : > { %7370 = vmatpush3.bf16.msra.mxu1 %v1076_v2  ;;  %7522 = vmatpush3.bf16.msra.mxu0 %v8157_v3  ;;  %s10119_s13 = smov (!%p168_p3, %s6871_s13), 1  ;;  %216 = vst.msk [vmem:[#allocation2] sm:$0xf] %vm9855_vm1, %v8117_v5  ;;  %217 = vst.msk [vmem:[#allocation2 + $0x4] sm:$0xf] %vm9855_vm1, %v8117_v5  ;;  %vm256_vm2 = vcmask 25600  }
  0x10   : > { %218 = vst.msk [vmem:[#allocation2 + $0x8] sm:$0xf] %vm9855_vm1, %v8117_v5  ;;  %219 = vst.msk [vmem:[#allocation2 + $0xc] sm:$0xf] %vm9855_vm1, %v8117_v5  ;;  %vm258_vm3 = vsmask.f32 1280  ;;  %8007 = vmatprep.subr.msk.bf16.mxu0 %vm9854_vm0, %v8162_v4 }
  0x11   : > { %220 = vst.msk [vmem:[#allocation2 + $0x10] sm:$0xf] %vm9855_vm1, %v8117_v5  ;;  %221 = vst.msk [vmem:[#allocation2 + $0x14] sm:$0xf] %vm9855_vm1, %v8117_v5  ;;  %vm259_vm4 = vsmask.f32 5392 }
  0x12   : > { %222 = vst.msk [vmem:[#allocation2 + $0x18] sm:$0xf] %vm9855_vm1, %v8117_v5  ;;  %223 = vst.msk [vmem:[#allocation2 + $0x1c] sm:$0xf] %vm9855_vm1, %v8117_v5  ;;  %s7164_s20 = sshll.u32 %s10119_s13, 7  ;;  %vm283_vm5 = vcmask 27649  }
  0x13   : > { %224 = vst.msk [vmem:[#allocation2 + $0x20] sm:$0xf] %vm9855_vm1, %v8117_v5  ;;  %225 = vst.msk [vmem:[#allocation2 + $0x24] sm:$0xf] %vm9855_vm1, %v8117_v5  ;;  %vm284_vm6 = vsmask.f32 7942  ;;  %s8216_s23 = scalar_lea.vmem %s9850_s0, %s7164_s20  ;;  %s9229_s15 = scalar_lea.vmem %s9852_s2, %s7164_s20 }
  0x14   : > { %226 = vst.msk [vmem:[#allocation2 + $0x28] sm:$0xf] %vm9855_vm1, %v8117_v5  ;;  %227 = vst.msk [vmem:[#allocation2 + $0x2c] sm:$0xf] %vm9855_vm1, %v8117_v5  ;;  %vm295_vm7 = vsmask.f32 2304 }
  0x15   : > { %228 = vst.msk [vmem:[#allocation2 + $0x30] sm:$0xf] %vm9855_vm1, %v8117_v5  ;;  %229 = vst.msk [vmem:[#allocation2 + $0x34] sm:$0xf] %vm9855_vm1, %v8117_v5  ;;  %vm296_vm8 = vsmask.f32 6416 }
  0x16   : > { %230 = vst.msk [vmem:[#allocation2 + $0x38] sm:$0xf] %vm9855_vm1, %v8117_v5  ;;  %231 = vst.msk [vmem:[#allocation2 + $0x3c] sm:$0xf] %vm9855_vm1, %v8117_v5  ;;  %vm320_vm9 = vcmask 27650   ;;  %vm327_vm11 = vcmask 26624  }
  0x17   : > { %232 = vst.msk [vmem:[#allocation2 + $0x40] sm:$0xf] %vm9855_vm1, %v8117_v5  ;;  %233 = vst.msk [vmem:[#allocation2 + $0x44] sm:$0xf] %vm9855_vm1, %v8117_v5  ;;  %vm321_vm10 = vsmask.f32 7946 }
  0x18   : > { %234 = vst.msk [vmem:[#allocation2 + $0x48] sm:$0xf] %vm9855_vm1, %v8117_v5  ;;  %235 = vst.msk [vmem:[#allocation2 + $0x4c] sm:$0xf] %vm9855_vm1, %v8117_v5  ;;  %v183_v6 = vld [vmem:[%s8216_s23] sm:$0xf] }
  0x19   : > { %236 = vst.msk [vmem:[#allocation2 + $0x50] sm:$0xf] %vm9855_vm1, %v8117_v5  ;;  %237 = vst.msk [vmem:[#allocation2 + $0x54] sm:$0xf] %vm9855_vm1, %v8117_v5  ;;  %v184_v7 = vld [vmem:[%s8216_s23 + $0x4] sm:$0xf] }
  0x1a   : > { %238 = vst.msk [vmem:[#allocation2 + $0x58] sm:$0xf] %vm9855_vm1, %v8117_v5  ;;  %239 = vst.msk [vmem:[#allocation2 + $0x5c] sm:$0xf] %vm9855_vm1, %v8117_v5  ;;  %v185_v8 = vld [vmem:[%s8216_s23 + $0x8] sm:$0xf] }
  0x1b   : > { %240 = vst.msk [vmem:[#allocation2 + $0x60] sm:$0xf] %vm9855_vm1, %v8117_v5  ;;  %241 = vst.msk [vmem:[#allocation2 + $0x64] sm:$0xf] %vm9855_vm1, %v8117_v5  ;;  %v262_v9 = vshrl.u32 %v183_v6, 16  ;;  %v265_v10 = vshll.u32 %v183_v6, 16 }
  0x1c   : > { %242 = vst.msk [vmem:[#allocation2 + $0x68] sm:$0xf] %vm9855_vm1, %v8117_v5  ;;  %243 = vst.msk [vmem:[#allocation2 + $0x6c] sm:$0xf] %vm9855_vm1, %v8117_v5  ;;  %v271_v11 = vshrl.u32 %v184_v7, 16  ;;  %v274_v12 = vshll.u32 %v184_v7, 16 }
  0x1d   : > { %244 = vst.msk [vmem:[#allocation2 + $0x70] sm:$0xf] %vm9855_vm1, %v8117_v5  ;;  %245 = vst.msk [vmem:[#allocation2 + $0x74] sm:$0xf] %vm9855_vm1, %v8117_v5  ;;  %v186_v13 = vld [vmem:[%s8216_s23 + $0xc] sm:$0xf] }
  0x1e   : > { %246 = vst.msk [vmem:[#allocation2 + $0x78] sm:$0xf] %vm9855_vm1, %v8117_v5  ;;  %247 = vst.msk [vmem:[#allocation2 + $0x7c] sm:$0xf] %vm9855_vm1, %v8117_v5  ;;  %v299_v14 = vshrl.u32 %v185_v8, 16  ;;  %v302_v15 = vshll.u32 %v185_v8, 16 }
  0x1f   : > { %248 = vst.msk [vmem:[#allocation2 + $0x80] sm:$0xf] %vm9855_vm1, %v8117_v5  ;;  %249 = vst.msk [vmem:[#allocation2 + $0x84] sm:$0xf] %vm9855_vm1, %v8117_v5  ;;  %v308_v16 = vshrl.u32 %v186_v13, 16  ;;  %v311_v17 = vshll.u32 %v186_v13, 16 }
  0x20   : > { %250 = vst.msk [vmem:[#allocation2 + $0x88] sm:$0xf] %vm9855_vm1, %v8117_v5  ;;  %251 = vst.msk [vmem:[#allocation2 + $0x8c] sm:$0xf] %vm9855_vm1, %v8117_v5  ;;  %v264_v18 = vrot.slane %v262_v9, 6  ;;  %v267_v19 = vrot.slane %v265_v10, 7 }
  0x21   : > { %252 = vst.msk [vmem:[#allocation2 + $0x90] sm:$0xf] %vm9855_vm1, %v8117_v5  ;;  %253 = vst.msk [vmem:[#allocation2 + $0x94] sm:$0xf] %vm9855_vm1, %v8117_v5  ;;  %v273_v20 = vrot.slane %v271_v11, 6  ;;  %v276_v21 = vrot.slane %v274_v12, 7 }
  0x22   : > { %254 = vst.msk [vmem:[#allocation2 + $0x98] sm:$0xf] %vm9855_vm1, %v8117_v5  ;;  %255 = vst.msk [vmem:[#allocation2 + $0x9c] sm:$0xf] %vm9855_vm1, %v8117_v5  ;;  %v187_v23 = vld [vmem:[%s8216_s23 + $0x10] sm:$0xf]  ;;  %v268_v28 = vor.u32 %v267_v19, %v264_v18 }
  0x23   : > { %257 = vst.msk [vmem:[#allocation2 + $0xa0] sm:$0x3] %vm256_vm2, %v8117_v5  ;;  %vm8224_vm12 = vmand %vm283_vm5, %vm284_vm6  ;;  %v286_v24 = vld [vmem:[#allocation2 + $0x8] sm:$0xe]  ;;  %v745_v25 = vld [vmem:[#allocation2] sm:$0xf]  ;;  %v277_v29 = vor.u32 %v276_v21, %v273_v20 }
  0x24   : > { %v746_v26 = vld [vmem:[#allocation2 + $0x4] sm:$0xf]  ;;  %vm8231_vm13 = vmor %vm258_vm3, %vm259_vm4  ;;  %v301_v31 = vrot.slane %v299_v14, 5  ;;  %v292_v33 = vld [vmem:[#allocation2 + $0x10] sm:$0x3]  ;;  %v304_v34 = vrot.slane %v302_v15, 6  ;;  %v287_v40 = vsel %vm8224_vm12, %v268_v28, %v286_v24 }
  0x25   : > { %v8235_v30 = vcombine.low %v745_v25, %v746_v26  ;;  %vm8239_vm14 = vmand %vm256_vm2, %vm258_vm3  ;;  %v310_v35 = vrot.slane %v308_v16, 5  ;;  %v313_v36 = vrot.slane %v311_v17, 6  ;;  %v336_v37 = vshll.u32 %v187_v23, 16  ;;  %v323_v42 = vld [vmem:[#allocation2 + $0x10] sm:$0xc]  ;;  %s6880_s16 = sshll.u32 %s10119_s13, 1 }
  0x26   : > { %v269_v38 = vrot.slane %v268_v28, 4  ;;  %v279_v39 = vrot.slane %v277_v29, 4  ;;  %vm8247_vm15 = vmand %vm320_vm9, %vm321_vm10  ;;  %288 = vst [vmem:[#allocation2 + $0x8] sm:$0xe] %v287_v40  ;;  %v305_v45 = vor.u32 %v304_v34, %v301_v31  ;;  %v188_v47 = vld [vmem:[%s8216_s23 + $0x14] sm:$0xf]  ;;  %s181_s19 = scalar_lea.vmem %s9853_s3, %s6880_s16 }
  0x27   : > { %v879_v43 = vshll.u32 %v8235_v30, 16  ;;  %vm8254_vm2 = vmor %vm295_vm7, %vm296_vm8  ;;  %v314_v46 = vor.u32 %v313_v36, %v310_v35  ;;  %v329_v48 = vld [vmem:[#allocation2 + $0x18] sm:$0x7]  ;;  %vm357_vm3 = vcmask 27651   ;;  %v877_v50 = vshrl.u32 %v8235_v30, 16 }
  0x28   : > { %v278_v49 = vsel %vm8231_vm13, %v269_v38, %v277_v29  ;;  %v293_v51 = vsel %vm8239_vm14, %v279_v39, %v292_v33  ;;  %vm8266_vm4 = vmand %vm327_vm11, %vm295_vm7  ;;  %vm332_vm5 = vsmask.f32 3328  ;;  %v360_v53 = vld [vmem:[#allocation2 + $0x18] sm:$0x8]  ;;  %v306_v54 = vrot.slane %v305_v45, 4 }
  0x29   : > { %289 = vst.msk [vmem:[#allocation2 + $0xc] sm:$0xf] %vm9855_vm1, %v278_v49  ;;  %294 = vst [vmem:[#allocation2 + $0x10] sm:$0x3] %v293_v51  ;;  %v324_v55 = vsel %vm8247_vm15, %v305_v45, %v323_v42  ;;  %v316_v56 = vrot.slane %v314_v46, 4  ;;  %v338_v57 = vrot.slane %v336_v37, 5 }
  0x2a   : > { %v189_v58 = vld [vmem:[%s8216_s23 + $0x18] sm:$0xf]  ;;  %325 = vst [vmem:[#allocation2 + $0x10] sm:$0xc] %v324_v55  ;;  %v339_v59 = vshrl.u32 %v187_v23, 16  ;;  %v345_v60 = vshll.u32 %v188_v47, 16  ;;  %v315_v63 = vsel %vm8254_vm2, %v306_v54, %v314_v46  ;;  %vm8293_vm11 = vmand %vm9855_vm1, %vm332_vm5 }
  0x2b   : > { %v349_v61 = vshrl.u32 %v188_v47, 16  ;;  %vm358_vm6 = vsmask.f32 7950  ;;  %v881_v62 = vrot.slane %v879_v43, 1  ;;  %v330_v0 = vsel %vm8266_vm4, %v316_v56, %v329_v48  ;;  %v781_v2 = vld [vmem:[%s9851_s1] sm:$0x3] }
  0x2c   : > { %vm333_vm8 = vsmask.f32 7440  ;;  %vm8279_vm9 = vmand %vm357_vm3, %vm358_vm6  ;;  %326 = vst.msk [vmem:[#allocation2 + $0x14] sm:$0xf] %vm9855_vm1, %v315_v63  ;;  %v341_v5 = vrot.slane %v339_v59, 4  ;;  %v347_v6 = vrot.slane %v345_v60, 5  ;;  %8002 = vmatprep.subr.msk.bf16.mxu1 %vm9854_vm0, %v781_v2 }
  0x2d   : > { %331 = vst [vmem:[#allocation2 + $0x18] sm:$0x7] %v330_v0  ;;  %v351_v7 = vrot.slane %v349_v61, 4  ;;  %v361_v8 = vsel %vm8279_vm9, %v338_v57, %v360_v53  ;;  %v190_v9 = vld [vmem:[%s8216_s23 + $0x1c] sm:$0xf]  ;;  %v9876_v10 = vmov 0  ;;  %vm8299_vm6 = vmor %vm332_vm5, %vm333_vm8  ;;  %v882_v25 = vor.u32 %v881_v62, %v877_v50 }
  0x2e   : > { %362 = vst [vmem:[#allocation2 + $0x18] sm:$0x8] %v361_v8  ;;  %v9877_v10 = vsel %vm8293_vm11, 4294967295, %v9876_v10  ;;  %v373_v11 = vshrl.u32 %v189_v58, 16  ;;  %v376_v12 = vshll.u32 %v189_v58, 16  ;;  %v342_v15 = vor.u32 %v341_v5, %v338_v57 }
  0x2f   : > { %vm392_vm3 = vsmask.f32 7938  ;;  %v2220_v13 = vld [vmem:[#allocation2 + $0x8] sm:$0xe]  ;;  %v352_v16 = vor.u32 %v351_v7, %v347_v6  ;;  %v366_v17 = vld [vmem:[#allocation2 + $0x20] sm:$0xf] }
  0x30   : > { %v394_v18 = vld [vmem:[#allocation2 + $0x24] sm:$0xf]  ;;  %vm369_vm10 = vsmask.f32 256  ;;  %v375_v19 = vrot.slane %v373_v11, 7  ;;  %vm8304_vm7 = vmand %vm9855_vm1, %vm392_vm3  ;;  %v381_v21 = vshrl.u32 %v190_v9, 16 }
  0x31   : > { %vm370_vm0 = vsmask.f32 4368  ;;  %v384_v23 = vshll.u32 %v190_v9, 16  ;;  %v8022_v24 = vld [vmem:[#allocation2 + $0x8] sm:$0xff]   ;;  %v343_v28 = vrot.slane %v342_v15, 4  ;;  %v353_v31 = vrot.slane %v352_v16, 4 }
  0x32   : > { %v8308_v26 = vld [vmem:[#allocation2 + $0xc] sm:$0xf]  ;;  %v378_v33 = vor.u32 %v376_v12, %v375_v19  ;;  %v379_v34 = vrot.slane %v375_v19, 4  ;;  %v884_v35 = vshll.u32 %v8022_v24, 16  ;;  %v888_v36 = vshrl.u32 %v8022_v24, 16  ;;  %vm8323_vm8 = vmor %vm369_vm10, %vm370_vm0 }
  0x33   : > { %v6995_v29 = vcombine.low %v2220_v13, %v8308_v26  ;;  %v348_v37 = vsel %vm8299_vm6, %v343_v28, %v347_v6  ;;  %v383_v38 = vrot.slane %v381_v21, 7  ;;  %v400_v39 = vld [vmem:[#allocation2 + $0x2c] sm:$0x1]  ;;  %v8023_v40 = vld [vmem:[#allocation2 + $0x10] sm:$0xff]   ;;  %v367_v43 = vsel %vm8293_vm11, %v353_v31, %v366_v17  ;;  %v191_v46 = vld [vmem:[%s8216_s23 + $0x20] sm:$0xf] }
  0x34   : > { %363 = vst.msk [vmem:[#allocation2 + $0x1c] sm:$0xf] %vm9855_vm1, %v348_v37  ;;  %v395_v45 = vsel %vm8304_vm7, %v378_v33, %v394_v18  ;;  %v886_v47 = vrot.slane %v884_v35, 1  ;;  %v8319_v48 = vld [vmem:[#allocation2 + $0x10] sm:$0xff]   ;;  %368 = vst [vmem:[#allocation2 + $0x20] sm:$0xf] %v367_v43 }
  0x35   : > { %v2354_v42 = vshrl.u32 %v6995_v29, 16  ;;  %v2357_v49 = vshll.u32 %v6995_v29, 16  ;;  %396 = vst [vmem:[#allocation2 + $0x24] sm:$0xf] %v395_v45  ;;  %v9882_v50 = vmov 0  ;;  %v386_v51 = vor.u32 %v384_v23, %v383_v38 }
  0x36   : > { %v9883_v50 = vsel %vm8323_vm8, 4294967295, %v9882_v50  ;;  %v388_v53 = vrot.slane %v383_v38, 4  ;;  %v892_v54 = vshll.u32 %v8023_v40, 16  ;;  %vm9884_vm3 = vcmask 1041408   ;;  %v8336_v62 = vld [vmem:[%s8216_s23 + $0x24] sm:$0xf] }
  0x37   : > { %v2356_v55 = vrot.slane %v2354_v42, 1  ;;  %v1296_v56 = vsel %vm9884_vm3, %v781_v2, 0  ;;  %vm398_vm5 = vcmask 24576   ;;  %vm9885_vm1 = vsmask.f32 7424 }
  0x38   : > { %v887_v57 = vsel %vm9885_vm1, %v882_v25, %v886_v47  ;;  %v890_v58 = vor.u32 %v888_v36, %v886_v47  ;;  %v2359_v59 = vrot.slane %v2357_v49, 2  ;;  %v2362_v60 = vshrl.u32 %v8319_v48, 16  ;;  %vm8331_vm11 = vmand %vm398_vm5, %vm369_vm10  ;;  %v425_v18 = vld [vmem:[#allocation2 + $0x2c] sm:$0xe] }
  0x39   : > { %v9886_v61 = vmov 0  ;;  %vm9888_vm0 = vcmask 31744   ;;  %v894_v63 = vrot.slane %v892_v54, 1  ;;  %v2365_v0 = vshll.u32 %v8319_v48, 16  ;;  %v8629_v1 = vld [vmem:[%s9851_s1 + $0xe] sm:$0x3] }
  0x3a   : > { %v9887_v61 = vsel %vm8331_vm11, 4294967295, %v9886_v61  ;;  %7371 = vmatprep.mubr.msk.bf16.mxu1 %vm9888_vm0, %v887_v57  ;;  %v387_v2 = vsel %vm8323_vm8, %v379_v34, %v386_v51  ;;  %v401_v5 = vsel %vm8331_vm11, %v388_v53, %v400_v39  ;;  %v2364_v6 = vrot.slane %v2362_v60, 1  ;;  %vm9891_vm5 = vmmov %vm9888_vm0  ;;  %v193_v53 = vld [vmem:[%s8216_s23 + $0x28] sm:$0xf] }
  0x3b   : > { %v896_v7 = vshrl.u32 %v8023_v40, 16  ;;  %vm9889_vm1 = vcmask 27648   ;;  %402 = vst [vmem:[#allocation2 + $0x2c] sm:$0x1] %v401_v5  ;;  %v404_v8 = vshrl.u32 %v191_v46, 16  ;;  %v407_v9 = vshll.u32 %v191_v46, 16 }
  0x3c   : > { %397 = vst.msk [vmem:[#allocation2 + $0x28] sm:$0xf] %vm9889_vm1, %v387_v2  ;;  %vm9890_vm10 = vsmask.f32 7424  ;;  %v2360_v12 = vor.u32 %v2359_v59, %v2356_v55  ;;  %v2367_v13 = vrot.slane %v2365_v0, 2  ;;  %v413_v15 = vshrl.u32 %v8336_v62, 16 }
  0x3d   : > { %v895_v11 = vsel %vm9890_vm10, %v890_v58, %v894_v63  ;;  %v8348_v16 = vld [vmem:[#allocation2 + $0x18] sm:$0xff]   ;;  %v406_v17 = vrot.slane %v404_v8, 6  ;;  %v409_v23 = vrot.slane %v407_v9, 7  ;;  %v898_v28 = vor.u32 %v896_v7, %v894_v63  ;;  %v8352_v29 = vld [vmem:[#allocation2 + $0x20] sm:$0xff]   ;;  %v194_v58 = vld [vmem:[%s8216_s23 + $0x2c] sm:$0xf] }
  0x3e   : > { %7372 = vmatmul.mubr.msk.bf16.vlgmr.msra.gmra.mrb[0].mxu1 %vm9891_vm5, %v895_v11  ;;  %v2368_v19 = vor.u32 %v2367_v13, %v2364_v6  ;;  %v8027_v21 = vld [vmem:[#allocation2 + $0x18] sm:$0xff]   ;;  %v2371_v24 = vshrl.u32 %v8348_v16, 16  ;;  %v2374_v25 = vshll.u32 %v8348_v16, 16  ;;  %v8354_v31 = vld [vmem:[#allocation2 + $0x20] sm:$0xff]   ;;  %vm9892_vm3 = vsmask.f32 6400 }
  0x3f   : > { %7408 = vmatpush3.bf16.msra.mxu1 %v1296_v56  ;;  %v900_v34 = vshll.u32 %v8027_v21, 16  ;;  %v904_v35 = vshrl.u32 %v8027_v21, 16  ;;  %v410_v36 = vor.u32 %v409_v23, %v406_v17  ;;  %v908_v39 = vshll.u32 %v8352_v29, 16  ;;  %v195_v59 = vld [vmem:[%s8216_s23 + $0x30] sm:$0xf]  ;;  %vm9894_vm5 = vmmov %vm9892_vm3 }
  0x40   : > { %v2369_v33 = vsel %vm9892_vm3, %v2360_v12, %v2368_v19  ;;  %v2373_v37 = vrot.slane %v2371_v24, 1  ;;  %v2376_v38 = vrot.slane %v2374_v25, 2  ;;  %v2380_v40 = vshrl.u32 %v8354_v31, 16  ;;  %vm9895_vm3 = vmmov %vm9888_vm0  ;;  %v454_v23 = vld [vmem:[#allocation2 + $0x34] sm:$0xc] }
  0x41   : > { %7523 = vmatprep.mubr.msk.bf16.mxu0 %vm9888_vm0, %v2369_v33  ;;  %v902_v42 = vrot.slane %v900_v34, 1  ;;  %v2383_v43 = vshll.u32 %v8354_v31, 16  ;;  %v426_v45 = vsel %vm8224_vm12, %v410_v36, %v425_v18  ;;  %vm9893_vm1 = vcmask 1041408  }
  0x42   : > { %v2377_v46 = vor.u32 %v2376_v38, %v2373_v37  ;;  %v2888_v47 = vsel %vm9893_vm1, %v8162_v4, 0  ;;  %v910_v49 = vrot.slane %v908_v39, 1  ;;  %v2382_v51 = vrot.slane %v2380_v40, 1  ;;  %427 = vst [vmem:[#allocation2 + $0x2c] sm:$0xe] %v426_v45  ;;  %vm9896_vm1 = vmmov %vm9890_vm10 }
  0x43   : > { %v903_v54 = vsel %vm9890_vm10, %v898_v28, %v902_v42  ;;  %v906_v55 = vor.u32 %v904_v35, %v902_v42  ;;  %v2385_v56 = vrot.slane %v2383_v43, 2  ;;  %v912_v57 = vshrl.u32 %v8352_v29, 16  ;;  %vm9897_vm10 = vmmov %vm9888_vm0  ;;  %v458_v39 = vld [vmem:[#allocation2 + $0x3c] sm:$0x7] }
  0x44   : > { %v2378_v60 = vsel %vm9894_vm5, %v2368_v19, %v2377_v46  ;;  %7375 = vmatprep.mubr.msk.bf16.mxu1 %vm9895_vm3, %v903_v54  ;;  %v411_v63 = vrot.slane %v410_v36, 4  ;;  %v415_v0 = vrot.slane %v413_v15, 6  ;;  %v416_v4 = vshll.u32 %v8336_v62, 16  ;;  %v429_v15 = vld [vmem:[#allocation2 + $0x34] sm:$0x3]  ;;  %vm9898_vm3 = vmmov %vm9888_vm0 }
  0x45   : > { %7524 = vmatmul.mubr.msk.bf16.vlgmr.msra.gmra.mrb[0].mxu0 %vm9888_vm0, %v2378_v60  ;;  %v911_v2 = vsel %vm9896_vm1, %v906_v55, %v910_v49  ;;  %v8375_v5 = vor.u32 %v2385_v56, %v2382_v51  ;;  %v433_v6 = vshrl.u32 %v193_v53, 16  ;;  %v436_v7 = vshll.u32 %v193_v53, 16  ;;  %v483_v19 = vld [vmem:[#allocation2 + $0x3c] sm:$0x8]  ;;  %v197_v56 = vld [vmem:[%s8216_s23 + $0x38] sm:$0xf] }
  0x46   : > { %7560 = vmatpush3.bf16.msra.mxu0 %v2888_v47  ;;  %7376 = vmatmul.mubr.msk.bf16.gmra.mrb[4].mxu1 %vm9897_vm10, %v911_v2  ;;  %v418_v8 = vrot.slane %v416_v4, 7  ;;  %v442_v9 = vshrl.u32 %v194_v58, 16  ;;  %v445_v11 = vshll.u32 %v194_v58, 16  ;;  %v462_v12 = vshll.u32 %v195_v59, 16  ;;  %v196_v47 = vld [vmem:[%s8216_s23 + $0x34] sm:$0xf] }
  0x47   : > { %v2387_v13 = vsel %vm9894_vm5, %v2377_v46, %v8375_v5  ;;  %v435_v62 = vrot.slane %v433_v6, 5  ;;  %v438_v17 = vrot.slane %v436_v7, 6  ;;  %v465_v18 = vshrl.u32 %v195_v59, 16  ;;  %v8406_v6 = vld [vmem:[%s8216_s23 + $0x40] sm:$0xf] }
  0x48   : > { %7527 = vmatprep.mubr.msk.bf16.mxu0 %vm9898_vm3, %v2387_v13  ;;  %v419_v21 = vor.u32 %v418_v8, %v415_v0  ;;  %v444_v24 = vrot.slane %v442_v9, 5  ;;  %v447_v25 = vrot.slane %v445_v11, 6  ;;  %v464_v28 = vrot.slane %v462_v12, 5  ;;  %v198_v0 = vld [vmem:[%s8216_s23 + $0x3c] sm:$0xf] }
  0x49   : > { %v8381_v29 = vld [vmem:[#allocation2 + $0x28] sm:$0xff]   ;;  %v439_v33 = vor.u32 %v438_v17, %v435_v62  ;;  %v467_v34 = vrot.slane %v465_v18, 4  ;;  %vm9899_vm0 = vcmask 27648   ;;  %v914_v51 = vor.u32 %v912_v57, %v910_v49  ;;  %v8411_v12 = vld [vmem:[%s8216_s23 + $0x44] sm:$0xf] }
  0x4a   : > { %v8383_v35 = vld [vmem:[#allocation2 + $0x28] sm:$0xff]   ;;  %v420_v36 = vsel %vm8231_vm13, %v411_v63, %v419_v21  ;;  %v421_v37 = vrot.slane %v419_v21, 4  ;;  %v448_v38 = vor.u32 %v447_v25, %v444_v24  ;;  %v484_v40 = vsel %vm8279_vm9, %v464_v28, %v483_v19  ;;  %vm9900_vm1 = vmmov %vm9899_vm0  ;;  %v487_v21 = vld [vmem:[#allocation2 + $0x44] sm:$0xf] }
  0x4b   : > { %v2389_v42 = vshrl.u32 %v8381_v29, 16  ;;  %v2392_v43 = vshll.u32 %v8381_v29, 16  ;;  %428 = vst.msk [vmem:[#allocation2 + $0x30] sm:$0xf] %vm9899_vm0, %v420_v36  ;;  %v455_v45 = vsel %vm8247_vm15, %v439_v33, %v454_v23  ;;  %v440_v46 = vrot.slane %v439_v33, 4 }
  0x4c   : > { %485 = vst [vmem:[#allocation2 + $0x3c] sm:$0x8] %v484_v40  ;;  %v916_v53 = vshll.u32 %v8383_v35, 16  ;;  %v430_v54 = vsel %vm8239_vm14, %v421_v37, %v429_v15  ;;  %456 = vst [vmem:[#allocation2 + $0x34] sm:$0xc] %v455_v45  ;;  %v450_v55 = vrot.slane %v448_v38, 4  ;;  %v468_v63 = vor.u32 %v467_v34, %v464_v28 }
  0x4d   : > { %v2391_v58 = vrot.slane %v2389_v42, 1  ;;  %v2394_v59 = vrot.slane %v2392_v43, 2  ;;  %431 = vst [vmem:[#allocation2 + $0x34] sm:$0x3] %v430_v54  ;;  %v449_v60 = vsel %vm8254_vm2, %v440_v46, %v448_v38  ;;  %v471_v57 = vshll.u32 %v196_v47, 16 }
  0x4e   : > { %v918_v4 = vrot.slane %v916_v53, 1  ;;  %457 = vst.msk [vmem:[#allocation2 + $0x38] sm:$0xf] %vm9900_vm1, %v449_v60  ;;  %v459_v49 = vsel %vm8266_vm4, %v450_v55, %v458_v39  ;;  %v475_v2 = vshrl.u32 %v196_v47, 16  ;;  %v469_v8 = vrot.slane %v468_v63, 4  ;;  %vm9903_vm1 = vmmov %vm9898_vm3 }
  0x4f   : > { %v8408_v7 = vor.u32 %v2394_v59, %v2391_v58  ;;  %460 = vst [vmem:[#allocation2 + $0x3c] sm:$0x7] %v459_v49  ;;  %v491_v9 = vshrl.u32 %v197_v56, 16  ;;  %v494_v11 = vshll.u32 %v197_v56, 16  ;;  %vm9901_vm10 = vsmask.f32 7424 }
  0x50   : > { %v919_v13 = vsel %vm9901_vm10, %v914_v51, %v918_v4  ;;  %v920_v15 = vshrl.u32 %v8383_v35, 16  ;;  %v473_v62 = vrot.slane %v471_v57, 5  ;;  %v477_v17 = vrot.slane %v475_v2, 4  ;;  %v8418_v18 = vld [vmem:[%s9851_s1 + $0xc] sm:$0x3] }
  0x51   : > { %v2396_v19 = vsel %vm9894_vm5, %v8375_v5, %v8408_v7  ;;  %7379 = vmatprep.mubr.msk.bf16.mxu1 %vm9898_vm3, %v919_v13  ;;  %v493_v23 = vrot.slane %v491_v9, 7  ;;  %v499_v24 = vshrl.u32 %v198_v0, 16  ;;  %v502_v25 = vshll.u32 %v198_v0, 16  ;;  %v510_v28 = vld [vmem:[#allocation2 + $0x48] sm:$0xf] }
  0x52   : > { %vm9902_vm0 = vcmask 1041408   ;;  %7528 = vmatmul.mubr.msk.bf16.gmra.mrb[4].mxu0 %vm9903_vm1, %v2396_v19  ;;  %v474_v33 = vsel %vm8299_vm6, %v469_v8, %v473_v62  ;;  %v478_v34 = vor.u32 %v477_v17, %v473_v62  ;;  %v518_v35 = vshrl.u32 %v8406_v6, 16  ;;  %v514_v39 = vld [vmem:[#allocation2 + $0x50] sm:$0x1]  ;;  %v201_v13 = vld [vmem:[%s8216_s23 + $0x48] sm:$0xf] }
  0x53   : > { %8008 = vmatprep.subr.msk.bf16.mxu0 %vm9902_vm0, %v8418_v18  ;;  %v521_v5 = vshll.u32 %v8406_v6, 16  ;;  %vm9904_vm10 = vcmask 27648   ;;  %v496_v36 = vor.u32 %v494_v11, %v493_v23  ;;  %v497_v37 = vrot.slane %v493_v23, 4 }
  0x54   : > { %486 = vst.msk [vmem:[#allocation2 + $0x40] sm:$0xf] %vm9904_vm10, %v474_v33  ;;  %v501_v38 = vrot.slane %v499_v24, 7  ;;  %v527_v40 = vshrl.u32 %v8411_v12, 16  ;;  %v8433_v42 = vld [vmem:[#allocation2 + $0x30] sm:$0xff]   ;;  %v479_v43 = vrot.slane %v478_v34, 4  ;;  %v922_v53 = vor.u32 %v920_v15, %v918_v4  ;;  %vm9906_vm3 = vmmov %vm9904_vm10 }
  0x55   : > { %v8435_v45 = vld [vmem:[#allocation2 + $0x30] sm:$0xff]   ;;  %v511_v47 = vsel %vm8304_vm7, %v496_v36, %v510_v28  ;;  %v924_v54 = vshll.u32 %v8433_v42, 16  ;;  %vm9905_vm5 = vnez %v9877_v10  ;;  %v928_v63 = vshrl.u32 %v8433_v42, 16 }
  0x56   : > { %v504_v46 = vor.u32 %v502_v25, %v501_v38  ;;  %v506_v51 = vrot.slane %v501_v38, 4  ;;  %v8440_v55 = vld [vmem:[#allocation2 + $0x38] sm:$0xff]   ;;  %v488_v56 = vsel %vm9905_vm5, %v479_v43, %v487_v21  ;;  %512 = vst [vmem:[#allocation2 + $0x48] sm:$0xf] %v511_v47  ;;  %v2398_v58 = vshrl.u32 %v8435_v45, 16 }
  0x57   : > { %v2401_v59 = vshll.u32 %v8435_v45, 16  ;;  %v8446_v60 = vld [vmem:[#allocation2 + $0x38] sm:$0xff]   ;;  %489 = vst [vmem:[#allocation2 + $0x44] sm:$0xf] %v488_v56  ;;  %v926_v4 = vrot.slane %v924_v54, 1  ;;  %v2407_v49 = vshrl.u32 %v8440_v55, 16 }
  0x58   : > { %v505_v0 = vsel %vm8323_vm8, %v497_v37, %v504_v46  ;;  %v2410_v57 = vshll.u32 %v8440_v55, 16  ;;  %v515_v2 = vsel %vm8331_vm11, %v506_v51, %v514_v39  ;;  %v2400_v6 = vrot.slane %v2398_v58, 1  ;;  %v539_v36 = vld [vmem:[#allocation2 + $0x50] sm:$0xe]  ;;  %v8462_v37 = vld [vmem:[#allocation2 + $0x8] sm:$0xc] }
  0x59   : > { %513 = vst.msk [vmem:[#allocation2 + $0x4c] sm:$0xf] %vm9906_vm3, %v505_v0  ;;  %v2403_v8 = vrot.slane %v2401_v59, 2  ;;  %v932_v9 = vshll.u32 %v8446_v60, 16  ;;  %v936_v11 = vshrl.u32 %v8446_v60, 16  ;;  %v2409_v62 = vrot.slane %v2407_v49, 1 }
  0x5a   : > { %516 = vst [vmem:[#allocation2 + $0x50] sm:$0x1] %v515_v2  ;;  %vm9907_vm0 = vsmask.f32 7424  ;;  %v2412_v17 = vrot.slane %v2410_v57, 2  ;;  %v930_v19 = vor.u32 %v928_v63, %v926_v4  ;;  %v520_v24 = vrot.slane %v518_v35, 6 }
  0x5b   : > { %v927_v15 = vsel %vm9907_vm0, %v922_v53, %v926_v4  ;;  %v2404_v21 = vor.u32 %v2403_v8, %v2400_v6  ;;  %v934_v23 = vrot.slane %v932_v9, 1  ;;  %v523_v25 = vrot.slane %v521_v5, 7  ;;  %vm9909_vm3 = vmmov %vm9907_vm0 }
  0x5c   : > { %7380 = vmatmul.mubr.msk.bf16.gmra.mrb[8].mxu1 %vm9903_vm1, %v927_v15  ;;  %v2413_v28 = vor.u32 %v2412_v17, %v2409_v62  ;;  %v529_v33 = vrot.slane %v527_v40, 6  ;;  %v530_v34 = vshll.u32 %v8411_v12, 16  ;;  %vm9908_vm10 = vsmask.f32 6400  ;;  %vm9910_vm0 = vmmov %vm9903_vm1 }
  0x5d   : > { %v2405_v38 = vsel %vm9908_vm10, %v8408_v7, %v2404_v21  ;;  %v935_v39 = vsel %vm9909_vm3, %v930_v19, %v934_v23  ;;  %v524_v43 = vor.u32 %v523_v25, %v520_v24  ;;  %v547_v46 = vshrl.u32 %v201_v13, 16  ;;  %vm9911_vm1 = vmmov %vm9908_vm10 }
  0x5e   : > { %7531 = vmatprep.mubr.msk.bf16.mxu0 %vm9910_vm0, %v2405_v38  ;;  %v2414_v47 = vsel %vm9911_vm1, %v2404_v21, %v2413_v28  ;;  %vm9912_vm11 = vmmov %vm9910_vm0  ;;  %v8470_v35 = vld [vmem:[#allocation2 + $0x40] sm:$0xff]   ;;  %v532_v5 = vrot.slane %v530_v34, 7  ;;  %v938_v12 = vor.u32 %v936_v11, %v934_v23  ;;  %v7033_v54 = vcombine.low %v8462_v37, %v8308_v26  ;;  %v202_v11 = vld [vmem:[%s8216_s23 + $0x4c] sm:$0xf] }
  0x5f   : > { %7383 = vmatprep.mubr.msk.bf16.mxu1 %vm9912_vm11, %v935_v39  ;;  %vm9913_vm8 = vmmov %vm9910_vm0  ;;  %v8473_v40 = vld [vmem:[#allocation2 + $0x40] sm:$0xff]   ;;  %v525_v7 = vrot.slane %v524_v43, 4  ;;  %v540_v53 = vsel %vm8224_vm12, %v524_v43, %v539_v36  ;;  %v940_v56 = vshll.u32 %v8470_v35, 16  ;;  %v944_v59 = vshrl.u32 %v8470_v35, 16  ;;  %v543_v21 = vld [vmem:[#allocation2 + $0x58] sm:$0x3] }
  0x60   : > { %7532 = vmatmul.mubr.msk.bf16.gmra.mrb[8].mxu0 %vm9913_vm8, %v2414_v47  ;;  %v8475_v51 = vld [vmem:[#allocation2 + $0x48] sm:$0xff]   ;;  %v533_v63 = vor.u32 %v532_v5, %v529_v33  ;;  %541 = vst [vmem:[#allocation2 + $0x50] sm:$0xe] %v540_v53  ;;  %v550_v0 = vshll.u32 %v201_v13, 16  ;;  %v2416_v4 = vshrl.u32 %v8473_v40, 16  ;;  %v2419_v49 = vshll.u32 %v8473_v40, 16  ;;  %vm9915_vm8 = vmmov %vm9909_vm3 }
  0x61   : > { %v8482_v58 = vld [vmem:[#allocation2 + $0x48] sm:$0xff]   ;;  %v2425_v57 = vshrl.u32 %v8475_v51, 16  ;;  %v2428_v2 = vshll.u32 %v8475_v51, 16  ;;  %v942_v6 = vrot.slane %v940_v56, 1  ;;  %v549_v15 = vrot.slane %v547_v46, 5  ;;  %vm9916_vm10 = vmmov %vm9910_vm0 }
  0x62   : > { %v948_v8 = vshll.u32 %v8482_v58, 16  ;;  %v534_v9 = vsel %vm8231_vm13, %v525_v7, %v533_v63  ;;  %v2418_v62 = vrot.slane %v2416_v4, 1  ;;  %v2421_v13 = vrot.slane %v2419_v49, 2  ;;  %v203_v43 = vld [vmem:[%s8216_s23 + $0x50] sm:$0xf]  ;;  %vm9917_vm0 = vmmov %vm9911_vm1 }
  0x63   : > { %v2427_v17 = vrot.slane %v2425_v57, 1  ;;  %v2430_v19 = vrot.slane %v2428_v2, 2  ;;  %vm9914_vm11 = vcmask 27648   ;;  %v943_v23 = vsel %vm9915_vm8, %v938_v12, %v942_v6  ;;  %v204_v46 = vld [vmem:[%s8216_s23 + $0x54] sm:$0xf]  ;;  %vm9918_vm1 = vmmov %vm9917_vm0 }
  0x64   : > { %542 = vst.msk [vmem:[#allocation2 + $0x54] sm:$0xf] %vm9914_vm11, %v534_v9  ;;  %v946_v24 = vor.u32 %v944_v59, %v942_v6  ;;  %v950_v25 = vrot.slane %v948_v8, 1  ;;  %v535_v33 = vrot.slane %v533_v63, 4  ;;  %7384 = vmatmul.mubr.msk.bf16.gmra.mrb[12].mxu1 %vm9916_vm10, %v943_v23  ;;  %v2422_v34 = vor.u32 %v2421_v13, %v2418_v62  ;;  %v568_v53 = vld [vmem:[#allocation2 + $0x58] sm:$0xc]  ;;  %vm9919_vm11 = vmmov %vm9916_vm10 }
  0x65   : > { %v8496_v36 = vor.u32 %v2430_v19, %v2427_v17  ;;  %v552_v38 = vrot.slane %v550_v0, 6  ;;  %v556_v39 = vshrl.u32 %v202_v11, 16  ;;  %v952_v5 = vshrl.u32 %v8482_v58, 16  ;;  %v8507_v56 = vld [vmem:[%s9851_s1 + $0x4] sm:$0x3] }
  0x66   : > { %v951_v47 = vsel %vm9909_vm3, %v946_v24, %v950_v25  ;;  %v544_v7 = vsel %vm8239_vm14, %v535_v33, %v543_v21  ;;  %v559_v12 = vshll.u32 %v202_v11, 16  ;;  %v2423_v59 = vsel %vm9917_vm0, %v2413_v28, %v2422_v34  ;;  %vm9921_vm3 = vmmov %vm9916_vm10  ;;  %v572_v9 = vld [vmem:[#allocation2 + $0x60] sm:$0x7]  ;;  %v597_v62 = vld [vmem:[#allocation2 + $0x60] sm:$0x8] }
  0x67   : > { %v2432_v63 = vsel %vm9918_vm1, %v2422_v34, %v8496_v36  ;;  %7387 = vmatprep.mubr.msk.bf16.mxu1 %vm9919_vm11, %v951_v47  ;;  %545 = vst [vmem:[#allocation2 + $0x58] sm:$0x3] %v544_v7  ;;  %v553_v0 = vor.u32 %v552_v38, %v549_v15  ;;  %v558_v4 = vrot.slane %v556_v39, 5  ;;  %vm9920_vm8 = vcmask 1041408   ;;  %7535 = vmatprep.mubr.msk.bf16.mxu0 %vm9916_vm10, %v2423_v59  ;;  %v205_v37 = vld [vmem:[%s8216_s23 + $0x58] sm:$0xf] }
  0x68   : > { %8003 = vmatprep.subr.msk.bf16.mxu1 %vm9920_vm8, %v8507_v56  ;;  %v561_v49 = vrot.slane %v559_v12, 6  ;;  %v576_v57 = vshll.u32 %v203_v43, 16  ;;  %v579_v2 = vshrl.u32 %v203_v43, 16  ;;  %v585_v6 = vshll.u32 %v204_v46, 16  ;;  %7536 = vmatmul.mubr.msk.bf16.gmra.mrb[12].mxu0 %vm9921_vm3, %v2432_v63  ;;  %vm9924_vm8 = vmmov %vm9921_vm3 }
  0x69   : > { %v554_v28 = vrot.slane %v553_v0, 4  ;;  %v569_v8 = vsel %vm8247_vm15, %v553_v0, %v568_v53  ;;  %v589_v11 = vshrl.u32 %v204_v46, 16  ;;  %v954_v13 = vor.u32 %v952_v5, %v950_v25  ;;  %v207_v53 = vld [vmem:[%s8216_s23 + $0x60] sm:$0xf] }
  0x6a   : > { %v562_v17 = vor.u32 %v561_v49, %v558_v4  ;;  %570 = vst [vmem:[#allocation2 + $0x58] sm:$0xc] %v569_v8  ;;  %v578_v19 = vrot.slane %v576_v57, 5  ;;  %v581_v23 = vrot.slane %v579_v2, 4  ;;  %vm2795_vm0 = vcmask 1045504  }
  0x6b   : > { %v8519_v15 = vld [vmem:[#allocation2 + $0x50] sm:$0xff]   ;;  %v2796_v24 = vrot.slane %v7033_v54, 2  ;;  %v2797_v33 = vrot.slane %v8319_v48, 2  ;;  %v587_v39 = vrot.slane %v585_v6, 5  ;;  %vm9922_vm1 = vcmask 27648  }
  0x6c   : > { %v8521_v21 = vld [vmem:[#allocation2 + $0x50] sm:$0xff]   ;;  %v956_v34 = vshll.u32 %v8519_v15, 16  ;;  %v563_v25 = vsel %vm8254_vm2, %v554_v28, %v562_v17  ;;  %v564_v38 = vrot.slane %v562_v17, 4  ;;  %v582_v47 = vor.u32 %v581_v23, %v578_v19  ;;  %v206_v48 = vld [vmem:[%s8216_s23 + $0x5c] sm:$0xf]  ;;  %vm9925_vm10 = vmmov %vm9922_vm1 }
  0x6d   : > { %v2434_v43 = vshrl.u32 %v8521_v21, 16  ;;  %v2437_v46 = vshll.u32 %v8521_v21, 16  ;;  %571 = vst.msk [vmem:[#allocation2 + $0x5c] sm:$0xf] %vm9922_vm1, %v563_v25  ;;  %v598_v26 = vsel %vm8279_vm9, %v578_v19, %v597_v62  ;;  %v8540_v7 = vsel %vm2795_vm0, %v2796_v24, %v2797_v33  ;;  %v624_v17 = vld [vmem:[#allocation2 + $0x6c] sm:$0xf]  ;;  %vm9927_vm1 = vmmov %vm9924_vm8 }
  0x6e   : > { %v958_v54 = vrot.slane %v956_v34, 1  ;;  %v573_v5 = vsel %vm8266_vm4, %v564_v38, %v572_v9  ;;  %599 = vst [vmem:[#allocation2 + $0x60] sm:$0x8] %v598_v26  ;;  %v2799_v12 = vrot.slane %v8348_v16, 2  ;;  %v583_v0 = vrot.slane %v582_v47, 4 }
  0x6f   : > { %v2436_v59 = vrot.slane %v2434_v43, 1  ;;  %v2439_v63 = vrot.slane %v2437_v46, 2  ;;  %574 = vst [vmem:[#allocation2 + $0x60] sm:$0x7] %v573_v5  ;;  %vm9923_vm11 = vsmask.f32 7424 }
  0x70   : > { %v959_v4 = vsel %vm9923_vm11, %v954_v13, %v958_v54  ;;  %v960_v49 = vshrl.u32 %v8519_v15, 16  ;;  %v8547_v57 = vsel %vm2795_vm0, %v2797_v33, %v2799_v12  ;;  %v591_v2 = vrot.slane %v589_v11, 4  ;;  %v601_v16 = vld [vmem:[#allocation2 + $0x68] sm:$0xf]  ;;  %v653_v5 = vld [vmem:[#allocation2 + $0x74] sm:$0xe] }
  0x71   : > { %7388 = vmatmul.mubr.msk.bf16.gmra.mrb[16].mxu1 %vm9924_vm8, %v959_v4  ;;  %v2440_v6 = vor.u32 %v2439_v63, %v2436_v59  ;;  %v588_v28 = vsel %vm8299_vm6, %v583_v0, %v587_v39  ;;  %v605_v8 = vshrl.u32 %v205_v37, 16  ;;  %v608_v9 = vshll.u32 %v205_v37, 16  ;;  %v628_v37 = vld [vmem:[#allocation2 + $0x74] sm:$0x1]  ;;  %vm9929_vm8 = vmmov %vm9925_vm10 }
  0x72   : > { %600 = vst.msk [vmem:[#allocation2 + $0x64] sm:$0xf] %vm9925_vm10, %v588_v28  ;;  %v592_v62 = vor.u32 %v591_v2, %v587_v39  ;;  %v613_v13 = vshrl.u32 %v206_v48, 16  ;;  %v616_v19 = vshll.u32 %v206_v48, 16  ;;  %v632_v23 = vshrl.u32 %v207_v53, 16 }
  0x73   : > { %vm9926_vm3 = vsmask.f32 6400  ;;  %v607_v11 = vrot.slane %v605_v8, 7  ;;  %v635_v33 = vshll.u32 %v207_v53, 16  ;;  %v2801_v34 = vrot.slane %v8354_v31, 2 }
  0x74   : > { %v2441_v24 = vsel %vm9926_vm3, %v8496_v36, %v2440_v6  ;;  %v8557_v25 = vld [vmem:[#allocation2 + $0x58] sm:$0xff]   ;;  %v962_v38 = vor.u32 %v960_v49, %v958_v54  ;;  %v593_v43 = vrot.slane %v592_v62, 4  ;;  %v615_v26 = vrot.slane %v613_v13, 7  ;;  %v208_v49 = vld [vmem:[%s8216_s23 + $0x64] sm:$0xf] }
  0x75   : > { %7539 = vmatprep.mubr.msk.bf16.mxu0 %vm9927_vm1, %v2441_v24  ;;  %v8559_v46 = vld [vmem:[#allocation2 + $0x58] sm:$0xff]   ;;  %v610_v39 = vor.u32 %v608_v9, %v607_v11  ;;  %v611_v47 = vrot.slane %v607_v11, 4  ;;  %v634_v48 = vrot.slane %v632_v23, 6  ;;  %v2443_v36 = vshrl.u32 %v8557_v25, 16  ;;  %v209_v62 = vld [vmem:[%s8216_s23 + $0x68] sm:$0xf] }
  0x76   : > { %v2446_v31 = vshll.u32 %v8557_v25, 16  ;;  %v602_v53 = vsel %vm9905_vm5, %v593_v43, %v601_v16  ;;  %v637_v54 = vrot.slane %v635_v33, 7  ;;  %v964_v59 = vshll.u32 %v8559_v46, 16  ;;  %v210_v13 = vld [vmem:[%s8216_s23 + $0x6c] sm:$0xf] }
  0x77   : > { %v968_v63 = vshrl.u32 %v8559_v46, 16  ;;  %603 = vst [vmem:[#allocation2 + $0x68] sm:$0xf] %v602_v53  ;;  %v625_v0 = vsel %vm8304_vm7, %v610_v39, %v624_v17  ;;  %v618_v4 = vor.u32 %v616_v19, %v615_v26  ;;  %v2445_v2 = vrot.slane %v2443_v36, 1  ;;  %v8581_v19 = vld [vmem:[%s8216_s23 + $0x70] sm:$0xf] }
  0x78   : > { %v2448_v28 = vrot.slane %v2446_v31, 2  ;;  %626 = vst [vmem:[#allocation2 + $0x6c] sm:$0xf] %v625_v0  ;;  %v620_v8 = vrot.slane %v615_v26, 4  ;;  %v638_v9 = vor.u32 %v637_v54, %v634_v48  ;;  %v966_v16 = vrot.slane %v964_v59, 1 }
  0x79   : > { %v8572_v23 = vld [vmem:[#allocation2 + $0x60] sm:$0xff]   ;;  %vm9928_vm11 = vnez %v9883_v50  ;;  %v8577_v11 = vsel %vm2795_vm0, %v2799_v12, %v2801_v34  ;;  %v2803_v17 = vrot.slane %v8381_v29, 2  ;;  %vm9930_vm10 = vnez %v9887_v61 }
  0x7a   : > { %v619_v24 = vsel %vm9928_vm11, %v611_v47, %v618_v4  ;;  %v8583_v33 = vor.u32 %v2448_v28, %v2445_v2  ;;  %v629_v43 = vsel %vm9930_vm10, %v620_v8, %v628_v37  ;;  %v654_v39 = vsel %vm8224_vm12, %v638_v9, %v653_v5  ;;  %v682_v4 = vld [vmem:[#allocation2 + $0x7c] sm:$0xc]  ;;  %v8698_v50 = vld [vmem:[#allocation2 + $0x60] sm:$0xff]  }
  0x7b   : > { %627 = vst.msk [vmem:[#allocation2 + $0x70] sm:$0xf] %vm9929_vm8, %v619_v24  ;;  %v639_v26 = vrot.slane %v638_v9, 4  ;;  %vm9931_vm3 = vsmask.f32 7424  ;;  %v970_v48 = vor.u32 %v968_v63, %v966_v16  ;;  %v972_v12 = vshll.u32 %v8572_v23, 16 }
  0x7c   : > { %v967_v47 = vsel %vm9931_vm3, %v962_v38, %v966_v16  ;;  %v976_v36 = vshrl.u32 %v8572_v23, 16  ;;  %630 = vst [vmem:[#allocation2 + $0x74] sm:$0x1] %v629_v43  ;;  %655 = vst [vmem:[#allocation2 + $0x74] sm:$0xe] %v654_v39  ;;  %vm9933_vm8 = vcmask 31744   ;;  %v8599_v22 = vsel %vm2795_vm0, %v2801_v34, %v2803_v17 }
  0x7d   : > { %vm9932_vm1 = vsmask.f32 6400  ;;  %7391 = vmatprep.mubr.msk.bf16.mxu1 %vm9933_vm8, %v967_v47  ;;  %v641_v37 = vshrl.u32 %v208_v49, 16  ;;  %v644_v5 = vshll.u32 %v208_v49, 16  ;;  %vm9934_vm12 = vmmov %vm9933_vm8  ;;  %v974_v38 = vrot.slane %v972_v12, 1 }
  0x7e   : > { %v2450_v31 = vsel %vm9932_vm1, %v2440_v6, %v8583_v33  ;;  %v661_v53 = vshrl.u32 %v209_v62, 16  ;;  %v664_v54 = vshll.u32 %v209_v62, 16  ;;  %v670_v59 = vshrl.u32 %v210_v13, 16  ;;  %v711_v63 = vld [vmem:[#allocation2 + $0x84] sm:$0x8]  ;;  %vm9935_vm3 = vmmov %vm9933_vm8 }
  0x7f   : > { %7540 = vmatmul.mubr.msk.bf16.gmra.mrb[16].mxu0 %vm9934_vm12, %v2450_v31  ;;  %v643_v6 = vrot.slane %v641_v37, 6  ;;  %v646_v0 = vrot.slane %v644_v5, 7  ;;  %v673_v2 = vshll.u32 %v210_v13, 16  ;;  %v690_v28 = vshll.u32 %v8581_v19, 16  ;;  %v8608_v8 = vld [vmem:[#allocation2 + $0x68] sm:$0xff]   ;;  %vm9938_vm12 = vmmov %vm9935_vm3 }
  0x80   : > { %7561 = vmatprep.mubr.msk.bf16.mxu0 %vm9935_vm3, %v8540_v7  ;;  %vm9936_vm1 = vsmask.f32 7424  ;;  %vm9937_vm8 = vcmask 1041408   ;;  %v657_v9 = vld [vmem:[#allocation2 + $0x7c] sm:$0x3]  ;;  %v663_v62 = vrot.slane %v661_v53, 5  ;;  %v978_v13 = vor.u32 %v976_v36, %v974_v38 }
  0x81   : > { %v975_v34 = vsel %vm9936_vm1, %v970_v48, %v974_v38  ;;  %v3327_v49 = vsel %vm9937_vm8, %v8418_v18, 0  ;;  %v666_v16 = vrot.slane %v664_v54, 6  ;;  %v647_v7 = vor.u32 %v646_v0, %v643_v6  ;;  %v686_v31 = vld [vmem:[#allocation2 + $0x84] sm:$0x7]  ;;  %v212_v37 = vld [vmem:[%s8216_s23 + $0x74] sm:$0xf] }
  0x82   : > { %7392 = vmatmul.mubr.msk.bf16.gmra.mrb[20].mxu1 %vm9938_vm12, %v975_v34  ;;  %v672_v24 = vrot.slane %v670_v59, 5  ;;  %v675_v43 = vrot.slane %v673_v2, 6  ;;  %v692_v39 = vrot.slane %v690_v28, 5  ;;  %v980_v47 = vshll.u32 %v8608_v8, 16 }
  0x83   : > { %v984_v48 = vshrl.u32 %v8608_v8, 16  ;;  %v667_v12 = vor.u32 %v666_v16, %v663_v62  ;;  %v8614_v18 = vld [vmem:[#allocation2 + $0x70] sm:$0xff]   ;;  %v648_v5 = vsel %vm8231_vm13, %v639_v26, %v647_v7  ;;  %v649_v53 = vrot.slane %v647_v7, 4  ;;  %vm9940_vm13 = vmmov %vm9938_vm12  ;;  %v715_v7 = vld [vmem:[#allocation2 + $0x8c] sm:$0xf] }
  0x84   : > { %v676_v54 = vor.u32 %v675_v43, %v672_v24  ;;  %v712_v59 = vsel %vm8279_vm9, %v692_v39, %v711_v63  ;;  %v982_v6 = vrot.slane %v980_v47, 1  ;;  %vm9939_vm3 = vcmask 27648   ;;  %vm9941_vm9 = vmmov %vm9936_vm1  ;;  %v213_v24 = vld [vmem:[%s8216_s23 + $0x78] sm:$0xf]  ;;  %v214_v47 = vld [vmem:[%s8216_s23 + $0x7c] sm:$0xf] }
  0x85   : > { %656 = vst.msk [vmem:[#allocation2 + $0x78] sm:$0xf] %vm9939_vm3, %v648_v5  ;;  %v683_v36 = vsel %vm8247_vm15, %v667_v12, %v682_v4  ;;  %v668_v38 = vrot.slane %v667_v12, 4  ;;  %713 = vst [vmem:[#allocation2 + $0x84] sm:$0x8] %v712_v59  ;;  %v988_v0 = vshll.u32 %v8614_v18, 16  ;;  %v658_v2 = vsel %vm8239_vm14, %v649_v53, %v657_v9 }
  0x86   : > { %684 = vst [vmem:[#allocation2 + $0x7c] sm:$0xc] %v683_v36  ;;  %v678_v27 = vrot.slane %v676_v54, 4  ;;  %v983_v41 = vsel %vm9941_vm9, %v978_v13, %v982_v6  ;;  %v986_v26 = vor.u32 %v984_v48, %v982_v6  ;;  %659 = vst [vmem:[#allocation2 + $0x7c] sm:$0x3] %v658_v2  ;;  %v693_v28 = vshrl.u32 %v8581_v19, 16 }
  0x87   : > { %7562 = vmatmul.mubr.msk.bf16.vlgmr.msra.gmra.mrb[0].mxu0 %vm9940_vm13, %v8547_v57  ;;  %v677_v63 = vsel %vm8254_vm2, %v668_v38, %v676_v54  ;;  %vm9942_vm15 = vmmov %vm9938_vm12  ;;  %v990_v32 = vrot.slane %v988_v0, 1  ;;  %v699_v34 = vshll.u32 %v212_v37, 16  ;;  %v2805_v44 = vrot.slane %v8435_v45, 2  ;;  %v738_v6 = vld [vmem:[#allocation2 + $0x90] sm:$0xf] }
  0x88   : > { %7598 = vmatpush3.bf16.msra.mxu0 %v3327_v49  ;;  %7395 = vmatprep.mubr.msk.bf16.mxu1 %vm9942_vm15, %v983_v41  ;;  %vm9943_vm14 = vmmov %vm9939_vm3  ;;  %v687_v4 = vsel %vm8266_vm4, %v678_v27, %v686_v31  ;;  %v703_v57 = vshrl.u32 %v212_v37, 16  ;;  %v695_v9 = vrot.slane %v693_v28, 4  ;;  %v992_v62 = vshrl.u32 %v8614_v18, 16 }
  0x89   : > { %685 = vst.msk [vmem:[#allocation2 + $0x80] sm:$0xf] %vm9943_vm14, %v677_v63  ;;  %vm9944_vm1 = vmmov %vm9938_vm12  ;;  %v701_v52 = vrot.slane %v699_v34, 5  ;;  %v2806_v45 = vsel %vm2795_vm0, %v2803_v17, %v2805_v44  ;;  %v2807_v48 = vrot.slane %v8440_v55, 2  ;;  %v2809_v55 = vrot.slane %v8473_v40, 2 }
  0x8a   : > { %7565 = vmatprep.mubr.msk.bf16.mxu0 %vm9944_vm1, %v8577_v11  ;;  %688 = vst [vmem:[#allocation2 + $0x84] sm:$0x7] %v687_v4  ;;  %vm9945_vm2 = vmmov %vm9937_vm8  ;;  %v705_v19 = vrot.slane %v703_v57, 4  ;;  %v696_v16 = vor.u32 %v695_v9, %v692_v39  ;;  %v994_v31 = vor.u32 %v992_v62, %v990_v32  ;;  %v719_v5 = vshrl.u32 %v213_v24, 16  ;;  %v742_v4 = vld [vmem:[#allocation2 + $0x98] sm:$0x1] }
  0x8b   : > { %8009 = vmatprep.subr.msk.bf16.mxu0 %vm9945_vm2, %v8629_v1  ;;  %vm9946_vm8 = vmmov %vm9941_vm9  ;;  %v722_v53 = vshll.u32 %v213_v24, 16  ;;  %v727_v38 = vshrl.u32 %v214_v47, 16  ;;  %v730_v0 = vshll.u32 %v214_v47, 16  ;;  %v2808_v41 = vsel %vm2795_vm0, %v2805_v44, %v2807_v48 }
  0x8c   : > { %v991_v49 = vsel %vm9946_vm8, %v986_v26, %v990_v32  ;;  %vm9947_vm4 = vmmov %vm9944_vm1  ;;  %v706_v11 = vor.u32 %v705_v19, %v701_v52  ;;  %v697_v13 = vrot.slane %v696_v16, 4  ;;  %v721_v36 = vrot.slane %v719_v5, 7  ;;  %v8730_v5 = vld [vmem:[#allocation2 + $0x10] sm:$0xff]  }
  0x8d   : > { %7396 = vmatmul.mubr.msk.bf16.gmra.mrb[24].mxu1 %vm9947_vm4, %v991_v49  ;;  %v8653_v43 = vld [vmem:[#allocation2 + $0x78] sm:$0xff]   ;;  %vm9948_vm12 = vmmov %vm9944_vm1  ;;  %v2810_v10 = vsel %vm2795_vm0, %v2807_v48, %v2809_v55  ;;  %v729_v63 = vrot.slane %v727_v38, 7  ;;  %v2811_v9 = vrot.slane %v8475_v51, 2  ;;  %v2813_v19 = vrot.slane %v8521_v21, 2 }
  0x8e   : > { %v707_v12 = vrot.slane %v706_v11, 4  ;;  %v996_v39 = vshll.u32 %v8653_v43, 16  ;;  %v1000_v29 = vshrl.u32 %v8653_v43, 16  ;;  %vm9949_vm3 = vmmov %vm9944_vm1  ;;  %v702_v17 = vsel %vm8299_vm6, %v697_v13, %v701_v52  ;;  %v8746_v38 = vld [vmem:[#allocation2 + $0x18] sm:$0xff]  }
  0x8f   : > { %7566 = vmatmul.mubr.msk.bf16.gmra.mrb[4].mxu0 %vm9948_vm12, %v8599_v22  ;;  %vm9950_vm13 = vmmov %vm9943_vm14  ;;  %v724_v40 = vor.u32 %v722_v53, %v721_v36  ;;  %v725_v26 = vrot.slane %v721_v36, 4  ;;  %v732_v28 = vor.u32 %v730_v0, %v729_v63  ;;  %v734_v57 = vrot.slane %v729_v63, 4  ;;  %v8735_v53 = vld [vmem:[#allocation2 + $0x78] sm:$0xff]   ;;  %v8750_v0 = vld [vmem:[#allocation2 + $0x20] sm:$0xff]  }
  0x90   : > { %7569 = vmatprep.mubr.msk.bf16.mxu0 %vm9949_vm3, %v2806_v45  ;;  %714 = vst.msk [vmem:[#allocation2 + $0x88] sm:$0xf] %vm9950_vm13, %v702_v17  ;;  %v716_v22 = vsel %vm9905_vm5, %v707_v12, %v715_v7  ;;  %v998_v54 = vrot.slane %v996_v39, 1  ;;  %vm9951_vm9 = vmmov %vm9946_vm8  ;;  %v2812_v11 = vsel %vm2795_vm0, %v2809_v55, %v2811_v9  ;;  %v2814_v21 = vsel %vm2795_vm0, %v2811_v9, %v2813_v19  ;;  %v8712_v39 = vld [vmem:[#allocation2 + $0x70] sm:$0xff]   ;;  %v8721_v17 = vld [vmem:[%s9851_s1 + $0x6] sm:$0x3] }
  0x91   : > { %v8660_v37 = vld [vmem:[#allocation2 + $0x80] sm:$0xff]   ;;  %717 = vst [vmem:[#allocation2 + $0x8c] sm:$0xf] %v716_v22  ;;  %vm9952_vm6 = vmmov %vm9944_vm1  ;;  %v739_v34 = vsel %vm8304_vm7, %v724_v40, %v738_v6  ;;  %v733_v62 = vsel %vm9928_vm11, %v725_v26, %v732_v28  ;;  %v743_v20 = vsel %vm9930_vm10, %v734_v57, %v742_v4  ;;  %v2815_v61 = vrot.slane %v8557_v25, 2  ;;  %v8726_v55 = vld [vmem:[#allocation2 + $0x8] sm:$0xff]  }
  0x92   : > { %v1004_v59 = vshll.u32 %v8660_v37, 16  ;;  %v999_v14 = vsel %vm9951_vm9, %v994_v31, %v998_v54  ;;  %v1002_v2 = vor.u32 %v1000_v29, %v998_v54  ;;  %vm9953_vm5 = vmmov %vm9946_vm8  ;;  %v1008_v49 = vshrl.u32 %v8660_v37, 16  ;;  %740 = vst [vmem:[#allocation2 + $0x90] sm:$0xf] %v739_v34  ;;  %v8710_v31 = vld [vmem:[#allocation2 + $0x68] sm:$0xff]  }
  0x93   : > { %7399 = vmatprep.mubr.msk.bf16.mxu1 %vm9952_vm6, %v999_v14  ;;  %vm9954_vm15 = vmmov %vm9944_vm1  ;;  %744 = vst [vmem:[#allocation2 + $0x98] sm:$0x1] %v743_v20  ;;  %v2817_v48 = vrot.slane %v8698_v50, 2  ;;  %v2816_v12 = vsel %vm2795_vm0, %v2813_v19, %v2815_v61  ;;  %v2821_v22 = vrot.slane %v8712_v39, 2  ;;  %v2823_v6 = vrot.slane %v8735_v53, 2  ;;  %v8764_v26 = vld [vmem:[#allocation2 + $0x28] sm:$0xff]  }
  0x94   : > { %v1006_v27 = vrot.slane %v1004_v59, 1  ;;  %vm9955_vm14 = vmmov %vm9944_vm1  ;;  %v8740_v59 = vld [vmem:[#allocation2 + $0x80] sm:$0xff]   ;;  %v3103_v63 = vld [vmem:[#allocation2 + $0x10] sm:$0xc] }
  0x95   : > { %vm9956_vm7 = vmmov %vm9950_vm13  ;;  %v2818_v25 = vsel %vm2795_vm0, %v2815_v61, %v2817_v48  ;;  %vm9964_vm13 = vcmask 1041408   ;;  %v2825_v36 = vrot.slane %v8740_v59, 2  ;;  %v2824_v14 = vsel %vm2795_vm0, %v2821_v22, %v2823_v6  ;;  %v8815_v61 = vld [vmem:[%s9851_s1 + $0x10] sm:$0x3] }
  0x96   : > { %v1007_v32 = vsel %vm9953_vm5, %v1002_v2, %v1006_v27  ;;  %741 = vst.msk [vmem:[#allocation2 + $0x94] sm:$0xf] %vm9956_vm7, %v733_v62  ;;  %v1010_v7 = vor.u32 %v1008_v49, %v1006_v27  ;;  %vm9957_vm11 = vmmov %vm9944_vm1  ;;  %v1572_v29 = vsel %vm9964_vm13, %v8507_v56, 0  ;;  %v8779_v49 = vld [vmem:[#allocation2 + $0x18] sm:$0xff]   ;;  %v8791_v62 = vld [vmem:[#allocation2 + $0x20] sm:$0xff]  }
  0x97   : > { %7400 = vmatmul.mubr.msk.bf16.gmra.mrb[28].mxu1 %vm9954_vm15, %v1007_v32  ;;  %7570 = vmatmul.mubr.msk.bf16.gmra.mrb[8].mxu0 %vm9955_vm14, %v2808_v41  ;;  %v8680_v44 = vld [vmem:[#allocation2 + $0x88] sm:$0xf]  ;;  %vm9958_vm10 = vmmov %vm9953_vm5  ;;  %v2826_v27 = vsel %vm2795_vm0, %v2823_v6, %v2825_v36  ;;  %v8768_v32 = vld [vmem:[#allocation2 + $0x14] sm:$0xf] }
  0x98   : > { %7573 = vmatprep.mubr.msk.bf16.mxu0 %vm9944_vm1, %v2810_v10  ;;  %v782_v52 = vld [vmem:[#allocation2 + $0x8c] sm:$0xf]  ;;  %vm9959_vm2 = vmmov %vm9944_vm1  ;;  %v8777_v57 = vcombine.low %v3103_v63, %v8768_v32 }
  0x99   : > { %v8691_v16 = vcombine.low %v8680_v44, %v782_v52  ;;  %vm9960_vm8 = vmmov %vm9944_vm1  ;;  %v8755_v2 = vld [vmem:[#allocation2 + $0x88] sm:$0xff]  }
  0x9a   : > { %vm9961_vm4 = vmmov %vm9944_vm1  ;;  %v2827_v10 = vrot.slane %v8755_v2, 2  ;;  %v8773_v28 = vld [vmem:[#allocation2 + $0x98] ss:$0 sps:$4 sm:$0x11]   ;;  %v3235_v52 = vrot.slane %v8777_v57, 2 }
  0x9b   : > { %v1012_v45 = vshll.u32 %v8691_v16, 16  ;;  %v1016_v51 = vshrl.u32 %v8691_v16, 16  ;;  %vm9962_vm12 = vmmov %vm9944_vm1  ;;  %v2831_v9 = vrot.slane %v8773_v28, 2 }
  0x9c   : > { %vm9963_vm3 = vmmov %vm9944_vm1  ;;  %v2828_v4 = vsel %vm2795_vm0, %v2825_v36, %v2827_v10  ;;  %v8102_v36 = vld [vmem:[#allocation2 + $0x4] sm:$0xf] }
  0x9d   : > { %v1014_v24 = vrot.slane %v1012_v45, 1  ;;  %vm9965_vm9 = vmmov %vm9944_vm1  ;;  %v8758_v41 = vld [vmem:[#allocation2 + $0x90] sm:$0xff]   ;;  %v3238_v45 = vrot.slane %v8791_v62, 2 }
  0x9e   : > { %vm9966_vm6 = vmmov %vm9944_vm1  ;;  %v2829_v40 = vrot.slane %v8758_v41, 2 }
  0x9f   : > { %7574 = vmatmul.mubr.msk.bf16.gmra.mrb[12].mxu0 %vm9957_vm11, %v2812_v11  ;;  %v1015_v13 = vsel %vm9958_vm10, %v1010_v7, %v1014_v24  ;;  %v1018_v47 = vor.u32 %v1016_v51, %v1014_v24  ;;  %vm9967_vm5 = vmmov %vm9944_vm1  ;;  %v8794_v7 = vld [vmem:[#allocation2 + $0x28] sm:$0xff]   ;;  %v8810_v24 = vld [vmem:[#allocation2 + $0x38] sm:$0xff]  }
  0xa0   : > { %7577 = vmatprep.mubr.msk.bf16.mxu0 %vm9959_vm2, %v2814_v21  ;;  %7403 = vmatprep.mubr.msk.bf16.mxu1 %vm9960_vm8, %v1015_v13  ;;  %vm9968_vm15 = vmmov %vm9964_vm13  ;;  %v2830_v34 = vsel %vm2795_vm0, %v2827_v10, %v2829_v40  ;;  %v2832_v19 = vsel %vm2795_vm0, %v2829_v40, %v2831_v9  ;;  %v3240_v51 = vrot.slane %v8794_v7, 2  ;;  %v8828_v13 = vld [vmem:[#allocation2 + $0x40] sm:$0xff]   ;;  %v780_v10 = vld [vmem:[#allocation2 + $0x8c] sm:$0x7] }
  0xa1   : > { %7404 = vmatmul.mubr.msk.bf16.gmra.mrb[32].mxu1 %vm9961_vm4, %v1018_v47  ;;  %vm9969_vm14 = vmmov %vm9944_vm1 }
  0xa2   : > { %7409 = vmatprep.mubr.msk.bf16.mxu1 %vm9962_vm12, %v8235_v30  ;;  %v2819_v30 = vrot.slane %v8710_v31, 2  ;;  %vm9970_vm7 = vmmov %vm9944_vm1  ;;  %v3241_v21 = vsel %vm2795_vm0, %v3238_v45, %v3240_v51 }
  0xa3   : > { %vm9971_vm11 = vmmov %vm9944_vm1 }
  0xa4   : > { %v2820_v56 = vsel %vm2795_vm0, %v2817_v48, %v2819_v30  ;;  %v2822_v54 = vsel %vm2795_vm0, %v2819_v30, %v2821_v22  ;;  %vm9972_vm10 = vmmov %vm9944_vm1  ;;  %v8831_v48 = vld [vmem:[#allocation2 + $0x48] sm:$0xff]   ;;  %v8842_v30 = vld [vmem:[#allocation2 + $0x50] sm:$0xff]  }
  0xa5   : > { %vm9973_vm2 = vmmov %vm9944_vm1  ;;  %v3250_v6 = vrot.slane %v8842_v30, 2 }
  0xa6   : > { %vm9974_vm8 = vmmov %vm9944_vm1 }
  0xa7   : > { %7578 = vmatmul.mubr.msk.bf16.gmra.mrb[16].mxu0 %vm9963_vm3, %v2816_v12  ;;  %vm9975_vm4 = vmmov %vm9944_vm1  ;;  %v3246_v12 = vrot.slane %v8828_v13, 2 }
  0xa8   : > { %7581 = vmatprep.mubr.msk.bf16.mxu0 %vm9965_vm9, %v2818_v25  ;;  %vm9976_vm12 = vmmov %vm9944_vm1  ;;  %v3248_v25 = vrot.slane %v8831_v48, 2 }
  0xa9   : > { %7410 = vmatmul.mubr.msk.bf16.vlgmr.msra.gmra.mrb[0].mxu1 %vm9966_vm6, %v8726_v55  ;;  %vm9977_vm3 = vmmov %vm9944_vm1 }
  0xaa   : > { %7413 = vmatprep.mubr.msk.bf16.mxu1 %vm9967_vm5, %v8730_v5  ;;  %7446 = vmatpush3.bf16.msra.mxu1 %v1572_v29  ;;  %vm9978_vm13 = vmmov %vm9944_vm1  ;;  %v3249_v22 = vsel %vm2795_vm0, %v3246_v12, %v3248_v25  ;;  %v3251_v40 = vsel %vm2795_vm0, %v3248_v25, %v3250_v6  ;;  %v1491_v25 = vrot.slane %v8764_v26, 1 }
  0xab   : > { %8004 = vmatprep.subr.msk.bf16.mxu1 %vm9968_vm15, %v8721_v17  ;;  %vm9979_vm9 = vmmov %vm9944_vm1 }
  0xac   : > { %vm9980_vm6 = vmmov %vm9944_vm1 }
  0xad   : > { %vm9981_vm5 = vmmov %vm9944_vm1 }
  0xae   : > { %vm9982_vm15 = vmmov %vm9944_vm1 }
  0xaf   : > { %7582 = vmatmul.mubr.msk.bf16.gmra.mrb[20].mxu0 %vm9969_vm14, %v2820_v56  ;;  %vm9983_vm14 = vmmov %vm9944_vm1  ;;  %v1475_v56 = vld [vmem:[#allocation2] sm:$0xe] }
  0xb0   : > { %7585 = vmatprep.mubr.msk.bf16.mxu0 %vm9944_vm1, %v2822_v54  ;;  %vm9984_vm1 = vcmask 1041408   ;;  %v8845_v54 = vld [vmem:[#allocation2 + $0x58] sm:$0xff]  }
  0xb1   : > { %7414 = vmatmul.mubr.msk.bf16.gmra.mrb[4].mxu1 %vm9970_vm7, %v8746_v38  ;;  %v3774_v11 = vsel %vm9984_vm1, %v8629_v1, 0  ;;  %vm9985_vm7 = vmmov %vm9973_vm2 }
  0xb2   : > { %7417 = vmatprep.mubr.msk.bf16.mxu1 %vm9971_vm11, %v8750_v0  ;;  %vm9986_vm11 = vmmov %vm9973_vm2 }
  0xb7   : > { %7586 = vmatmul.mubr.msk.bf16.gmra.mrb[24].mxu0 %vm9972_vm10, %v2824_v14  ;;  %vm9987_vm10 = vmmov %vm9984_vm1  ;;  %v6938_v14 = vcombine.low %v1475_v56, %v8102_v36  ;;  %v8898_v56 = vld [vmem:[#allocation2 + $0x88] sm:$0xff]  }
  0xb8   : > { %7589 = vmatprep.mubr.msk.bf16.mxu0 %vm9973_vm2, %v2826_v27  ;;  %v3252_v27 = vrot.slane %v8845_v54, 2  ;;  %vm9997_vm1 = vmmov %vm9973_vm2  ;;  %v3264_v36 = vrot.slane %v8898_v56, 2 }
  0xb9   : > { %7418 = vmatmul.mubr.msk.bf16.gmra.mrb[8].mxu1 %vm9974_vm8, %v8764_v26  ;;  %vm9988_vm8 = vmmov %vm9973_vm2  ;;  %v1482_v63 = vrot.slane %v6938_v14, 1  ;;  %v8104_v14 = vld [vmem:[#allocation2 + $0x30] sm:$0xff]  }
  0xba   : > { %7421 = vmatprep.mubr.msk.bf16.mxu1 %vm9975_vm4, %v8433_v42  ;;  %v3236_v42 = vrot.slane %v8779_v49, 2  ;;  %vm9989_vm4 = vmmov %vm9973_vm2  ;;  %v3253_v9 = vsel %vm2795_vm0, %v3250_v6, %v3252_v27 }
  0xbc   : > { %v3237_v20 = vsel %vm2795_vm0, %v3235_v52, %v3236_v42  ;;  %v8860_v52 = vld [vmem:[#allocation2 + $0x68] sm:$0xff]  }
  0xbf   : > { %7590 = vmatmul.mubr.msk.bf16.gmra.mrb[28].mxu0 %vm9976_vm12, %v2828_v4  ;;  %vm9990_vm12 = vmmov %vm9973_vm2  ;;  %v1483_v4 = vrot.slane %v8726_v55, 1  ;;  %v1485_v55 = vrot.slane %v8730_v5, 1 }
  0xc0   : > { %7593 = vmatprep.mubr.msk.bf16.mxu0 %vm9977_vm3, %v2830_v34  ;;  %vm9991_vm3 = vmmov %vm9973_vm2  ;;  %v8857_v34 = vld [vmem:[#allocation2 + $0x60] sm:$0xff]  }
  0xc1   : > { %7422 = vmatmul.mubr.msk.bf16.gmra.mrb[12].mxu1 %vm9978_vm13, %v8446_v60  ;;  %v3239_v60 = vsel %vm2795_vm0, %v3236_v42, %v3238_v45  ;;  %vm9992_vm13 = vmmov %vm9973_vm2  ;;  %v6918_v42 = vcombine.low %v8680_v44, %v780_v10  ;;  %v3256_v45 = vrot.slane %v8860_v52, 2  ;;  %v1487_v44 = vrot.slane %v8746_v38, 1 }
  0xc2   : > { %7425 = vmatprep.mubr.msk.bf16.mxu1 %vm9979_vm9, %v8470_v35  ;;  %v8805_v35 = vld [vmem:[#allocation2 + $0x30] sm:$0xff]   ;;  %vm9993_vm9 = vmmov %vm9973_vm2 }
  0xc7   : > { %7594 = vmatmul.mubr.msk.bf16.gmra.mrb[32].mxu0 %vm9980_vm6, %v2832_v19  ;;  %vm9994_vm6 = vmmov %vm9973_vm2 }
  0xc8   : > { %7599 = vmatprep.mubr.msk.bf16.mxu0 %vm9981_vm5, %v3237_v20  ;;  %vm9995_vm5 = vmmov %vm9973_vm2  ;;  %v3254_v20 = vrot.slane %v8857_v34, 2 }
  0xc9   : > { %7426 = vmatmul.mubr.msk.bf16.gmra.mrb[16].mxu1 %vm9982_vm15, %v8482_v58  ;;  %v3242_v58 = vrot.slane %v8805_v35, 2  ;;  %vm9996_vm15 = vmmov %vm9973_vm2 }
  0xca   : > { %7429 = vmatprep.mubr.msk.bf16.mxu1 %vm9983_vm14, %v8519_v15  ;;  %v3244_v15 = vrot.slane %v8810_v24, 2  ;;  %vm1481_vm14 = vcmask 1046528  }
  0xcb   : > { %v3243_v1 = vsel %vm2795_vm0, %v3240_v51, %v3242_v58  ;;  %v1484_v19 = vsel %vm1481_vm14, %v1482_v63, %v1483_v4  ;;  %v3255_v51 = vsel %vm2795_vm0, %v3252_v27, %v3254_v20  ;;  %v1493_v27 = vrot.slane %v8104_v14, 1 }
  0xcc   : > { %v3245_v47 = vsel %vm2795_vm0, %v3242_v58, %v3244_v15  ;;  %v3247_v29 = vsel %vm2795_vm0, %v3244_v15, %v3246_v12  ;;  %v1486_v58 = vsel %vm1481_vm14, %v1483_v4, %v1485_v55  ;;  %v1488_v15 = vsel %vm1481_vm14, %v1485_v55, %v1487_v44  ;;  %v8909_v4 = vld [vmem:[#allocation2 + $0x90] sm:$0xff]  }
  0xcf   : > { %7600 = vmatmul.mubr.msk.bf16.vlgmr.msra.gmra.mrb[0].mxu0 %vm9985_vm7, %v3239_v60  ;;  %vm9998_vm7 = vmmov %vm9997_vm1  ;;  %v8873_v60 = vld [vmem:[#allocation2 + $0x70] sm:$0xff]  }
  0xd0   : > { %7636 = vmatpush3.bf16.msra.mxu0 %v3774_v11  ;;  %7603 = vmatprep.mubr.msk.bf16.mxu0 %vm9986_vm11, %v3241_v21  ;;  %vm9999_vm11 = vmmov %vm9997_vm1  ;;  %v3257_v11 = vsel %vm2795_vm0, %v3254_v20, %v3256_v45  ;;  %v8876_v21 = vld [vmem:[#allocation2 + $0x78] sm:$0xff]  }
  0xd1   : > { %8010 = vmatprep.subr.msk.bf16.mxu0 %vm9987_vm10, %v8815_v61  ;;  %7430 = vmatmul.mubr.msk.bf16.gmra.mrb[20].mxu1 %vm9973_vm2, %v8559_v46  ;;  %vm10000_vm10 = vmmov %vm9997_vm1  ;;  %v3260_v38 = vrot.slane %v8876_v21, 2 }
  0xd2   : > { %7433 = vmatprep.mubr.msk.bf16.mxu1 %vm9988_vm8, %v8572_v23  ;;  %vm10001_vm2 = vmmov %vm9997_vm1 }
  0xd3   : > { %vm10002_vm8 = vmmov %vm9997_vm1 }
  0xd7   : > { %7604 = vmatmul.mubr.msk.bf16.gmra.mrb[4].mxu0 %vm9989_vm4, %v3243_v1  ;;  %vm10003_vm4 = vcmask 1041408   ;;  %v3258_v1 = vrot.slane %v8873_v60, 2 }
  0xd8   : > { %7607 = vmatprep.mubr.msk.bf16.mxu0 %vm9990_vm12, %v3245_v47  ;;  %v2005_v5 = vsel %vm10003_vm4, %v8721_v17, 0  ;;  %vm10004_vm12 = vmmov %vm9997_vm1  ;;  %v1489_v47 = vrot.slane %v8750_v0, 1  ;;  %v8103_v17 = vld [vmem:[%s9851_s1 + $0x8] sm:$0x3] }
  0xd9   : > { %7434 = vmatmul.mubr.msk.bf16.gmra.mrb[24].mxu1 %vm9991_vm3, %v8608_v8  ;;  %vm10005_vm3 = vmmov %vm9997_vm1  ;;  %v3259_v12 = vsel %vm2795_vm0, %v3256_v45, %v3258_v1  ;;  %v3266_v45 = vrot.slane %v8909_v4, 2 }
  0xda   : > { %7437 = vmatprep.mubr.msk.bf16.mxu1 %vm9992_vm13, %v8614_v18  ;;  %vm10006_vm13 = vmmov %vm10003_vm4  ;;  %v1490_v6 = vsel %vm1481_vm14, %v1487_v44, %v1489_v47  ;;  %v1492_v0 = vsel %vm1481_vm14, %v1489_v47, %v1491_v25  ;;  %v3553_v44 = vshll.u32 %v8777_v57, 16 }
  0xdb   : > { %vm10016_vm4 = vmmov %vm9997_vm1 }
  0xdf   : > { %7608 = vmatmul.mubr.msk.bf16.gmra.mrb[8].mxu0 %vm9993_vm9, %v3247_v29  ;;  %v8891_v29 = vld [vmem:[#allocation2 + $0x80] sm:$0xff]   ;;  %vm10007_vm9 = vmmov %vm9997_vm1 }
  0xe0   : > { %7611 = vmatprep.mubr.msk.bf16.mxu0 %vm9994_vm6, %v3249_v22  ;;  %v3261_v22 = vsel %vm2795_vm0, %v3258_v1, %v3260_v38  ;;  %vm10008_vm6 = vmmov %vm9997_vm1  ;;  %v3262_v26 = vrot.slane %v8891_v29, 2  ;;  %v3267_v1 = vsel %vm2795_vm0, %v3264_v36, %v3266_v45 }
  0xe1   : > { %7438 = vmatmul.mubr.msk.bf16.gmra.mrb[28].mxu1 %vm9995_vm5, %v8653_v43  ;;  %vm10009_vm5 = vmmov %vm9997_vm1 }
  0xe2   : > { %7441 = vmatprep.mubr.msk.bf16.mxu1 %vm9996_vm15, %v8660_v37  ;;  %vm10010_vm15 = vmmov %vm9997_vm1  ;;  %v3263_v10 = vsel %vm2795_vm0, %v3260_v38, %v3262_v26  ;;  %v8107_v38 = vld [vmem:[#allocation2 + $0x48] sm:$0xff]  }
  0xe3   : > { %v1499_v47 = vrot.slane %v8107_v38, 1 }
  0xe7   : > { %7612 = vmatmul.mubr.msk.bf16.gmra.mrb[12].mxu0 %vm9997_vm1, %v3251_v40  ;;  %v8105_v40 = vld [vmem:[#allocation2 + $0x38] sm:$0xff]  }
  0xe8   : > { %7615 = vmatprep.mubr.msk.bf16.mxu0 %vm9998_vm7, %v3253_v9  ;;  %v1495_v63 = vrot.slane %v8105_v40, 1  ;;  %v8911_v9 = vld [vmem:[#allocation2 + $0x98] sm:$0xff]   ;;  %vm10011_vm7 = vmmov %vm9997_vm1 }
  0xe9   : > { %7442 = vmatmul.mubr.msk.bf16.gmra.mrb[32].mxu1 %vm9999_vm11, %v6918_v42  ;;  %v3265_v42 = vsel %vm2795_vm0, %v3262_v26, %v3264_v36  ;;  %v3268_v55 = vrot.slane %v8911_v9, 2  ;;  %vm10012_vm11 = vmmov %vm9997_vm1  ;;  %v3567_v36 = vshrl.u32 %v8791_v62, 16 }
  0xea   : > { %7447 = vmatprep.mubr.msk.bf16.mxu1 %vm10000_vm10, %v1484_v19  ;;  %v1494_v19 = vsel %vm1481_vm14, %v1491_v25, %v1493_v27  ;;  %v1496_v20 = vsel %vm1481_vm14, %v1493_v27, %v1495_v63  ;;  %vm10013_vm10 = vmmov %vm9997_vm1  ;;  %v8076_v25 = vld [vmem:[#allocation2 + $0xa0] ss:$0 sps:$4 sm:$0x11]   ;;  %v3570_v27 = vshll.u32 %v8791_v62, 16 }
  0xeb   : > { %v3270_v14 = vrot.slane %v8076_v25, 2  ;;  %v3585_v25 = vshrl.u32 %v8805_v35, 16 }
  0xef   : > { %7616 = vmatmul.mubr.msk.bf16.gmra.mrb[16].mxu0 %vm10001_vm2, %v3255_v51  ;;  %v3550_v51 = vshrl.u32 %v8777_v57, 16  ;;  %vm10014_vm2 = vmmov %vm9997_vm1 }
  0xf0   : > { %7619 = vmatprep.mubr.msk.bf16.mxu0 %vm10002_vm8, %v3257_v11  ;;  %v3558_v11 = vshrl.u32 %v8779_v49, 16  ;;  %vm10015_vm8 = vmmov %vm9997_vm1 }
  0xf1   : > { %7448 = vmatmul.mubr.msk.bf16.vlgmr.msra.gmra.mrb[0].mxu1 %vm10004_vm12, %v1486_v58  ;;  %v3561_v58 = vshll.u32 %v8779_v49, 16  ;;  %vm3548_vm12 = vsmask.f32 5376 }
  0xf2   : > { %7451 = vmatprep.mubr.msk.bf16.mxu1 %vm10005_vm3, %v1488_v15  ;;  %7484 = vmatpush3.bf16.msra.mxu1 %v2005_v5  ;;  %v8106_v15 = vld [vmem:[#allocation2 + $0x40] sm:$0xff]   ;;  %v3560_v57 = vrot.slane %v3558_v11, 2  ;;  %vm10017_vm3 = vmmov %vm9997_vm1  ;;  %v3572_v11 = vrot.slane %v3570_v27, 3 }
  0xf3   : > { %8006 = vmatprep.subr.msk.bf16.mxu1 %vm10006_vm13, %v8103_v17  ;;  %v1497_v5 = vrot.slane %v8106_v15, 1  ;;  %v3552_v17 = vrot.slane %v3550_v51, 2  ;;  %v1503_v51 = vrot.slane %v8559_v46, 1  ;;  %vm10018_vm13 = vmmov %vm9997_vm1 }
  0xf5   : > { %v1500_v26 = vsel %vm1481_vm14, %v1497_v5, %v1499_v47 }
  0xf7   : > { %7620 = vmatmul.mubr.msk.bf16.gmra.mrb[20].mxu0 %vm10007_vm9, %v3259_v12  ;;  %v3269_v12 = vsel %vm2795_vm0, %v3266_v45, %v3268_v55  ;;  %v3271_v45 = vsel %vm2795_vm0, %v3268_v55, %v3270_v14  ;;  %vm10019_vm9 = vmmov %vm9997_vm1  ;;  %v3588_v55 = vshll.u32 %v8805_v35, 16 }
  0xf8   : > { %7623 = vmatprep.mubr.msk.bf16.mxu0 %vm10008_vm6, %v3261_v22  ;;  %v3555_v22 = vrot.slane %v3553_v44, 3  ;;  %v3569_v44 = vrot.slane %v3567_v36, 2  ;;  %vm10020_vm6 = vmmov %vm9997_vm1 }
  0xf9   : > { %7452 = vmatmul.mubr.msk.bf16.gmra.mrb[4].mxu1 %vm10009_vm5, %v1490_v6  ;;  %v3563_v6 = vrot.slane %v3561_v58, 3  ;;  %vm10021_vm5 = vmmov %vm9997_vm1 }
  0xfa   : > { %7455 = vmatprep.mubr.msk.bf16.mxu1 %vm10010_vm15, %v1492_v0  ;;  %v1498_v0 = vsel %vm1481_vm14, %v1495_v63, %v1497_v5  ;;  %v8108_v63 = vld [vmem:[#allocation2 + $0x50] sm:$0xff]   ;;  %vm10022_vm15 = vcmask 1041408  }
  0xfb   : > { %v3564_v40 = vor.u32 %v3563_v6, %v3560_v57  ;;  %v1507_v6 = vrot.slane %v8608_v8, 1  ;;  %v4088_v14 = vsel %vm10022_vm15, %v8815_v61, 0  ;;  %v3603_v8 = vshrl.u32 %v8828_v13, 16  ;;  %vm10034_vm15 = vmmov %vm9997_vm1 }
  0xfc   : > { %v3612_v61 = vshrl.u32 %v8831_v48, 16 }
  0xff   : > { %7624 = vmatmul.mubr.msk.bf16.gmra.mrb[24].mxu0 %vm9997_vm1, %v3263_v10  ;;  %v3556_v10 = vor.u32 %v3555_v22, %v3552_v17  ;;  %v3594_v17 = vshrl.u32 %v8810_v24, 16  ;;  %v3597_v22 = vshll.u32 %v8810_v24, 16 }
 0x100   : > { %7627 = vmatprep.mubr.msk.bf16.mxu0 %vm10011_vm7, %v3265_v42  ;;  %v3576_v42 = vshrl.u32 %v8794_v7, 16  ;;  %vm10023_vm7 = vmmov %vm9997_vm1 }
 0x101   : > { %7456 = vmatmul.mubr.msk.bf16.gmra.mrb[8].mxu1 %vm10012_vm11, %v1494_v19  ;;  %v3579_v19 = vshll.u32 %v8794_v7, 16  ;;  %v3565_v58 = vsel %vm3548_vm12, %v3556_v10, %v3564_v40  ;;  %v3596_v27 = vrot.slane %v3594_v17, 2  ;;  %v3599_v10 = vrot.slane %v3597_v22, 3  ;;  %vm10024_vm11 = vmmov %vm9997_vm1 }
 0x102   : > { %7459 = vmatprep.mubr.msk.bf16.mxu1 %vm10013_vm10, %v1496_v20  ;;  %v1501_v20 = vrot.slane %v8108_v63, 1  ;;  %v3578_v15 = vrot.slane %v3576_v42, 2  ;;  %vm10025_vm10 = vmmov %vm9997_vm1  ;;  %v3633_v17 = vshll.u32 %v8845_v54, 16  ;;  %v1513_v22 = vrot.slane %v8660_v37, 1 }
 0x103   : > { %v3581_v5 = vrot.slane %v3579_v19, 3  ;;  %v3606_v19 = vshll.u32 %v8828_v13, 16  ;;  %v3600_v63 = vor.u32 %v3599_v10, %v3596_v27  ;;  %v8077_v10 = vld [vmem:[#allocation2 + $0x8] sm:$0xfe]  }
 0x104   : > { %v1504_v38 = vsel %vm1481_vm14, %v1501_v20, %v1503_v51 }
 0x105   : > { %v3582_v46 = vor.u32 %v3581_v5, %v3578_v15  ;;  %v3614_v5 = vrot.slane %v3612_v61, 2  ;;  %v1915_v61 = vrot.slane %v8077_v10, 1  ;;  %v8081_v10 = vld [vmem:[#allocation2 + $0x28] sm:$0xff]  }
 0x107   : > { %7628 = vmatmul.mubr.msk.bf16.gmra.mrb[28].mxu0 %vm10014_vm2, %v3267_v1  ;;  %v1502_v1 = vsel %vm1481_vm14, %v1499_v47, %v1501_v20  ;;  %v1505_v47 = vrot.slane %v8572_v23, 1  ;;  %v3615_v20 = vshll.u32 %v8831_v48, 16  ;;  %vm10026_vm2 = vmmov %vm9997_vm1 }
 0x108   : > { %7631 = vmatprep.mubr.msk.bf16.mxu0 %vm10015_vm8, %v3269_v12  ;;  %v3573_v12 = vor.u32 %v3572_v11, %v3569_v44  ;;  %v1511_v44 = vrot.slane %v8653_v43, 1  ;;  %v3605_v11 = vrot.slane %v3603_v8, 2  ;;  %vm10027_vm8 = vmmov %vm9997_vm1 }
 0x109   : > { %7460 = vmatmul.mubr.msk.bf16.gmra.mrb[12].mxu1 %vm10016_vm4, %v1498_v0  ;;  %v3587_v0 = vrot.slane %v3585_v25, 2  ;;  %v1506_v42 = vsel %vm1481_vm14, %v1503_v51, %v1505_v47  ;;  %v1508_v23 = vsel %vm1481_vm14, %v1505_v47, %v1507_v6  ;;  %vm10028_vm4 = vmmov %vm9997_vm1 }
 0x10a   : > { %7463 = vmatprep.mubr.msk.bf16.mxu1 %vm10017_vm3, %v1500_v26  ;;  %v3574_v57 = vsel %vm3548_vm12, %v3564_v40, %v3573_v12  ;;  %v3590_v26 = vrot.slane %v3588_v55, 3  ;;  %v3583_v36 = vsel %vm3548_vm12, %v3573_v12, %v3582_v46  ;;  %v3624_v55 = vshll.u32 %v8842_v30, 16  ;;  %vm10029_vm3 = vmmov %vm9997_vm1 }
 0x10b   : > { %v1514_v27 = vsel %vm1481_vm14, %v1511_v44, %v1513_v22 }
 0x10c   : > { %v3591_v40 = vor.u32 %v3590_v26, %v3587_v0  ;;  %v3626_v0 = vrot.slane %v3624_v55, 3 }
 0x10e   : > { %v3592_v51 = vsel %vm3548_vm12, %v3582_v46, %v3591_v40  ;;  %v3601_v15 = vsel %vm3548_vm12, %v3591_v40, %v3600_v63  ;;  %v3630_v46 = vshrl.u32 %v8845_v54, 16  ;;  %v3639_v40 = vshrl.u32 %v8857_v34, 16 }
 0x10f   : > { %7632 = vmatmul.mubr.msk.bf16.gmra.mrb[32].mxu0 %vm10018_vm13, %v3271_v45  ;;  %v1509_v45 = vrot.slane %v8614_v18, 1  ;;  %v3621_v18 = vshrl.u32 %v8842_v30, 16  ;;  %vm10030_vm13 = vmmov %vm9997_vm1 }
 0x110   : > { %7637 = vmatprep.mubr.msk.bf16.mxu0 %vm10019_vm9, %v3565_v58  ;;  %v3608_v58 = vrot.slane %v3606_v19, 3  ;;  %vm10031_vm9 = vmmov %vm9997_vm1  ;;  %v3648_v19 = vshrl.u32 %v8860_v52, 16 }
 0x111   : > { %7464 = vmatmul.mubr.msk.bf16.gmra.mrb[16].mxu1 %vm10020_vm6, %v1502_v1  ;;  %v3617_v1 = vrot.slane %v3615_v20, 3  ;;  %v1512_v12 = vsel %vm1481_vm14, %v1509_v45, %v1511_v44  ;;  %vm10032_vm6 = vmmov %vm9997_vm1 }
 0x112   : > { %7467 = vmatprep.mubr.msk.bf16.mxu1 %vm10021_vm5, %v1504_v38  ;;  %v1510_v38 = vsel %vm1481_vm14, %v1507_v6, %v1509_v45  ;;  %v3609_v25 = vor.u32 %v3608_v58, %v3605_v11  ;;  %v3623_v6 = vrot.slane %v3621_v18, 2  ;;  %vm10033_vm5 = vmmov %vm9997_vm1  ;;  %v3650_v58 = vrot.slane %v3648_v19, 2 }
 0x113   : > { %v3618_v43 = vor.u32 %v3617_v1, %v3614_v5  ;;  %v8079_v5 = vld [vmem:[#allocation2 + $0x18] sm:$0xff]   ;;  %v3660_v18 = vshll.u32 %v8873_v60, 16  ;;  %v3687_v19 = vshll.u32 %v8898_v56, 16 }
 0x114   : > { %v3610_v47 = vsel %vm3548_vm12, %v3600_v63, %v3609_v25  ;;  %v3627_v37 = vor.u32 %v3626_v0, %v3623_v6  ;;  %v3651_v63 = vshll.u32 %v8860_v52, 16 }
 0x115   : > { %v3619_v26 = vsel %vm3548_vm12, %v3609_v25, %v3618_v43  ;;  %v3657_v25 = vshrl.u32 %v8873_v60, 16  ;;  %v3662_v0 = vrot.slane %v3660_v18, 3 }
 0x116   : > { %v3628_v20 = vsel %vm3548_vm12, %v3618_v43, %v3627_v37  ;;  %v3666_v43 = vshrl.u32 %v8876_v21, 16 }
 0x117   : > { %7638 = vmatmul.mubr.msk.bf16.vlgmr.msra.gmra.mrb[0].mxu0 %vm9997_vm1, %v3574_v57  ;;  %v1515_v57 = vrot.slane %v8691_v16, 1  ;;  %v3642_v16 = vshll.u32 %v8857_v34, 16  ;;  %v3659_v6 = vrot.slane %v3657_v25, 2  ;;  %v3696_v25 = vshll.u32 %v8909_v4, 16 }
 0x118   : > { %7674 = vmatpush3.bf16.msra.mxu0 %v4088_v14  ;;  %7641 = vmatprep.mubr.msk.bf16.mxu0 %vm10023_vm7, %v3583_v36  ;;  %v3632_v14 = vrot.slane %v3630_v46, 2  ;;  %v3635_v36 = vrot.slane %v3633_v17, 3  ;;  %v3669_v46 = vshll.u32 %v8876_v21, 16  ;;  %vm10035_vm7 = vmmov %vm9997_vm1  ;;  %v1918_v17 = vrot.slane %v8079_v5, 1  ;;  %v8083_v5 = vld [vmem:[#allocation2 + $0x38] sm:$0xff]  }
 0x119   : > { %7468 = vmatmul.mubr.msk.bf16.gmra.mrb[20].mxu1 %vm10024_vm11, %v1506_v42  ;;  %v1516_v42 = vsel %vm1481_vm14, %v1513_v22, %v1515_v57  ;;  %v3644_v44 = vrot.slane %v3642_v16, 3  ;;  %vm10036_vm11 = vmmov %vm9997_vm1 }
 0x11a   : > { %7471 = vmatprep.mubr.msk.bf16.mxu1 %vm10025_vm10, %v1508_v23  ;;  %v8078_v23 = vld [vmem:[#allocation2 + $0x10] sm:$0xff]   ;;  %v3636_v8 = vor.u32 %v3635_v36, %v3632_v14  ;;  %v3668_v14 = vrot.slane %v3666_v43, 2  ;;  %v3671_v36 = vrot.slane %v3669_v46, 3  ;;  %vm10037_vm10 = vmmov %vm9997_vm1  ;;  %v3705_v43 = vshll.u32 %v8911_v9, 16 }
 0x11b   : > { %v1916_v45 = vrot.slane %v8078_v23, 1  ;;  %v3675_v23 = vshrl.u32 %v8891_v29, 16  ;;  %v1926_v46 = vrot.slane %v8083_v5, 1 }
 0x11c   : > { %v3637_v11 = vsel %vm3548_vm12, %v3627_v37, %v3636_v8  ;;  %v8082_v37 = vld [vmem:[#allocation2 + $0x30] sm:$0xff]   ;;  %v3672_v16 = vor.u32 %v3671_v36, %v3668_v14  ;;  %v3707_v36 = vrot.slane %v3705_v43, 3  ;;  %v8090_v43 = vld [vmem:[#allocation2 + $0x68] sm:$0xff]  }
 0x11d   : > { %v1917_v1 = vsel %vm1481_vm14, %v1915_v61, %v1916_v45 }
 0x11f   : > { %7642 = vmatmul.mubr.msk.bf16.gmra.mrb[4].mxu0 %vm10026_vm2, %v3592_v51  ;;  %v3641_v51 = vrot.slane %v3639_v40, 2  ;;  %vm10038_vm2 = vmmov %vm9997_vm1  ;;  %v3678_v40 = vshll.u32 %v8891_v29, 16 }
 0x120   : > { %7645 = vmatprep.mubr.msk.bf16.mxu0 %vm10027_vm8, %v3601_v15  ;;  %v3653_v15 = vrot.slane %v3651_v63, 3  ;;  %vm10039_vm8 = vmmov %vm9997_vm1  ;;  %v1922_v63 = vrot.slane %v8081_v10, 1  ;;  %v8085_v10 = vld [vmem:[#allocation2 + $0x48] sm:$0xff]  }
 0x121   : > { %7472 = vmatmul.mubr.msk.bf16.gmra.mrb[24].mxu1 %vm10028_vm4, %v1510_v38  ;;  %v3645_v38 = vor.u32 %v3644_v44, %v3641_v51  ;;  %vm10040_vm4 = vmmov %vm9997_vm1  ;;  %v3680_v51 = vrot.slane %v3678_v40, 3 }
 0x122   : > { %7475 = vmatprep.mubr.msk.bf16.mxu1 %vm10029_vm3, %v1512_v12  ;;  %v8080_v12 = vld [vmem:[#allocation2 + $0x20] sm:$0xff]   ;;  %v3654_v55 = vor.u32 %v3653_v15, %v3650_v58  ;;  %v3689_v58 = vrot.slane %v3687_v19, 3  ;;  %vm10041_vm3 = vmmov %vm9997_vm1  ;;  %v1930_v19 = vrot.slane %v8085_v10, 1 }
 0x123   : > { %v3646_v22 = vsel %vm3548_vm12, %v3636_v8, %v3645_v38  ;;  %v3684_v8 = vshrl.u32 %v8898_v56, 16  ;;  %v8094_v10 = vld [vmem:[#allocation2 + $0x80] sm:$0xff]  }
 0x127   : > { %7646 = vmatmul.mubr.msk.bf16.gmra.mrb[8].mxu0 %vm10030_vm13, %v3610_v47  ;;  %v1920_v47 = vrot.slane %v8080_v12, 1  ;;  %vm10042_vm13 = vmmov %vm9997_vm1  ;;  %v3693_v12 = vshrl.u32 %v8909_v4, 16 }
 0x128   : > { %7649 = vmatprep.mubr.msk.bf16.mxu0 %vm10031_vm9, %v3619_v26  ;;  %v3655_v26 = vsel %vm3548_vm12, %v3645_v38, %v3654_v55  ;;  %vm10043_vm9 = vmmov %vm9997_vm1 }
 0x129   : > { %7476 = vmatmul.mubr.msk.bf16.gmra.mrb[28].mxu1 %vm10032_vm6, %v1514_v27  ;;  %v1919_v27 = vsel %vm1481_vm14, %v1916_v45, %v1918_v17  ;;  %v3677_v45 = vrot.slane %v3675_v23, 2  ;;  %v1923_v15 = vsel %vm1481_vm14, %v1920_v47, %v1922_v63  ;;  %vm10044_vm6 = vmmov %vm9997_vm1 }
 0x12a   : > { %7479 = vmatprep.mubr.msk.bf16.mxu1 %vm10033_vm5, %v1516_v42  ;;  %v1921_v42 = vsel %vm1481_vm14, %v1918_v17, %v1920_v47  ;;  %v3695_v47 = vrot.slane %v3693_v12, 2  ;;  %vm10045_vm5 = vmmov %vm9997_vm1 }
 0x12b   : > { %v3681_v38 = vor.u32 %v3680_v51, %v3677_v45 }
 0x12d   : > { %v3682_v17 = vsel %vm3548_vm12, %v3672_v16, %v3681_v38 }
 0x12f   : > { %7650 = vmatmul.mubr.msk.bf16.gmra.mrb[12].mxu0 %vm10034_vm15, %v3628_v20  ;;  %v1924_v20 = vrot.slane %v8082_v37, 1  ;;  %vm10046_vm15 = vmmov %vm9997_vm1  ;;  %v8086_v37 = vld [vmem:[#allocation2 + $0x50] sm:$0xff]  }
 0x130   : > { %7653 = vmatprep.mubr.msk.bf16.mxu0 %vm9997_vm1, %v3637_v11  ;;  %v3686_v11 = vrot.slane %v3684_v8, 2  ;;  %v3989_v8 = vld [vmem:[#allocation2 + $0x10] sm:$0x8] }
 0x131   : > { %7480 = vmatmul.mubr.msk.bf16.gmra.mrb[32].mxu1 %vm10035_vm7, %v1515_v57  ;;  %v3663_v57 = vor.u32 %v3662_v0, %v3659_v6  ;;  %v3698_v6 = vrot.slane %v3696_v25, 3  ;;  %v9032_v0 = vld [vmem:[#allocation2 + $0xa0] ss:$0 sps:$4 sm:$0x33]   ;;  %vm10047_vm7 = vmmov %vm9997_vm1 }
 0x132   : > { %7485 = vmatprep.mubr.msk.bf16.mxu1 %vm10036_vm11, %v1917_v1  ;;  %v1925_v1 = vsel %vm1481_vm14, %v1922_v63, %v1924_v20  ;;  %v3690_v18 = vor.u32 %v3689_v58, %v3686_v11  ;;  %v3711_v23 = vshrl.u32 %v9032_v0, 16  ;;  %v3714_v40 = vshll.u32 %v9032_v0, 16  ;;  %vm10048_vm11 = vmmov %vm9997_vm1  ;;  %v8087_v58 = vld [vmem:[#allocation2 + $0x58] sm:$0xff]  }
 0x133   : > { %v3664_v61 = vsel %vm3548_vm12, %v3654_v55, %v3663_v57  ;;  %v3673_v44 = vsel %vm3548_vm12, %v3663_v57, %v3672_v16  ;;  %v3702_v55 = vshrl.u32 %v8911_v9, 16  ;;  %v3699_v57 = vor.u32 %v3698_v6, %v3695_v47 }
 0x134   : > { %v3716_v45 = vrot.slane %v3714_v40, 3  ;;  %v1938_v47 = vrot.slane %v8090_v43, 1 }
 0x135   : > { %v3704_v14 = vrot.slane %v3702_v55, 2  ;;  %v3700_v63 = vsel %vm3548_vm12, %v3690_v18, %v3699_v57 }
 0x137   : > { %7654 = vmatmul.mubr.msk.bf16.gmra.mrb[16].mxu0 %vm10037_vm10, %v3646_v22  ;;  %v3708_v16 = vor.u32 %v3707_v36, %v3704_v14  ;;  %vm10049_vm10 = vmmov %vm9997_vm1 }
 0x138   : > { %7657 = vmatprep.mubr.msk.bf16.mxu0 %vm10038_vm2, %v3655_v26  ;;  %v3691_v26 = vsel %vm3548_vm12, %v3681_v38, %v3690_v18  ;;  %vm10050_vm2 = vmmov %vm9997_vm1 }
 0x139   : > { %7486 = vmatmul.mubr.msk.bf16.vlgmr.msra.gmra.mrb[0].mxu1 %vm10039_vm8, %v1919_v27  ;;  %v1927_v27 = vsel %vm1481_vm14, %v1924_v20, %v1926_v46  ;;  %v3713_v20 = vrot.slane %v3711_v23, 2  ;;  %v3709_v51 = vsel %vm3548_vm12, %v3699_v57, %v3708_v16  ;;  %vm3995_vm8 = vcmask 1044480  }
 0x13a   : > { %7489 = vmatprep.mubr.msk.bf16.mxu1 %vm10040_vm4, %v1921_v42  ;;  %7712 = vmatpush3.bf16.msra.mxu1 %v8157_v3  ;;  %v8084_v3 = vld [vmem:[#allocation2 + $0x40] sm:$0xff]   ;;  %vm10051_vm4 = vmmov %vm9997_vm1  ;;  %v1944_v23 = vrot.slane %v8094_v10, 1  ;;  %v4021_v10 = vrot.slane %v8876_v21, 3 }
 0x13b   : > { %v1928_v22 = vrot.slane %v8084_v3, 1  ;;  %v3717_v5 = vor.u32 %v3716_v45, %v3713_v20  ;;  %v3997_v3 = vrot.slane %v8779_v49, 3  ;;  %v3999_v49 = vrot.slane %v8791_v62, 3 }
 0x13d   : > { %v1929_v42 = vsel %vm1481_vm14, %v1926_v46, %v1928_v22  ;;  %v1931_v11 = vsel %vm1481_vm14, %v1928_v22, %v1930_v19  ;;  %v3718_v12 = vsel %vm3548_vm12, %v3708_v16, %v3717_v5  ;;  %v4001_v22 = vrot.slane %v8794_v7, 3  ;;  %vm10055_vm12 = vmmov %vm9997_vm1 }
 0x13e   : > { %v4000_v6 = vsel %vm3995_vm8, %v3997_v3, %v3999_v49  ;;  %v4003_v7 = vrot.slane %v8805_v35, 3 }
 0x13f   : > { %7658 = vmatmul.mubr.msk.bf16.gmra.mrb[20].mxu0 %vm10041_vm3, %v3664_v61  ;;  %v1932_v61 = vrot.slane %v8086_v37, 1  ;;  %vm10052_vm3 = vmmov %vm9997_vm1  ;;  %v4002_v14 = vsel %vm3995_vm8, %v3999_v49, %v4001_v22  ;;  %v4017_v49 = vrot.slane %v8860_v52, 3 }
 0x140   : > { %7661 = vmatprep.mubr.msk.bf16.mxu0 %vm10042_vm13, %v3673_v44  ;;  %v7111_v44 = vcombine.low %v3989_v8, %v8768_v32  ;;  %v1934_v32 = vrot.slane %v8087_v58, 1  ;;  %vm10053_vm13 = vmmov %vm9997_vm1  ;;  %v4004_v37 = vsel %vm3995_vm8, %v4001_v22, %v4003_v7  ;;  %v8095_v8 = vld [vmem:[#allocation2 + $0x88] sm:$0xff]   ;;  %v2482_v22 = vshll.u32 %v8735_v53, 16 }
 0x141   : > { %7490 = vmatmul.mubr.msk.bf16.gmra.mrb[4].mxu1 %vm10043_vm9, %v1923_v15  ;;  %v1933_v15 = vsel %vm1481_vm14, %v1930_v19, %v1932_v61  ;;  %vm10054_vm9 = vmmov %vm9997_vm1  ;;  %v8096_v19 = vld [vmem:[#allocation2 + $0x90] sm:$0xff]  }
 0x142   : > { %7493 = vmatprep.mubr.msk.bf16.mxu1 %vm10044_vm6, %v1925_v1  ;;  %v8089_v1 = vld [vmem:[#allocation2 + $0x60] sm:$0xff]   ;;  %v3996_v38 = vrot.slane %v7111_v44, 3  ;;  %v1935_v55 = vsel %vm1481_vm14, %v1932_v61, %v1934_v32  ;;  %vm10056_vm6 = vmmov %vm9997_vm1  ;;  %v1946_v61 = vrot.slane %v8095_v8, 1  ;;  %v1948_v45 = vrot.slane %v8096_v19, 1 }
 0x143   : > { %v1936_v25 = vrot.slane %v8089_v1, 1  ;;  %v2455_v44 = vshll.u32 %v8698_v50, 16  ;;  %v4013_v1 = vrot.slane %v8845_v54, 3 }
 0x144   : > { %v3998_v18 = vsel %vm3995_vm8, %v3996_v38, %v3997_v3  ;;  %v1947_v58 = vsel %vm1481_vm14, %v1944_v23, %v1946_v61  ;;  %v2464_v38 = vshll.u32 %v8710_v31, 16 }
 0x145   : > { %v1937_v46 = vsel %vm1481_vm14, %v1934_v32, %v1936_v25  ;;  %v1939_v36 = vsel %vm1481_vm14, %v1936_v25, %v1938_v47  ;;  %v2457_v5 = vrot.slane %v2455_v44, 2  ;;  %v2473_v25 = vshll.u32 %v8712_v39, 16 }
 0x147   : > { %7662 = vmatmul.mubr.msk.bf16.gmra.mrb[24].mxu0 %vm10045_vm5, %v3682_v17  ;;  %v8092_v17 = vld [vmem:[#allocation2 + $0x70] sm:$0xff]   ;;  %vm10057_vm5 = vmmov %vm9997_vm1 }
 0x148   : > { %7665 = vmatprep.mubr.msk.bf16.mxu0 %vm10046_vm15, %v3691_v26  ;;  %v1940_v26 = vrot.slane %v8092_v17, 1  ;;  %vm10058_vm15 = vmmov %vm9997_vm1  ;;  %v2479_v17 = vshrl.u32 %v8735_v53, 16  ;;  %v4019_v53 = vrot.slane %v8873_v60, 3  ;;  %v2509_v60 = vshll.u32 %v8758_v41, 16 }
 0x149   : > { %7494 = vmatmul.mubr.msk.bf16.gmra.mrb[8].mxu1 %vm9997_vm1, %v1927_v27  ;;  %v8093_v27 = vld [vmem:[#allocation2 + $0x78] sm:$0xff]  }
 0x14a   : > { %7497 = vmatprep.mubr.msk.bf16.mxu1 %vm10047_vm7, %v1929_v42  ;;  %v1941_v62 = vsel %vm1481_vm14, %v1938_v47, %v1940_v26  ;;  %v4005_v42 = vrot.slane %v8810_v24, 3  ;;  %v1942_v57 = vrot.slane %v8093_v27, 1  ;;  %vm10059_vm7 = vmmov %vm9997_vm1  ;;  %v4007_v24 = vrot.slane %v8828_v13, 3 }
 0x14b   : > { %v1949_v13 = vsel %vm1481_vm14, %v1946_v61, %v1948_v45  ;;  %v4025_v61 = vrot.slane %v8898_v56, 3  ;;  %v4027_v56 = vrot.slane %v8909_v4, 3 }
 0x14c   : > { %v4006_v40 = vsel %vm3995_vm8, %v4003_v7, %v4005_v42  ;;  %v1943_v16 = vsel %vm1481_vm14, %v1940_v26, %v1942_v57  ;;  %v1945_v35 = vsel %vm1481_vm14, %v1942_v57, %v1944_v23  ;;  %v4008_v20 = vsel %vm3995_vm8, %v4005_v42, %v4007_v24  ;;  %vm10067_vm14 = vmmov %vm9997_vm1 }
 0x14d   : > { %v2497_v42 = vshrl.u32 %v8755_v2, 16  ;;  %v2500_v57 = vshll.u32 %v8755_v2, 16  ;;  %v4023_v2 = vrot.slane %v8891_v29, 3  ;;  %v2515_v29 = vshll.u32 %v8773_v28, 16 }
 0x14e   : > { %v4031_v28 = vrot.slane %v9032_v0, 3 }
 0x14f   : > { %7666 = vmatmul.mubr.msk.bf16.gmra.mrb[28].mxu0 %vm10048_vm11, %v3700_v63  ;;  %vm10060_vm11 = vmmov %vm9997_vm1  ;;  %v4009_v63 = vrot.slane %v8831_v48, 3  ;;  %v4011_v48 = vrot.slane %v8842_v30, 3  ;;  %v2499_v8 = vrot.slane %v2497_v42, 1 }
 0x150   : > { %7669 = vmatprep.mubr.msk.bf16.mxu0 %vm10049_vm10, %v3709_v51  ;;  %vm10061_vm10 = vmmov %vm9997_vm1  ;;  %v2452_v51 = vshrl.u32 %v8698_v50, 16  ;;  %v2461_v50 = vshrl.u32 %v8710_v31, 16  ;;  %v4015_v31 = vrot.slane %v8857_v34, 3  ;;  %v2491_v34 = vshll.u32 %v8740_v59, 16 }
 0x151   : > { %7498 = vmatmul.mubr.msk.bf16.gmra.mrb[12].mxu1 %vm10050_vm2, %v1931_v11  ;;  %vm10062_vm2 = vmmov %vm9997_vm1  ;;  %v4010_v11 = vsel %vm3995_vm8, %v4007_v24, %v4009_v63  ;;  %v4012_v3 = vsel %vm3995_vm8, %v4009_v63, %v4011_v48  ;;  %v4014_v30 = vsel %vm3995_vm8, %v4011_v48, %v4013_v1  ;;  %v2511_v63 = vrot.slane %v2509_v60, 2 }
 0x152   : > { %7501 = vmatprep.mubr.msk.bf16.mxu1 %vm10051_vm4, %v1933_v15  ;;  %vm10063_vm4 = vmmov %vm9997_vm1  ;;  %v2454_v15 = vrot.slane %v2452_v51, 1  ;;  %v2463_v54 = vrot.slane %v2461_v50, 1  ;;  %v4016_v47 = vsel %vm3995_vm8, %v4013_v1, %v4015_v31  ;;  %v4018_v26 = vsel %vm3995_vm8, %v4015_v31, %v4017_v49 }
 0x153   : > { %v2493_v7 = vrot.slane %v2491_v34, 2  ;;  %v4026_v51 = vsel %vm3995_vm8, %v4023_v2, %v4025_v61  ;;  %v4028_v48 = vsel %vm3995_vm8, %v4025_v61, %v4027_v56 }
 0x154   : > { %v2458_v32 = vor.u32 %v2457_v5, %v2454_v15 }
 0x157   : > { %7670 = vmatmul.mubr.msk.bf16.gmra.mrb[32].mxu0 %vm10052_vm3, %v3718_v12  ;;  %vm10064_vm3 = vmmov %vm9997_vm1  ;;  %v2470_v12 = vshrl.u32 %v8712_v39, 16 }
 0x158   : > { %7675 = vmatprep.mubr.msk.bf16.mxu0 %vm10053_vm13, %v3998_v18  ;;  %vm10065_vm13 = vmmov %vm9997_vm1  ;;  %v2466_v18 = vrot.slane %v2464_v38, 2 }
 0x159   : > { %7502 = vmatmul.mubr.msk.bf16.gmra.mrb[16].mxu1 %vm10054_vm9, %v1935_v55  ;;  %vm10066_vm9 = vmmov %vm9997_vm1  ;;  %v2472_v43 = vrot.slane %v2470_v12, 1 }
 0x15a   : > { %7505 = vmatprep.mubr.msk.bf16.mxu1 %vm10055_vm12, %v1937_v46  ;;  %vm10068_vm12 = vsmask.f32 6400  ;;  %v2475_v46 = vrot.slane %v2473_v25, 2  ;;  %v2467_v39 = vor.u32 %v2466_v18, %v2463_v54 }
 0x15b   : > { %v2459_v55 = vsel %vm10068_vm12, %v8583_v33, %v2458_v32 }
 0x15c   : > { %v2476_v33 = vor.u32 %v2475_v46, %v2472_v43 }
 0x15f   : > { %7676 = vmatmul.mubr.msk.bf16.vlgmr.msra.gmra.mrb[0].mxu0 %vm10056_vm6, %v4000_v6  ;;  %vm10069_vm6 = vmmov %vm9997_vm1  ;;  %v2488_v6 = vshrl.u32 %v8740_v59, 16 }
 0x160   : > { %7679 = vmatprep.mubr.msk.bf16.mxu0 %vm10057_vm5, %v4002_v14  ;;  %vm10070_vm5 = vmmov %vm9997_vm1  ;;  %v2481_v14 = vrot.slane %v2479_v17, 1  ;;  %v4345_v17 = vlaneseq }
 0x161   : > { %7506 = vmatmul.mubr.msk.bf16.gmra.mrb[20].mxu1 %vm10058_vm15, %v1939_v36  ;;  %vm10071_vm15 = vmmov %vm9997_vm1  ;;  %v2484_v36 = vrot.slane %v2482_v22, 2 }
 0x162   : > { %7509 = vmatprep.mubr.msk.bf16.mxu1 %vm9997_vm1, %v1941_v62  ;;  %vm10072_vm1 = vmmov %vm10068_vm12  ;;  %v2490_v62 = vrot.slane %v2488_v6, 1 }
 0x163   : > { %v2468_v52 = vsel %vm10072_vm1, %v2458_v32, %v2467_v39  ;;  %v2485_v59 = vor.u32 %v2484_v36, %v2481_v14  ;;  %vm10081_vm12 = vmmov %vm10062_vm2 }
 0x164   : > { %v2494_v23 = vor.u32 %v2493_v7, %v2490_v62 }
 0x167   : > { %7680 = vmatmul.mubr.msk.bf16.gmra.mrb[4].mxu0 %vm10059_vm7, %v4004_v37  ;;  %vm10073_vm7 = vmmov %vm10062_vm2  ;;  %v4020_v37 = vsel %vm3995_vm8, %v4017_v49, %v4019_v53  ;;  %v8118_v49 = vmov 1983009808  }
 0x168   : > { %7683 = vmatprep.mubr.msk.bf16.mxu0 %vm10060_vm11, %v4006_v40  ;;  %vm10074_vm11 = vmmov %vm10072_vm1  ;;  %v2506_v40 = vshrl.u32 %v8758_v41, 16 }
 0x169   : > { %7510 = vmatmul.mubr.msk.bf16.gmra.mrb[24].mxu1 %vm10061_vm10, %v1943_v16  ;;  %v2477_v27 = vsel %vm10074_vm11, %v2467_v39, %v2476_v33  ;;  %vm10075_vm10 = vmmov %vm10062_vm2  ;;  %v4022_v16 = vsel %vm3995_vm8, %v4019_v53, %v4021_v10  ;;  %v4343_v39 = vunpack.c.l.s4 %v8118_v49 }
 0x16a   : > { %7513 = vmatprep.mubr.msk.bf16.mxu1 %vm10062_vm2, %v1945_v35  ;;  %v2502_v35 = vrot.slane %v2500_v57, 2  ;;  %v2508_v19 = vrot.slane %v2506_v40, 1  ;;  %vm10086_vm11 = vmmov %vm10062_vm2 }
 0x16c   : > { %v2503_v41 = vor.u32 %v2502_v35, %v2499_v8 }
 0x16f   : > { %7684 = vmatmul.mubr.msk.bf16.gmra.mrb[8].mxu0 %vm10063_vm4, %v4008_v20  ;;  %vm10076_vm4 = vmmov %vm10062_vm2  ;;  %v4024_v20 = vsel %vm3995_vm8, %v4021_v10, %v4023_v2 }
 0x170   : > { %7687 = vmatprep.mubr.msk.bf16.mxu0 %vm10064_vm3, %v4010_v11  ;;  %vm10077_vm3 = vmmov %vm10072_vm1 }
 0x171   : > { %7514 = vmatmul.mubr.msk.bf16.gmra.mrb[28].mxu1 %vm10065_vm13, %v1947_v58  ;;  %v2486_v21 = vsel %vm10077_vm3, %v2476_v33, %v2485_v59  ;;  %vm10078_vm13 = vmmov %vm10062_vm2  ;;  %v4029_v58 = vrot.slane %v8911_v9, 3  ;;  %v4346_v33 = vshrl.u32 %v4345_v17, 7 }
 0x172   : > { %7517 = vmatprep.mubr.msk.bf16.mxu1 %vm10066_vm9, %v1949_v13  ;;  %vm10079_vm9 = vmmov %vm10072_vm1  ;;  %v2517_v13 = vrot.slane %v2515_v29, 2 }
 0x173   : > { %v2495_v24 = vsel %vm10079_vm9, %v2485_v59, %v2494_v23  ;;  %v4030_v15 = vsel %vm3995_vm8, %v4027_v56, %v4029_v58  ;;  %vm10089_vm3 = vmmov %vm10076_vm4  ;;  %v4032_v4 = vsel %vm3995_vm8, %v4029_v58, %v4031_v28  ;;  %vm5810_vm8 = vcmask 64512  }
 0x174   : > { %vm10091_vm9 = vmmov %vm10089_vm3 }
 0x177   : > { %7688 = vmatmul.mubr.msk.bf16.gmra.mrb[12].mxu0 %vm10067_vm14, %v4012_v3  ;;  %vm10080_vm14 = vmmov %vm10062_vm2 }
 0x178   : > { %7691 = vmatprep.mubr.msk.bf16.mxu0 %vm10069_vm6, %v4014_v30  ;;  %vm10082_vm6 = vmmov %vm10062_vm2 }
 0x179   : > { %7518 = vmatmul.mubr.msk.bf16.gmra.mrb[32].mxu1 %vm10070_vm5, %v1948_v45  ;;  %v2512_v45 = vor.u32 %v2511_v63, %v2508_v19  ;;  %vm10083_vm5 = vmmov %vm10072_vm1 }
 0x17a   : > { %7543 = vmatprep.mubr.msk.bf16.mxu1 %vm10071_vm15, %v2459_v55  ;;  %v2504_v44 = vsel %vm10083_vm5, %v2494_v23, %v2503_v41  ;;  %vm10084_vm15 = vmmov %vm10062_vm2 }
 0x17b   : > { %v2513_v11 = vsel %vm10072_vm1, %v2503_v41, %v2512_v45 }
 0x17f   : > { %7692 = vmatmul.mubr.msk.bf16.gmra.mrb[16].mxu0 %vm10073_vm7, %v4016_v47  ;;  %vm10085_vm7 = vmmov %vm10062_vm2  ;;  %v4344_v47 = vunpack.c.0.s8 %v4343_v39 }
 0x180   : > { %7695 = vmatprep.mubr.msk.bf16.mxu0 %vm10075_vm10, %v4018_v26  ;;  %vm10087_vm10 = vmmov %vm10062_vm2 }
 0x181   : > { %7544 = vmatmul.mubr.msk.bf16.vlgmr.msra.gmra.mrb[20].mxu1 %vm10062_vm2, %v2468_v52  ;;  %vm10088_vm2 = vmmov %vm10072_vm1  ;;  %v9189_v52 = vsub.s32 %v4344_v47, %v4346_v33 }
 0x182   : > { %7547 = vmatprep.mubr.msk.bf16.mxu1 %vm10076_vm4, %v2477_v27  ;;  %v2518_v5 = vsel %vm10088_vm2, %v2512_v45, %v2517_v13 }
 0x187   : > { %7696 = vmatmul.mubr.msk.bf16.gmra.mrb[20].mxu0 %vm10078_vm13, %v4020_v37  ;;  %vm10090_vm13 = vmmov %vm10089_vm3 }
 0x188   : > { %7699 = vmatprep.mubr.msk.bf16.mxu0 %vm10080_vm14, %v4022_v16  ;;  %vm5777_vm14 = vcmask 60416  }
 0x189   : > { %7548 = vmatmul.mubr.msk.bf16.gmra.mrb[24].mxu1 %vm10081_vm12, %v2486_v21  ;;  %vm6783_vm12 = vcmask 58368  }
 0x18a   : > { %7551 = vmatprep.mubr.msk.bf16.mxu1 %vm10082_vm6, %v2495_v24 }
 0x18f   : > { %7700 = vmatmul.mubr.msk.bf16.gmra.mrb[24].mxu0 %vm10084_vm15, %v4024_v20 }
 0x190   : > { %7703 = vmatprep.mubr.msk.bf16.mxu0 %vm10085_vm7, %v4026_v51 }
 0x191   : > { %7552 = vmatmul.mubr.msk.bf16.gmra.mrb[28].mxu1 %vm10086_vm11, %v2504_v44 }
 0x192   : > { %7555 = vmatprep.mubr.msk.bf16.mxu1 %vm10087_vm10, %v2513_v11 }
 0x197   : > { %7704 = vmatmul.mubr.msk.bf16.gmra.mrb[28].mxu0 %vm10076_vm4, %v4028_v48 }
 0x198   : > { %7707 = vmatprep.mubr.msk.bf16.mxu0 %vm10089_vm3, %v4030_v15 }
 0x199   : > { %7556 = vmatmul.mubr.msk.bf16.gmra.mrb[32].mxu1 %vm10090_vm13, %v2518_v5 }
 0x19f   : > { %7708 = vmatmul.mubr.msk.bf16.gmra.mrb[32].mxu0 %vm10091_vm9, %v4032_v4 }
 0x20c   : > { %v7487_v9 = vpop.f32.mrb[0].mxu1 }
 0x20d   : > { %v2041_v1 = vpop.f32.mrb[1].mxu1 }
 0x20e   : > { %v7488_v50 = vpop.f32.mrb[2].mxu1 }
 0x20f   : > { %v2044_v38 = vpop.f32.mrb[3].mxu1 }
 0x214   : > { %v9157_v3 = vpop.f32.mrb[4].mxu1 }
 0x215   : > { %v9159_v32 = vpop.f32.mrb[5].mxu1 }
 0x216   : > { %v9161_v12 = vpop.f32.mrb[6].mxu1 }
 0x217   : > { %v9163_v25 = vpop.f32.mrb[7].mxu1 }
 0x21c   : > { %v9165_v30 = vpop.f32.mrb[8].mxu1 }
 0x21d   : > { %v9167_v0 = vpop.f32.mrb[9].mxu1 }
 0x21e   : > { %v9169_v54 = vpop.f32.mrb[10].mxu1 }
 0x21f   : > { %v9171_v18 = vpop.f32.mrb[11].mxu1 }
 0x224   : > { %v9173_v55 = vpop.f32.mrb[12].mxu1 }
 0x225   : > { %v9175_v31 = vpop.f32.mrb[13].mxu1 }
 0x226   : > { %v9177_v43 = vpop.f32.mrb[14].mxu1 }
 0x227   : > { %v9179_v46 = vpop.f32.mrb[15].mxu1 }
 0x22c   : > { %v9181_v22 = vpop.f32.mrb[16].mxu1 }
 0x22d   : > { %v9183_v6 = vpop.f32.mrb[17].mxu1 }
 0x22e   : > { %v9185_v34 = vpop.f32.mrb[18].mxu1 }
 0x22f   : > { %v9187_v26 = vpop.f32.mrb[19].mxu1 }
 0x232   : > { %v7677_v14 = vpop.f32.mrb[0].mxu0 }
 0x233   : > { %v7713_v36 = vadd.f32 %v7677_v14, %v7487_v9  ;;  %v4124_v27 = vpop.f32.mrb[1].mxu0 }
 0x234   : > { %v7714_v53 = vadd.f32 %v4124_v27, %v2041_v1  ;;  %v7678_v62 = vpop.f32.mrb[2].mxu0 }
 0x235   : > { %v4375_v7 = vcombine.high %v7713_v36, %v7713_v36  ;;  %v4382_v10 = vrot.slane %v7713_v36, %v9189_v52  ;;  %v7715_v59 = vadd.f32 %v7678_v62, %v7488_v50  ;;  %v4127_v42 = vpop.f32.mrb[3].mxu0 }
 0x236   : > { %v4341_v57 = vcombine.high %v7714_v53, %v7714_v53  ;;  %v4348_v37 = vrot.slane %v7714_v53, %v9189_v52  ;;  %v7716_v23 = vadd.f32 %v4127_v42, %v2044_v38 }
 0x237   : > { %v4389_v40 = vrot.slane %v4375_v7, %v9189_v52  ;;  %v4390_v60 = vcombine.high %v4382_v10, %v4382_v10  ;;  %v4392_v16 = vcombine.high %v7715_v59, %v7715_v59  ;;  %v4399_v21 = vrot.slane %v7715_v59, %v9189_v52 }
 0x238   : > { %v4355_v8 = vrot.slane %v4341_v57, %v9189_v52  ;;  %v4356_v35 = vcombine.high %v4348_v37, %v4348_v37  ;;  %v5880_v24 = vmul.f32 %v4348_v37, %v4348_v37  ;;  %v4358_v2 = vcombine.high %v7716_v23, %v7716_v23 }
 0x239   : > { %v5107_v19 = vcombine.low %v4390_v60, %v4389_v40  ;;  %v5888_v63 = vmul.f32 %v4390_v60, %v4390_v60  ;;  %v5889_v61 = vmul.f32 %v4389_v40, %v4389_v40  ;;  %v4391_v41 = vcombine.high %v4389_v40, %v4389_v40 }
 0x23a   : > { %v4357_v20 = vcombine.high %v4355_v8, %v4355_v8  ;;  %v5073_v45 = vcombine.low %v4348_v37, %v4356_v35  ;;  %v5881_v51 = vmul.f32 %v4356_v35, %v4356_v35  ;;  %v5882_v44 = vmul.f32 %v4355_v8, %v4355_v8  ;;  %v7681_v29 = vpop.f32.mrb[4].mxu0 }
 0x23b   : > { %v5115_v11 = vrot.slane %v5107_v19, %v9189_v52  ;;  %v6170_v56 = vcombine.low %v5888_v63, %v5889_v61  ;;  %v9198_v58 = vrot.slane %v4392_v16, %v9189_v52  ;;  %v9200_v13 = vcombine.high %v4399_v21, %v4399_v21  ;;  %v4140_v48 = vpop.f32.mrb[5].mxu0 }
 0x23c   : > { %v5074_v15 = vcombine.low %v4355_v8, %v4357_v20  ;;  %v5081_v5 = vrot.slane %v5073_v45, %v9189_v52  ;;  %v5883_v28 = vmul.f32 %v4357_v20, %v4357_v20  ;;  %v6136_v4 = vcombine.low %v5880_v24, %v5881_v51  ;;  %v9203_v9 = vpop.f32.mrb[6].mxu0 }
 0x23d   : > { %v6178_v1 = vrot.slane %v6170_v56, %v9189_v52  ;;  %v5108_v50 = vcombine.low %v4391_v41, %v4399_v21  ;;  %v5124_v38 = vcombine.low %v9200_v13, %v9198_v58  ;;  %v5890_v49 = vmul.f32 %v4391_v41, %v4391_v41  ;;  %v9208_v39 = vpop.f32.mrb[7].mxu0 }
 0x23e   : > { %v5088_v17 = vrot.slane %v5074_v15, %v9189_v52  ;;  %v6137_v47 = vcombine.low %v5882_v44, %v5883_v28  ;;  %v6144_v33 = vrot.slane %v6136_v4, %v9189_v52  ;;  %v5891_v14 = vmul.f32 %v4399_v21, %v4399_v21 }
 0x23f   : > { %v5122_v36 = vrot.slane %v5108_v50, %v9189_v52  ;;  %v9215_v27 = vmul.f32 %v9200_v13, %v9200_v13  ;;  %v9219_v53 = vmul.f32 %v9198_v58, %v9198_v58  ;;  %v4365_v62 = vrot.slane %v7716_v23, %v9189_v52 }
 0x240   : > { %v5089_v7 = vcombine.low %v5081_v5, %v5088_v17  ;;  %v6151_v10 = vrot.slane %v6137_v47, %v9189_v52  ;;  %v6171_v59 = vcombine.low %v5890_v49, %v5891_v14  ;;  %v4372_v42 = vrot.slane %v4358_v2, %v9189_v52 }
 0x241   : > { %v5123_v57 = vcombine.low %v5115_v11, %v5122_v36  ;;  %v6187_v37 = vcombine.low %v9215_v27, %v9219_v53  ;;  %v4373_v40 = vcombine.high %v4365_v62, %v4365_v62  ;;  %v5884_v60 = vmul.f32 %v4365_v62, %v4365_v62 }
 0x242   : > { %v7166_v23 = vpack.c.bf16 %v5089_v7, %v5089_v7  ;;  %v5811_v16 = vsel %vm5810_vm8, %v5089_v7, 0.0  ;;  %v6152_v21 = vcombine.low %v6144_v33, %v6151_v10  ;;  %v6185_v8 = vrot.slane %v6171_v59, %v9189_v52  ;;  %v9235_v35 = vpop.f32.mrb[8].mxu0 }
 0x243   : > { %v7168_v24 = vpack.c.bf16 %v5123_v57, %v5123_v57  ;;  %v5814_v2 = vsel %vm5810_vm8, %v5123_v57, 0.0  ;;  %v4374_v19 = vcombine.high %v4372_v42, %v4372_v42  ;;  %v5090_v63 = vcombine.low %v4365_v62, %v4373_v40  ;;  %v9238_v61 = vpop.f32.mrb[9].mxu0 }
 0x244   : > { %5778 = vst.msk [vmem:[%s9229_s15] sm:$0xf] %vm5777_vm14, %v7166_v23  ;;  %v6712_v41 = vsel %vm5810_vm8, %v6152_v21, 0.0  ;;  %v6186_v20 = vcombine.low %v6178_v1, %v6185_v8  ;;  %v5885_v45 = vmul.f32 %v4373_v40, %v4373_v40  ;;  %v5886_v51 = vmul.f32 %v4372_v42, %v4372_v42  ;;  %v9243_v44 = vpop.f32.mrb[10].mxu0 }
 0x245   : > { %5780 = vst.msk [vmem:[%s9229_s15 + $0x8] sm:$0xf] %vm5777_vm14, %v7168_v24  ;;  %v5091_v11 = vcombine.low %v4372_v42, %v4374_v19  ;;  %v5098_v56 = vrot.slane %v5090_v63, %v9189_v52  ;;  %v5887_v13 = vmul.f32 %v4374_v19, %v4374_v19  ;;  %v7717_v15 = vadd.f32 %v7681_v29, %v9157_v3  ;;  %v9249_v5 = vpop.f32.mrb[11].mxu0 }
 0x246   : > { %v6715_v28 = vsel %vm5810_vm8, %v6186_v20, 0.0  ;;  %v6153_v4 = vcombine.low %v5884_v60, %v5885_v45  ;;  %v7718_v50 = vadd.f32 %v4140_v48, %v9159_v32  ;;  %v4408_v1 = vcombine.high %v9198_v58, %v9198_v58 }
 0x247   : > { %v5105_v49 = vrot.slane %v5091_v11, %v9189_v52  ;;  %v6154_v17 = vcombine.low %v5886_v51, %v5887_v13  ;;  %v4442_v47 = vcombine.high %v7717_v15, %v7717_v15  ;;  %v4449_v33 = vrot.slane %v7717_v15, %v9189_v52 }
 0x248   : > { %v6161_v14 = vrot.slane %v6153_v4, %v9189_v52  ;;  %v4409_v36 = vcombine.high %v7718_v50, %v7718_v50  ;;  %v4416_v3 = vrot.slane %v7718_v50, %v9189_v52  ;;  %v5132_v29 = vrot.slane %v5124_v38, %v9189_v52 }
 0x249   : > { %v5106_v62 = vcombine.low %v5098_v56, %v5105_v49  ;;  %v6168_v7 = vrot.slane %v6154_v17, %v9189_v52  ;;  %v4456_v32 = vrot.slane %v4442_v47, %v9189_v52  ;;  %v4457_v48 = vcombine.high %v4449_v33, %v4449_v33 }
 0x24a   : > { %v5902_v58 = vmul.f32 %v4449_v33, %v4449_v33  ;;  %v4423_v10 = vrot.slane %v4409_v36, %v9189_v52  ;;  %v5125_v59 = vcombine.low %v4408_v1, %v4416_v3  ;;  %v5894_v42 = vmul.f32 %v4408_v1, %v4408_v1  ;;  %v9263_v57 = vpop.f32.mrb[12].mxu0 }
 0x24b   : > { %v7167_v40 = vpack.c.bf16 %v5106_v62, %v5106_v62  ;;  %v5812_v60 = vsel %vm5810_vm8, %v5106_v62, 0.0  ;;  %v6169_v23 = vcombine.low %v6161_v14, %v6168_v7  ;;  %v9266_v21 = vcombine.high %v4456_v32, %v4456_v32  ;;  %v9268_v38 = vpop.f32.mrb[13].mxu0 }
 0x24c   : > { %v5813_v8 = vadd.f32 %v5812_v60, %v5811_v16  ;;  %v5159_v24 = vcombine.low %v4449_v33, %v4457_v48  ;;  %v5903_v19 = vmul.f32 %v4457_v48, %v4457_v48  ;;  %v4424_v63 = vcombine.high %v4423_v10, %v4423_v10  ;;  %v9270_v20 = vpop.f32.mrb[14].mxu0 }
 0x24d   : > { %5779 = vst.msk [vmem:[%s9229_s15 + $0x4] sm:$0xf] %vm5777_vm14, %v7167_v40  ;;  %v6713_v45 = vsel %vm5810_vm8, %v6169_v23, 0.0  ;;  %v9277_v51 = vmul.f32 %v9266_v21, %v9266_v21  ;;  %v5139_v11 = vrot.slane %v5125_v59, %v9189_v52  ;;  %v5895_v56 = vmul.f32 %v4416_v3, %v4416_v3  ;;  %v9280_v13 = vpop.f32.mrb[15].mxu0 }
 0x24e   : > { %v6714_v15 = vadd.f32 %v6713_v45, %v6712_v41  ;;  %v9283_v16 = vrot.slane %v5159_v24, %v9189_v52  ;;  %v6222_v4 = vcombine.low %v5902_v58, %v5903_v19  ;;  %v5141_v50 = vcombine.low %v4423_v10, %v4424_v63 }
 0x24f   : > { %v5140_v1 = vcombine.low %v5132_v29, %v5139_v11  ;;  %v5815_v49 = vadd.f32 %v5814_v2, %v5813_v8  ;;  %v5896_v17 = vmul.f32 %v4423_v10, %v4423_v10  ;;  %v5897_v47 = vmul.f32 %v4424_v63, %v4424_v63 }
 0x250   : > { %v9286_v33 = vrot.slane %v6222_v4, %v9189_v52  ;;  %v9289_v14 = vrot.slane %v5141_v50, %v9189_v52  ;;  %v6188_v36 = vcombine.low %v5894_v42, %v5895_v56  ;;  %v6195_v41 = vrot.slane %v6187_v37, %v9189_v52 }
 0x251   : > { %v7169_v3 = vpack.c.bf16 %v5140_v1, %v5140_v1  ;;  %v5816_v62 = vsel %vm5810_vm8, %v5140_v1, 0.0  ;;  %v6204_v29 = vcombine.low %v5896_v17, %v5897_v47  ;;  %v6716_v2 = vadd.f32 %v6715_v28, %v6714_v15 }
 0x252   : > { %v9296_v7 = vadd.f32 %v5816_v62, %v5815_v49  ;;  %v6202_v32 = vrot.slane %v6188_v36, %v9189_v52  ;;  %v7719_v48 = vadd.f32 %v9203_v9, %v9161_v12  ;;  %v7720_v58 = vadd.f32 %v9208_v39, %v9163_v25  ;;  %v9303_v10 = vpop.f32.mrb[16].mxu0 }
 0x253   : > { %5781 = vst.msk [vmem:[%s9229_s15 + $0xc] sm:$0xf] %vm5777_vm14, %v7169_v3  ;;  %v9308_v27 = vrot.slane %v6204_v29, %v9189_v52  ;;  %v7721_v53 = vadd.f32 %v9235_v35, %v9165_v30  ;;  %v9314_v37 = vadd.f32 %v9238_v61, %v9167_v0  ;;  %v9318_v12 = vadd.f32 %v9243_v44, %v9169_v54  ;;  %v9320_v9 = vpop.f32.mrb[17].mxu0 }
 0x254   : > { %v6203_v25 = vcombine.low %v6195_v41, %v6202_v32  ;;  %v4459_v39 = vcombine.high %v7719_v48, %v7719_v48  ;;  %v4466_v28 = vrot.slane %v7719_v48, %v9189_v52  ;;  %v4425_v59 = vcombine.high %v7720_v58, %v7720_v58  ;;  %v9323_v42 = vpop.f32.mrb[18].mxu0  ;;  %v9331_v54 = vpop.f32.mrb[20].mxu1 }
 0x255   : > { %v4432_v40 = vrot.slane %v7720_v58, %v9189_v52  ;;  %v4509_v30 = vcombine.high %v7721_v53, %v7721_v53  ;;  %v9327_v35 = vrot.slane %v7721_v53, %v9189_v52  ;;  %v4476_v0 = vcombine.high %v9314_v37, %v9314_v37  ;;  %v9333_v61 = vpop.f32.mrb[19].mxu0  ;;  %v9340_v24 = vpop.f32.mrb[21].mxu1 }
 0x256   : > { %v6717_v44 = vsel %vm5810_vm8, %v6203_v25, 0.0  ;;  %v9337_v60 = vrot.slane %v4459_v39, %v9189_v52  ;;  %v4474_v23 = vcombine.high %v4466_v28, %v4466_v28  ;;  %v5175_v8 = vcombine.low %v9266_v21, %v4466_v28  ;;  %v9343_v56 = vpop.f32.mrb[22].mxu1 }
 0x257   : > { %v6718_v19 = vadd.f32 %v6717_v44, %v6716_v2  ;;  %v5905_v63 = vmul.f32 %v4466_v28, %v4466_v28  ;;  %v4439_v45 = vrot.slane %v4425_v59, %v9189_v52  ;;  %v4440_v11 = vcombine.high %v4432_v40, %v4432_v40  ;;  %v9349_v49 = vpop.f32.mrb[23].mxu1 }
 0x258   : > { %v5176_v15 = vcombine.low %v4474_v23, %v9337_v60  ;;  %v5183_v4 = vrot.slane %v5175_v8, %v9189_v52  ;;  %v5906_v50 = vmul.f32 %v4474_v23, %v4474_v23  ;;  %v5907_v1 = vmul.f32 %v9337_v60, %v9337_v60 }
 0x259   : > { %v6238_v21 = vcombine.low %v9277_v51, %v5905_v63  ;;  %v4441_v17 = vcombine.high %v4439_v45, %v4439_v45  ;;  %v5142_v47 = vcombine.low %v4432_v40, %v4440_v11  ;;  %v5898_v36 = vmul.f32 %v4432_v40, %v4432_v40 }
 0x25a   : > { %v5190_v41 = vrot.slane %v5176_v15, %v9189_v52  ;;  %v6239_v3 = vcombine.low %v5906_v50, %v5907_v1  ;;  %v5899_v62 = vmul.f32 %v4440_v11, %v4440_v11  ;;  %v5900_v29 = vmul.f32 %v4439_v45, %v4439_v45  ;;  %v9353_v2 = vpop.f32.mrb[20].mxu0 }
 0x25b   : > { %v6246_v32 = vrot.slane %v6238_v21, %v9189_v52  ;;  %v5156_v48 = vrot.slane %v5142_v47, %v9189_v52  ;;  %v5158_v58 = vcombine.low %v4439_v45, %v4441_v17  ;;  %v5901_v53 = vmul.f32 %v4441_v17, %v4441_v17  ;;  %v9357_v25 = vpop.f32.mrb[21].mxu0 }
 0x25c   : > { %v5191_v39 = vcombine.low %v5183_v4, %v5190_v41  ;;  %v6253_v51 = vrot.slane %v6239_v3, %v9189_v52  ;;  %v6205_v28 = vcombine.low %v5898_v36, %v5899_v62  ;;  %v4523_v59 = vrot.slane %v4509_v30, %v9189_v52  ;;  %v9361_v40 = vpop.f32.mrb[22].mxu0  ;;  %v9367_v45 = vpop.f32.mrb[24].mxu1 }
 0x25d   : > { %v5157_v44 = vcombine.low %v9289_v14, %v5156_v48  ;;  %v5166_v23 = vrot.slane %v5158_v58, %v9189_v52  ;;  %v6221_v8 = vcombine.low %v5900_v29, %v5901_v53  ;;  %v4524_v63 = vcombine.high %v9327_v35, %v9327_v35  ;;  %v9369_v11 = vpop.f32.mrb[23].mxu0  ;;  %v9373_v1 = vpop.f32.mrb[25].mxu1 }
 0x25e   : > { %v7172_v15 = vpack.c.bf16 %v5191_v39, %v5191_v39  ;;  %v5822_v4 = vsel %vm5810_vm8, %v5191_v39, 0.0  ;;  %v6254_v30 = vcombine.low %v6246_v32, %v6253_v51  ;;  %v6219_v50 = vrot.slane %v6205_v28, %v9189_v52  ;;  %v9378_v36 = vpop.f32.mrb[26].mxu1 }
 0x25f   : > { %v5174_v14 = vcombine.low %v5166_v23, %v9283_v16  ;;  %v7170_v21 = vpack.c.bf16 %v5157_v44, %v5157_v44  ;;  %v5818_v17 = vsel %vm5810_vm8, %v5157_v44, 0.0  ;;  %v6229_v47 = vrot.slane %v6221_v8, %v9189_v52  ;;  %v9385_v32 = vpop.f32.mrb[27].mxu1 }
 0x260   : > { %5784 = vst.msk [vmem:[%s9229_s15 + $0x18] sm:$0xf] %vm5777_vm14, %v7172_v15  ;;  %v6723_v41 = vsel %vm5810_vm8, %v6254_v30, 0.0  ;;  %v5819_v3 = vadd.f32 %v5818_v17, %v9296_v7  ;;  %v6220_v62 = vcombine.low %v9308_v27, %v6219_v50  ;;  %v4525_v29 = vcombine.high %v4523_v59, %v4523_v59 }
 0x261   : > { %v7171_v16 = vpack.c.bf16 %v5174_v14, %v5174_v14  ;;  %5782 = vst.msk [vmem:[%s9229_s15 + $0x10] sm:$0xf] %vm5777_vm14, %v7170_v21  ;;  %v5820_v48 = vsel %vm5810_vm8, %v5174_v14, 0.0  ;;  %v6237_v58 = vcombine.low %v6229_v47, %v9286_v33  ;;  %v5226_v53 = vcombine.low %v9327_v35, %v4524_v63 }
 0x262   : > { %v5821_v39 = vadd.f32 %v5820_v48, %v5819_v3  ;;  %v6719_v51 = vsel %vm5810_vm8, %v6220_v62, 0.0  ;;  %v5227_v28 = vcombine.low %v4523_v59, %v4525_v29  ;;  %v5916_v7 = vmul.f32 %v9327_v35, %v9327_v35  ;;  %v9395_v27 = vpop.f32.mrb[24].mxu0 }
 0x263   : > { %5783 = vst.msk [vmem:[%s9229_s15 + $0x14] sm:$0xf] %vm5777_vm14, %v7171_v16  ;;  %v6720_v44 = vadd.f32 %v6719_v51, %v6718_v19  ;;  %v6721_v23 = vsel %vm5810_vm8, %v6237_v58, 0.0  ;;  %v5234_v8 = vrot.slane %v5226_v53, %v9189_v52  ;;  %v5917_v15 = vmul.f32 %v4524_v63, %v4524_v63  ;;  %v9401_v33 = vpop.f32.mrb[25].mxu0 }
 0x264   : > { %v5241_v30 = vrot.slane %v5227_v28, %v9189_v52  ;;  %v5918_v50 = vmul.f32 %v4523_v59, %v4523_v59  ;;  %v5919_v14 = vmul.f32 %v4525_v29, %v4525_v29  ;;  %v4475_v21 = vcombine.high %v9337_v60, %v9337_v60  ;;  %v9406_v35 = vpop.f32.mrb[26].mxu0  ;;  %v9414_v3 = vpop.f32.mrb[28].mxu1 }
 0x265   : > { %v6722_v17 = vadd.f32 %v6721_v23, %v6720_v44  ;;  %v6289_v47 = vcombine.low %v5916_v7, %v5917_v15  ;;  %v4483_v19 = vrot.slane %v9314_v37, %v9189_v52  ;;  %v4490_v63 = vrot.slane %v4476_v0, %v9189_v52  ;;  %v9416_v62 = vpop.f32.mrb[27].mxu0  ;;  %v9418_v48 = vpop.f32.mrb[29].mxu1 }
 0x266   : > { %v5242_v59 = vcombine.low %v5234_v8, %v5241_v30  ;;  %v6290_v29 = vcombine.low %v5918_v50, %v5919_v14  ;;  %v5823_v16 = vadd.f32 %v5822_v4, %v5821_v39  ;;  %v5908_v60 = vmul.f32 %v4475_v21, %v4475_v21  ;;  %v9421_v7 = vpop.f32.mrb[30].mxu1 }
 0x267   : > { %v6297_v58 = vrot.slane %v6289_v47, %v9189_v52  ;;  %v4491_v53 = vcombine.high %v4483_v19, %v4483_v19  ;;  %v5192_v51 = vcombine.low %v4475_v21, %v4483_v19  ;;  %v5909_v28 = vmul.f32 %v4483_v19, %v4483_v19  ;;  %10092 = vst [vmem:[#allocation3_spill] sm:$0xff] %v9421_v7  ;;  %v9427_v8 = vpop.f32.mrb[31].mxu1 }
 0x268   : > { %v7175_v37 = vpack.c.bf16 %v5242_v59, %v5242_v59  ;;  %v9424_v0 = vsel %vm5810_vm8, %v5242_v59, 0.0  ;;  %v6304_v44 = vrot.slane %v6290_v29, %v9189_v52  ;;  %v5911_v23 = vmul.f32 %v4490_v63, %v4490_v63  ;;  %10093 = vst [vmem:[#allocation4_spill] sm:$0xff] %v9427_v8 }
 0x269   : > { %v5193_v4 = vcombine.low %v4491_v53, %v4490_v63  ;;  %v5200_v39 = vrot.slane %v5192_v51, %v9189_v52  ;;  %v5910_v15 = vmul.f32 %v4491_v53, %v4491_v53  ;;  %v6255_v30 = vcombine.low %v5908_v60, %v5909_v28 }
 0x26a   : > { %5787 = vst.msk [vmem:[%s9229_s15 + $0x24] sm:$0xf] %vm5777_vm14, %v7175_v37  ;;  %v6305_v50 = vcombine.low %v6297_v58, %v6304_v44  ;;  %v6724_v14 = vadd.f32 %v6723_v41, %v6722_v17  ;;  %v4526_v21 = vcombine.high %v9318_v12, %v9318_v12  ;;  %v4533_v47 = vrot.slane %v9318_v12, %v9189_v52  ;;  %v9436_v19 = vpop.f32.mrb[28].mxu0 }
 0x26b   : > { %v5207_v59 = vrot.slane %v5193_v4, %v9189_v52  ;;  %v6256_v29 = vcombine.low %v5910_v15, %v5911_v23  ;;  %v6263_v63 = vrot.slane %v6255_v30, %v9189_v52  ;;  %v7724_v60 = vadd.f32 %v9249_v5, %v9171_v18  ;;  %v9442_v53 = vpop.f32.mrb[29].mxu0 }
 0x26c   : > { %10094 = vst [vmem:[#allocation5_spill] sm:$0xff] %v9442_v53  ;;  %v9445_v41 = vsel %vm5810_vm8, %v6305_v50, 0.0  ;;  %v4540_v17 = vrot.slane %v4526_v21, %v9189_v52  ;;  %v4541_v58 = vcombine.high %v4533_v47, %v4533_v47  ;;  %v7725_v12 = vadd.f32 %v9263_v57, %v9173_v55  ;;  %v9450_v51 = vpop.f32.mrb[30].mxu0  ;;  %v9454_v18 = vpop.f32.mrb[32].mxu1 }
 0x26d   : > { %10095 = vst [vmem:[#allocation6_spill] sm:$0xff] %v9450_v51  ;;  %v5208_v28 = vcombine.low %v5200_v39, %v5207_v59  ;;  %v6270_v37 = vrot.slane %v6256_v29, %v9189_v52  ;;  %v4492_v44 = vcombine.high %v7724_v60, %v7724_v60  ;;  %v4499_v23 = vrot.slane %v7724_v60, %v9189_v52  ;;  %v9456_v5 = vpop.f32.mrb[31].mxu0  ;;  %v9458_v21 = vpop.f32.mrb[33].mxu1 }
 0x26e   : > { %10096 = vst [vmem:[#allocation7_spill] sm:$0xff] %v9454_v18  ;;  %10097 = vst [vmem:[#allocation8_spill] sm:$0xff] %v9456_v5  ;;  %v5243_v4 = vcombine.low %v4541_v58, %v4540_v17  ;;  %v5920_v15 = vmul.f32 %v4541_v58, %v4541_v58  ;;  %v5921_v30 = vmul.f32 %v4540_v17, %v4540_v17  ;;  %v9462_v59 = vpop.f32.mrb[34].mxu1 }
 0x26f   : > { %v4576_v50 = vcombine.high %v7725_v12, %v7725_v12  ;;  %10098 = vst [vmem:[#allocation9_spill] sm:$0xff] %v9458_v21  ;;  %v7173_v55 = vpack.c.bf16 %v5208_v28, %v5208_v28  ;;  %v5824_v57 = vsel %vm5810_vm8, %v5208_v28, 0.0  ;;  %v6271_v39 = vcombine.low %v6263_v63, %v6270_v37  ;;  %10099 = vst [vmem:[#allocation10_spill] sm:$0xff] %v9462_v59  ;;  %v9467_v8 = vpop.f32.mrb[35].mxu1 }
 0x270   : > { %v4506_v47 = vrot.slane %v4492_v44, %v9189_v52  ;;  %v5825_v29 = vadd.f32 %v5824_v57, %v5823_v16  ;;  %v9465_v60 = vrot.slane %v5243_v4, %v9189_v52  ;;  %v6306_v18 = vcombine.low %v5920_v15, %v5921_v30  ;;  %10100 = vst [vmem:[#allocation11_spill] sm:$0xff] %v9467_v8 }
 0x271   : > { %v4507_v5 = vcombine.high %v4499_v23, %v4499_v23  ;;  %5785 = vst.msk [vmem:[%s9229_s15 + $0x1c] sm:$0xf] %vm5777_vm14, %v7173_v55  ;;  %v6725_v58 = vsel %vm5810_vm8, %v6271_v39, 0.0  ;;  %v5912_v51 = vmul.f32 %v4499_v23, %v4499_v23  ;;  %v4583_v30 = vrot.slane %v7725_v12, %v9189_v52 }
 0x272   : > { %v4508_v21 = vcombine.high %v4506_v47, %v4506_v47  ;;  %v5914_v28 = vmul.f32 %v4506_v47, %v4506_v47  ;;  %v6726_v63 = vadd.f32 %v6725_v58, %v6724_v14  ;;  %v9473_v37 = vrot.slane %v6306_v18, %v9189_v52  ;;  %v9475_v57 = vpop.f32.mrb[32].mxu0 }
 0x273   : > { %v5209_v44 = vcombine.low %v4499_v23, %v4507_v5  ;;  %v5913_v16 = vmul.f32 %v4507_v5, %v4507_v5  ;;  %10101 = vst [vmem:[#allocation12_spill] sm:$0xff] %v9475_v57  ;;  %v4590_v8 = vrot.slane %v4576_v50, %v9189_v52  ;;  %v9479_v55 = vpop.f32.mrb[33].mxu0  ;;  %v7726_v14 = vadd.f32 %v9268_v38, %v9175_v31 }
 0x274   : > { %v5210_v4 = vcombine.low %v4506_v47, %v4508_v21  ;;  %v5915_v15 = vmul.f32 %v4508_v21, %v4508_v21  ;;  %10102 = vst [vmem:[#allocation13_spill] sm:$0xff] %v9479_v55  ;;  %v4542_v18 = vcombine.high %v4540_v17, %v4540_v17  ;;  %v9484_v58 = vpop.f32.mrb[34].mxu0  ;;  %v4591_v47 = vcombine.high %v4583_v30, %v4583_v30 }
 0x275   : > { %v5217_v39 = vrot.slane %v5209_v44, %v9189_v52  ;;  %v6272_v59 = vcombine.low %v5912_v51, %v5913_v16  ;;  %10103 = vst [vmem:[#allocation14_spill] sm:$0xff] %v9484_v58  ;;  %v4592_v21 = vcombine.high %v4590_v8, %v4590_v8  ;;  %v9487_v57 = vpop.f32.mrb[35].mxu0  ;;  %v5930_v50 = vmul.f32 %v4583_v30, %v4583_v30 }
 0x276   : > { %v5224_v23 = vrot.slane %v5210_v4, %v9189_v52  ;;  %v6273_v5 = vcombine.low %v5914_v28, %v5915_v15  ;;  %10104 = vst [vmem:[#allocation15_spill] sm:$0xff] %v9487_v57  ;;  %v5932_v55 = vmul.f32 %v4590_v8, %v4590_v8  ;;  %v4543_v7 = vcombine.high %v7726_v14, %v7726_v14 }
 0x277   : > { %v6280_v12 = vrot.slane %v6272_v59, %v9189_v52  ;;  %v5278_v31 = vcombine.low %v4583_v30, %v4591_v47  ;;  %v5294_v38 = vcombine.low %v4590_v8, %v4592_v21  ;;  %v5931_v17 = vmul.f32 %v4591_v47, %v4591_v47 }
 0x278   : > { %v5225_v44 = vcombine.low %v5217_v39, %v5224_v23  ;;  %v6287_v51 = vrot.slane %v6273_v5, %v9189_v52  ;;  %v5933_v16 = vmul.f32 %v4592_v21, %v4592_v21  ;;  %v4550_v4 = vrot.slane %v7726_v14, %v9189_v52 }
 0x279   : > { %v4557_v28 = vrot.slane %v4543_v7, %v9189_v52  ;;  %v9495_v59 = vrot.slane %v5278_v31, %v9189_v52  ;;  %v5302_v39 = vrot.slane %v5294_v38, %v9189_v52  ;;  %v6341_v23 = vcombine.low %v5930_v50, %v5931_v17 }
 0x27a   : > { %v7174_v15 = vpack.c.bf16 %v5225_v44, %v5225_v44  ;;  %v5826_v57 = vsel %vm5810_vm8, %v5225_v44, 0.0  ;;  %v6288_v58 = vcombine.low %v6280_v12, %v6287_v51  ;;  %v6357_v5 = vcombine.low %v5932_v55, %v5933_v16 }
 0x27b   : > { %v5827_v53 = vadd.f32 %v5826_v57, %v5825_v29  ;;  %v4558_v30 = vcombine.high %v4550_v4, %v4550_v4  ;;  %v5244_v14 = vcombine.low %v4542_v18, %v4550_v4  ;;  %v5922_v47 = vmul.f32 %v4542_v18, %v4542_v18 }
 0x27c   : > { %5786 = vst.msk [vmem:[%s9229_s15 + $0x20] sm:$0xf] %vm5777_vm14, %v7174_v15  ;;  %v6727_v8 = vsel %vm5810_vm8, %v6288_v58, 0.0  ;;  %v9502_v21 = vrot.slane %v6341_v23, %v9189_v52  ;;  %v9505_v12 = vrot.slane %v6357_v5, %v9189_v52  ;;  %v5923_v44 = vmul.f32 %v4550_v4, %v4550_v4 }
 0x27d   : > { %v6728_v7 = vadd.f32 %v6727_v8, %v6726_v63  ;;  %v5258_v29 = vrot.slane %v5244_v14, %v9189_v52  ;;  %v5260_v57 = vcombine.low %v4558_v30, %v4557_v28  ;;  %v5924_v50 = vmul.f32 %v4558_v30, %v4558_v30 }
 0x27e   : > { %v5925_v55 = vmul.f32 %v4557_v28, %v4557_v28  ;;  %v6307_v51 = vcombine.low %v5922_v47, %v5923_v44  ;;  %v7727_v58 = vadd.f32 %v9270_v20, %v9177_v43  ;;  %v7728_v18 = vadd.f32 %v9280_v13, %v9179_v46 }
 0x27f   : > { %v4559_v63 = vcombine.high %v4557_v28, %v4557_v28  ;;  %v5259_v31 = vcombine.low %v9465_v60, %v5258_v29  ;;  %v5268_v17 = vrot.slane %v5260_v57, %v9189_v52  ;;  %v5829_v16 = vadd.f32 %v9424_v0, %v5827_v53 }
 0x280   : > { %v6323_v38 = vcombine.low %v5924_v50, %v5925_v55  ;;  %v6321_v4 = vrot.slane %v6307_v51, %v9189_v52  ;;  %v4593_v15 = vcombine.high %v7727_v58, %v7727_v58  ;;  %v4600_v23 = vrot.slane %v7727_v58, %v9189_v52 }
 0x281   : > { %v4560_v5 = vcombine.high %v7728_v18, %v7728_v18  ;;  %v7176_v8 = vpack.c.bf16 %v5259_v31, %v5259_v31  ;;  %v5830_v43 = vsel %vm5810_vm8, %v5259_v31, 0.0  ;;  %v4567_v46 = vrot.slane %v7728_v18, %v9189_v52 }
 0x282   : > { %v5926_v20 = vmul.f32 %v4559_v63, %v4559_v63  ;;  %v6322_v13 = vcombine.low %v9473_v37, %v6321_v4  ;;  %v4607_v60 = vrot.slane %v4593_v15, %v9189_v52  ;;  %v4608_v28 = vcombine.high %v4600_v23, %v4600_v23 }
 0x283   : > { %v5934_v30 = vmul.f32 %v4600_v23, %v4600_v23  ;;  %5788 = vst.msk [vmem:[%s9229_s15 + $0x28] sm:$0xf] %vm5777_vm14, %v7176_v8  ;;  %v4574_v0 = vrot.slane %v4560_v5, %v9189_v52  ;;  %v5261_v53 = vcombine.low %v4559_v63, %v4567_v46  ;;  %v5831_v14 = vadd.f32 %v5830_v43, %v5829_v16 }
 0x284   : > { %v5927_v47 = vmul.f32 %v4567_v46, %v4567_v46  ;;  %v6731_v44 = vsel %vm5810_vm8, %v6322_v13, 0.0  ;;  %v9525_v29 = vcombine.high %v4607_v60, %v4607_v60  ;;  %v5295_v57 = vcombine.low %v4600_v23, %v4608_v28 }
 0x285   : > { %v5935_v50 = vmul.f32 %v4608_v28, %v4608_v28  ;;  %v4575_v55 = vcombine.high %v4574_v0, %v4574_v0  ;;  %v5275_v37 = vrot.slane %v5261_v53, %v9189_v52  ;;  %v5928_v51 = vmul.f32 %v4574_v0, %v4574_v0 }
 0x286   : > { %v6324_v58 = vcombine.low %v5926_v20, %v5927_v47  ;;  %v5309_v18 = vrot.slane %v5295_v57, %v9189_v52  ;;  %v9531_v31 = vmul.f32 %v9525_v29, %v9525_v29  ;;  %v6331_v16 = vrot.slane %v6323_v38, %v9189_v52 }
 0x287   : > { %v6358_v63 = vcombine.low %v5934_v30, %v5935_v50  ;;  %v5276_v4 = vcombine.low %v5268_v17, %v5275_v37  ;;  %v5277_v15 = vcombine.low %v4574_v0, %v4575_v55  ;;  %v5929_v5 = vmul.f32 %v4575_v55, %v4575_v55 }
 0x288   : > { %v6338_v23 = vrot.slane %v6324_v58, %v9189_v52  ;;  %v5310_v8 = vcombine.low %v5302_v39, %v5309_v18  ;;  %v6730_v46 = vadd.f32 %v9445_v41, %v6728_v7  ;;  %v7729_v20 = vadd.f32 %v9303_v10, %v9181_v22 }
 0x289   : > { %v6372_v43 = vrot.slane %v6358_v63, %v9189_v52  ;;  %v5285_v13 = vrot.slane %v5277_v15, %v9189_v52  ;;  %v7177_v60 = vpack.c.bf16 %v5276_v4, %v5276_v4  ;;  %v5832_v38 = vsel %vm5810_vm8, %v5276_v4, 0.0 }
 0x28a   : > { %v6339_v17 = vcombine.low %v6331_v16, %v6338_v23  ;;  %v7179_v28 = vpack.c.bf16 %v5310_v8, %v5310_v8  ;;  %v5836_v30 = vsel %vm5810_vm8, %v5310_v8, 0.0  ;;  %v5833_v39 = vadd.f32 %v5832_v38, %v5831_v14 }
 0x28b   : > { %v6373_v0 = vcombine.low %v9505_v12, %v6372_v43  ;;  %v5293_v53 = vcombine.low %v5285_v13, %v9495_v59  ;;  %5789 = vst.msk [vmem:[%s9229_s15 + $0x2c] sm:$0xf] %vm5777_vm14, %v7177_v60  ;;  %v6340_v41 = vcombine.low %v5928_v51, %v5929_v5  ;;  %v6732_v7 = vadd.f32 %v6731_v44, %v6730_v46 }
 0x28c   : > { %v6733_v22 = vsel %vm5810_vm8, %v6339_v17, 0.0  ;;  %5791 = vst.msk [vmem:[%s9229_s15 + $0x34] sm:$0xf] %vm5777_vm14, %v7179_v28  ;;  %v4643_v47 = vcombine.high %v7729_v20, %v7729_v20  ;;  %v4650_v57 = vrot.slane %v7729_v20, %v9189_v52  ;;  %v7730_v12 = vadd.f32 %v9320_v9, %v9183_v6 }
 0x28d   : > { %v6737_v10 = vsel %vm5810_vm8, %v6373_v0, 0.0  ;;  %v7178_v14 = vpack.c.bf16 %v5293_v53, %v5293_v53  ;;  %v5834_v59 = vsel %vm5810_vm8, %v5293_v53, 0.0  ;;  %v6348_v50 = vrot.slane %v6340_v41, %v9189_v52 }
 0x28e   : > { %v6734_v55 = vadd.f32 %v6733_v22, %v6732_v7  ;;  %v5835_v37 = vadd.f32 %v5834_v59, %v5833_v39  ;;  %v4657_v44 = vrot.slane %v4643_v47, %v9189_v52  ;;  %v4658_v51 = vcombine.high %v4650_v57, %v4650_v57 }
 0x28f   : > { %v5944_v58 = vmul.f32 %v4650_v57, %v4650_v57  ;;  %5790 = vst.msk [vmem:[%s9229_s15 + $0x30] sm:$0xf] %vm5777_vm14, %v7178_v14  ;;  %v6356_v18 = vcombine.low %v6348_v50, %v9502_v21  ;;  %v4610_v63 = vcombine.high %v7730_v12, %v7730_v12  ;;  %v4617_v16 = vrot.slane %v7730_v12, %v9189_v52 }
 0x290   : > { %v7731_v6 = vadd.f32 %v9323_v42, %v9185_v34  ;;  %v5837_v9 = vadd.f32 %v5836_v30, %v5835_v37  ;;  %v4659_v4 = vcombine.high %v4657_v44, %v4657_v44  ;;  %v5345_v15 = vcombine.low %v4650_v57, %v4658_v51 }
 0x291   : > { %v5945_v5 = vmul.f32 %v4658_v51, %v4658_v51  ;;  %v6735_v23 = vsel %vm5810_vm8, %v6356_v18, 0.0  ;;  %v5946_v8 = vmul.f32 %v4657_v44, %v4657_v44  ;;  %v4624_v43 = vrot.slane %v4610_v63, %v9189_v52 }
 0x292   : > { %v4625_v46 = vcombine.high %v4617_v16, %v4617_v16  ;;  %v6736_v20 = vadd.f32 %v6735_v23, %v6734_v55  ;;  %v5346_v13 = vcombine.low %v4657_v44, %v4659_v4  ;;  %v5353_v21 = vrot.slane %v5345_v15, %v9189_v52 }
 0x293   : > { %v5947_v60 = vmul.f32 %v4659_v4, %v4659_v4  ;;  %v6408_v38 = vcombine.low %v5944_v58, %v5945_v5  ;;  %v5311_v17 = vcombine.low %v9525_v29, %v4617_v16  ;;  %v5937_v34 = vmul.f32 %v4617_v16, %v4617_v16 }
 0x294   : > { %v5312_v28 = vcombine.low %v4625_v46, %v4624_v43  ;;  %v6738_v42 = vadd.f32 %v6737_v10, %v6736_v20  ;;  %v5360_v30 = vrot.slane %v5346_v13, %v9189_v52  ;;  %v5938_v39 = vmul.f32 %v4625_v46, %v4625_v46 }
 0x295   : > { %v6409_v0 = vcombine.low %v5946_v8, %v5947_v60  ;;  %v6416_v53 = vrot.slane %v6408_v38, %v9189_v52  ;;  %v5319_v41 = vrot.slane %v5311_v17, %v9189_v52  ;;  %v5939_v22 = vmul.f32 %v4624_v43, %v4624_v43 }
 0x296   : > { %v5326_v7 = vrot.slane %v5312_v28, %v9189_v52  ;;  %v5361_v47 = vcombine.low %v5353_v21, %v5360_v30  ;;  %v6374_v29 = vcombine.low %v9531_v31, %v5937_v34  ;;  %v4660_v12 = vcombine.high %v7731_v6, %v7731_v6 }
 0x297   : > { %v6423_v57 = vrot.slane %v6409_v0, %v9189_v52  ;;  %v6375_v14 = vcombine.low %v5938_v39, %v5939_v22  ;;  %v4667_v59 = vrot.slane %v7731_v6, %v9189_v52  ;;  %v7732_v50 = vadd.f32 %v9333_v61, %v9187_v26 }
 0x298   : > { %v5327_v10 = vcombine.low %v5319_v41, %v5326_v7  ;;  %v7182_v55 = vpack.c.bf16 %v5361_v47, %v5361_v47  ;;  %v6382_v44 = vrot.slane %v6374_v29, %v9189_v52  ;;  %v4674_v31 = vrot.slane %v4660_v12, %v9189_v52 }
 0x299   : > { %v6424_v37 = vcombine.low %v6416_v53, %v6423_v57  ;;  %v6389_v18 = vrot.slane %v6375_v14, %v9189_v52  ;;  %v4675_v16 = vcombine.high %v4667_v59, %v4667_v59  ;;  %v5948_v4 = vmul.f32 %v4667_v59, %v4667_v59 }
 0x29a   : > { %v7180_v51 = vpack.c.bf16 %v5327_v10, %v5327_v10  ;;  %v5838_v58 = vsel %vm5810_vm8, %v5327_v10, 0.0  ;;  %5794 = vst.msk [vmem:[%s9229_s15 + $0x40] sm:$0xf] %vm5777_vm14, %v7182_v55  ;;  %v4676_v26 = vcombine.high %v4674_v31, %v4674_v31  ;;  %v5950_v61 = vmul.f32 %v4674_v31, %v4674_v31 }
 0x29b   : > { %v5839_v63 = vadd.f32 %v5838_v58, %v5837_v9  ;;  %v6390_v6 = vcombine.low %v6382_v44, %v6389_v18  ;;  %v4626_v15 = vcombine.high %v4624_v43, %v4624_v43  ;;  %v5362_v5 = vcombine.low %v4667_v59, %v4675_v16 }
 0x29c   : > { %5792 = vst.msk [vmem:[%s9229_s15 + $0x38] sm:$0xf] %vm5777_vm14, %v7180_v51  ;;  %v5949_v23 = vmul.f32 %v4675_v16, %v4675_v16  ;;  %v4627_v8 = vcombine.high %v7732_v50, %v7732_v50  ;;  %v4634_v46 = vrot.slane %v7732_v50, %v9189_v52  ;;  %v5363_v13 = vcombine.low %v4674_v31, %v4676_v26 }
 0x29d   : > { %v6739_v20 = vsel %vm5810_vm8, %v6390_v6, 0.0  ;;  %v5951_v21 = vmul.f32 %v4676_v26, %v4676_v26  ;;  %v5940_v60 = vmul.f32 %v4626_v15, %v4626_v15  ;;  %v5370_v9 = vrot.slane %v5362_v5, %v9189_v52 }
 0x29e   : > { %v6740_v38 = vadd.f32 %v6739_v20, %v6738_v42  ;;  %v6425_v17 = vcombine.low %v5948_v4, %v5949_v23  ;;  %v4641_v28 = vrot.slane %v4627_v8, %v9189_v52  ;;  %v5377_v34 = vrot.slane %v5363_v13, %v9189_v52 }
 0x29f   : > { %v6426_v30 = vcombine.low %v5950_v61, %v5951_v21  ;;  %v4642_v43 = vcombine.high %v4634_v46, %v4634_v46  ;;  %v5328_v0 = vcombine.low %v4626_v15, %v4634_v46  ;;  %v5941_v53 = vmul.f32 %v4634_v46, %v4634_v46 }
 0x2a0   : > { %v6433_v39 = vrot.slane %v6425_v17, %v9189_v52  ;;  %v5943_v41 = vmul.f32 %v4641_v28, %v4641_v28  ;;  %v7733_v7 = vadd.f32 %v9353_v2, %v9331_v54  ;;  %v5378_v22 = vcombine.low %v5370_v9, %v5377_v34 }
 0x2a1   : > { %v6440_v42 = vrot.slane %v6426_v30, %v9189_v52  ;;  %v5329_v57 = vcombine.low %v4642_v43, %v4641_v28  ;;  %v5336_v29 = vrot.slane %v5328_v0, %v9189_v52  ;;  %v5842_v12 = vsel %vm5810_vm8, %v5361_v47, 0.0 }
 0x2a2   : > { %v5942_v10 = vmul.f32 %v4642_v43, %v4642_v43  ;;  %v6391_v14 = vcombine.low %v5940_v60, %v5941_v53  ;;  %v4711_v59 = vcombine.high %v7733_v7, %v7733_v7  ;;  %v6743_v50 = vsel %vm5810_vm8, %v6424_v37, 0.0 }
 0x2a3   : > { %v7183_v55 = vpack.c.bf16 %v5378_v22, %v5378_v22  ;;  %v6441_v44 = vcombine.low %v6433_v39, %v6440_v42  ;;  %v5343_v51 = vrot.slane %v5329_v57, %v9189_v52  ;;  %v9598_v2 = vrot.slane %v7733_v7, %v9189_v52 }
 0x2a4   : > { %v6392_v58 = vcombine.low %v5942_v10, %v5943_v41  ;;  %v6399_v54 = vrot.slane %v6391_v14, %v9189_v52  ;;  %v4725_v18 = vrot.slane %v4711_v59, %v9189_v52  ;;  %v5844_v47 = vsel %vm5810_vm8, %v5378_v22, 0.0 }
 0x2a5   : > { %5795 = vst.msk [vmem:[%s9229_s15 + $0x44] sm:$0xf] %vm5777_vm14, %v7183_v55  ;;  %v5344_v31 = vcombine.low %v5336_v29, %v5343_v51  ;;  %v7734_v37 = vadd.f32 %v9357_v25, %v9340_v24  ;;  %v7735_v16 = vadd.f32 %v9361_v40, %v9343_v56  ;;  %v7736_v61 = vadd.f32 %v9369_v11, %v9349_v49 }
 0x2a6   : > { %v6406_v4 = vrot.slane %v6392_v58, %v9189_v52  ;;  %v4726_v6 = vcombine.high %v4725_v18, %v4725_v18  ;;  %v5960_v26 = vmul.f32 %v4725_v18, %v4725_v18  ;;  %v9620_v11 = vmul.f32 %v9598_v2, %v9598_v2 }
 0x2a7   : > { %v7181_v15 = vpack.c.bf16 %v5344_v31, %v5344_v31  ;;  %v5840_v5 = vsel %vm5810_vm8, %v5344_v31, 0.0  ;;  %v4677_v23 = vcombine.high %v7734_v37, %v7734_v37  ;;  %v4684_v8 = vrot.slane %v7734_v37, %v9189_v52 }
 0x2a8   : > { %v5841_v46 = vadd.f32 %v5840_v5, %v5839_v63  ;;  %v6407_v20 = vcombine.low %v6399_v54, %v6406_v4  ;;  %v5413_v13 = vcombine.low %v4725_v18, %v4726_v6  ;;  %v5961_v24 = vmul.f32 %v4726_v6, %v4726_v6 }
 0x2a9   : > { %5793 = vst.msk [vmem:[%s9229_s15 + $0x3c] sm:$0xf] %vm5777_vm14, %v7181_v15  ;;  %v4691_v56 = vrot.slane %v4677_v23, %v9189_v52  ;;  %v4692_v25 = vcombine.high %v4684_v8, %v4684_v8  ;;  %v4727_v40 = vcombine.high %v7735_v16, %v7735_v16  ;;  %v4734_v21 = vrot.slane %v7735_v16, %v9189_v52 }
 0x2aa   : > { %v5843_v60 = vadd.f32 %v5842_v12, %v5841_v46  ;;  %v6741_v49 = vsel %vm5810_vm8, %v6407_v20, 0.0  ;;  %v6476_v9 = vcombine.low %v5960_v26, %v5961_v24  ;;  %v6745_v30 = vsel %vm5810_vm8, %v6441_v44, 0.0 }
 0x2ab   : > { %v6742_v63 = vadd.f32 %v6741_v49, %v6740_v38  ;;  %v5379_v17 = vcombine.low %v4692_v25, %v4691_v56  ;;  %v5952_v28 = vmul.f32 %v4692_v25, %v4692_v25  ;;  %v5953_v34 = vmul.f32 %v4691_v56, %v4691_v56 }
 0x2ac   : > { %v5421_v43 = vrot.slane %v5413_v13, %v9189_v52  ;;  %v4741_v0 = vrot.slane %v4727_v40, %v9189_v52  ;;  %v4742_v39 = vcombine.high %v4734_v21, %v4734_v21  ;;  %v9626_v41 = vrot.slane %v6476_v9, %v9189_v52 }
 0x2ad   : > { %v6744_v53 = vadd.f32 %v6743_v50, %v6742_v63  ;;  %v5962_v7 = vmul.f32 %v4734_v21, %v4734_v21  ;;  %v4693_v22 = vcombine.high %v4691_v56, %v4691_v56  ;;  %v6442_v42 = vcombine.low %v5952_v28, %v5953_v34 }
 0x2ae   : > { %v4743_v57 = vcombine.high %v4741_v0, %v4741_v0  ;;  %v5414_v29 = vcombine.low %v4734_v21, %v4742_v39  ;;  %v5963_v38 = vmul.f32 %v4742_v39, %v4742_v39  ;;  %v5387_v12 = vrot.slane %v5379_v17, %v9189_v52 }
 0x2af   : > { %v4694_v10 = vcombine.high %v7736_v61, %v7736_v61  ;;  %v4701_v14 = vrot.slane %v7736_v61, %v9189_v52  ;;  %v5845_v59 = vadd.f32 %v5844_v47, %v5843_v60  ;;  %v5964_v58 = vmul.f32 %v4741_v0, %v4741_v0 }
 0x2b0   : > { %v5428_v55 = vrot.slane %v5414_v29, %v9189_v52  ;;  %v5430_v44 = vcombine.low %v4741_v0, %v4743_v57  ;;  %v5965_v51 = vmul.f32 %v4743_v57, %v4743_v57  ;;  %v6477_v50 = vcombine.low %v5962_v7, %v5963_v38 }
 0x2b1   : > { %v4708_v54 = vrot.slane %v4694_v10, %v9189_v52  ;;  %v4709_v18 = vcombine.high %v4701_v14, %v4701_v14  ;;  %v5380_v31 = vcombine.low %v4693_v22, %v4701_v14  ;;  %v6450_v37 = vrot.slane %v6442_v42, %v9189_v52 }
 0x2b2   : > { %v5429_v16 = vcombine.low %v5421_v43, %v5428_v55  ;;  %v6491_v4 = vrot.slane %v6477_v50, %v9189_v52  ;;  %v5954_v6 = vmul.f32 %v4693_v22, %v4693_v22  ;;  %v9635_v26 = vrot.slane %v5430_v44, %v9189_v52 }
 0x2b3   : > { %v4710_v47 = vcombine.high %v4708_v54, %v4708_v54  ;;  %v5394_v61 = vrot.slane %v5380_v31, %v9189_v52  ;;  %v5396_v15 = vcombine.low %v4709_v18, %v4708_v54  ;;  %v6493_v8 = vcombine.low %v5964_v58, %v5965_v51 }
 0x2b4   : > { %v7186_v5 = vpack.c.bf16 %v5429_v16, %v5429_v16  ;;  %v6492_v23 = vcombine.low %v9626_v41, %v6491_v4  ;;  %v5955_v46 = vmul.f32 %v4701_v14, %v4701_v14  ;;  %v5850_v20 = vsel %vm5810_vm8, %v5429_v16, 0.0 }
 0x2b5   : > { %v5395_v13 = vcombine.low %v5387_v12, %v5394_v61  ;;  %v5397_v24 = vcombine.low %v4710_v47, %v9598_v2  ;;  %v5956_v56 = vmul.f32 %v4709_v18, %v4709_v18  ;;  %v5404_v25 = vrot.slane %v5396_v15, %v9189_v52 }
 0x2b6   : > { %5798 = vst.msk [vmem:[%s9229_s15 + $0x50] sm:$0xf] %vm5777_vm14, %v7186_v5  ;;  %v5957_v40 = vmul.f32 %v4708_v54, %v4708_v54  ;;  %v5958_v21 = vmul.f32 %v4710_v47, %v4710_v47  ;;  %v6443_v60 = vcombine.low %v5954_v6, %v5955_v46  ;;  %v6746_v17 = vadd.f32 %v6745_v30, %v6744_v53 }
 0x2b7   : > { %v5411_v49 = vrot.slane %v5397_v24, %v9189_v52  ;;  %v7184_v9 = vpack.c.bf16 %v5395_v13, %v5395_v13  ;;  %v5846_v63 = vsel %vm5810_vm8, %v5395_v13, 0.0  ;;  %v7737_v39 = vadd.f32 %v9395_v27, %v9367_v45 }
 0x2b8   : > { %v5847_v28 = vadd.f32 %v5846_v63, %v5845_v59  ;;  %v6457_v34 = vrot.slane %v6443_v60, %v9189_v52  ;;  %v6459_v43 = vcombine.low %v5956_v56, %v5957_v40  ;;  %v6460_v2 = vcombine.low %v5958_v21, %v9620_v11 }
 0x2b9   : > { %v5412_v0 = vcombine.low %v5404_v25, %v5411_v49  ;;  %5796 = vst.msk [vmem:[%s9229_s15 + $0x48] sm:$0xf] %vm5777_vm14, %v7184_v9  ;;  %v7738_v41 = vadd.f32 %v9401_v33, %v9373_v1  ;;  %v7739_v7 = vadd.f32 %v9406_v35, %v9378_v36  ;;  %v7740_v11 = vadd.f32 %v9416_v62, %v9385_v32 }
 0x2ba   : > { %v6458_v30 = vcombine.low %v6450_v37, %v6457_v34  ;;  %v6467_v53 = vrot.slane %v6459_v43, %v9189_v52  ;;  %v6474_v22 = vrot.slane %v6460_v2, %v9189_v52  ;;  %v4778_v29 = vcombine.high %v7737_v39, %v7737_v39 }
 0x2bb   : > { %v7185_v42 = vpack.c.bf16 %v5412_v0, %v5412_v0  ;;  %v5848_v57 = vsel %vm5810_vm8, %v5412_v0, 0.0  ;;  %v9662_v45 = vrot.slane %v7737_v39, %v9189_v52  ;;  %v4744_v36 = vcombine.high %v7738_v41, %v7738_v41 }
 0x2bc   : > { %v5849_v27 = vadd.f32 %v5848_v57, %v5847_v28  ;;  %v6475_v1 = vcombine.low %v6467_v53, %v6474_v22  ;;  %v6747_v33 = vsel %vm5810_vm8, %v6458_v30, 0.0  ;;  %v6501_v35 = vrot.slane %v6493_v8, %v9189_v52 }
 0x2bd   : > { %5797 = vst.msk [vmem:[%s9229_s15 + $0x4c] sm:$0xf] %vm5777_vm14, %v7185_v42  ;;  %v6748_v38 = vadd.f32 %v6747_v33, %v6746_v17  ;;  %v4792_v12 = vrot.slane %v4778_v29, %v9189_v52  ;;  %v4793_v32 = vcombine.high %v9662_v45, %v9662_v45  ;;  %v4751_v10 = vrot.slane %v7738_v41, %v9189_v52 }
 0x2be   : > { %v6749_v62 = vsel %vm5810_vm8, %v6475_v1, 0.0  ;;  %v4758_v14 = vrot.slane %v4744_v36, %v9189_v52  ;;  %v5851_v59 = vadd.f32 %v5850_v20, %v5849_v27  ;;  %v6751_v58 = vsel %vm5810_vm8, %v6492_v23, 0.0 }
 0x2bf   : > { %v6750_v55 = vadd.f32 %v6749_v62, %v6748_v38  ;;  %v5465_v44 = vcombine.low %v4793_v32, %v4792_v12  ;;  %v5974_v51 = vmul.f32 %v4793_v32, %v4793_v32  ;;  %v5975_v50 = vmul.f32 %v4792_v12, %v4792_v12 }
 0x2c0   : > { %v4759_v54 = vcombine.high %v4751_v10, %v4751_v10  ;;  %v4760_v18 = vcombine.high %v4758_v14, %v4758_v14  ;;  %v4794_v31 = vcombine.high %v7739_v7, %v7739_v7  ;;  %v9677_v37 = vmul.f32 %v9662_v45, %v9662_v45 }
 0x2c1   : > { %v5966_v16 = vmul.f32 %v4751_v10, %v4751_v10  ;;  %v6752_v4 = vadd.f32 %v6751_v58, %v6750_v55  ;;  %v4801_v6 = vrot.slane %v7739_v7, %v9189_v52  ;;  %v5479_v47 = vrot.slane %v5465_v44, %v9189_v52 }
 0x2c2   : > { %v5431_v61 = vcombine.low %v4751_v10, %v4759_v54  ;;  %v5967_v15 = vmul.f32 %v4759_v54, %v4759_v54  ;;  %v4808_v5 = vrot.slane %v4794_v31, %v9189_v52  ;;  %v6528_v8 = vcombine.low %v5974_v51, %v5975_v50  ;;  %v10105_v31 = vld [vmem:[#allocation5_spill] sm:$0xff] }
 0x2c3   : > { %v5968_v46 = vmul.f32 %v4760_v18, %v4760_v18  ;;  %v4809_v23 = vcombine.high %v4801_v6, %v4801_v6  ;;  %v4761_v20 = vcombine.high %v7740_v11, %v7740_v11  ;;  %v5976_v25 = vmul.f32 %v4801_v6, %v4801_v6 }
 0x2c4   : > { %v5445_v13 = vrot.slane %v5431_v61, %v9189_v52  ;;  %v6494_v24 = vcombine.low %v5966_v16, %v5967_v15  ;;  %v4810_v56 = vcombine.high %v4808_v5, %v4808_v5  ;;  %v4768_v60 = vrot.slane %v7740_v11, %v9189_v52 }
 0x2c5   : > { %v5481_v40 = vcombine.low %v4801_v6, %v4809_v23  ;;  %v5977_v21 = vmul.f32 %v4809_v23, %v4809_v23  ;;  %v4775_v49 = vrot.slane %v4761_v20, %v9189_v52  ;;  %v5978_v43 = vmul.f32 %v4808_v5, %v4808_v5 }
 0x2c6   : > { %v5446_v9 = vcombine.low %v9635_v26, %v5445_v13  ;;  %v6508_v63 = vrot.slane %v6494_v24, %v9189_v52  ;;  %v5482_v17 = vcombine.low %v4808_v5, %v4810_v56  ;;  %v5979_v28 = vmul.f32 %v4810_v56, %v4810_v56  ;;  %v10106_v24 = vld [vmem:[#allocation3_spill] sm:$0xff]  ;;  %v10107_v56 = vld [vmem:[#allocation6_spill] sm:$0xff] }
 0x2c7   : > { %v5489_v34 = vrot.slane %v5481_v40, %v9189_v52  ;;  %v4776_v2 = vcombine.high %v4768_v60, %v4768_v60  ;;  %v4777_v0 = vcombine.high %v4775_v49, %v4775_v49  ;;  %v6544_v22 = vcombine.low %v5976_v25, %v5977_v21 }
 0x2c8   : > { %v7187_v39 = vpack.c.bf16 %v5446_v9, %v5446_v9  ;;  %v5852_v41 = vsel %vm5810_vm8, %v5446_v9, 0.0  ;;  %v6509_v7 = vcombine.low %v6501_v35, %v6508_v63  ;;  %v5496_v30 = vrot.slane %v5482_v17, %v9189_v52 }
 0x2c9   : > { %v5853_v53 = vadd.f32 %v5852_v41, %v5851_v59  ;;  %v6545_v11 = vcombine.low %v5978_v43, %v5979_v28  ;;  %v5447_v26 = vcombine.low %v4760_v18, %v4768_v60  ;;  %v5448_v29 = vcombine.low %v4776_v2, %v4775_v49 }
 0x2ca   : > { %5799 = vst.msk [vmem:[%s9229_s15 + $0x54] sm:$0xf] %vm5777_vm14, %v7187_v39  ;;  %v6753_v42 = vsel %vm5810_vm8, %v6509_v7, 0.0  ;;  %v5497_v57 = vcombine.low %v5489_v34, %v5496_v30  ;;  %v5464_v27 = vcombine.low %v4777_v0, %v9662_v45  ;;  %v6542_v1 = vrot.slane %v6528_v8, %v9189_v52 }
 0x2cb   : > { %v6754_v33 = vadd.f32 %v6753_v42, %v6752_v4  ;;  %v6559_v36 = vrot.slane %v6545_v11, %v9189_v52  ;;  %v5455_v35 = vrot.slane %v5447_v26, %v9189_v52  ;;  %v5462_v12 = vrot.slane %v5448_v29, %v9189_v52 }
 0x2cc   : > { %v7190_v38 = vpack.c.bf16 %v5497_v57, %v5497_v57  ;;  %v5472_v32 = vrot.slane %v5464_v27, %v9189_v52  ;;  %v5969_v62 = vmul.f32 %v4768_v60, %v4768_v60  ;;  %v6552_v10 = vrot.slane %v6544_v22, %v9189_v52 }
 0x2cd   : > { %v5970_v14 = vmul.f32 %v4776_v2, %v4776_v2  ;;  %v5971_v59 = vmul.f32 %v4775_v49, %v4775_v49  ;;  %v5972_v55 = vmul.f32 %v4777_v0, %v4777_v0  ;;  %v5463_v45 = vcombine.low %v5455_v35, %v5462_v12 }
 0x2ce   : > { %5802 = vst.msk [vmem:[%s9229_s15 + $0x60] sm:$0xf] %vm5777_vm14, %v7190_v38  ;;  %v5480_v44 = vcombine.low %v5472_v32, %v5479_v47  ;;  %v6510_v51 = vcombine.low %v5968_v46, %v5969_v62  ;;  %v7741_v50 = vadd.f32 %v9436_v19, %v9414_v3  ;;  %v6560_v58 = vcombine.low %v6552_v10, %v6559_v36 }
 0x2cf   : > { %v6511_v54 = vcombine.low %v5970_v14, %v5971_v59  ;;  %v6527_v18 = vcombine.low %v5972_v55, %v9677_v37  ;;  %v7742_v16 = vadd.f32 %v10105_v31, %v9418_v48  ;;  %v7188_v4 = vpack.c.bf16 %v5463_v45, %v5463_v45 }
 0x2d0   : > { %v7189_v6 = vpack.c.bf16 %v5480_v44, %v5480_v44  ;;  %v5854_v61 = vsel %vm5810_vm8, %v5463_v45, 0.0  ;;  %v5856_v15 = vsel %vm5810_vm8, %v5480_v44, 0.0  ;;  %v6518_v47 = vrot.slane %v6510_v51, %v9189_v52  ;;  %v10108_v44 = vld [vmem:[#allocation4_spill] sm:$0xff] }
 0x2d1   : > { %v5855_v5 = vadd.f32 %v5854_v61, %v5853_v53  ;;  %v6525_v8 = vrot.slane %v6511_v54, %v9189_v52  ;;  %v6535_v3 = vrot.slane %v6527_v18, %v9189_v52  ;;  %5800 = vst.msk [vmem:[%s9229_s15 + $0x58] sm:$0xf] %vm5777_vm14, %v7188_v4  ;;  %v4845_v19 = vcombine.high %v7741_v50, %v7741_v50  ;;  %v10109_v51 = vld [vmem:[#allocation8_spill] sm:$0xff] }
 0x2d2   : > { %5801 = vst.msk [vmem:[%s9229_s15 + $0x5c] sm:$0xf] %vm5777_vm14, %v7189_v6  ;;  %v9717_v48 = vrot.slane %v7741_v50, %v9189_v52  ;;  %v4811_v37 = vcombine.high %v7742_v16, %v7742_v16  ;;  %v4818_v46 = vrot.slane %v7742_v16, %v9189_v52  ;;  %v7743_v25 = vadd.f32 %v10107_v56, %v10106_v24 }
 0x2d3   : > { %v5857_v23 = vadd.f32 %v5856_v15, %v5855_v5  ;;  %v6526_v20 = vcombine.low %v6518_v47, %v6525_v8  ;;  %v6543_v13 = vcombine.low %v6535_v3, %v6542_v1  ;;  %v4859_v40 = vrot.slane %v4845_v19, %v9189_v52 }
 0x2d4   : > { %v4860_v21 = vcombine.high %v9717_v48, %v9717_v48  ;;  %v4825_v60 = vrot.slane %v4811_v37, %v9189_v52  ;;  %v5858_v49 = vsel %vm5810_vm8, %v5497_v57, 0.0  ;;  %v4826_v17 = vcombine.high %v4818_v46, %v4818_v46 }
 0x2d5   : > { %v6755_v9 = vsel %vm5810_vm8, %v6526_v20, 0.0  ;;  %v6757_v63 = vsel %vm5810_vm8, %v6543_v13, 0.0  ;;  %v6759_v28 = vsel %vm5810_vm8, %v6560_v58, 0.0  ;;  %v5980_v2 = vmul.f32 %v4818_v46, %v4818_v46 }
 0x2d6   : > { %v6756_v34 = vadd.f32 %v6755_v9, %v6754_v33  ;;  %v5988_v43 = vmul.f32 %v4860_v21, %v4860_v21  ;;  %v5989_v0 = vmul.f32 %v4859_v40, %v4859_v40  ;;  %v4827_v39 = vcombine.high %v4825_v60, %v4825_v60  ;;  %v10110_v9 = vld [vmem:[#allocation7_spill] sm:$0xff] }
 0x2d7   : > { %v5498_v41 = vcombine.low %v4818_v46, %v4826_v17  ;;  %v5981_v7 = vmul.f32 %v4826_v17, %v4826_v17  ;;  %v9732_v53 = vmul.f32 %v9717_v48, %v9717_v48  ;;  %v4861_v22 = vcombine.high %v4859_v40, %v4859_v40 }
 0x2d8   : > { %v6758_v30 = vadd.f32 %v6757_v63, %v6756_v34  ;;  %v4862_v11 = vcombine.high %v7743_v25, %v7743_v25  ;;  %v5499_v26 = vcombine.low %v4825_v60, %v4827_v39  ;;  %v5982_v42 = vmul.f32 %v4825_v60, %v4825_v60  ;;  %v10111_v63 = vld [vmem:[#allocation12_spill] sm:$0xff]  ;;  %v10112_v34 = vld [vmem:[#allocation9_spill] sm:$0xff] }
 0x2d9   : > { %v5983_v57 = vmul.f32 %v4827_v39, %v4827_v39  ;;  %v6561_v29 = vcombine.low %v5980_v2, %v5981_v7  ;;  %v5532_v27 = vcombine.low %v4860_v21, %v4859_v40  ;;  %v4869_v1 = vrot.slane %v7743_v25, %v9189_v52  ;;  %v10115_v39 = vld [vmem:[#allocation14_spill] sm:$0xff] }
 0x2da   : > { %v4876_v33 = vrot.slane %v4862_v11, %v9189_v52  ;;  %v5990_v36 = vmul.f32 %v4861_v22, %v4861_v22  ;;  %v6595_v35 = vcombine.low %v5988_v43, %v5989_v0  ;;  %v5506_v38 = vrot.slane %v5498_v41, %v9189_v52  ;;  %v10113_v43 = vld [vmem:[#allocation13_spill] sm:$0xff]  ;;  %v10114_v0 = vld [vmem:[#allocation10_spill] sm:$0xff] }
 0x2db   : > { %v5513_v12 = vrot.slane %v5499_v26, %v9189_v52  ;;  %v6562_v32 = vcombine.low %v5982_v42, %v5983_v57  ;;  %v6569_v62 = vrot.slane %v6561_v29, %v9189_v52  ;;  %v5533_v14 = vcombine.low %v4861_v22, %v4869_v1 }
 0x2dc   : > { %v4877_v10 = vcombine.high %v4876_v33, %v4876_v33  ;;  %v5991_v59 = vmul.f32 %v4869_v1, %v4869_v1  ;;  %v7744_v50 = vadd.f32 %v10109_v51, %v10108_v44  ;;  %v5859_v58 = vadd.f32 %v5858_v49, %v5857_v23 }
 0x2dd   : > { %v5514_v55 = vcombine.low %v5506_v38, %v5513_v12  ;;  %v6576_v45 = vrot.slane %v6562_v32, %v9189_v52  ;;  %v5540_v54 = vrot.slane %v5532_v27, %v9189_v52  ;;  %v5547_v18 = vrot.slane %v5533_v14, %v9189_v52 }
 0x2de   : > { %v5549_v31 = vcombine.low %v4876_v33, %v4877_v10  ;;  %v6596_v16 = vcombine.low %v5990_v36, %v5991_v59  ;;  %v4828_v15 = vcombine.high %v7744_v50, %v7744_v50  ;;  %v5993_v47 = vmul.f32 %v4877_v10, %v4877_v10 }
 0x2df   : > { %v7191_v4 = vpack.c.bf16 %v5514_v55, %v5514_v55  ;;  %v5860_v6 = vsel %vm5810_vm8, %v5514_v55, 0.0  ;;  %v6577_v61 = vcombine.low %v6569_v62, %v6576_v45  ;;  %v5548_v5 = vcombine.low %v5540_v54, %v5547_v18 }
 0x2e0   : > { %v6603_v8 = vrot.slane %v6595_v35, %v9189_v52  ;;  %v6610_v3 = vrot.slane %v6596_v16, %v9189_v52  ;;  %v5992_v19 = vmul.f32 %v4876_v33, %v4876_v33  ;;  %v4835_v37 = vrot.slane %v7744_v50, %v9189_v52 }
 0x2e1   : > { %5803 = vst.msk [vmem:[%s9229_s15 + $0x64] sm:$0xf] %vm5777_vm14, %v7191_v4  ;;  %v4842_v46 = vrot.slane %v4828_v15, %v9189_v52  ;;  %v5861_v23 = vadd.f32 %v5860_v6, %v5859_v58  ;;  %v6761_v20 = vsel %vm5810_vm8, %v6577_v61, 0.0  ;;  %v5557_v13 = vrot.slane %v5549_v31, %v9189_v52 }
 0x2e2   : > { %v7193_v24 = vpack.c.bf16 %v5548_v5, %v5548_v5  ;;  %v6611_v56 = vcombine.low %v6603_v8, %v6610_v3  ;;  %v4843_v25 = vcombine.high %v4835_v37, %v4835_v37  ;;  %v6760_v60 = vadd.f32 %v6759_v28, %v6758_v30 }
 0x2e3   : > { %v4844_v40 = vcombine.high %v4842_v46, %v4842_v46  ;;  %v5985_v21 = vmul.f32 %v4842_v46, %v4842_v46  ;;  %v6612_v49 = vcombine.low %v5992_v19, %v5993_v47  ;;  %v7745_v17 = vadd.f32 %v10111_v63, %v10110_v9 }
 0x2e4   : > { %5805 = vst.msk [vmem:[%s9229_s15 + $0x6c] sm:$0xf] %vm5777_vm14, %v7193_v24  ;;  %v7746_v2 = vadd.f32 %v10113_v43, %v10112_v34  ;;  %v7747_v41 = vadd.f32 %v10115_v39, %v10114_v0  ;;  %v5515_v7 = vcombine.low %v4843_v25, %v4842_v46  ;;  %v5984_v11 = vmul.f32 %v4843_v25, %v4843_v25  ;;  %v10117_v25 = vld [vmem:[#allocation15_spill] sm:$0xff] }
 0x2e5   : > { %v5516_v22 = vcombine.low %v4844_v40, %v9717_v48  ;;  %v5986_v26 = vmul.f32 %v4844_v40, %v4844_v40  ;;  %v6762_v42 = vadd.f32 %v6761_v20, %v6760_v60  ;;  %v4912_v57 = vcombine.high %v7745_v17, %v7745_v17 }
 0x2e6   : > { %v9763_v28 = vrot.slane %v7745_v17, %v9189_v52  ;;  %v4878_v30 = vcombine.high %v7746_v2, %v7746_v2  ;;  %v5523_v29 = vrot.slane %v5515_v7, %v9189_v52  ;;  %v6578_v1 = vcombine.low %v5984_v11, %v5985_v21 }
 0x2e7   : > { %v5530_v27 = vrot.slane %v5516_v22, %v9189_v52  ;;  %v6579_v33 = vcombine.low %v5986_v26, %v9732_v53  ;;  %v5864_v36 = vsel %vm5810_vm8, %v5548_v5, 0.0  ;;  %v9770_v35 = vrot.slane %v4912_v57, %v9189_v52 }
 0x2e8   : > { %v9774_v48 = vcombine.high %v9763_v28, %v9763_v28  ;;  %v4885_v38 = vrot.slane %v7746_v2, %v9189_v52  ;;  %v6586_v32 = vrot.slane %v6578_v1, %v9189_v52  ;;  %v4892_v10 = vrot.slane %v4878_v30, %v9189_v52 }
 0x2e9   : > { %v5531_v12 = vcombine.low %v5523_v29, %v5530_v27  ;;  %v6593_v62 = vrot.slane %v6579_v33, %v9189_v52  ;;  %v6620_v53 = vrot.slane %v6612_v49, %v9189_v52  ;;  %v4928_v14 = vcombine.high %v9770_v35, %v9770_v35 }
 0x2ea   : > { %v9785_v59 = vmul.f32 %v9774_v48, %v9774_v48  ;;  %v9789_v55 = vmul.f32 %v9770_v35, %v9770_v35  ;;  %v4893_v50 = vcombine.high %v4885_v38, %v4885_v38  ;;  %v6765_v58 = vsel %vm5810_vm8, %v6611_v56, 0.0  ;;  %v10116_v56 = vld [vmem:[#allocation11_spill] sm:$0xff] }
 0x2eb   : > { %v7192_v45 = vpack.c.bf16 %v5531_v12, %v5531_v12  ;;  %v5862_v44 = vsel %vm5810_vm8, %v5531_v12, 0.0  ;;  %v6594_v51 = vcombine.low %v6586_v32, %v6593_v62  ;;  %v5584_v18 = vcombine.low %v9774_v48, %v9770_v35 }
 0x2ec   : > { %v5863_v54 = vadd.f32 %v5862_v44, %v5861_v23  ;;  %v9797_v31 = vmul.f32 %v9763_v28, %v9763_v28  ;;  %v6004_v4 = vmul.f32 %v4928_v14, %v4928_v14  ;;  %v4894_v6 = vcombine.high %v4892_v10, %v4892_v10 }
 0x2ed   : > { %5804 = vst.msk [vmem:[%s9229_s15 + $0x68] sm:$0xf] %vm5777_vm14, %v7192_v45  ;;  %v6763_v16 = vsel %vm5810_vm8, %v6594_v51, 0.0  ;;  %v5550_v61 = vcombine.low %v4885_v38, %v4893_v50  ;;  %v5994_v47 = vmul.f32 %v4885_v38, %v4885_v38  ;;  %v5995_v8 = vmul.f32 %v4893_v50, %v4893_v50 }
 0x2ee   : > { %v5865_v15 = vadd.f32 %v5864_v36, %v5863_v54  ;;  %v6764_v5 = vadd.f32 %v6763_v16, %v6762_v42  ;;  %v6647_v3 = vcombine.low %v9785_v59, %v9789_v55  ;;  %v5566_v37 = vcombine.low %v4892_v10, %v4894_v6 }
 0x2ef   : > { %v5564_v19 = vrot.slane %v5550_v61, %v9189_v52  ;;  %v5997_v46 = vmul.f32 %v4894_v6, %v4894_v6  ;;  %v6613_v20 = vcombine.low %v5994_v47, %v5995_v8  ;;  %v4304_v24 = vsel %vm2795_vm0, %v7747_v41, 0.0 }
 0x2f0   : > { %v6766_v23 = vadd.f32 %v6765_v58, %v6764_v5  ;;  %v7748_v40 = vadd.f32 %v10117_v25, %v10116_v56  ;;  %v5574_v60 = vrot.slane %v5566_v37, %v9189_v52  ;;  %v5996_v49 = vmul.f32 %v4892_v10, %v4892_v10 }
 0x2f1   : > { %v5565_v21 = vcombine.low %v5557_v13, %v5564_v19  ;;  %v4929_v9 = vcombine.high %v4304_v24, %v4304_v24  ;;  %v6627_v63 = vrot.slane %v6613_v20, %v9189_v52  ;;  %v4936_v17 = vrot.slane %v4304_v24, %v9189_v52 }
 0x2f2   : > { %v4895_v34 = vcombine.high %v7748_v40, %v7748_v40  ;;  %v4902_v43 = vrot.slane %v7748_v40, %v9189_v52  ;;  %v6629_v39 = vcombine.low %v5996_v49, %v5997_v46  ;;  %v5598_v58 = vrot.slane %v5584_v18, %v9189_v52 }
 0x2f3   : > { %v7194_v2 = vpack.c.bf16 %v5565_v21, %v5565_v21  ;;  %v5866_v0 = vsel %vm5810_vm8, %v5565_v21, 0.0  ;;  %v4943_v41 = vrot.slane %v4929_v9, %v9189_v52  ;;  %v6628_v13 = vcombine.low %v6620_v53, %v6627_v63 }
 0x2f4   : > { %v5867_v7 = vadd.f32 %v5866_v0, %v5865_v15  ;;  %v4944_v22 = vcombine.high %v4936_v17, %v4936_v17  ;;  %v5600_v11 = vcombine.low %v4928_v14, %v4936_v17  ;;  %v6005_v26 = vmul.f32 %v4936_v17, %v4936_v17 }
 0x2f5   : > { %5806 = vst.msk [vmem:[%s9229_s15 + $0x70] sm:$0xf] %vm5777_vm14, %v7194_v2  ;;  %v6007_v42 = vmul.f32 %v4943_v41, %v4943_v41  ;;  %v4909_v57 = vrot.slane %v4895_v34, %v9189_v52  ;;  %v4910_v30 = vcombine.high %v4902_v43, %v4902_v43  ;;  %v6767_v29 = vsel %vm5810_vm8, %v6628_v13, 0.0 }
 0x2f6   : > { %v5601_v27 = vcombine.low %v4944_v22, %v4943_v41  ;;  %v5608_v1 = vrot.slane %v5600_v11, %v9189_v52  ;;  %v6006_v33 = vmul.f32 %v4944_v22, %v4944_v22  ;;  %v6768_v36 = vadd.f32 %v6767_v29, %v6766_v23 }
 0x2f7   : > { %v6663_v35 = vcombine.low %v6004_v4, %v6005_v26  ;;  %v4911_v48 = vcombine.high %v4909_v57, %v4909_v57  ;;  %v5567_v38 = vcombine.low %v4902_v43, %v4910_v30  ;;  %v5998_v62 = vmul.f32 %v4902_v43, %v4902_v43 }
 0x2f8   : > { %v5615_v12 = vrot.slane %v5601_v27, %v9189_v52  ;;  %v6664_v32 = vcombine.low %v6006_v33, %v6007_v42  ;;  %v5999_v10 = vmul.f32 %v4910_v30, %v4910_v30  ;;  %v6637_v45 = vrot.slane %v6629_v39, %v9189_v52 }
 0x2f9   : > { %v6671_v53 = vrot.slane %v6663_v35, %v9189_v52  ;;  %v5581_v14 = vrot.slane %v5567_v38, %v9189_v52  ;;  %v5583_v59 = vcombine.low %v4911_v48, %v9763_v28  ;;  %v6000_v55 = vmul.f32 %v4911_v48, %v4911_v48 }
 0x2fa   : > { %v5616_v44 = vcombine.low %v5608_v1, %v5615_v12  ;;  %v6678_v51 = vrot.slane %v6664_v32, %v9189_v52  ;;  %v6630_v50 = vcombine.low %v5998_v62, %v5999_v10  ;;  %v6661_v6 = vrot.slane %v6647_v3, %v9189_v52 }
 0x2fb   : > { %v5582_v54 = vcombine.low %v5574_v60, %v5581_v14  ;;  %v5591_v16 = vrot.slane %v5583_v59, %v9189_v52  ;;  %v6646_v4 = vcombine.low %v6000_v55, %v9797_v31  ;;  %vm6781_vm0 = vcmask 1040384  }
 0x2fc   : > { %v7197_v61 = vpack.c.bf16 %v5616_v44, %v5616_v44  ;;  %v6679_v28 = vcombine.low %v6671_v53, %v6678_v51  ;;  %v6644_v15 = vrot.slane %v6630_v50, %v9189_v52  ;;  %v5872_v24 = vsel %vm5810_vm8, %v5616_v44, 0.0 }
 0x2fd   : > { %v5599_v5 = vcombine.low %v5591_v16, %v5598_v58  ;;  %v7195_v47 = vpack.c.bf16 %v5582_v54, %v5582_v54  ;;  %v5868_v8 = vsel %vm5810_vm8, %v5582_v54, 0.0  ;;  %v6654_v19 = vrot.slane %v6646_v4, %v9189_v52 }
 0x2fe   : > { %5809 = vst.msk [vmem:[%s9229_s15 + $0x7c] sm:$0xf] %vm5777_vm14, %v7197_v61  ;;  %v5869_v18 = vadd.f32 %v5868_v8, %v5867_v7  ;;  %v6645_v37 = vcombine.low %v6637_v45, %v6644_v15  ;;  %v6773_v21 = vsel %vm5810_vm8, %v6679_v28, 0.0 }
 0x2ff   : > { %v7196_v46 = vpack.c.bf16 %v5599_v5, %v5599_v5  ;;  %5807 = vst.msk [vmem:[%s9229_s15 + $0x74] sm:$0xf] %vm5777_vm14, %v7195_v47  ;;  %v5870_v31 = vsel %vm5810_vm8, %v5599_v5, 0.0  ;;  %v6662_v3 = vcombine.low %v6654_v19, %v6661_v6 }
 0x300   : > { %v5871_v23 = vadd.f32 %v5870_v31, %v5869_v18  ;;  %v6769_v20 = vsel %vm5810_vm8, %v6645_v37, 0.0 }
 0x301   : > { %5808 = vst.msk [vmem:[%s9229_s15 + $0x78] sm:$0xf] %vm5777_vm14, %v7196_v46  ;;  %v6770_v56 = vadd.f32 %v6769_v20, %v6768_v36  ;;  %v6771_v52 = vsel %vm5810_vm8, %v6662_v3, 0.0 }
 0x302   : > { %v5873_v25 = vadd.f32 %v5872_v24, %v5871_v23 }
 0x303   : > { %v6772_v40 = vadd.f32 %v6771_v52, %v6770_v56 }
 0x304   : > { %v5874_v60 = vrot.slane %v5873_v25, 4 }
 0x305   : > { %v6774_v49 = vadd.f32 %v6773_v21, %v6772_v40 }
 0x306   : > { %v5875_v9 = vadd.f32 %v5874_v60, %v5873_v25 }
 0x307   : > { %v6775_v63 = vrot.slane %v6774_v49, 4 }
 0x308   : > { %v5876_v17 = vrot.slane %v5875_v9, 2 }
 0x309   : > { %v6776_v34 = vadd.f32 %v6775_v63, %v6774_v49 }
 0x30a   : > { %v5877_v43 = vadd.f32 %v5876_v17, %v5875_v9 }
 0x30b   : > { %v6777_v2 = vrot.slane %v6776_v34, 2 }
 0x30c   : > { %v5878_v0 = vrot.slane %v5877_v43, 1 }
 0x30d   : > { %v6778_v39 = vadd.f32 %v6777_v2, %v6776_v34 }
 0x30e   : > { %v5879_v7 = vadd.f32 %v5878_v0, %v5877_v43 }
 0x30f   : > { %v6779_v41 = vrot.slane %v6778_v39, 1 }
 0x311   : > { %v6780_v13 = vadd.f32 %v6779_v41, %v6778_v39 }
 0x313   : > { %v6782_v22 = vsel %vm6781_vm0, %v5879_v7, %v6780_v13 }
 0x314   : > { %6784 = vst.msk [vmem:[%s181_s19] sm:$0x3] %vm6783_vm12, %v6782_v22 }
 0x315 PF: > { %s14_s12 = sadd.s32 1, %s8115_s12  }
 0x316   : > { %p11_p4 = scmp.ge.s32.totalorder %s14_s12, 4  }
 0x318   :  { %13 = sbr.rel (!%p11_p4) target bundleno = 1 (0x1), region = 78 }

// kernel: basic_block_forward.5
= control target key start
LH: loop header
LB: loop body
LE: loop exit
PB: predicated region body
PF: predicated region fallthrough
CT: control target
= control target key end

     0   :  { %s8545_s15 = smov 0   ;;  %s10352_s0 = inlined_call_operand.vmem [shape: bf16[2,16,16,8], index: 0, kind: input, shape index: {}]   ;;  %s10353_s1 = inlined_call_operand.vmem [shape: bf16[3,3,8,8], index: 1, kind: input, shape index: {}]   ;;  %s10354_s2 = inlined_call_operand.vmem [shape: f32[2,8], index: 2, kind: input, shape index: {}]   ;;  %s10355_s3 = inlined_call_operand.vmem [shape: bf16[2,16,16,8], index: 3, kind: output, shape index: {0}]   ;;  %s10356_s4 = inlined_call_operand.vmem [shape: f32[2,2,8], index: 4, kind: output, shape index: {1}]  }
   0x1 LB: > { %s7128_s16 = sadd.s32 4294967295, %s8516_s15   ;;  %p7132_p0 = scmp.ge.s32.totalorder %s8516_s15, 1  ;;  %s8516_s15 = sphi %s8545_s15, %s15_s15  }
   0x2   : > { %p165_p1 = scmp.lt.s32.totalorder %s8516_s15, 3 }
   0x4   : > { %p166_p2 = pnand %p7132_p0, %p165_p1 }
   0x6   : > { %169 = sbr.rel (%p166_p2) target bundleno = 809 (0x329), region = 32 }
   0xd   : > { %v7170_v0 = vld [vmem:[%s10353_s1 + $0x4] sm:$0xf]  ;;  %vm10357_vm0 = vcmask 1043456   ;;  %v7283_v1 = vld [vmem:[%s10353_s1 + $0x10] sm:$0xf]  ;;  %p195_p3 = scmp.lt.s32.totalorder %s7128_s16, 1  ;;  %v275_v2 = vlaneseq }
   0xe   : > { %8401 = vmatprep.subr.msk.bf16.mxu1 %vm10357_vm0, %v7170_v0  ;;  %8405 = vmatprep.subr.msk.bf16.mxu0 %vm10357_vm0, %v7283_v1  ;;  %v1336_v3 = vsel %vm10357_vm0, %v7170_v0, 0  ;;  %v8563_v4 = vsel %vm10357_vm0, %v7283_v1, 0  ;;  %vm10359_vm1 = vcmask 60416   ;;  %v8518_v6 = vmov 0   ;;  %v242_v7 = vld [vmem:[%s10354_s2] sm:$0x3] }
   0xf   : > { %7770 = vmatpush3.bf16.msra.mxu1 %v1336_v3  ;;  %7922 = vmatpush3.bf16.msra.mxu0 %v8563_v4  ;;  %s10734_s16 = smov (!%p195_p3, %s7128_s16), 1  ;;  %v8568_v5 = vshrl.u32 %v275_v2, 7  ;;  %396 = vst.msk [vmem:[#allocation2] sm:$0xf] %vm10359_vm1, %v8518_v6  ;;  %397 = vst.msk [vmem:[#allocation2 + $0x4] sm:$0xf] %vm10359_vm1, %v8518_v6 }
  0x10   : > { %398 = vst.msk [vmem:[#allocation2 + $0x8] sm:$0xf] %vm10359_vm1, %v8518_v6  ;;  %399 = vst.msk [vmem:[#allocation2 + $0xc] sm:$0xf] %vm10359_vm1, %v8518_v6  ;;  %vm10358_vm2 = vcmask 58368   ;;  %s7453_s23 = sshll.u32 %s10734_s16, 7 }
  0x11   : > { %400 = vst.msk [vmem:[#allocation2 + $0x10] sm:$0xf] %vm10359_vm1, %v8518_v6  ;;  %401 = vst.msk [vmem:[#allocation2 + $0x14] sm:$0xf] %vm10359_vm1, %v8518_v6  ;;  %v277_v8 = vsub.s32 0, %v8568_v5  ;;  %v313_v9 = vsub.s32 1, %v8568_v5  ;;  %s8622_s26 = scalar_lea.vmem %s10352_s0, %s7453_s23  ;;  %s9738_s24 = scalar_lea.vmem %s10355_s3, %s7453_s23 }
  0x12   : > { %402 = vst.msk [vmem:[#allocation2 + $0x18] sm:$0xf] %vm10359_vm1, %v8518_v6  ;;  %403 = vst.msk [vmem:[#allocation2 + $0x1c] sm:$0xf] %vm10359_vm1, %v8518_v6  ;;  %v7520_v10 = vld [vmem:[%s8622_s26] sm:$0xff]   ;;  %v7583_v12 = vld [vmem:[%s8622_s26 + $0x8] sm:$0xff]  }
  0x13   : > { %404 = vst.msk [vmem:[#allocation2 + $0x20] sm:$0xf] %vm10359_vm1, %v8518_v6  ;;  %405 = vst.msk [vmem:[#allocation2 + $0x24] sm:$0xf] %vm10359_vm1, %v8518_v6  ;;  %v8625_v11 = vrot.slane %v242_v7, %v277_v8  ;;  %vm443_vm3 = vsmask.f32 1280  ;;  %v7521_v13 = vunpack.c.l.bf16 %v7520_v10  ;;  %v7522_v14 = vunpack.c.h.bf16 %v7520_v10 }
  0x14   : > { %406 = vst.msk [vmem:[#allocation2 + $0x28] sm:$0xf] %vm10359_vm1, %v8518_v6  ;;  %407 = vst.msk [vmem:[#allocation2 + $0x2c] sm:$0xf] %vm10359_vm1, %v8518_v6  ;;  %v8628_v15 = vrot.slane %v242_v7, %v313_v9  ;;  %vm444_vm4 = vsmask.f32 5392  ;;  %v7525_v16 = vunpack.c.l.bf16 %v7583_v12  ;;  %v7526_v19 = vunpack.c.h.bf16 %v7583_v12 }
  0x15   : > { %408 = vst.msk [vmem:[#allocation2 + $0x30] sm:$0xf] %vm10359_vm1, %v8518_v6  ;;  %409 = vst.msk [vmem:[#allocation2 + $0x34] sm:$0xf] %vm10359_vm1, %v8518_v6  ;;  %v8633_v17 = vld [vmem:[%s10353_s1 + $0x14] sm:$0xf]  ;;  %v279_v23 = vmul.f32 %v7521_v13, %v8625_v11  ;;  %v280_v24 = vmul.f32 %v7522_v14, %v8625_v11 }
  0x16   : > { %410 = vst.msk [vmem:[#allocation2 + $0x38] sm:$0xf] %vm10359_vm1, %v8518_v6  ;;  %411 = vst.msk [vmem:[#allocation2 + $0x3c] sm:$0xf] %vm10359_vm1, %v8518_v6  ;;  %v7584_v18 = vld [vmem:[%s8622_s26 + $0x10] sm:$0xff]   ;;  %vm468_vm5 = vcmask 60417   ;;  %8407 = vmatprep.subr.msk.bf16.mxu0 %vm10357_vm0, %v8633_v17  ;;  %v281_v27 = vmul.f32 %v7525_v16, %v8625_v11  ;;  %v282_v29 = vmul.f32 %v7526_v19, %v8625_v11 }
  0x17   : > { %412 = vst.msk [vmem:[#allocation2 + $0x40] sm:$0xf] %vm10359_vm1, %v8518_v6  ;;  %413 = vst.msk [vmem:[#allocation2 + $0x44] sm:$0xf] %vm10359_vm1, %v8518_v6  ;;  %vm469_vm6 = vsmask.f32 7942  ;;  %v7529_v20 = vunpack.c.l.bf16 %v7584_v18  ;;  %v7530_v21 = vunpack.c.h.bf16 %v7584_v18  ;;  %v315_v32 = vadd.f32 %v8628_v15, %v279_v23 }
  0x18   : > { %414 = vst.msk [vmem:[#allocation2 + $0x48] sm:$0xf] %vm10359_vm1, %v8518_v6  ;;  %415 = vst.msk [vmem:[#allocation2 + $0x4c] sm:$0xf] %vm10359_vm1, %v8518_v6  ;;  %v8641_v22 = vld [vmem:[%s10353_s1] sm:$0xf]  ;;  %v316_v33 = vadd.f32 %v8628_v15, %v280_v24  ;;  %v317_v34 = vadd.f32 %v8628_v15, %v281_v27  ;;  %v318_v36 = vadd.f32 %v8628_v15, %v282_v29 }
  0x19   : > { %416 = vst.msk [vmem:[#allocation2 + $0x50] sm:$0xf] %vm10359_vm1, %v8518_v6  ;;  %417 = vst.msk [vmem:[#allocation2 + $0x54] sm:$0xf] %vm10359_vm1, %v8518_v6  ;;  %v1005_v25 = vld [vmem:[#allocation2] sm:$0xf]  ;;  %8402 = vmatprep.subr.msk.bf16.mxu1 %vm10357_vm0, %v8641_v22  ;;  %v283_v30 = vmul.f32 %v7529_v20, %v8625_v11  ;;  %v284_v31 = vmul.f32 %v7530_v21, %v8625_v11 }
  0x1a   : > { %418 = vst.msk [vmem:[#allocation2 + $0x58] sm:$0xf] %vm10359_vm1, %v8518_v6  ;;  %419 = vst.msk [vmem:[#allocation2 + $0x5c] sm:$0xf] %vm10359_vm1, %v8518_v6  ;;  %v1006_v26 = vld [vmem:[#allocation2 + $0x4] sm:$0xf] }
  0x1b   : > { %420 = vst.msk [vmem:[#allocation2 + $0x60] sm:$0xf] %vm10359_vm1, %v8518_v6  ;;  %421 = vst.msk [vmem:[#allocation2 + $0x64] sm:$0xf] %vm10359_vm1, %v8518_v6  ;;  %vm485_vm7 = vsmask.f32 2304  ;;  %v8648_v28 = vcombine.low %v1005_v25, %v1006_v26  ;;  %v319_v37 = vadd.f32 %v8628_v15, %v283_v30  ;;  %v320_v41 = vadd.f32 %v8628_v15, %v284_v31 }
  0x1c   : > { %422 = vst.msk [vmem:[#allocation2 + $0x68] sm:$0xf] %vm10359_vm1, %v8518_v6  ;;  %423 = vst.msk [vmem:[#allocation2 + $0x6c] sm:$0xf] %vm10359_vm1, %v8518_v6  ;;  %vm486_vm8 = vsmask.f32 6416 }
  0x1d   : > { %424 = vst.msk [vmem:[#allocation2 + $0x70] sm:$0xf] %vm10359_vm1, %v8518_v6  ;;  %425 = vst.msk [vmem:[#allocation2 + $0x74] sm:$0xf] %vm10359_vm1, %v8518_v6  ;;  %vm510_vm9 = vcmask 60418   ;;  %v1139_v35 = vshll.u32 %v8648_v28, 16 }
  0x1e   : > { %426 = vst.msk [vmem:[#allocation2 + $0x78] sm:$0xf] %vm10359_vm1, %v8518_v6  ;;  %427 = vst.msk [vmem:[#allocation2 + $0x7c] sm:$0xf] %vm10359_vm1, %v8518_v6  ;;  %vm511_vm10 = vsmask.f32 7946 }
  0x1f   : > { %428 = vst.msk [vmem:[#allocation2 + $0x80] sm:$0xf] %vm10359_vm1, %v8518_v6  ;;  %429 = vst.msk [vmem:[#allocation2 + $0x84] sm:$0xf] %vm10359_vm1, %v8518_v6  ;;  %v347_v38 = vmax.f32 %v315_v32, 0.0  ;;  %v348_v39 = vmax.f32 %v316_v33, 0.0 }
  0x20   : > { %430 = vst.msk [vmem:[#allocation2 + $0x88] sm:$0xf] %vm10359_vm1, %v8518_v6  ;;  %431 = vst.msk [vmem:[#allocation2 + $0x8c] sm:$0xf] %vm10359_vm1, %v8518_v6  ;;  %v349_v40 = vmax.f32 %v317_v34, 0.0  ;;  %v1137_v42 = vshrl.u32 %v8648_v28, 16 }
  0x21   : > { %432 = vst.msk [vmem:[#allocation2 + $0x90] sm:$0xf] %vm10359_vm1, %v8518_v6  ;;  %433 = vst.msk [vmem:[#allocation2 + $0x94] sm:$0xf] %vm10359_vm1, %v8518_v6  ;;  %v350_v43 = vmax.f32 %v318_v36, 0.0  ;;  %v351_v44 = vmax.f32 %v319_v37, 0.0  ;;  %v7455_v45 = vpack.c.bf16 %v347_v38, %v347_v38  ;;  %v7456_v46 = vpack.c.bf16 %v348_v39, %v348_v39 }
  0x22   : > { %434 = vst.msk [vmem:[#allocation2 + $0x98] sm:$0xf] %vm10359_vm1, %v8518_v6  ;;  %435 = vst.msk [vmem:[#allocation2 + $0x9c] sm:$0xf] %vm10359_vm1, %v8518_v6  ;;  %vm517_vm11 = vcmask 59392   ;;  %v8661_v47 = vrot.slane %v1139_v35, 1  ;;  %v7457_v48 = vpack.c.bf16 %v349_v40, %v349_v40 }
  0x23   : > { %437 = vst.msk [vmem:[#allocation2 + $0xa0] sm:$0x3] %vm10358_vm2, %v8518_v6  ;;  %v7458_v49 = vpack.c.bf16 %v350_v43, %v350_v43  ;;  %v352_v50 = vmax.f32 %v320_v41, 0.0  ;;  %v7459_v51 = vpack.c.bf16 %v351_v44, %v351_v44  ;;  %vm527_vm12 = vsmask.f32 3328  ;;  %vm8665_vm15 = vmand %vm10358_vm2, %vm443_vm3  ;;  %v7585_v38 = vld [vmem:[%s8622_s26 + $0x18] sm:$0xff]  }
  0x24   : > { %vm528_vm13 = vsmask.f32 7440  ;;  %vm552_vm14 = vcmask 60419   ;;  %v447_v52 = vshrl.u32 %v7455_v45, 16  ;;  %v450_v53 = vshll.u32 %v7455_v45, 16  ;;  %vm8671_vm0 = vmor %vm443_vm3, %vm444_vm4  ;;  %v7586_v44 = vld [vmem:[%s8622_s26 + $0x20] sm:$0xff]  }
  0x25   : > { %v456_v54 = vshrl.u32 %v7456_v46, 16  ;;  %v459_v55 = vshll.u32 %v7456_v46, 16  ;;  %v489_v58 = vshrl.u32 %v7457_v48, 16  ;;  %v492_v59 = vshll.u32 %v7457_v48, 16  ;;  %vm8677_vm2 = vmand %vm468_vm5, %vm469_vm6  ;;  %v471_v3 = vld [vmem:[#allocation2 + $0x8] sm:$0xe] }
  0x26   : > { %v498_v60 = vshrl.u32 %v7458_v49, 16  ;;  %v501_v61 = vshll.u32 %v7458_v49, 16  ;;  %v449_v62 = vrot.slane %v447_v52, 6  ;;  %v452_v63 = vrot.slane %v450_v53, 7  ;;  %vm8683_vm3 = vmor %vm485_vm7, %vm486_vm8  ;;  %v477_v14 = vld [vmem:[#allocation2 + $0x10] sm:$0x3] }
  0x27   : > { %v458_v0 = vrot.slane %v456_v54, 6  ;;  %v461_v1 = vrot.slane %v459_v55, 7  ;;  %v491_v7 = vrot.slane %v489_v58, 5  ;;  %v494_v8 = vrot.slane %v492_v59, 6  ;;  %vm8689_vm4 = vmand %vm510_vm9, %vm511_vm10  ;;  %v513_v18 = vld [vmem:[#allocation2 + $0x10] sm:$0xc] }
  0x28   : > { %v500_v9 = vrot.slane %v498_v60, 5  ;;  %v503_v10 = vrot.slane %v501_v61, 6  ;;  %v453_v12 = vor.u32 %v452_v63, %v449_v62  ;;  %v7460_v19 = vpack.c.bf16 %v352_v50, %v352_v50  ;;  %vm8695_vm5 = vmand %vm517_vm11, %vm485_vm7  ;;  %v555_v26 = vld [vmem:[#allocation2 + $0x18] sm:$0x8]  ;;  %v519_v31 = vld [vmem:[#allocation2 + $0x18] sm:$0x7] }
  0x29   : > { %v462_v13 = vor.u32 %v461_v1, %v458_v0  ;;  %v531_v20 = vshll.u32 %v7459_v51, 16  ;;  %v495_v21 = vor.u32 %v494_v8, %v491_v7  ;;  %v534_v25 = vshrl.u32 %v7459_v51, 16  ;;  %vm8724_vm7 = vmor %vm527_vm12, %vm528_vm13  ;;  %v7587_v58 = vld [vmem:[%s8622_s26 + $0x28] sm:$0xff]   ;;  %v8738_v63 = vld [vmem:[%s8622_s26 + $0x30] sm:$0xff]   ;;  %s7137_s23 = sshll.u32 %s10734_s16, 1 }
  0x2a   : > { %v504_v23 = vor.u32 %v503_v10, %v500_v9  ;;  %vm553_vm6 = vsmask.f32 7950  ;;  %v454_v27 = vrot.slane %v453_v12, 4  ;;  %v472_v30 = vsel %vm8677_vm2, %v453_v12, %v471_v3  ;;  %v8751_v9 = vld [vmem:[%s8622_s26 + $0x38] sm:$0xff]   ;;  %s208_s27 = scalar_lea.vmem %s10356_s4, %s7137_s23 }
  0x2b   : > { %v464_v29 = vrot.slane %v462_v13, 4  ;;  %v533_v32 = vrot.slane %v531_v20, 5  ;;  %vm8702_vm8 = vmand %vm552_vm14, %vm553_vm6  ;;  %473 = vst [vmem:[#allocation2 + $0x8] sm:$0xe] %v472_v30  ;;  %v496_v34 = vrot.slane %v495_v21, 4  ;;  %v514_v35 = vsel %vm8689_vm4, %v495_v21, %v513_v18 }
  0x2c   : > { %v506_v36 = vrot.slane %v504_v23, 4  ;;  %v536_v37 = vrot.slane %v534_v25, 4  ;;  %v463_v39 = vsel %vm8671_vm0, %v454_v27, %v462_v13  ;;  %515 = vst [vmem:[#allocation2 + $0x10] sm:$0xc] %v514_v35  ;;  %v540_v41 = vshll.u32 %v7460_v19, 16  ;;  %vm8755_vm14 = vmand %vm10359_vm1, %vm527_vm12 }
  0x2d   : > { %v478_v40 = vsel %vm8665_vm15, %v464_v29, %v477_v14  ;;  %v556_v43 = vsel %vm8702_vm8, %v533_v32, %v555_v26  ;;  %474 = vst.msk [vmem:[#allocation2 + $0xc] sm:$0xf] %vm10359_vm1, %v463_v39  ;;  %v505_v45 = vsel %vm8683_vm3, %v496_v34, %v504_v23  ;;  %v7533_v51 = vunpack.c.l.bf16 %v7585_v38 }
  0x2e   : > { %479 = vst [vmem:[#allocation2 + $0x10] sm:$0x3] %v478_v40  ;;  %v520_v46 = vsel %vm8695_vm5, %v506_v36, %v519_v31  ;;  %v537_v48 = vor.u32 %v536_v37, %v533_v32  ;;  %557 = vst [vmem:[#allocation2 + $0x18] sm:$0x8] %v556_v43  ;;  %v542_v50 = vrot.slane %v540_v41, 5  ;;  %v544_v52 = vshrl.u32 %v7460_v19, 16 }
  0x2f   : > { %516 = vst.msk [vmem:[#allocation2 + $0x14] sm:$0xf] %vm10359_vm1, %v505_v45  ;;  %521 = vst [vmem:[#allocation2 + $0x18] sm:$0x7] %v520_v46  ;;  %vm10362_vm9 = vsmask.f32 7424  ;;  %v7534_v54 = vunpack.c.h.bf16 %v7585_v38  ;;  %v7537_v55 = vunpack.c.l.bf16 %v7586_v44  ;;  %v1142_v59 = vor.u32 %v8661_v47, %v1137_v42 }
  0x30   : > { %v538_v53 = vrot.slane %v537_v48, 4  ;;  %vm10361_vm10 = vcmask 64512   ;;  %vm10382_vm11 = vcmask 1043456   ;;  %v285_v61 = vmul.f32 %v7533_v51, %v8625_v11 }
  0x31   : > { %v8734_v60 = vsel %vm10382_vm11, %v8633_v17, 0  ;;  %v546_v62 = vrot.slane %v544_v52, 4  ;;  %vm10383_vm13 = vmmov %vm10382_vm11  ;;  %v286_v3 = vmul.f32 %v7534_v54, %v8625_v11  ;;  %v287_v42 = vmul.f32 %v7537_v55, %v8625_v11 }
  0x32   : > { %v543_v0 = vsel %vm8724_vm7, %v538_v53, %v542_v50  ;;  %v8744_v1 = vsel %vm10383_vm13, %v8641_v22, 0  ;;  %v321_v17 = vadd.f32 %v8628_v15, %v285_v61  ;;  %v7538_v7 = vunpack.c.h.bf16 %v7586_v44  ;;  %v2480_v10 = vld [vmem:[#allocation2 + $0x8] sm:$0xe]  ;;  %v561_v22 = vld [vmem:[#allocation2 + $0x20] sm:$0xf] }
  0x33   : > { %558 = vst.msk [vmem:[#allocation2 + $0x1c] sm:$0xf] %vm10359_vm1, %v543_v0  ;;  %v547_v47 = vor.u32 %v546_v62, %v542_v50  ;;  %v7541_v8 = vunpack.c.l.bf16 %v7587_v58  ;;  %v8760_v13 = vadd.f32 %v8628_v15, %v286_v3  ;;  %v8763_v14 = vadd.f32 %v8628_v15, %v287_v42 }
  0x34   : > { %v7542_v18 = vunpack.c.h.bf16 %v7587_v58  ;;  %v7545_v19 = vunpack.c.l.bf16 %v8738_v63  ;;  %v8422_v20 = vld [vmem:[#allocation2 + $0x8] sm:$0xff]   ;;  %vm10360_vm6 = vsmask.f32 6400  ;;  %v353_v21 = vmax.f32 %v321_v17, 0.0 }
  0x35   : > { %v288_v23 = vmul.f32 %v7538_v7, %v8625_v11  ;;  %v289_v25 = vmul.f32 %v7541_v8, %v8625_v11  ;;  %v7546_v26 = vunpack.c.h.bf16 %v8738_v63  ;;  %v8769_v29 = vld [vmem:[#allocation2 + $0xc] sm:$0xf]  ;;  %v548_v30 = vrot.slane %v547_v47, 4 }
  0x36   : > { %v8423_v27 = vld [vmem:[#allocation2 + $0x10] sm:$0xff]   ;;  %vm592_vm12 = vsmask.f32 7938  ;;  %v290_v31 = vmul.f32 %v7542_v18, %v8625_v11  ;;  %v8773_v32 = vmul.f32 %v7545_v19, %v8625_v11  ;;  %v7549_v34 = vunpack.c.l.bf16 %v8751_v9 }
  0x37   : > { %v1144_v35 = vshll.u32 %v8422_v20, 16  ;;  %v1148_v36 = vshrl.u32 %v8422_v20, 16  ;;  %v7284_v37 = vcombine.low %v2480_v10, %v8769_v29  ;;  %v7461_v38 = vpack.c.bf16 %v353_v21, %v353_v21  ;;  %v8777_v40 = vld [vmem:[#allocation2 + $0x10] sm:$0xff]  }
  0x38   : > { %v1152_v39 = vshll.u32 %v8423_v27, 16  ;;  %v562_v41 = vsel %vm8755_vm14, %v548_v30, %v561_v22  ;;  %v324_v43 = vadd.f32 %v8628_v15, %v288_v23  ;;  %v8783_v44 = vadd.f32 %v8628_v15, %v289_v25 }
  0x39   : > { %v1146_v45 = vrot.slane %v1144_v35, 1  ;;  %v2614_v46 = vshrl.u32 %v7284_v37, 16  ;;  %v2617_v48 = vshll.u32 %v7284_v37, 16  ;;  %v1156_v50 = vshrl.u32 %v8423_v27, 16  ;;  %563 = vst [vmem:[#allocation2 + $0x20] sm:$0xf] %v562_v41 }
  0x3a   : > { %v1154_v51 = vrot.slane %v1152_v39, 1  ;;  %v2622_v52 = vshrl.u32 %v8777_v40, 16  ;;  %v2625_v53 = vshll.u32 %v8777_v40, 16  ;;  %v8787_v54 = vld [vmem:[#allocation2 + $0x18] sm:$0xff]   ;;  %vm570_vm13 = vsmask.f32 4368 }
  0x3b   : > { %v8790_v55 = vadd.f32 %v8628_v15, %v290_v31  ;;  %v1147_v58 = vsel %vm10362_vm9, %v1142_v59, %v1146_v45  ;;  %v1150_v61 = vor.u32 %v1148_v36, %v1146_v45  ;;  %v2616_v62 = vrot.slane %v2614_v46, 1  ;;  %v8427_v3 = vld [vmem:[#allocation2 + $0x18] sm:$0xff]   ;;  %v594_v27 = vld [vmem:[#allocation2 + $0x24] sm:$0xf] }
  0x3c   : > { %v2619_v0 = vrot.slane %v2617_v48, 2  ;;  %7771 = vmatprep.mubr.msk.bf16.mxu1 %vm10361_vm10, %v1147_v58  ;;  %v2624_v42 = vrot.slane %v2622_v52, 1  ;;  %v2627_v17 = vrot.slane %v2625_v53, 2  ;;  %v2631_v47 = vshrl.u32 %v8787_v54, 16  ;;  %v8807_v41 = vld [vmem:[%s10353_s1 + $0x18] sm:$0xf] }
  0x3d   : > { %v2634_v7 = vshll.u32 %v8787_v54, 16  ;;  %v1155_v8 = vsel %vm10362_vm9, %v1150_v61, %v1154_v51  ;;  %v1158_v22 = vor.u32 %v1156_v50, %v1154_v51  ;;  %v1160_v18 = vshll.u32 %v8427_v3, 16 }
  0x3e   : > { %v2620_v10 = vor.u32 %v2619_v0, %v2616_v62  ;;  %7772 = vmatmul.mubr.msk.bf16.vlgmr.msra.gmra.mrb[0].mxu1 %vm10361_vm10, %v1155_v8  ;;  %v2628_v59 = vor.u32 %v2627_v17, %v2624_v42  ;;  %v2633_v19 = vrot.slane %v2631_v47, 1  ;;  %v573_v21 = vshrl.u32 %v7461_v38, 16 }
  0x3f   : > { %v2636_v20 = vrot.slane %v2634_v7, 2  ;;  %v1162_v23 = vrot.slane %v1160_v18, 1  ;;  %v576_v25 = vshll.u32 %v7461_v38, 16  ;;  %v1164_v30 = vshrl.u32 %v8427_v3, 16  ;;  %7808 = vmatpush3.bf16.msra.mxu1 %v8744_v1 }
  0x40   : > { %v354_v31 = vmax.f32 %v8760_v13, 0.0  ;;  %v2629_v35 = vsel %vm10360_vm6, %v2620_v10, %v2628_v59  ;;  %v575_v37 = vrot.slane %v573_v21, 7  ;;  %v355_v39 = vmax.f32 %v8763_v14, 0.0 }
  0x41   : > { %v8801_v36 = vor.u32 %v2636_v20, %v2633_v19  ;;  %7923 = vmatprep.mubr.msk.bf16.mxu0 %vm10361_vm10, %v2629_v35  ;;  %v1163_v38 = vsel %vm10362_vm9, %v1158_v22, %v1162_v23  ;;  %vm10386_vm1 = vcmask 60416   ;;  %v10387_v1 = vmov 0  ;;  %v630_v20 = vld [vmem:[#allocation2 + $0x2c] sm:$0xe] }
  0x42   : > { %vm8813_vm11 = vmand %vm10386_vm1, %vm592_vm12  ;;  %v8817_v13 = vor.u32 %v1164_v30, %v1162_v23  ;;  %v7462_v45 = vpack.c.bf16 %v354_v31, %v354_v31  ;;  %v356_v46 = vmax.f32 %v324_v43, 0.0  ;;  %7775 = vmatprep.mubr.msk.bf16.mxu1 %vm10361_vm10, %v1163_v38  ;;  %v578_v48 = vor.u32 %v576_v25, %v575_v37  ;;  %v634_v38 = vld [vmem:[#allocation2 + $0x34] sm:$0x3] }
  0x43   : > { %v10388_v1 = vsel %vm8813_vm11, 4294967295, %v10387_v1  ;;  %v2638_v14 = vsel %vm10360_vm6, %v2628_v59, %v8801_v36  ;;  %v579_v50 = vrot.slane %v575_v37, 4  ;;  %v7463_v51 = vpack.c.bf16 %v355_v39, %v355_v39 }
  0x44   : > { %7924 = vmatmul.mubr.msk.bf16.vlgmr.msra.gmra.mrb[0].mxu0 %vm10361_vm10, %v2638_v14  ;;  %v581_v52 = vshrl.u32 %v7462_v45, 16  ;;  %v584_v53 = vshll.u32 %v7462_v45, 16  ;;  %v357_v58 = vmax.f32 %v8783_v44, 0.0  ;;  %v7464_v61 = vpack.c.bf16 %v356_v46, %v356_v46 }
  0x45   : > { %7960 = vmatpush3.bf16.msra.mxu0 %v8734_v60  ;;  %v595_v43 = vsel %vm8813_vm11, %v578_v48, %v594_v27  ;;  %v609_v62 = vshrl.u32 %v7463_v51, 16  ;;  %v612_v0 = vshll.u32 %v7463_v51, 16  ;;  %v327_v3 = vadd.f32 %v8628_v15, %v8773_v32  ;;  %v600_v32 = vld [vmem:[#allocation2 + $0x2c] sm:$0x1]  ;;  %v664_v51 = vld [vmem:[#allocation2 + $0x34] sm:$0xc] }
  0x46   : > { %596 = vst [vmem:[#allocation2 + $0x24] sm:$0xf] %v595_v43  ;;  %vm10389_vm1 = vsmask.f32 256  ;;  %v583_v17 = vrot.slane %v581_v52, 7  ;;  %v618_v44 = vshrl.u32 %v7464_v61, 16  ;;  %v7465_v7 = vpack.c.bf16 %v357_v58, %v357_v58 }
  0x47   : > { %vm8831_vm12 = vmor %vm10389_vm1, %vm570_vm13  ;;  %v621_v47 = vshll.u32 %v7464_v61, 16  ;;  %vm10392_vm6 = vcmask 1043456   ;;  %vm10394_vm9 = vcmask 57344   ;;  %v611_v8 = vrot.slane %v609_v62, 6  ;;  %v698_v61 = vld [vmem:[#allocation2 + $0x3c] sm:$0x8] }
  0x48   : > { %8408 = vmatprep.subr.msk.bf16.mxu0 %vm10392_vm6, %v8807_v41  ;;  %vm10393_vm10 = vmmov %vm10389_vm1  ;;  %v614_v10 = vrot.slane %v612_v0, 7  ;;  %v358_v22 = vmax.f32 %v8790_v55, 0.0  ;;  %v359_v18 = vmax.f32 %v327_v3, 0.0  ;;  %v586_v59 = vor.u32 %v584_v53, %v583_v17 }
  0x49   : > { %vm8839_vm11 = vmand %vm10394_vm9, %vm10393_vm10  ;;  %v588_v19 = vrot.slane %v583_v17, 4  ;;  %v620_v21 = vrot.slane %v618_v44, 6  ;;  %v623_v23 = vrot.slane %v621_v47, 7  ;;  %v643_v27 = vshrl.u32 %v7465_v7, 16 }
  0x4a   : > { %v615_v25 = vor.u32 %v614_v10, %v611_v8  ;;  %v646_v30 = vshll.u32 %v7465_v7, 16  ;;  %v7466_v31 = vpack.c.bf16 %v358_v22, %v358_v22  ;;  %v587_v35 = vsel %vm8831_vm12, %v579_v50, %v586_v59  ;;  %v7226_v10 = vld [vmem:[%s10353_s1 + $0x8] sm:$0xf] }
  0x4b   : > { %v601_v37 = vsel %vm8839_vm11, %v588_v19, %v600_v32  ;;  %v624_v39 = vor.u32 %v623_v23, %v620_v21  ;;  %v7467_v45 = vpack.c.bf16 %v359_v18, %v359_v18  ;;  %vm10397_vm9 = vcmask 60416   ;;  %8403 = vmatprep.subr.msk.bf16.mxu1 %vm10392_vm6, %v7226_v10 }
  0x4c   : > { %597 = vst.msk [vmem:[#allocation2 + $0x28] sm:$0xf] %vm10397_vm9, %v587_v35  ;;  %602 = vst [vmem:[#allocation2 + $0x2c] sm:$0x1] %v601_v37  ;;  %v631_v55 = vsel %vm8677_vm2, %v615_v25, %v630_v20  ;;  %v616_v46 = vrot.slane %v615_v25, 4  ;;  %v645_v14 = vrot.slane %v643_v27, 5  ;;  %v292_v3 = vmul.f32 %v7546_v26, %v8625_v11 }
  0x4d   : > { %v648_v48 = vrot.slane %v646_v30, 6  ;;  %632 = vst [vmem:[#allocation2 + $0x2c] sm:$0xe] %v631_v55  ;;  %v626_v52 = vrot.slane %v624_v39, 4  ;;  %v652_v53 = vshrl.u32 %v7466_v31, 16  ;;  %v655_v50 = vshll.u32 %v7466_v31, 16  ;;  %vm10398_vm10 = vmmov %vm10397_vm9 }
  0x4e   : > { %v677_v58 = vshll.u32 %v7467_v45, 16  ;;  %v8428_v43 = vld [vmem:[#allocation2 + $0x20] sm:$0xff]   ;;  %v625_v62 = vsel %vm8671_vm0, %v616_v46, %v624_v39  ;;  %v680_v17 = vshrl.u32 %v7467_v45, 16  ;;  %v668_v25 = vld [vmem:[#allocation2 + $0x3c] sm:$0x7]  ;;  %v328_v27 = vadd.f32 %v8628_v15, %v292_v3  ;;  %vm10400_vm1 = vmmov %vm10397_vm9 }
  0x4f   : > { %v649_v0 = vor.u32 %v648_v48, %v645_v14  ;;  %v8856_v44 = vld [vmem:[#allocation2 + $0x20] sm:$0xff]   ;;  %633 = vst.msk [vmem:[#allocation2 + $0x30] sm:$0xf] %vm10398_vm10, %v625_v62  ;;  %v635_v47 = vsel %vm8665_vm15, %v626_v52, %v634_v38  ;;  %v654_v7 = vrot.slane %v652_v53, 5  ;;  %v657_v32 = vrot.slane %v655_v50, 6 }
  0x50   : > { %v679_v8 = vrot.slane %v677_v58, 5  ;;  %v1168_v22 = vshll.u32 %v8428_v43, 16  ;;  %v1172_v18 = vshrl.u32 %v8428_v43, 16  ;;  %636 = vst [vmem:[#allocation2 + $0x34] sm:$0x3] %v635_v47  ;;  %v2640_v59 = vshrl.u32 %v8856_v44, 16 }
  0x51   : > { %v665_v63 = vsel %vm8689_vm4, %v649_v0, %v664_v51  ;;  %v650_v26 = vrot.slane %v649_v0, 4  ;;  %v2643_v19 = vshll.u32 %v8856_v44, 16  ;;  %v658_v20 = vor.u32 %v657_v32, %v654_v7  ;;  %v8874_v35 = vld [vmem:[%s8622_s26 + $0x40] sm:$0xff]  }
  0x52   : > { %666 = vst [vmem:[#allocation2 + $0x34] sm:$0xc] %v665_v63  ;;  %v699_v21 = vsel %vm8702_vm8, %v679_v8, %v698_v61  ;;  %v1170_v23 = vrot.slane %v1168_v22, 1  ;;  %v682_v30 = vrot.slane %v680_v17, 4  ;;  %v7550_v31 = vunpack.c.h.bf16 %v8751_v9 }
  0x53   : > { %700 = vst [vmem:[#allocation2 + $0x3c] sm:$0x8] %v699_v21  ;;  %v2642_v37 = vrot.slane %v2640_v59, 1  ;;  %v2645_v39 = vrot.slane %v2643_v19, 2  ;;  %v659_v38 = vsel %vm8683_vm3, %v650_v26, %v658_v20  ;;  %v293_v45 = vmul.f32 %v7549_v34, %v8625_v11 }
  0x54   : > { %vm10399_vm13 = vsmask.f32 7424  ;;  %v8883_v46 = vld [vmem:[#allocation2 + $0x28] sm:$0xff]   ;;  %v1174_v14 = vor.u32 %v1172_v18, %v1170_v23  ;;  %v660_v48 = vrot.slane %v658_v20, 4  ;;  %667 = vst.msk [vmem:[#allocation2 + $0x38] sm:$0xf] %vm10400_vm1, %v659_v38  ;;  %v683_v51 = vor.u32 %v682_v30, %v679_v8 }
  0x55   : > { %v1171_v55 = vsel %vm10399_vm13, %v8817_v13, %v1170_v23  ;;  %vm10401_vm9 = vcmask 64512   ;;  %v2646_v52 = vor.u32 %v2645_v39, %v2642_v37  ;;  %v8431_v53 = vld [vmem:[#allocation2 + $0x28] sm:$0xff]   ;;  %v360_v50 = vmax.f32 %v328_v27, 0.0 }
  0x56   : > { %7776 = vmatmul.mubr.msk.bf16.gmra.mrb[4].mxu1 %vm10401_vm9, %v1171_v55  ;;  %v294_v58 = vmul.f32 %v7550_v31, %v8625_v11  ;;  %v329_v9 = vadd.f32 %v8628_v15, %v293_v45  ;;  %v2649_v34 = vshrl.u32 %v8883_v46, 16  ;;  %v2652_v13 = vshll.u32 %v8883_v46, 16  ;;  %vm10403_vm6 = vmmov %vm10401_vm9 }
  0x57   : > { %v669_v61 = vsel %vm8695_vm5, %v660_v48, %v668_v25  ;;  %v7553_v43 = vunpack.c.l.bf16 %v8874_v35  ;;  %vm10402_vm10 = vsmask.f32 6400  ;;  %v1176_v0 = vshll.u32 %v8431_v53, 16  ;;  %vm10405_vm9 = vmmov %vm10403_vm6 }
  0x58   : > { %v2647_v62 = vsel %vm10402_vm10, %v8801_v36, %v2646_v52  ;;  %v1180_v3 = vshrl.u32 %v8431_v53, 16  ;;  %670 = vst [vmem:[#allocation2 + $0x3c] sm:$0x7] %v669_v61  ;;  %v7468_v17 = vpack.c.bf16 %v360_v50, %v360_v50  ;;  %v2651_v47 = vrot.slane %v2649_v34, 1  ;;  %vm10404_vm1 = vmmov %vm10402_vm10 }
  0x59   : > { %7927 = vmatprep.mubr.msk.bf16.mxu0 %vm10403_vm6, %v2647_v62  ;;  %v2654_v7 = vrot.slane %v2652_v13, 2  ;;  %v8432_v32 = vld [vmem:[#allocation2 + $0x30] sm:$0xff]   ;;  %v330_v10 = vadd.f32 %v8628_v15, %v294_v58  ;;  %v7554_v22 = vunpack.c.h.bf16 %v8874_v35  ;;  %v1178_v18 = vrot.slane %v1176_v0, 1  ;;  %vm10406_vm10 = vmmov %vm10403_vm6 }
  0x5a   : > { %v8897_v8 = vld [vmem:[#allocation2 + $0x30] sm:$0xff]   ;;  %v684_v63 = vrot.slane %v683_v51, 4  ;;  %v686_v26 = vshll.u32 %v7468_v17, 16  ;;  %v690_v59 = vshrl.u32 %v7468_v17, 16  ;;  %v1184_v19 = vshll.u32 %v8432_v32, 16  ;;  %vm10407_vm6 = vmmov %vm10399_vm13 }
  0x5b   : > { %v2655_v36 = vor.u32 %v2654_v7, %v2651_v47  ;;  %v2658_v20 = vshrl.u32 %v8897_v8, 16  ;;  %v2661_v21 = vshll.u32 %v8897_v8, 16  ;;  %v1179_v23 = vsel %vm10399_vm13, %v1174_v14, %v1178_v18 }
  0x5c   : > { %v1182_v25 = vor.u32 %v1180_v3, %v1178_v18  ;;  %v1188_v27 = vshrl.u32 %v8432_v32, 16  ;;  %v688_v30 = vrot.slane %v686_v26, 5  ;;  %7779 = vmatprep.mubr.msk.bf16.mxu1 %vm10405_vm9, %v1179_v23  ;;  %v1186_v35 = vrot.slane %v1184_v19, 1 }
  0x5d   : > { %v2656_v31 = vsel %vm10404_vm1, %v2646_v52, %v2655_v36  ;;  %v2660_v37 = vrot.slane %v2658_v20, 1  ;;  %v2663_v39 = vrot.slane %v2661_v21, 2  ;;  %v692_v45 = vrot.slane %v690_v59, 4  ;;  %v702_v52 = vld [vmem:[#allocation2 + $0x44] sm:$0xf]  ;;  %vm10409_vm1 = vmmov %vm10405_vm9 }
  0x5e   : > { %7928 = vmatmul.mubr.msk.bf16.gmra.mrb[4].mxu0 %vm10406_vm10, %v2656_v31  ;;  %v689_v38 = vsel %vm8724_vm7, %v684_v63, %v688_v30  ;;  %v361_v55 = vmax.f32 %v329_v9, 0.0  ;;  %v362_v48 = vmax.f32 %v330_v10, 0.0  ;;  %v1187_v14 = vsel %vm10407_vm6, %v1182_v25, %v1186_v35  ;;  %vm10411_vm10 = vmmov %vm10409_vm1  ;;  %v734_v31 = vld [vmem:[#allocation2 + $0x50] sm:$0x1] }
  0x5f   : > { %v2664_v51 = vor.u32 %v2663_v39, %v2660_v37  ;;  %v8910_v53 = vld [vmem:[#allocation2 + $0x38] sm:$0xff]   ;;  %v1190_v50 = vor.u32 %v1188_v27, %v1186_v35  ;;  %vm10408_vm13 = vcmask 60416   ;;  %v295_v58 = vmul.f32 %v7553_v43, %v8625_v11  ;;  %7780 = vmatmul.mubr.msk.bf16.gmra.mrb[8].mxu1 %vm10409_vm1, %v1187_v14  ;;  %v7591_v35 = vld [vmem:[%s8622_s26 + $0x48] sm:$0xff]  }
  0x60   : > { %701 = vst.msk [vmem:[#allocation2 + $0x40] sm:$0xf] %vm10408_vm13, %v689_v38  ;;  %v8435_v34 = vld [vmem:[#allocation2 + $0x38] sm:$0xff]   ;;  %v693_v13 = vor.u32 %v692_v45, %v688_v30  ;;  %v7469_v61 = vpack.c.bf16 %v361_v55, %v361_v55  ;;  %v7470_v62 = vpack.c.bf16 %v362_v48, %v362_v48  ;;  %v296_v9 = vmul.f32 %v7554_v22, %v8625_v11  ;;  %v730_v22 = vld [vmem:[#allocation2 + $0x48] sm:$0xf]  ;;  %v7592_v55 = vld [vmem:[%s8622_s26 + $0x50] sm:$0xff]  }
  0x61   : > { %vm10410_vm9 = vsmask.f32 6400  ;;  %v2667_v3 = vshrl.u32 %v8910_v53, 16  ;;  %v2670_v17 = vshll.u32 %v8910_v53, 16  ;;  %v331_v47 = vadd.f32 %v8628_v15, %v295_v58 }
  0x62   : > { %v2665_v0 = vsel %vm10410_vm9, %v2655_v36, %v2664_v51  ;;  %v1192_v7 = vshll.u32 %v8435_v34, 16  ;;  %v694_v43 = vrot.slane %v693_v13, 4  ;;  %v1196_v32 = vshrl.u32 %v8435_v34, 16  ;;  %vm10412_vm13 = vmmov %vm10410_vm9 }
  0x63   : > { %7931 = vmatprep.mubr.msk.bf16.mxu0 %vm10411_vm10, %v2665_v0  ;;  %v711_v10 = vshrl.u32 %v7469_v61, 16  ;;  %v2669_v18 = vrot.slane %v2667_v3, 1  ;;  %v2672_v63 = vrot.slane %v2670_v17, 2  ;;  %v714_v26 = vshll.u32 %v7469_v61, 16  ;;  %vm10413_vm9 = vmmov %vm10409_vm1  ;;  %v8939_v3 = vld [vmem:[#allocation2 + $0x8] sm:$0xc] }
  0x64   : > { %v719_v59 = vshrl.u32 %v7470_v62, 16  ;;  %v1194_v36 = vrot.slane %v1192_v7, 1  ;;  %v703_v19 = vsel %vm8755_vm14, %v694_v43, %v702_v52  ;;  %v722_v21 = vshll.u32 %v7470_v62, 16 }
  0x65   : > { %v713_v20 = vrot.slane %v711_v10, 7  ;;  %v8923_v23 = vor.u32 %v2672_v63, %v2669_v18  ;;  %704 = vst [vmem:[#allocation2 + $0x44] sm:$0xf] %v703_v19  ;;  %v332_v27 = vadd.f32 %v8628_v15, %v296_v9  ;;  %v363_v30 = vmax.f32 %v331_v47, 0.0 }
  0x66   : > { %v721_v25 = vrot.slane %v719_v59, 7  ;;  %v1195_v37 = vsel %vm10407_vm6, %v1190_v50, %v1194_v36  ;;  %v1198_v39 = vor.u32 %v1196_v32, %v1194_v36  ;;  %vm10414_vm10 = vnez %v10388_v1 }
  0x67   : > { %v716_v38 = vor.u32 %v714_v26, %v713_v20  ;;  %v717_v45 = vrot.slane %v713_v20, 4  ;;  %v2674_v48 = vsel %vm10412_vm13, %v2664_v51, %v8923_v23  ;;  %7783 = vmatprep.mubr.msk.bf16.mxu1 %vm10409_vm1, %v1195_v37  ;;  %v364_v52 = vmax.f32 %v332_v27, 0.0 }
  0x68   : > { %v724_v14 = vor.u32 %v722_v21, %v721_v25  ;;  %v726_v58 = vrot.slane %v721_v25, 4  ;;  %7932 = vmatmul.mubr.msk.bf16.gmra.mrb[8].mxu0 %vm10413_vm9, %v2674_v48  ;;  %v7471_v13 = vpack.c.bf16 %v363_v30, %v363_v30  ;;  %v7557_v61 = vunpack.c.l.bf16 %v7591_v35  ;;  %v764_v30 = vld [vmem:[#allocation2 + $0x50] sm:$0xe] }
  0x69   : > { %v731_v34 = vsel %vm10414_vm10, %v716_v38, %v730_v22  ;;  %v7558_v50 = vunpack.c.h.bf16 %v7591_v35  ;;  %v7472_v9 = vpack.c.bf16 %v364_v52, %v364_v52  ;;  %v7561_v0 = vunpack.c.l.bf16 %v7592_v55 }
  0x6a   : > { %v725_v62 = vsel %vm8831_vm12, %v717_v45, %v724_v14  ;;  %732 = vst [vmem:[#allocation2 + $0x48] sm:$0xf] %v731_v34  ;;  %v735_v51 = vsel %vm8839_vm11, %v726_v58, %v734_v31  ;;  %vm10415_vm6 = vcmask 60416   ;;  %v743_v17 = vshrl.u32 %v7471_v13, 16  ;;  %v768_v58 = vld [vmem:[#allocation2 + $0x58] sm:$0x3] }
  0x6b   : > { %733 = vst.msk [vmem:[#allocation2 + $0x4c] sm:$0xf] %vm10415_vm6, %v725_v62  ;;  %736 = vst [vmem:[#allocation2 + $0x50] sm:$0x1] %v735_v51  ;;  %v746_v47 = vshll.u32 %v7471_v13, 16  ;;  %v297_v7 = vmul.f32 %v7557_v61, %v8625_v11  ;;  %v298_v43 = vmul.f32 %v7558_v50, %v8625_v11  ;;  %v752_v32 = vshrl.u32 %v7472_v9, 16 }
  0x6c   : > { %v755_v10 = vshll.u32 %v7472_v9, 16  ;;  %v7562_v18 = vunpack.c.h.bf16 %v7592_v55  ;;  %v299_v63 = vmul.f32 %v7561_v0, %v8625_v11  ;;  %v8945_v26 = vld [vmem:[#allocation2 + $0x40] sm:$0xff]   ;;  %v745_v59 = vrot.slane %v743_v17, 6 }
  0x6d   : > { %v333_v22 = vadd.f32 %v8628_v15, %v297_v7  ;;  %v334_v36 = vadd.f32 %v8628_v15, %v298_v43  ;;  %v7322_v19 = vcombine.low %v8939_v3, %v8769_v29  ;;  %v8951_v20 = vld [vmem:[#allocation2 + $0x40] sm:$0xff]   ;;  %v748_v21 = vrot.slane %v746_v47, 7 }
  0x6e   : > { %v754_v25 = vrot.slane %v752_v32, 6  ;;  %v757_v27 = vrot.slane %v755_v10, 7  ;;  %v300_v31 = vmul.f32 %v7562_v18, %v8625_v11  ;;  %v1200_v35 = vshll.u32 %v8945_v26, 16 }
  0x6f   : > { %v1204_v37 = vshrl.u32 %v8945_v26, 16  ;;  %v365_v38 = vmax.f32 %v333_v22, 0.0  ;;  %v366_v45 = vmax.f32 %v334_v36, 0.0  ;;  %v2676_v55 = vshrl.u32 %v8951_v20, 16 }
  0x70   : > { %v2679_v48 = vshll.u32 %v8951_v20, 16  ;;  %v749_v14 = vor.u32 %v748_v21, %v745_v59  ;;  %v758_v52 = vor.u32 %v757_v27, %v754_v25  ;;  %v1202_v34 = vrot.slane %v1200_v35, 1 }
  0x71   : > { %v7473_v13 = vpack.c.bf16 %v365_v38, %v365_v38  ;;  %v7474_v61 = vpack.c.bf16 %v366_v45, %v366_v45  ;;  %v335_v50 = vadd.f32 %v8628_v15, %v299_v63  ;;  %v2678_v62 = vrot.slane %v2676_v55, 1 }
  0x72   : > { %v2681_v51 = vrot.slane %v2679_v48, 2  ;;  %v8959_v9 = vld [vmem:[#allocation2 + $0x48] sm:$0xff]   ;;  %v765_v17 = vsel %vm8677_vm2, %v749_v14, %v764_v30  ;;  %v336_v47 = vadd.f32 %v8628_v15, %v300_v31  ;;  %vm10416_vm13 = vsmask.f32 7424 }
  0x73   : > { %v8961_v0 = vld [vmem:[#allocation2 + $0x48] sm:$0xff]   ;;  %v1203_v7 = vsel %vm10416_vm13, %v1198_v39, %v1202_v34  ;;  %v1206_v43 = vor.u32 %v1204_v37, %v1202_v34  ;;  %v750_v32 = vrot.slane %v749_v14, 4  ;;  %766 = vst [vmem:[#allocation2 + $0x50] sm:$0xe] %v765_v17  ;;  %v760_v10 = vrot.slane %v758_v52, 4  ;;  %vm10418_vm13 = vmmov %vm10409_vm1  ;;  %v8984_v34 = vld [vmem:[%s8622_s26 + $0x58] sm:$0xff]  }
  0x74   : > { %7784 = vmatmul.mubr.msk.bf16.gmra.mrb[12].mxu1 %vm10409_vm1, %v1203_v7  ;;  %v2682_v18 = vor.u32 %v2681_v51, %v2678_v62  ;;  %v2685_v63 = vshrl.u32 %v8959_v9, 16  ;;  %v2688_v59 = vshll.u32 %v8959_v9, 16  ;;  %v1208_v22 = vshll.u32 %v8961_v0, 16  ;;  %v798_v17 = vld [vmem:[#allocation2 + $0x58] sm:$0xc] }
  0x75   : > { %v759_v36 = vsel %vm8671_vm0, %v750_v32, %v758_v52  ;;  %v1212_v21 = vshrl.u32 %v8961_v0, 16  ;;  %v769_v39 = vsel %vm8665_vm15, %v760_v10, %v768_v58  ;;  %v777_v25 = vshrl.u32 %v7473_v13, 16  ;;  %v802_v10 = vld [vmem:[#allocation2 + $0x60] sm:$0x7] }
  0x76   : > { %vm10417_vm9 = vsmask.f32 6400  ;;  %v2687_v30 = vrot.slane %v2685_v63, 1  ;;  %v2690_v31 = vrot.slane %v2688_v59, 2  ;;  %v1210_v35 = vrot.slane %v1208_v22, 1 }
  0x77   : > { %v2683_v27 = vsel %vm10417_vm9, %v8923_v23, %v2682_v18  ;;  %767 = vst.msk [vmem:[#allocation2 + $0x54] sm:$0xf] %vm10415_vm6, %v759_v36  ;;  %770 = vst [vmem:[#allocation2 + $0x58] sm:$0x3] %v769_v39  ;;  %v779_v37 = vrot.slane %v777_v25, 5  ;;  %v780_v38 = vshll.u32 %v7473_v13, 16 }
  0x78   : > { %7935 = vmatprep.mubr.msk.bf16.mxu0 %vm10418_vm13, %v2683_v27  ;;  %v786_v45 = vshrl.u32 %v7474_v61, 16  ;;  %v789_v55 = vshll.u32 %v7474_v61, 16  ;;  %v8980_v48 = vor.u32 %v2690_v31, %v2687_v30  ;;  %vm10419_vm1 = vsmask.f32 7424  ;;  %vm10420_vm9 = vmmov %vm10418_vm13 }
  0x79   : > { %v1211_v14 = vsel %vm10419_vm1, %v1206_v43, %v1210_v35  ;;  %v1214_v52 = vor.u32 %v1212_v21, %v1210_v35  ;;  %v367_v58 = vmax.f32 %v335_v50, 0.0  ;;  %v782_v23 = vrot.slane %v780_v38, 6  ;;  %vm10422_vm1 = vmmov %vm10420_vm9 }
  0x7a   : > { %7787 = vmatprep.mubr.msk.bf16.mxu1 %vm10420_vm9, %v1211_v14  ;;  %v788_v62 = vrot.slane %v786_v45, 5  ;;  %v791_v51 = vrot.slane %v789_v55, 6  ;;  %v368_v7 = vmax.f32 %v336_v47, 0.0  ;;  %vm10421_vm6 = vsmask.f32 6400 }
  0x7b   : > { %v2692_v13 = vsel %vm10421_vm6, %v2682_v18, %v8980_v48  ;;  %v7475_v32 = vpack.c.bf16 %v367_v58, %v367_v58  ;;  %vm10365_vm13 = vcmask 1045504   ;;  %v3056_v61 = vrot.slane %v7322_v19, 2  ;;  %v832_v47 = vld [vmem:[#allocation2 + $0x60] sm:$0x8] }
  0x7c   : > { %7936 = vmatmul.mubr.msk.bf16.gmra.mrb[12].mxu0 %vm10422_vm1, %v2692_v13  ;;  %v783_v50 = vor.u32 %v782_v23, %v779_v37  ;;  %v792_v43 = vor.u32 %v791_v51, %v788_v62  ;;  %v7476_v63 = vpack.c.bf16 %v368_v7, %v368_v7  ;;  %v3057_v59 = vrot.slane %v8777_v40, 2  ;;  %v7594_v7 = vld [vmem:[%s8622_s26 + $0x60] sm:$0xff]  }
  0x7d   : > { %v811_v22 = vshll.u32 %v7475_v32, 16  ;;  %v814_v36 = vshrl.u32 %v7475_v32, 16  ;;  %v3059_v21 = vrot.slane %v8787_v54, 2  ;;  %vm10423_vm9 = vcmask 1043456  }
  0x7e   : > { %v8997_v18 = vsel %vm10423_vm9, %v8807_v41, 0  ;;  %v8999_v39 = vld [vmem:[#allocation2 + $0x50] sm:$0xff]   ;;  %v784_v29 = vrot.slane %v783_v50, 4  ;;  %v799_v3 = vsel %vm8689_vm4, %v783_v50, %v798_v17  ;;  %v9004_v19 = vsel %vm10365_vm13, %v3056_v61, %v3057_v59 }
  0x7f   : > { %v7565_v40 = vunpack.c.l.bf16 %v8984_v34  ;;  %v9007_v25 = vld [vmem:[#allocation2 + $0x50] sm:$0xff]   ;;  %800 = vst [vmem:[#allocation2 + $0x58] sm:$0xc] %v799_v3  ;;  %v794_v27 = vrot.slane %v792_v43, 4  ;;  %v813_v54 = vrot.slane %v811_v22, 5  ;;  %v816_v30 = vrot.slane %v814_v36, 4 }
  0x80   : > { %v820_v41 = vshll.u32 %v7476_v63, 16  ;;  %v1216_v31 = vshll.u32 %v8999_v39, 16  ;;  %v793_v35 = vsel %vm8683_vm3, %v784_v29, %v792_v43  ;;  %v1220_v37 = vshrl.u32 %v8999_v39, 16 }
  0x81   : > { %v9014_v38 = vsel %vm10365_vm13, %v3057_v59, %v3059_v21  ;;  %v2694_v45 = vshrl.u32 %v9007_v25, 16  ;;  %v2697_v55 = vshll.u32 %v9007_v25, 16  ;;  %vm10424_vm6 = vcmask 60416  }
  0x82   : > { %801 = vst.msk [vmem:[#allocation2 + $0x5c] sm:$0xf] %vm10424_vm6, %v793_v35  ;;  %v803_v14 = vsel %vm8695_vm5, %v794_v27, %v802_v10  ;;  %v817_v58 = vor.u32 %v816_v30, %v813_v54  ;;  %v1218_v23 = vrot.slane %v1216_v31, 1  ;;  %v822_v62 = vrot.slane %v820_v41, 5  ;;  %v836_v27 = vld [vmem:[#allocation2 + $0x68] sm:$0xf] }
  0x83   : > { %804 = vst [vmem:[#allocation2 + $0x60] sm:$0x7] %v803_v14  ;;  %v833_v51 = vsel %vm8702_vm8, %v813_v54, %v832_v47  ;;  %v301_v17 = vmul.f32 %v7565_v40, %v8625_v11  ;;  %v2696_v13 = vrot.slane %v2694_v45, 1  ;;  %v2699_v32 = vrot.slane %v2697_v55, 2  ;;  %v9032_v40 = vld [vmem:[%s8622_s26 + $0x68] sm:$0xff]  }
  0x84   : > { %v818_v61 = vrot.slane %v817_v58, 4  ;;  %834 = vst [vmem:[#allocation2 + $0x60] sm:$0x8] %v833_v51  ;;  %v824_v50 = vshrl.u32 %v7476_v63, 16  ;;  %vm10425_vm1 = vsmask.f32 7424  ;;  %v1222_v59 = vor.u32 %v1220_v37, %v1218_v23 }
  0x85   : > { %v1219_v43 = vsel %vm10425_vm1, %v1214_v52, %v1218_v23  ;;  %v337_v10 = vadd.f32 %v8628_v15, %v301_v17  ;;  %v7566_v22 = vunpack.c.h.bf16 %v8984_v34  ;;  %vm10426_vm9 = vcmask 64512  }
  0x86   : > { %7788 = vmatmul.mubr.msk.bf16.gmra.mrb[16].mxu1 %vm10426_vm9, %v1219_v43  ;;  %v2700_v36 = vor.u32 %v2699_v32, %v2696_v13  ;;  %v823_v47 = vsel %vm8724_vm7, %v818_v61, %v822_v62  ;;  %v826_v29 = vrot.slane %v824_v50, 4  ;;  %v7569_v3 = vunpack.c.l.bf16 %v7594_v7  ;;  %v864_v43 = vld [vmem:[#allocation2 + $0x6c] sm:$0xf] }
  0x87   : > { %835 = vst.msk [vmem:[#allocation2 + $0x64] sm:$0xf] %vm10424_vm6, %v823_v47  ;;  %v369_v63 = vmax.f32 %v337_v10, 0.0  ;;  %v302_v52 = vmul.f32 %v7566_v22, %v8625_v11  ;;  %v3061_v54 = vrot.slane %v8856_v44, 2  ;;  %v7570_v30 = vunpack.c.h.bf16 %v7594_v7 }
  0x88   : > { %vm10427_vm1 = vsmask.f32 6400  ;;  %v827_v41 = vor.u32 %v826_v29, %v822_v62  ;;  %v303_v31 = vmul.f32 %v7569_v3, %v8625_v11  ;;  %v3063_v35 = vrot.slane %v8883_v46, 2 }
  0x89   : > { %v2701_v34 = vsel %vm10427_vm1, %v8980_v48, %v2700_v36  ;;  %v9042_v37 = vld [vmem:[#allocation2 + $0x58] sm:$0xff]   ;;  %v7477_v45 = vpack.c.bf16 %v369_v63, %v369_v63  ;;  %v338_v55 = vadd.f32 %v8628_v15, %v302_v52  ;;  %v9046_v14 = vsel %vm10365_vm13, %v3059_v21, %v3061_v54 }
  0x8a   : > { %7939 = vmatprep.mubr.msk.bf16.mxu0 %vm10426_vm9, %v2701_v34  ;;  %v7573_v44 = vunpack.c.l.bf16 %v9032_v40  ;;  %v9049_v58 = vld [vmem:[#allocation2 + $0x58] sm:$0xff]   ;;  %v828_v48 = vrot.slane %v827_v41, 4  ;;  %v339_v23 = vadd.f32 %v8628_v15, %v303_v31  ;;  %v9055_v62 = vsel %vm10365_vm13, %v3061_v54, %v3063_v35  ;;  %vm10429_vm13 = vmmov %vm10426_vm9 }
  0x8b   : > { %v304_v51 = vmul.f32 %v7570_v30, %v8625_v11  ;;  %v2703_v17 = vshrl.u32 %v9042_v37, 16  ;;  %v2706_v7 = vshll.u32 %v9042_v37, 16  ;;  %v845_v21 = vshrl.u32 %v7477_v45, 16 }
  0x8c   : > { %v848_v13 = vshll.u32 %v7477_v45, 16  ;;  %v1224_v32 = vshll.u32 %v9049_v58, 16  ;;  %v1228_v61 = vshrl.u32 %v9049_v58, 16  ;;  %v837_v50 = vsel %vm8755_vm14, %v828_v48, %v836_v27 }
  0x8d   : > { %v370_v10 = vmax.f32 %v338_v55, 0.0  ;;  %v2705_v22 = vrot.slane %v2703_v17, 1  ;;  %v2708_v47 = vrot.slane %v2706_v7, 2  ;;  %838 = vst [vmem:[#allocation2 + $0x68] sm:$0xf] %v837_v50  ;;  %v847_v29 = vrot.slane %v845_v21, 7 }
  0x8e   : > { %v371_v3 = vmax.f32 %v339_v23, 0.0  ;;  %v1226_v63 = vrot.slane %v1224_v32, 1  ;;  %v9064_v52 = vld [vmem:[#allocation2 + $0x60] sm:$0xff]   ;;  %v305_v30 = vmul.f32 %v7573_v44, %v8625_v11  ;;  %v340_v34 = vadd.f32 %v8628_v15, %v304_v51  ;;  %v9074_v7 = vld [vmem:[%s8622_s26 + $0x70] sm:$0xff]  }
  0x8f   : > { %v7478_v54 = vpack.c.bf16 %v370_v10, %v370_v10  ;;  %v9068_v41 = vor.u32 %v2708_v47, %v2705_v22  ;;  %v850_v31 = vor.u32 %v848_v13, %v847_v29  ;;  %v851_v27 = vrot.slane %v847_v29, 4  ;;  %v898_v22 = vld [vmem:[#allocation2 + $0x74] sm:$0xe] }
  0x90   : > { %v7479_v45 = vpack.c.bf16 %v371_v3, %v371_v3  ;;  %vm10428_vm6 = vsmask.f32 7424  ;;  %v1230_v48 = vor.u32 %v1228_v61, %v1226_v63  ;;  %v1232_v17 = vshll.u32 %v9064_v52, 16 }
  0x91   : > { %v1227_v55 = vsel %vm10428_vm6, %v1222_v59, %v1226_v63  ;;  %v1236_v23 = vshrl.u32 %v9064_v52, 16  ;;  %v2710_v21 = vsel %vm10427_vm1, %v2700_v36, %v9068_v41  ;;  %v865_v44 = vsel %vm10414_vm10, %v850_v31, %v864_v43  ;;  %vm10430_vm6 = vmmov %vm10426_vm9  ;;  %v868_v36 = vld [vmem:[#allocation2 + $0x74] sm:$0x1] }
  0x92   : > { %7791 = vmatprep.mubr.msk.bf16.mxu1 %vm10426_vm9, %v1227_v55  ;;  %v853_v51 = vshrl.u32 %v7478_v54, 16  ;;  %v856_v13 = vshll.u32 %v7478_v54, 16  ;;  %7940 = vmatmul.mubr.msk.bf16.gmra.mrb[16].mxu0 %vm10429_vm13, %v2710_v21  ;;  %v1234_v59 = vrot.slane %v1232_v17, 1  ;;  %866 = vst [vmem:[#allocation2 + $0x6c] sm:$0xf] %v865_v44  ;;  %v877_v32 = vshrl.u32 %v7479_v45, 16  ;;  %vm10432_vm13 = vmmov %vm10430_vm6 }
  0x93   : > { %v880_v61 = vshll.u32 %v7479_v45, 16  ;;  %v341_v50 = vadd.f32 %v8628_v15, %v305_v30  ;;  %7961 = vmatprep.mubr.msk.bf16.mxu0 %vm10430_vm6, %v9004_v19  ;;  %v372_v47 = vmax.f32 %v340_v34, 0.0  ;;  %v7574_v29 = vunpack.c.h.bf16 %v9032_v40 }
  0x94   : > { %v855_v10 = vrot.slane %v853_v51, 7  ;;  %v7577_v43 = vunpack.c.l.bf16 %v9074_v7  ;;  %vm10431_vm1 = vsmask.f32 7424  ;;  %v1238_v63 = vor.u32 %v1236_v23, %v1234_v59 }
  0x95   : > { %v1235_v3 = vsel %vm10431_vm1, %v1230_v48, %v1234_v59  ;;  %v879_v54 = vrot.slane %v877_v32, 6  ;;  %v882_v31 = vrot.slane %v880_v61, 7  ;;  %v373_v55 = vmax.f32 %v341_v50, 0.0 }
  0x96   : > { %7792 = vmatmul.mubr.msk.bf16.gmra.mrb[20].mxu1 %vm10432_vm13, %v1235_v3  ;;  %v858_v45 = vor.u32 %v856_v13, %v855_v10  ;;  %v860_v30 = vrot.slane %v855_v10, 4  ;;  %v7480_v17 = vpack.c.bf16 %v372_v47, %v372_v47  ;;  %v306_v21 = vmul.f32 %v7574_v29, %v8625_v11 }
  0x97   : > { %v883_v19 = vor.u32 %v882_v31, %v879_v54  ;;  %v307_v34 = vmul.f32 %v7577_v43, %v8625_v11  ;;  %v3065_v40 = vrot.slane %v8897_v8, 2  ;;  %vm10433_vm9 = vcmask 60416   ;;  %v9103_v8 = vld [vmem:[%s10353_s1 + $0x1c] sm:$0xf] }
  0x98   : > { %v859_v44 = vsel %vm8831_vm12, %v851_v27, %v858_v45  ;;  %v869_v48 = vsel %vm8839_vm11, %v860_v30, %v868_v36  ;;  %v886_v23 = vshrl.u32 %v7480_v17, 16  ;;  %v889_v51 = vshll.u32 %v7480_v17, 16  ;;  %v902_v31 = vld [vmem:[#allocation2 + $0x7c] sm:$0x3] }
  0x99   : > { %867 = vst.msk [vmem:[#allocation2 + $0x70] sm:$0xf] %vm10433_vm9, %v859_v44  ;;  %870 = vst [vmem:[#allocation2 + $0x74] sm:$0x1] %v869_v48  ;;  %v899_v13 = vsel %vm8677_vm2, %v883_v19, %v898_v22  ;;  %v884_v59 = vrot.slane %v883_v19, 4  ;;  %v7481_v32 = vpack.c.bf16 %v373_v55, %v373_v55  ;;  %v342_v61 = vadd.f32 %v8628_v15, %v306_v21  ;;  %v9105_v27 = vld [vmem:[#allocation2 + $0x68] sm:$0xff]  }
  0x9a   : > { %900 = vst [vmem:[#allocation2 + $0x74] sm:$0xe] %v899_v13  ;;  %v888_v50 = vrot.slane %v886_v23, 6  ;;  %v891_v10 = vrot.slane %v889_v51, 7  ;;  %v343_v36 = vadd.f32 %v8628_v15, %v307_v34  ;;  %vm10434_vm6 = vcmask 1045504   ;;  %vm10435_vm2 = vmmov %vm10432_vm13 }
  0x9b   : > { %v3066_v2 = vsel %vm10434_vm6, %v3063_v35, %v3065_v40  ;;  %7962 = vmatmul.mubr.msk.bf16.vlgmr.msra.gmra.mrb[0].mxu0 %vm10435_vm2, %v9014_v38  ;;  %v911_v22 = vshrl.u32 %v7481_v32, 16  ;;  %v914_v47 = vshll.u32 %v7481_v32, 16  ;;  %v374_v29 = vmax.f32 %v342_v61, 0.0  ;;  %vm10436_vm1 = vmmov %vm10435_vm2  ;;  %v932_v21 = vld [vmem:[#allocation2 + $0x7c] sm:$0xc] }
  0x9c   : > { %v3067_v43 = vrot.slane %v8910_v53, 2  ;;  %7998 = vmatpush3.bf16.msra.mxu0 %v8997_v18  ;;  %v1240_v3 = vshll.u32 %v9105_v27, 16  ;;  %v1244_v54 = vshrl.u32 %v9105_v27, 16  ;;  %7965 = vmatprep.mubr.msk.bf16.mxu0 %vm10436_vm1, %v9046_v14  ;;  %v892_v46 = vor.u32 %v891_v10, %v888_v50  ;;  %vm10437_vm13 = vmmov %vm10434_vm6  ;;  %v966_v23 = vld [vmem:[#allocation2 + $0x84] sm:$0x8] }
  0x9d   : > { %v375_v35 = vmax.f32 %v343_v36, 0.0  ;;  %v913_v45 = vrot.slane %v911_v22, 5  ;;  %v916_v30 = vrot.slane %v914_v47, 6  ;;  %v7482_v38 = vpack.c.bf16 %v374_v29, %v374_v29  ;;  %v936_v29 = vld [vmem:[#allocation2 + $0x84] sm:$0x7] }
  0x9e   : > { %v3068_v55 = vsel %vm10437_vm13, %v3065_v40, %v3067_v43  ;;  %vm10438_vm9 = vcmask 1043456   ;;  %v1242_v18 = vrot.slane %v1240_v3, 1  ;;  %v893_v17 = vsel %vm8671_vm0, %v884_v59, %v892_v46  ;;  %vm10441_vm0 = vmmov %vm10436_vm1 }
  0x9f   : > { %8409 = vmatprep.subr.msk.bf16.mxu0 %vm10438_vm9, %v9103_v8  ;;  %v894_v19 = vrot.slane %v892_v46, 4  ;;  %v7483_v14 = vpack.c.bf16 %v375_v35, %v375_v35  ;;  %vm10439_vm6 = vcmask 60416   ;;  %v917_v34 = vor.u32 %v916_v30, %v913_v45  ;;  %vm10448_vm9 = vmmov %vm10441_vm0 }
  0xa0   : > { %901 = vst.msk [vmem:[#allocation2 + $0x78] sm:$0xf] %vm10439_vm6, %v893_v17  ;;  %v920_v44 = vshrl.u32 %v7482_v38, 16  ;;  %v923_v48 = vshll.u32 %v7482_v38, 16  ;;  %v7578_v51 = vunpack.c.h.bf16 %v9074_v7  ;;  %vm10440_vm2 = vsmask.f32 7424 }
  0xa1   : > { %v1243_v40 = vsel %vm10440_vm2, %v1238_v63, %v1242_v18  ;;  %v903_v13 = vsel %vm8665_vm15, %v894_v19, %v902_v31  ;;  %v945_v32 = vshll.u32 %v7483_v14, 16  ;;  %v9132_v57 = vld [vmem:[#allocation2 + $0x70] sm:$0xff]   ;;  %v933_v59 = vsel %vm8689_vm4, %v917_v34, %v932_v21  ;;  %vm10442_vm15 = vmmov %vm10441_vm0 }
  0xa2   : > { %7795 = vmatprep.mubr.msk.bf16.mxu1 %vm10436_vm1, %v1243_v40  ;;  %904 = vst [vmem:[#allocation2 + $0x7c] sm:$0x3] %v903_v13  ;;  %v918_v61 = vrot.slane %v917_v34, 4  ;;  %v922_v50 = vrot.slane %v920_v44, 5  ;;  %v925_v10 = vrot.slane %v923_v48, 6  ;;  %v308_v7 = vmul.f32 %v7578_v51, %v8625_v11  ;;  %vm10443_vm4 = vmmov %vm10439_vm6 }
  0xa3   : > { %934 = vst [vmem:[#allocation2 + $0x7c] sm:$0xc] %v933_v59  ;;  %v947_v36 = vrot.slane %v945_v32, 5  ;;  %v948_v63 = vshrl.u32 %v7483_v14, 16  ;;  %v1246_v22 = vor.u32 %v1244_v54, %v1242_v18  ;;  %v1248_v56 = vshll.u32 %v9132_v57, 16  ;;  %7966 = vmatmul.mubr.msk.bf16.gmra.mrb[4].mxu0 %vm10441_vm0, %v9055_v62  ;;  %vm10444_vm13 = vmmov %vm10440_vm2  ;;  %v7597_v18 = vld [vmem:[%s8622_s26 + $0x78] sm:$0xff]  }
  0xa4   : > { %v926_v47 = vor.u32 %v925_v10, %v922_v50  ;;  %7969 = vmatprep.mubr.msk.bf16.mxu0 %vm10442_vm15, %v3066_v2  ;;  %v344_v3 = vadd.f32 %v8628_v15, %v308_v7  ;;  %v3069_v45 = vrot.slane %v8951_v20, 2  ;;  %v1252_v38 = vshrl.u32 %v9132_v57, 16  ;;  %vm10449_vm6 = vmmov %vm10440_vm2 }
  0xa5   : > { %v967_v16 = vsel %vm8702_vm8, %v947_v36, %v966_v23  ;;  %v950_v46 = vrot.slane %v948_v63, 4  ;;  %v1250_v31 = vrot.slane %v1248_v56, 1  ;;  %vm10445_vm8 = vmmov %vm10441_vm0  ;;  %v7581_v34 = vunpack.c.l.bf16 %v7597_v18 }
  0xa6   : > { %v927_v54 = vsel %vm8683_vm3, %v918_v61, %v926_v47  ;;  %v928_v35 = vrot.slane %v926_v47, 4  ;;  %968 = vst [vmem:[#allocation2 + $0x84] sm:$0x8] %v967_v16  ;;  %v376_v62 = vmax.f32 %v344_v3, 0.0  ;;  %vm10446_vm3 = vcmask 1045504   ;;  %vm10450_vm2 = vmmov %vm10443_vm4  ;;  %v9179_v47 = vld [vmem:[#allocation2 + $0x60] sm:$0xff]  }
  0xa7   : > { %935 = vst.msk [vmem:[#allocation2 + $0x80] sm:$0xf] %vm10443_vm4, %v927_v54  ;;  %v951_v30 = vor.u32 %v950_v46, %v947_v36  ;;  %v1251_v33 = vsel %vm10444_vm13, %v1246_v22, %v1250_v31  ;;  %v3070_v20 = vsel %vm10446_vm3, %v3067_v43, %v3069_v45  ;;  %v7582_v44 = vunpack.c.h.bf16 %v7597_v18  ;;  %vm10451_vm1 = vmmov %vm10441_vm0  ;;  %v1002_v18 = vld [vmem:[#allocation2 + $0x98] sm:$0x1] }
  0xa8   : > { %v937_v2 = vsel %vm8695_vm5, %v928_v35, %v936_v29  ;;  %7796 = vmatmul.mubr.msk.bf16.gmra.mrb[24].mxu1 %vm10445_vm8, %v1251_v33  ;;  %v7484_v6 = vpack.c.bf16 %v376_v62, %v376_v62  ;;  %v1254_v48 = vor.u32 %v1252_v38, %v1250_v31  ;;  %vm10447_vm5 = vmmov %vm10441_vm0  ;;  %v3071_v23 = vrot.slane %v8959_v9, 2  ;;  %v998_v38 = vld [vmem:[#allocation2 + $0x90] sm:$0xf] }
  0xa9   : > { %938 = vst [vmem:[#allocation2 + $0x84] sm:$0x7] %v937_v2  ;;  %v952_v19 = vrot.slane %v951_v30, 4  ;;  %v3073_v13 = vrot.slane %v9007_v25, 2  ;;  %v309_v53 = vmul.f32 %v7581_v34, %v8625_v11  ;;  %v310_v59 = vmul.f32 %v7582_v44, %v8625_v11  ;;  %vm10452_vm0 = vmmov %vm10446_vm3  ;;  %v9196_v44 = vld [vmem:[#allocation2 + $0x70] sm:$0xff]  }
  0xaa   : > { %v9154_v17 = vld [vmem:[#allocation2 + $0x78] sm:$0xff]   ;;  %v954_v21 = vshll.u32 %v7484_v6, 16  ;;  %v958_v14 = vshrl.u32 %v7484_v6, 16  ;;  %v3072_v11 = vsel %vm10452_vm0, %v3069_v45, %v3071_v23  ;;  %vm10454_vm15 = vmmov %vm10451_vm1  ;;  %v3075_v31 = vrot.slane %v9042_v37, 2 }
  0xab   : > { %v1256_v24 = vshll.u32 %v9154_v17, 16  ;;  %7970 = vmatmul.mubr.msk.bf16.gmra.mrb[8].mxu0 %vm10447_vm5, %v3068_v55  ;;  %v1260_v32 = vshrl.u32 %v9154_v17, 16  ;;  %v970_v55 = vld [vmem:[#allocation2 + $0x8c] sm:$0xf]  ;;  %v345_v9 = vadd.f32 %v8628_v15, %v309_v53  ;;  %v346_v25 = vadd.f32 %v8628_v15, %v310_v59  ;;  %vm10455_vm4 = vmmov %vm10451_vm1 }
  0xac   : > { %v956_v51 = vrot.slane %v954_v21, 5  ;;  %v960_v40 = vrot.slane %v958_v14, 4  ;;  %7973 = vmatprep.mubr.msk.bf16.mxu0 %vm10448_vm9, %v3070_v20  ;;  %vm10456_vm13 = vmmov %vm10449_vm6  ;;  %v3077_v62 = vrot.slane %v9179_v47, 2  ;;  %v9192_v20 = vld [vmem:[#allocation2 + $0x68] sm:$0xff]  }
  0xad   : > { %v1258_v43 = vrot.slane %v1256_v24, 1  ;;  %v377_v63 = vmax.f32 %v345_v9, 0.0  ;;  %v378_v29 = vmax.f32 %v346_v25, 0.0  ;;  %vm10457_vm8 = vmmov %vm10451_vm1 }
  0xae   : > { %v957_v61 = vsel %vm8724_vm7, %v952_v19, %v956_v51  ;;  %v961_v50 = vor.u32 %v960_v40, %v956_v51  ;;  %vm10453_vm7 = vmmov %vm10452_vm0 }
  0xaf   : > { %v1259_v10 = vsel %vm10449_vm6, %v1254_v48, %v1258_v43  ;;  %969 = vst.msk [vmem:[#allocation2 + $0x88] sm:$0xf] %vm10450_vm2, %v957_v61  ;;  %v1262_v49 = vor.u32 %v1260_v32, %v1258_v43  ;;  %v3074_v56 = vsel %vm10453_vm7, %v3071_v23, %v3073_v13  ;;  %v7485_v3 = vpack.c.bf16 %v377_v63, %v377_v63  ;;  %vm10459_vm3 = vmmov %vm10452_vm0 }
  0xb0   : > { %v9171_v36 = vld [vmem:[#allocation2 + $0x80] sm:$0xff]   ;;  %7799 = vmatprep.mubr.msk.bf16.mxu1 %vm10451_vm1, %v1259_v10  ;;  %v962_v7 = vrot.slane %v961_v50, 4  ;;  %v7486_v15 = vpack.c.bf16 %v378_v29, %v378_v29  ;;  %v3078_v34 = vsel %vm10459_vm3, %v3075_v31, %v3077_v62  ;;  %vm10460_vm5 = vmmov %vm10451_vm1  ;;  %v3079_v43 = vrot.slane %v9192_v20, 2 }
  0xb1   : > { %v1264_v22 = vshll.u32 %v9171_v36, 16  ;;  %v979_v54 = vshrl.u32 %v7485_v3, 16  ;;  %v982_v35 = vshll.u32 %v7485_v3, 16  ;;  %v1268_v14 = vshrl.u32 %v9171_v36, 16  ;;  %vm10461_vm9 = vmmov %vm10451_vm1  ;;  %v9220_v25 = vld [vmem:[#allocation2 + $0x80] sm:$0xff]   ;;  %v9244_v3 = vld [vmem:[#allocation2 + $0x8] sm:$0xff]  }
  0xb2   : > { %v971_v16 = vsel %vm8755_vm14, %v962_v7, %v970_v55  ;;  %v987_v30 = vshrl.u32 %v7486_v15, 16  ;;  %v990_v33 = vshll.u32 %v7486_v15, 16  ;;  %vm10458_vm14 = vmmov %vm10452_vm0  ;;  %v3081_v61 = vrot.slane %v9196_v44, 2  ;;  %v9215_v55 = vld [vmem:[#allocation2 + $0x78] sm:$0xff]  }
  0xb3   : > { %v1266_v46 = vrot.slane %v1264_v22, 1  ;;  %972 = vst [vmem:[#allocation2 + $0x8c] sm:$0xf] %v971_v16  ;;  %7974 = vmatmul.mubr.msk.bf16.gmra.mrb[12].mxu0 %vm10454_vm15, %v3072_v11  ;;  %v981_v12 = vrot.slane %v979_v54, 7  ;;  %v3076_v19 = vsel %vm10458_vm14, %v3073_v13, %v3075_v31  ;;  %vm10462_vm6 = vmmov %vm10450_vm2  ;;  %v3083_v7 = vrot.slane %v9215_v55, 2 }
  0xb4   : > { %7977 = vmatprep.mubr.msk.bf16.mxu0 %vm10455_vm4, %v3074_v56  ;;  %v989_v2 = vrot.slane %v987_v30, 7  ;;  %vm10466_vm2 = vmmov %vm10451_vm1  ;;  %v3085_v11 = vrot.slane %v9220_v25, 2  ;;  %v8497_v22 = vld [vmem:[%s10353_s1 + $0x8] sm:$0xf]  ;;  %v9242_v16 = vld [vmem:[%s10353_s1 + $0xc] sm:$0xf] }
  0xb5   : > { %v1267_v45 = vsel %vm10456_vm13, %v1262_v49, %v1266_v46  ;;  %v984_v37 = vor.u32 %v982_v35, %v981_v12  ;;  %v985_v21 = vrot.slane %v981_v12, 4  ;;  %v1270_v1 = vor.u32 %v1268_v14, %v1266_v46  ;;  %vm10470_vm4 = vmmov %vm10459_vm3  ;;  %v9249_v46 = vld [vmem:[#allocation2 + $0x10] sm:$0xff]   ;;  %v9267_v12 = vld [vmem:[#allocation2 + $0x18] sm:$0xff]  }
  0xb6   : > { %7800 = vmatmul.mubr.msk.bf16.gmra.mrb[28].mxu1 %vm10457_vm8, %v1267_v45  ;;  %v9189_v6 = vld [vmem:[#allocation2 + $0x88] sm:$0xf]  ;;  %v992_v48 = vor.u32 %v990_v33, %v989_v2  ;;  %v994_v24 = vrot.slane %v989_v2, 4  ;;  %v3084_v63 = vsel %vm10470_vm4, %v3081_v61, %v3083_v7  ;;  %vm10472_vm8 = vmmov %vm10459_vm3  ;;  %v3363_v54 = vld [vmem:[#allocation2 + $0x10] sm:$0xc] }
  0xb7   : > { %v999_v51 = vsel %vm10414_vm10, %v984_v37, %v998_v38  ;;  %vm10465_vm10 = vmmov %vm10452_vm0  ;;  %v9258_v35 = vld [vmem:[#allocation2 + $0x14] sm:$0xf]  ;;  %v9269_v38 = vld [vmem:[#allocation2 + $0x18] sm:$0xff]   ;;  %v3496_v37 = vrot.slane %v9267_v12, 2 }
  0xb8   : > { %v993_v13 = vsel %vm8831_vm12, %v985_v21, %v992_v48  ;;  %1000 = vst [vmem:[#allocation2 + $0x90] sm:$0xf] %v999_v51  ;;  %v1003_v53 = vsel %vm8839_vm11, %v994_v24, %v1002_v18  ;;  %vm10463_vm12 = vmmov %vm10452_vm0  ;;  %v3082_v10 = vsel %vm10465_vm10, %v3079_v43, %v3081_v61  ;;  %v9265_v33 = vcombine.low %v3363_v54, %v9258_v35  ;;  %v9274_v2 = vld [vmem:[#allocation2 + $0x20] sm:$0xff]   ;;  %v9286_v48 = vld [vmem:[#allocation2 + $0x28] sm:$0xff]  }
  0xb9   : > { %1001 = vst.msk [vmem:[#allocation2 + $0x94] sm:$0xf] %vm10462_vm6, %v993_v13  ;;  %1004 = vst [vmem:[#allocation2 + $0x98] sm:$0x1] %v1003_v53  ;;  %v3080_v50 = vsel %vm10463_vm12, %v3077_v62, %v3079_v43  ;;  %v9283_v14 = vld [vmem:[#allocation2 + $0x20] sm:$0xff]   ;;  %v9288_v24 = vld [vmem:[#allocation2 + $0x28] sm:$0xff]  }
  0xba   : > { %v1042_v23 = vld [vmem:[#allocation2 + $0x8c] sm:$0xf]  ;;  %vm10464_vm11 = vmmov %vm10456_vm13  ;;  %vm10471_vm13 = vcmask 1043456   ;;  %v3498_v51 = vrot.slane %v9283_v14, 2  ;;  %v3500_v13 = vrot.slane %v9286_v48, 2  ;;  %v9301_v43 = vld [vmem:[#allocation2 + $0x30] sm:$0xff]  }
  0xbb   : > { %v9201_v40 = vcombine.low %v9189_v6, %v1042_v23  ;;  %7978 = vmatmul.mubr.msk.bf16.gmra.mrb[16].mxu0 %vm10460_vm5, %v3076_v19  ;;  %vm10467_vm0 = vmmov %vm10451_vm1  ;;  %v9230_v49 = vld [vmem:[#allocation2 + $0x88] sm:$0xff]   ;;  %v1832_v56 = vsel %vm10471_vm13, %v8497_v22, 0  ;;  %v3495_v19 = vrot.slane %v9265_v33, 2  ;;  %v9293_v23 = vld [vmem:[#allocation2 + $0x30] sm:$0xff]  }
  0xbc   : > { %7981 = vmatprep.mubr.msk.bf16.mxu0 %vm10461_vm9, %v3078_v34  ;;  %vm10468_vm7 = vmmov %vm10467_vm0  ;;  %v3087_v15 = vrot.slane %v9230_v49, 2  ;;  %v9311_v61 = vld [vmem:[%s10353_s1 + $0x20] sm:$0xf]  ;;  %v9340_v22 = vld [vmem:[#allocation2 + $0x50] sm:$0xff]  }
  0xbd   : > { %v1272_v32 = vshll.u32 %v9201_v40, 16  ;;  %v1276_v59 = vshrl.u32 %v9201_v40, 16  ;;  %vm10469_vm15 = vmmov %vm10467_vm0 }
  0xbe   : > { %vm10473_vm14 = vmmov %vm10467_vm0 }
  0xbf   : > { %v1274_v42 = vrot.slane %v1272_v32, 1  ;;  %vm10474_vm3 = vmmov %vm10467_vm0  ;;  %v9305_v32 = vld [vmem:[#allocation2 + $0x38] sm:$0xff]  }
  0xc0   : > { %v9236_v29 = vld [vmem:[#allocation2 + $0x90] sm:$0xff]   ;;  %vm10475_vm5 = vmmov %vm10467_vm0  ;;  %v9261_v62 = vld [vmem:[#allocation2 + $0x98] ss:$0 sps:$4 sm:$0x11]  }
  0xc1   : > { %v1275_v60 = vsel %vm10464_vm11, %v1270_v1, %v1274_v42  ;;  %v1278_v9 = vor.u32 %v1276_v59, %v1274_v42  ;;  %vm10476_vm9 = vmmov %vm10467_vm0  ;;  %v3089_v31 = vrot.slane %v9236_v29, 2  ;;  %v3091_v18 = vrot.slane %v9261_v62, 2  ;;  %v9313_v42 = vld [vmem:[#allocation2 + $0x38] sm:$0xff]  }
  0xc2   : > { %7803 = vmatprep.mubr.msk.bf16.mxu1 %vm10466_vm2, %v1275_v60  ;;  %vm10477_vm6 = vmmov %vm10471_vm13 }
  0xc3   : > { %7804 = vmatmul.mubr.msk.bf16.gmra.mrb[32].mxu1 %vm10451_vm1, %v1278_v9  ;;  %7982 = vmatmul.mubr.msk.bf16.gmra.mrb[20].mxu0 %vm10467_vm0, %v3080_v50  ;;  %vm10478_vm12 = vmmov %vm10470_vm4  ;;  %v3504_v50 = vrot.slane %v9305_v32, 2  ;;  %v9326_v9 = vld [vmem:[#allocation2 + $0x40] sm:$0xff]  }
  0xc4   : > { %7809 = vmatprep.mubr.msk.bf16.mxu1 %vm10468_vm7, %v8648_v28  ;;  %7985 = vmatprep.mubr.msk.bf16.mxu0 %vm10469_vm15, %v3082_v10  ;;  %v3086_v28 = vsel %vm10472_vm8, %v3083_v7, %v3085_v11  ;;  %v3088_v45 = vsel %vm10478_vm12, %v3085_v11, %v3087_v15  ;;  %vm10479_vm11 = vmmov %vm10470_vm4  ;;  %v9329_v7 = vld [vmem:[#allocation2 + $0x48] sm:$0xff]  }
  0xc5   : > { %v3090_v30 = vsel %vm10479_vm11, %v3087_v15, %v3089_v31  ;;  %vm10480_vm10 = vmmov %vm10467_vm0  ;;  %v3508_v11 = vrot.slane %v9329_v7, 2 }
  0xc6   : > { %vm10481_vm2 = vmmov %vm10467_vm0 }
  0xc7   : > { %vm10482_vm1 = vmmov %vm10467_vm0 }
  0xc8   : > { %vm10483_vm7 = vmmov %vm10470_vm4 }
  0xc9   : > { %v3092_v21 = vsel %vm10483_vm7, %v3089_v31, %v3091_v18  ;;  %vm10484_vm15 = vmmov %vm10470_vm4  ;;  %v9354_v31 = vld [vmem:[#allocation2 + $0x60] sm:$0xff]  }
  0xca   : > { %v3497_v34 = vsel %vm10484_vm15, %v3495_v19, %v3496_v37  ;;  %vm10485_vm4 = vmmov %vm10467_vm0  ;;  %v1735_v19 = vld [vmem:[#allocation2] sm:$0xe] }
  0xcb   : > { %7810 = vmatmul.mubr.msk.bf16.vlgmr.msra.gmra.mrb[0].mxu1 %vm10473_vm14, %v9244_v3  ;;  %7986 = vmatmul.mubr.msk.bf16.gmra.mrb[24].mxu0 %vm10474_vm3, %v3084_v63  ;;  %vm10486_vm13 = vmmov %vm10467_vm0 }
  0xcc   : > { %7813 = vmatprep.mubr.msk.bf16.mxu1 %vm10475_vm5, %v9249_v46  ;;  %7846 = vmatpush3.bf16.msra.mxu1 %v1832_v56  ;;  %vm10487_vm8 = vmmov %vm10467_vm0 }
  0xcd   : > { %7989 = vmatprep.mubr.msk.bf16.mxu0 %vm10476_vm9, %v3086_v28  ;;  %8404 = vmatprep.subr.msk.bf16.mxu1 %vm10477_vm6, %v9242_v16  ;;  %vm10488_vm14 = vmmov %vm10467_vm0  ;;  %v9343_v28 = vld [vmem:[#allocation2 + $0x58] sm:$0xff]  }
  0xce   : > { %vm10489_vm3 = vmmov %vm10483_vm7 }
  0xcf   : > { %v3499_v53 = vsel %vm10489_vm3, %v3496_v37, %v3498_v51  ;;  %vm10490_vm5 = vmmov %vm10477_vm6 }
  0xd0   : > { %v4034_v1 = vsel %vm10490_vm5, %v9103_v8, 0  ;;  %vm10491_vm9 = vmmov %vm10489_vm3  ;;  %v3502_v8 = vrot.slane %v9301_v43, 2 }
  0xd1   : > { %v3501_v59 = vsel %vm10491_vm9, %v3498_v51, %v3500_v13  ;;  %vm10492_vm6 = vmmov %vm10467_vm0 }
  0xd2   : > { %vm10493_vm12 = vmmov %vm10467_vm0 }
  0xd3   : > { %7814 = vmatmul.mubr.msk.bf16.gmra.mrb[4].mxu1 %vm10480_vm10, %v9269_v38  ;;  %7990 = vmatmul.mubr.msk.bf16.gmra.mrb[28].mxu0 %vm10481_vm2, %v3088_v45  ;;  %vm10494_vm11 = vmmov %vm10467_vm0  ;;  %v9357_v45 = vld [vmem:[#allocation2 + $0x68] sm:$0xff]  }
  0xd4   : > { %7817 = vmatprep.mubr.msk.bf16.mxu1 %vm10482_vm1, %v9274_v2  ;;  %7993 = vmatprep.mubr.msk.bf16.mxu0 %vm10467_vm0, %v3090_v30  ;;  %vm10495_vm10 = vmmov %vm10467_vm0  ;;  %v3514_v30 = vrot.slane %v9354_v31, 2  ;;  %v3516_v18 = vrot.slane %v9357_v45, 2 }
  0xd5   : > { %vm10496_vm2 = vmmov %vm10490_vm5 }
  0xd6   : > { %vm10497_vm1 = vmmov %vm10489_vm3 }
  0xd7   : > { %v3503_v60 = vsel %vm10497_vm1, %v3500_v13, %v3502_v8  ;;  %vm10498_vm0 = vmmov %vm10497_vm1 }
  0xd8   : > { %v3505_v10 = vsel %vm10498_vm0, %v3502_v8, %v3504_v50  ;;  %vm10499_vm7 = vmmov %vm10485_vm4 }
  0xd9   : > { %vm10500_vm15 = vmmov %vm10485_vm4 }
  0xda   : > { %vm10504_vm3 = vmmov %vm10485_vm4 }
  0xdb   : > { %7818 = vmatmul.mubr.msk.bf16.gmra.mrb[8].mxu1 %vm10485_vm4, %v9288_v24  ;;  %7994 = vmatmul.mubr.msk.bf16.gmra.mrb[32].mxu0 %vm10486_vm13, %v3092_v21  ;;  %vm10501_vm13 = vmmov %vm10485_vm4  ;;  %v9368_v21 = vld [vmem:[#allocation2 + $0x70] sm:$0xff]  }
  0xdc   : > { %7821 = vmatprep.mubr.msk.bf16.mxu1 %vm10487_vm8, %v9293_v23  ;;  %7999 = vmatprep.mubr.msk.bf16.mxu0 %vm10488_vm14, %v3497_v34  ;;  %vm10502_vm8 = vmmov %vm10498_vm0  ;;  %v8505_v34 = vld [vmem:[#allocation2 + $0x4] sm:$0xf] }
  0xdd   : > { %vm10503_vm14 = vmmov %vm10498_vm0  ;;  %v7227_v51 = vcombine.low %v1735_v19, %v8505_v34  ;;  %v9402_v19 = vld [vmem:[#allocation2 + $0x98] sm:$0xff]  }
  0xde   : > { %vm10505_vm5 = vmmov %vm10504_vm3 }
  0xdf   : > { %vm10506_vm9 = vmmov %vm10504_vm3  ;;  %v1742_v8 = vrot.slane %v7227_v51, 1  ;;  %v1751_v51 = vrot.slane %v9288_v24, 1 }
  0xe3   : > { %7822 = vmatmul.mubr.msk.bf16.gmra.mrb[12].mxu1 %vm10492_vm6, %v9313_v42  ;;  %8000 = vmatmul.mubr.msk.bf16.vlgmr.msra.gmra.mrb[0].mxu0 %vm10493_vm12, %v3499_v53  ;;  %vm10507_vm6 = vmmov %vm10504_vm3  ;;  %v9371_v53 = vld [vmem:[#allocation2 + $0x78] sm:$0xff]  }
  0xe4   : > { %7825 = vmatprep.mubr.msk.bf16.mxu1 %vm10494_vm11, %v8945_v26  ;;  %8036 = vmatpush3.bf16.msra.mxu0 %v4034_v1  ;;  %v3506_v26 = vrot.slane %v9326_v9, 2  ;;  %vm10508_vm12 = vmmov %vm10498_vm0  ;;  %v1040_v1 = vld [vmem:[#allocation2 + $0x8c] sm:$0x7] }
  0xe5   : > { %8003 = vmatprep.mubr.msk.bf16.mxu0 %vm10495_vm10, %v3501_v59  ;;  %8410 = vmatprep.subr.msk.bf16.mxu0 %vm10496_vm2, %v9311_v61  ;;  %vm10509_vm11 = vmmov %vm10498_vm0  ;;  %v3518_v59 = vrot.slane %v9368_v21, 2 }
  0xe6   : > { %v3507_v63 = vsel %vm10502_vm8, %v3504_v50, %v3506_v26  ;;  %v3509_v56 = vsel %vm10503_vm14, %v3506_v26, %v3508_v11  ;;  %vm10510_vm10 = vmmov %vm10504_vm3  ;;  %v1743_v50 = vrot.slane %v9244_v3, 1  ;;  %v1745_v3 = vrot.slane %v9249_v46, 1 }
  0xe7   : > { %vm10511_vm2 = vmmov %vm10504_vm3 }
  0xe8   : > { %vm10512_vm1 = vmmov %vm10511_vm2 }
  0xe9   : > { %vm10513_vm0 = vmmov %vm10512_vm1 }
  0xea   : > { %vm10519_vm14 = vmmov %vm10513_vm0 }
  0xeb   : > { %7826 = vmatmul.mubr.msk.bf16.gmra.mrb[16].mxu1 %vm10499_vm7, %v8961_v0  ;;  %8004 = vmatmul.mubr.msk.bf16.gmra.mrb[4].mxu0 %vm10500_vm15, %v3503_v60  ;;  %v3510_v0 = vrot.slane %v9340_v22, 2  ;;  %vm10514_vm7 = vmmov %vm10502_vm8  ;;  %v3520_v60 = vrot.slane %v9371_v53, 2 }
  0xec   : > { %7829 = vmatprep.mubr.msk.bf16.mxu1 %vm10485_vm4, %v8999_v39  ;;  %8007 = vmatprep.mubr.msk.bf16.mxu0 %vm10501_vm13, %v3505_v10  ;;  %v3512_v39 = vrot.slane %v9343_v28, 2  ;;  %vm10515_vm15 = vmmov %vm10514_vm7  ;;  %v7207_v10 = vcombine.low %v9189_v6, %v1040_v1  ;;  %v3528_v1 = vrot.slane %v9402_v19, 2 }
  0xed   : > { %v3511_v15 = vsel %vm10508_vm12, %v3508_v11, %v3510_v0  ;;  %v3517_v13 = vsel %vm10515_vm15, %v3514_v30, %v3516_v18  ;;  %vm10516_vm4 = vmmov %vm10513_vm0  ;;  %v9384_v11 = vld [vmem:[#allocation2 + $0x80] sm:$0xff]  }
  0xee   : > { %v3513_v54 = vsel %vm10509_vm11, %v3510_v0, %v3512_v39  ;;  %v3515_v37 = vsel %vm10514_vm7, %v3512_v39, %v3514_v30  ;;  %vm10517_vm13 = vmmov %vm10513_vm0  ;;  %v9388_v0 = vld [vmem:[#allocation2 + $0x88] sm:$0xff]   ;;  %v3522_v6 = vrot.slane %v9384_v11, 2  ;;  %v1747_v39 = vrot.slane %v9269_v38, 1 }
  0xef   : > { %vm10518_vm8 = vmmov %vm10513_vm0  ;;  %v1749_v38 = vrot.slane %v9274_v2, 1  ;;  %v8506_v2 = vld [vmem:[%s10353_s1 + $0x10] sm:$0xf] }
  0xf0   : > { %vm10523_vm12 = vmmov %vm10513_vm0 }
  0xf1   : > { %vm10524_vm11 = vmmov %vm10513_vm0 }
  0xf2   : > { %vm10530_vm15 = vmmov %vm10516_vm4 }
  0xf3   : > { %7830 = vmatmul.mubr.msk.bf16.gmra.mrb[20].mxu1 %vm10504_vm3, %v9049_v58  ;;  %8008 = vmatmul.mubr.msk.bf16.gmra.mrb[8].mxu0 %vm10505_vm5, %v3507_v63  ;;  %vm1741_vm3 = vcmask 1046528   ;;  %vm10520_vm5 = vmmov %vm10514_vm7 }
  0xf4   : > { %7833 = vmatprep.mubr.msk.bf16.mxu1 %vm10506_vm9, %v9064_v52  ;;  %8011 = vmatprep.mubr.msk.bf16.mxu0 %vm10507_vm6, %v3509_v56  ;;  %v3519_v26 = vsel %vm10520_vm5, %v3516_v18, %v3518_v59  ;;  %v1744_v63 = vsel %vm1741_vm3, %v1742_v8, %v1743_v50  ;;  %vm10521_vm9 = vmmov %vm10520_vm5  ;;  %v9400_v18 = vld [vmem:[#allocation2 + $0x90] sm:$0xff]   ;;  %v3818_v8 = vshrl.u32 %v9267_v12, 16  ;;  %v1750_v24 = vsel %vm1741_vm3, %v1747_v39, %v1749_v38 }
  0xf5   : > { %v3521_v56 = vsel %vm10521_vm9, %v3518_v59, %v3520_v60  ;;  %vm10522_vm6 = vmmov %vm10513_vm0  ;;  %v3813_v59 = vshll.u32 %v9265_v33, 16 }
  0xf6   : > { %vm10529_vm7 = vmmov %vm10516_vm4 }
  0xf7   : > { %vm10535_vm9 = vmmov %vm10516_vm4 }
  0xfb   : > { %7834 = vmatmul.mubr.msk.bf16.gmra.mrb[24].mxu1 %vm10510_vm10, %v9105_v27  ;;  %8012 = vmatmul.mubr.msk.bf16.gmra.mrb[12].mxu0 %vm10511_vm2, %v3511_v15  ;;  %vm10525_vm10 = vmmov %vm10513_vm0  ;;  %v3524_v15 = vrot.slane %v9388_v0, 2 }
  0xfc   : > { %7837 = vmatprep.mubr.msk.bf16.mxu1 %vm10512_vm1, %v9132_v57  ;;  %8015 = vmatprep.mubr.msk.bf16.mxu0 %vm10513_vm0, %v3513_v54  ;;  %v1746_v54 = vsel %vm1741_vm3, %v1743_v50, %v1745_v3  ;;  %vm10526_vm2 = vmmov %vm10520_vm5  ;;  %vm10527_vm1 = vcmask 1043456   ;;  %v3821_v50 = vshll.u32 %v9267_v12, 16 }
  0xfd   : > { %v3523_v30 = vsel %vm10526_vm2, %v3520_v60, %v3522_v6  ;;  %v2265_v46 = vsel %vm10527_vm1, %v9242_v16, 0  ;;  %vm10528_vm0 = vmmov %vm10526_vm2  ;;  %v3810_v16 = vshrl.u32 %v9265_v33, 16  ;;  %v1752_v60 = vsel %vm1741_vm3, %v1749_v38, %v1751_v51 }
  0xfe   : > { %v3525_v34 = vsel %vm10528_vm0, %v3522_v6, %v3524_v15  ;;  %vm10534_vm5 = vmmov %vm10528_vm0  ;;  %v3823_v6 = vrot.slane %v3821_v50, 3  ;;  %v3836_v38 = vshrl.u32 %v9286_v48, 16 }
  0xff   : > { %v3812_v33 = vrot.slane %v3810_v16, 2  ;;  %vm10539_vm2 = vmmov %vm10528_vm0 }
 0x103   : > { %7838 = vmatmul.mubr.msk.bf16.gmra.mrb[28].mxu1 %vm10516_vm4, %v9154_v17  ;;  %8016 = vmatmul.mubr.msk.bf16.gmra.mrb[16].mxu0 %vm10517_vm13, %v3515_v37  ;;  %v1748_v37 = vsel %vm1741_vm3, %v1745_v3, %v1747_v39  ;;  %vm10531_vm13 = vmmov %vm10516_vm4  ;;  %v3820_v3 = vrot.slane %v3818_v8, 2 }
 0x104   : > { %7841 = vmatprep.mubr.msk.bf16.mxu1 %vm10518_vm8, %v9171_v36  ;;  %8019 = vmatprep.mubr.msk.bf16.mxu0 %vm10519_vm14, %v3517_v13  ;;  %v3526_v13 = vrot.slane %v9400_v18, 2  ;;  %vm10532_vm8 = vmmov %vm10527_vm1 }
 0x105   : > { %vm10533_vm14 = vmmov %vm10528_vm0 }
 0x106   : > { %vm10540_vm1 = vmmov %vm10516_vm4 }
 0x107   : > { %vm10541_vm0 = vmmov %vm10540_vm1 }
 0x10b   : > { %7842 = vmatmul.mubr.msk.bf16.gmra.mrb[32].mxu1 %vm10522_vm6, %v7207_v10  ;;  %8020 = vmatmul.mubr.msk.bf16.gmra.mrb[20].mxu0 %vm10523_vm12, %v3519_v26  ;;  %v3527_v10 = vsel %vm10533_vm14, %v3524_v15, %v3526_v13  ;;  %v3529_v26 = vsel %vm10534_vm5, %v3526_v13, %v3528_v1  ;;  %vm10536_vm6 = vmmov %vm10516_vm4  ;;  %v3827_v15 = vshrl.u32 %v9283_v14, 16  ;;  %v3839_v13 = vshll.u32 %v9286_v48, 16 }
 0x10c   : > { %7847 = vmatprep.mubr.msk.bf16.mxu1 %vm10524_vm11, %v1744_v63  ;;  %8023 = vmatprep.mubr.msk.bf16.mxu0 %vm10525_vm10, %v3521_v56  ;;  %v8476_v63 = vld [vmem:[#allocation2 + $0xa0] ss:$0 sps:$4 sm:$0x11]   ;;  %v3815_v56 = vrot.slane %v3813_v59, 3  ;;  %vm10537_vm12 = vmmov %vm10516_vm4  ;;  %vm3808_vm10 = vsmask.f32 5376 }
 0x10d   : > { %vm10538_vm11 = vmmov %vm10516_vm4  ;;  %v3530_v39 = vrot.slane %v8476_v63, 2  ;;  %v3829_v59 = vrot.slane %v3827_v15, 2  ;;  %v8508_v63 = vld [vmem:[#allocation2 + $0x48] sm:$0xff]  }
 0x10e   : > { %vm10547_vm14 = vmmov %vm10541_vm0 }
 0x10f   : > { %vm10548_vm5 = vmmov %vm10541_vm0 }
 0x113   : > { %7848 = vmatmul.mubr.msk.bf16.vlgmr.msra.gmra.mrb[0].mxu1 %vm10529_vm7, %v1746_v54  ;;  %8024 = vmatmul.mubr.msk.bf16.gmra.mrb[24].mxu0 %vm10530_vm15, %v3523_v30  ;;  %v1753_v54 = vrot.slane %v9293_v23, 1  ;;  %v3830_v30 = vshll.u32 %v9283_v14, 16  ;;  %v3531_v23 = vsel %vm10539_vm2, %v3528_v1, %v3530_v39  ;;  %vm10542_vm7 = vmmov %vm10541_vm0  ;;  %v3845_v1 = vshrl.u32 %v9301_v43, 16 }
 0x114   : > { %7851 = vmatprep.mubr.msk.bf16.mxu1 %vm10516_vm4, %v1748_v37  ;;  %7884 = vmatpush3.bf16.msra.mxu1 %v2265_v46  ;;  %v1755_v37 = vrot.slane %v9313_v42, 1  ;;  %v3816_v46 = vor.u32 %v3815_v56, %v3812_v33  ;;  %v8507_v42 = vld [vmem:[#allocation2 + $0x40] sm:$0xff]   ;;  %vm10543_vm15 = vmmov %vm10541_vm0  ;;  %v1759_v33 = vrot.slane %v8508_v63, 1  ;;  %v3854_v56 = vshrl.u32 %v9305_v32, 16 }
 0x115   : > { %8027 = vmatprep.mubr.msk.bf16.mxu0 %vm10531_vm13, %v3525_v34  ;;  %8406 = vmatprep.subr.msk.bf16.mxu1 %vm10532_vm8, %v8506_v2  ;;  %v3824_v34 = vor.u32 %v3823_v6, %v3820_v3  ;;  %v1754_v16 = vsel %vm1741_vm3, %v1751_v51, %v1753_v54  ;;  %v3832_v8 = vrot.slane %v3830_v30, 3  ;;  %v3857_v3 = vshll.u32 %v9305_v32, 16  ;;  %vm10544_vm4 = vmmov %vm10532_vm8 }
 0x116   : > { %v1756_v50 = vsel %vm1741_vm3, %v1753_v54, %v1755_v37  ;;  %v3847_v15 = vrot.slane %v3845_v1, 2  ;;  %vm10545_vm13 = vmmov %vm10541_vm0 }
 0x117   : > { %v3825_v2 = vsel %vm3808_vm10, %v3816_v46, %v3824_v34  ;;  %v3833_v51 = vor.u32 %v3832_v8, %v3829_v59  ;;  %vm10546_vm8 = vmmov %vm10541_vm0  ;;  %v3863_v8 = vshrl.u32 %v9326_v9, 16 }
 0x118   : > { %vm10553_vm2 = vmmov %vm10541_vm0 }
 0x119   : > { %v3834_v39 = vsel %vm3808_vm10, %v3824_v34, %v3833_v51 }
 0x11b   : > { %7852 = vmatmul.mubr.msk.bf16.gmra.mrb[4].mxu1 %vm10535_vm9, %v1750_v24  ;;  %8028 = vmatmul.mubr.msk.bf16.gmra.mrb[28].mxu0 %vm10536_vm6, %v3527_v10  ;;  %v3838_v24 = vrot.slane %v3836_v38, 2  ;;  %v1757_v10 = vrot.slane %v8507_v42, 1  ;;  %v4348_v38 = vsel %vm10544_vm4, %v9311_v61, 0  ;;  %v1763_v61 = vrot.slane %v9049_v58, 1  ;;  %vm10549_vm9 = vmmov %vm10541_vm0 }
 0x11c   : > { %7855 = vmatprep.mubr.msk.bf16.mxu1 %vm10537_vm12, %v1752_v60  ;;  %8031 = vmatprep.mubr.msk.bf16.mxu0 %vm10538_vm11, %v3529_v26  ;;  %v3841_v60 = vrot.slane %v3839_v13, 3  ;;  %v3848_v26 = vshll.u32 %v9301_v43, 16  ;;  %v3856_v13 = vrot.slane %v3854_v56, 2  ;;  %vm10550_vm6 = vmmov %vm10541_vm0  ;;  %v1765_v58 = vrot.slane %v9064_v52, 1 }
 0x11d   : > { %v1758_v54 = vsel %vm1741_vm3, %v1755_v37, %v1757_v10  ;;  %v1760_v46 = vsel %vm1741_vm3, %v1757_v10, %v1759_v33  ;;  %v8509_v37 = vld [vmem:[#allocation2 + $0x50] sm:$0xff]   ;;  %vm10551_vm12 = vmmov %vm10541_vm0 }
 0x11e   : > { %v3842_v6 = vor.u32 %v3841_v60, %v3838_v24  ;;  %v3850_v30 = vrot.slane %v3848_v26, 3  ;;  %v1761_v59 = vrot.slane %v8509_v37, 1  ;;  %v3872_v24 = vshrl.u32 %v9329_v7, 16  ;;  %vm10552_vm11 = vmmov %vm10541_vm0 }
 0x11f   : > { %v3875_v60 = vshll.u32 %v9329_v7, 16  ;;  %vm10557_vm4 = vmmov %vm10541_vm0 }
 0x120   : > { %v3851_v34 = vor.u32 %v3850_v30, %v3847_v15  ;;  %v1762_v42 = vsel %vm1741_vm3, %v1759_v33, %v1761_v59  ;;  %v1764_v26 = vsel %vm1741_vm3, %v1761_v59, %v1763_v61  ;;  %v3874_v56 = vrot.slane %v3872_v24, 2 }
 0x121   : > { %v3890_v30 = vshrl.u32 %v9343_v28, 16 }
 0x122   : > { %v3852_v10 = vsel %vm3808_vm10, %v3842_v6, %v3851_v34 }
 0x123   : > { %7856 = vmatmul.mubr.msk.bf16.gmra.mrb[8].mxu1 %vm10540_vm1, %v1754_v16  ;;  %8032 = vmatmul.mubr.msk.bf16.gmra.mrb[32].mxu0 %vm10541_vm0, %v3531_v23  ;;  %v3859_v16 = vrot.slane %v3857_v3, 3  ;;  %v3843_v23 = vsel %vm3808_vm10, %v3833_v51, %v3842_v6  ;;  %v3865_v51 = vrot.slane %v3863_v8, 2  ;;  %v3877_v3 = vrot.slane %v3875_v60, 3  ;;  %vm10554_vm1 = vmmov %vm10541_vm0 }
 0x124   : > { %7859 = vmatprep.mubr.msk.bf16.mxu1 %vm10542_vm7, %v1756_v50  ;;  %8037 = vmatprep.mubr.msk.bf16.mxu0 %vm10543_vm15, %v3825_v2  ;;  %v3866_v50 = vshll.u32 %v9326_v9, 16  ;;  %v3881_v6 = vshrl.u32 %v9340_v22, 16  ;;  %v3892_v59 = vrot.slane %v3890_v30, 2  ;;  %vm10555_vm7 = vmmov %vm10541_vm0  ;;  %v3908_v60 = vshrl.u32 %v9357_v45, 16 }
 0x125   : > { %v3860_v2 = vor.u32 %v3859_v16, %v3856_v13  ;;  %v3878_v15 = vor.u32 %v3877_v3, %v3874_v56  ;;  %vm10556_vm15 = vmmov %vm10541_vm0  ;;  %v3929_v30 = vshll.u32 %v9371_v53, 16 }
 0x126   : > { %v3868_v1 = vrot.slane %v3866_v50, 3  ;;  %v3883_v16 = vrot.slane %v3881_v6, 2  ;;  %v3899_v50 = vshrl.u32 %v9354_v31, 16  ;;  %v3910_v56 = vrot.slane %v3908_v60, 2 }
 0x127   : > { %v3861_v63 = vsel %vm3808_vm10, %v3851_v34, %v3860_v2  ;;  %v3920_v6 = vshll.u32 %v9368_v21, 16  ;;  %v3947_v60 = vshll.u32 %v9388_v0, 16 }
 0x128   : > { %v3869_v33 = vor.u32 %v3868_v1, %v3865_v51  ;;  %v3901_v1 = vrot.slane %v3899_v50, 2 }
 0x12a   : > { %v3870_v13 = vsel %vm3808_vm10, %v3860_v2, %v3869_v33  ;;  %v3879_v37 = vsel %vm3808_vm10, %v3869_v33, %v3878_v15  ;;  %v1771_v2 = vrot.slane %v9154_v17, 1  ;;  %v1773_v17 = vrot.slane %v9171_v36, 1 }
 0x12b   : > { %7860 = vmatmul.mubr.msk.bf16.gmra.mrb[12].mxu1 %vm10545_vm13, %v1758_v54  ;;  %8038 = vmatmul.mubr.msk.bf16.vlgmr.msra.gmra.mrb[0].mxu0 %vm10546_vm8, %v3834_v39  ;;  %v3884_v54 = vshll.u32 %v9340_v22, 16  ;;  %v1767_v39 = vrot.slane %v9105_v27, 1  ;;  %v1769_v27 = vrot.slane %v9132_v57, 1  ;;  %vm10558_vm13 = vmmov %vm10541_vm0  ;;  %v3917_v33 = vshrl.u32 %v9368_v21, 16 }
 0x12c   : > { %7863 = vmatprep.mubr.msk.bf16.mxu1 %vm10547_vm14, %v1760_v46  ;;  %8074 = vmatpush3.bf16.msra.mxu0 %v4348_v38  ;;  %v3893_v46 = vshll.u32 %v9343_v28, 16  ;;  %v1766_v38 = vsel %vm1741_vm3, %v1763_v61, %v1765_v58  ;;  %v3902_v61 = vshll.u32 %v9354_v31, 16  ;;  %vm10559_vm8 = vmmov %vm10541_vm0  ;;  %v3922_v36 = vrot.slane %v3920_v6, 3 }
 0x12d   : > { %8041 = vmatprep.mubr.msk.bf16.mxu0 %vm10548_vm5, %v3843_v23  ;;  %v3886_v52 = vrot.slane %v3884_v54, 3  ;;  %v1768_v23 = vsel %vm1741_vm3, %v1765_v58, %v1767_v39  ;;  %v1775_v54 = vrot.slane %v9201_v40, 1  ;;  %vm10560_vm14 = vmmov %vm10541_vm0  ;;  %v3956_v6 = vshll.u32 %v9400_v18, 16 }
 0x12e   : > { %v3895_v34 = vrot.slane %v3893_v46, 3  ;;  %v3904_v57 = vrot.slane %v3902_v61, 3  ;;  %v1774_v46 = vsel %vm1741_vm3, %v1771_v2, %v1773_v17  ;;  %vm10561_vm5 = vmmov %vm10541_vm0 }
 0x12f   : > { %v3887_v8 = vor.u32 %v3886_v52, %v3883_v16  ;;  %v1776_v16 = vsel %vm1741_vm3, %v1773_v17, %v1775_v54  ;;  %v8477_v52 = vld [vmem:[#allocation2 + $0x8] sm:$0xfe]  }
 0x130   : > { %v3896_v24 = vor.u32 %v3895_v34, %v3892_v59  ;;  %v3905_v58 = vor.u32 %v3904_v57, %v3901_v1  ;;  %v3931_v34 = vrot.slane %v3929_v30, 3  ;;  %v2175_v50 = vrot.slane %v8477_v52, 1  ;;  %v9532_v52 = vld [vmem:[#allocation2 + $0xa0] ss:$0 sps:$4 sm:$0x33]  }
 0x131   : > { %v3888_v51 = vsel %vm3808_vm10, %v3878_v15, %v3887_v8  ;;  %v3926_v15 = vshrl.u32 %v9371_v53, 16  ;;  %v3965_v30 = vshll.u32 %v9402_v19, 16 }
 0x133   : > { %7864 = vmatmul.mubr.msk.bf16.gmra.mrb[16].mxu1 %vm10549_vm9, %v1762_v42  ;;  %8042 = vmatmul.mubr.msk.bf16.gmra.mrb[4].mxu0 %vm10550_vm6, %v3852_v10  ;;  %v3911_v42 = vshll.u32 %v9357_v45, 16  ;;  %v1770_v10 = vsel %vm1741_vm3, %v1767_v39, %v1769_v27  ;;  %v3928_v59 = vrot.slane %v3926_v15, 2  ;;  %vm10562_vm9 = vmmov %vm10541_vm0  ;;  %v3962_v15 = vshrl.u32 %v9402_v19, 16 }
 0x134   : > { %7867 = vmatprep.mubr.msk.bf16.mxu1 %vm10551_vm12, %v1764_v26  ;;  %8045 = vmatprep.mubr.msk.bf16.mxu0 %vm10552_vm11, %v3861_v63  ;;  %v1772_v26 = vsel %vm1741_vm3, %v1769_v27, %v1771_v2  ;;  %v3897_v63 = vsel %vm3808_vm10, %v3887_v8, %v3896_v24  ;;  %vm10563_vm6 = vmmov %vm10541_vm0  ;;  %v3935_v27 = vshrl.u32 %v9384_v11, 16  ;;  %v3938_v8 = vshll.u32 %v9384_v11, 16 }
 0x135   : > { %v3913_v3 = vrot.slane %v3911_v42, 3  ;;  %v3932_v2 = vor.u32 %v3931_v34, %v3928_v59  ;;  %v8479_v42 = vld [vmem:[#allocation2 + $0x18] sm:$0xff]   ;;  %vm10564_vm12 = vmmov %vm10541_vm0  ;;  %v3964_v59 = vrot.slane %v3962_v15, 2  ;;  %v3967_v34 = vrot.slane %v3965_v30, 3  ;;  %v8485_v15 = vld [vmem:[#allocation2 + $0x48] sm:$0xff]  }
 0x136   : > { %v3940_v1 = vrot.slane %v3938_v8, 3  ;;  %vm10565_vm11 = vmmov %vm10541_vm0  ;;  %v2178_v17 = vrot.slane %v8479_v42, 1 }
 0x137   : > { %v3914_v39 = vor.u32 %v3913_v3, %v3910_v56  ;;  %v3949_v3 = vrot.slane %v3947_v60, 3  ;;  %v4249_v60 = vld [vmem:[#allocation2 + $0x10] sm:$0x8] }
 0x13b   : > { %7868 = vmatmul.mubr.msk.bf16.gmra.mrb[20].mxu1 %vm10553_vm2, %v1766_v38  ;;  %8046 = vmatmul.mubr.msk.bf16.gmra.mrb[8].mxu0 %vm10554_vm1, %v3870_v13  ;;  %v3906_v38 = vsel %vm3808_vm10, %v3896_v24, %v3905_v58  ;;  %v3919_v13 = vrot.slane %v3917_v33, 2  ;;  %v3944_v24 = vshrl.u32 %v9388_v0, 16  ;;  %vm10566_vm2 = vmmov %vm10541_vm0  ;;  %v3953_v33 = vshrl.u32 %v9400_v18, 16 }
 0x13c   : > { %7871 = vmatprep.mubr.msk.bf16.mxu1 %vm10541_vm0, %v1768_v23  ;;  %8049 = vmatprep.mubr.msk.bf16.mxu0 %vm10555_vm7, %v3879_v37  ;;  %v8478_v23 = vld [vmem:[#allocation2 + $0x10] sm:$0xff]   ;;  %v3915_v37 = vsel %vm3808_vm10, %v3905_v58, %v3914_v39  ;;  %vm10567_vm1 = vmmov %vm10541_vm0 }
 0x13d   : > { %v3923_v40 = vor.u32 %v3922_v36, %v3919_v13  ;;  %v2176_v61 = vrot.slane %v8478_v23, 1  ;;  %v3946_v56 = vrot.slane %v3944_v24, 2  ;;  %v3955_v36 = vrot.slane %v3953_v33, 2  ;;  %vm10568_vm7 = vmmov %vm10541_vm0 }
 0x13e   : > { %v3968_v24 = vor.u32 %v3967_v34, %v3964_v59  ;;  %v8489_v34 = vld [vmem:[#allocation2 + $0x60] sm:$0xff]  }
 0x13f   : > { %v2177_v57 = vsel %vm1741_vm3, %v2175_v50, %v2176_v61  ;;  %v3971_v50 = vshrl.u32 %v9532_v52, 16 }
 0x143   : > { %7872 = vmatmul.mubr.msk.bf16.gmra.mrb[24].mxu1 %vm10556_vm15, %v1770_v10  ;;  %8050 = vmatmul.mubr.msk.bf16.gmra.mrb[12].mxu0 %vm10557_vm4, %v3888_v51  ;;  %v3924_v10 = vsel %vm3808_vm10, %v3914_v39, %v3923_v40  ;;  %v3937_v51 = vrot.slane %v3935_v27, 2  ;;  %vm10569_vm15 = vmmov %vm10541_vm0 }
 0x144   : > { %7875 = vmatprep.mubr.msk.bf16.mxu1 %vm10558_vm13, %v1772_v26  ;;  %8053 = vmatprep.mubr.msk.bf16.mxu0 %vm10559_vm8, %v3897_v63  ;;  %v8480_v26 = vld [vmem:[#allocation2 + $0x20] sm:$0xff]   ;;  %v3933_v63 = vsel %vm3808_vm10, %v3923_v40, %v3932_v2  ;;  %vm10570_vm4 = vmmov %vm10541_vm0 }
 0x145   : > { %v3941_v58 = vor.u32 %v3940_v1, %v3937_v51  ;;  %v2180_v39 = vrot.slane %v8480_v26, 1  ;;  %v3973_v1 = vrot.slane %v3971_v50, 2  ;;  %vm10571_vm13 = vmmov %vm10541_vm0 }
 0x146   : > { %vm10572_vm8 = vmmov %vm10541_vm0 }
 0x147   : > { %v3942_v13 = vsel %vm3808_vm10, %v3932_v2, %v3941_v58  ;;  %v2181_v23 = vsel %vm1741_vm3, %v2178_v17, %v2180_v39 }
 0x14b   : > { %7876 = vmatmul.mubr.msk.bf16.gmra.mrb[28].mxu1 %vm10560_vm14, %v1774_v46  ;;  %8054 = vmatmul.mubr.msk.bf16.gmra.mrb[16].mxu0 %vm10561_vm5, %v3906_v38  ;;  %v3950_v46 = vor.u32 %v3949_v3, %v3946_v56  ;;  %v8481_v38 = vld [vmem:[#allocation2 + $0x28] sm:$0xff]   ;;  %v7400_v56 = vcombine.low %v4249_v60, %v9258_v35  ;;  %vm10573_vm14 = vmmov %vm10541_vm0  ;;  %v8492_v60 = vld [vmem:[#allocation2 + $0x70] sm:$0xff]  }
 0x14c   : > { %7879 = vmatprep.mubr.msk.bf16.mxu1 %vm10562_vm9, %v1776_v16  ;;  %8057 = vmatprep.mubr.msk.bf16.mxu0 %vm10563_vm6, %v3915_v37  ;;  %v3958_v16 = vrot.slane %v3956_v6, 3  ;;  %v8482_v37 = vld [vmem:[#allocation2 + $0x30] sm:$0xff]   ;;  %v2182_v27 = vrot.slane %v8481_v38, 1  ;;  %vm10574_vm5 = vmmov %vm10541_vm0  ;;  %v4257_v6 = vrot.slane %v9267_v12, 3  ;;  %vm4255_vm9 = vcmask 1044480  }
 0x14d   : > { %v3951_v40 = vsel %vm3808_vm10, %v3941_v58, %v3950_v46  ;;  %v2184_v2 = vrot.slane %v8482_v37, 1  ;;  %v4256_v33 = vrot.slane %v7400_v56, 3  ;;  %vm10575_vm6 = vmmov %vm10541_vm0  ;;  %v2190_v38 = vrot.slane %v8485_v15, 1  ;;  %v8496_v15 = vld [vmem:[#allocation2 + $0x90] sm:$0xff]  }
 0x14e   : > { %v3959_v8 = vor.u32 %v3958_v16, %v3955_v36  ;;  %v2183_v42 = vsel %vm1741_vm3, %v2180_v39, %v2182_v27  ;;  %v4259_v12 = vrot.slane %v9283_v14, 3  ;;  %v4261_v36 = vrot.slane %v9286_v48, 3 }
 0x14f   : > { %v2185_v26 = vsel %vm1741_vm3, %v2182_v27, %v2184_v2  ;;  %v4263_v48 = vrot.slane %v9301_v43, 3  ;;  %v2196_v27 = vrot.slane %v8489_v34, 1  ;;  %v2730_v34 = vshrl.u32 %v9196_v44, 16 }
 0x150   : > { %v3960_v51 = vsel %vm3808_vm10, %v3950_v46, %v3959_v8  ;;  %v8486_v46 = vld [vmem:[#allocation2 + $0x50] sm:$0xff]   ;;  %v4260_v37 = vsel %vm4255_vm9, %v4257_v6, %v4259_v12 }
 0x153   : > { %7880 = vmatmul.mubr.msk.bf16.gmra.mrb[32].mxu1 %vm10564_vm12, %v1775_v54  ;;  %8058 = vmatmul.mubr.msk.bf16.gmra.mrb[20].mxu0 %vm10565_vm11, %v3924_v10  ;;  %v2179_v54 = vsel %vm1741_vm3, %v2176_v61, %v2178_v17  ;;  %v3974_v61 = vshll.u32 %v9532_v52, 16  ;;  %v8483_v10 = vld [vmem:[#allocation2 + $0x38] sm:$0xff]   ;;  %vm10576_vm12 = vmmov %vm10541_vm0 }
 0x154   : > { %7885 = vmatprep.mubr.msk.bf16.mxu1 %vm10566_vm2, %v2177_v57  ;;  %8061 = vmatprep.mubr.msk.bf16.mxu0 %vm10567_vm1, %v3933_v63  ;;  %v3969_v63 = vsel %vm3808_vm10, %v3959_v8, %v3968_v24  ;;  %v2186_v3 = vrot.slane %v8483_v10, 1  ;;  %vm10577_vm11 = vmmov %vm10541_vm0  ;;  %v4265_v8 = vrot.slane %v9305_v32, 3  ;;  %v4267_v32 = vrot.slane %v9326_v9, 3 }
 0x155   : > { %v3976_v57 = vrot.slane %v3974_v61, 3  ;;  %vm10578_vm2 = vmmov %vm10541_vm0  ;;  %v8490_v61 = vld [vmem:[#allocation2 + $0x68] sm:$0xff]   ;;  %v2200_v10 = vrot.slane %v8492_v60, 1  ;;  %v2748_v60 = vshrl.u32 %v9220_v25, 16 }
 0x156   : > { %v2187_v39 = vsel %vm1741_vm3, %v2184_v2, %v2186_v3  ;;  %vm10580_vm1 = vmmov %vm10541_vm0  ;;  %v4264_v2 = vsel %vm4255_vm9, %v4261_v36, %v4263_v48  ;;  %v2198_v43 = vrot.slane %v8490_v61, 1  ;;  %v2732_v61 = vrot.slane %v2730_v34, 1 }
 0x157   : > { %v3977_v17 = vor.u32 %v3976_v57, %v3973_v1  ;;  %v8493_v57 = vld [vmem:[#allocation2 + $0x78] sm:$0xff]  }
 0x158   : > { %v2199_v1 = vsel %vm1741_vm3, %v2196_v27, %v2198_v43  ;;  %v2202_v9 = vrot.slane %v8493_v57, 1 }
 0x159   : > { %v3978_v35 = vsel %vm3808_vm10, %v3968_v24, %v3977_v17  ;;  %vm10579_vm10 = vmmov %vm10541_vm0  ;;  %v4273_v17 = vrot.slane %v9343_v28, 3  ;;  %v4275_v28 = vrot.slane %v9354_v31, 3  ;;  %v2724_v31 = vshll.u32 %v9192_v20, 16 }
 0x15b   : > { %7886 = vmatmul.mubr.msk.bf16.vlgmr.msra.gmra.mrb[0].mxu1 %vm10541_vm0, %v2179_v54  ;;  %8062 = vmatmul.mubr.msk.bf16.gmra.mrb[24].mxu0 %vm10568_vm7, %v3942_v13  ;;  %v4258_v54 = vsel %vm4255_vm9, %v4256_v33, %v4257_v6  ;;  %v2192_v13 = vrot.slane %v8486_v46, 1  ;;  %vm10581_vm7 = vmmov %vm10541_vm0  ;;  %v8495_v33 = vld [vmem:[#allocation2 + $0x88] sm:$0xff]   ;;  %v2712_v46 = vshrl.u32 %v9179_v47, 16 }
 0x15c   : > { %7889 = vmatprep.mubr.msk.bf16.mxu1 %vm10569_vm15, %v2181_v23  ;;  %8112 = vmatpush3.bf16.msra.mxu1 %v8563_v4  ;;  %v8484_v4 = vld [vmem:[#allocation2 + $0x40] sm:$0xff]   ;;  %v8487_v23 = vld [vmem:[#allocation2 + $0x58] sm:$0xff]   ;;  %vm10582_vm15 = vmmov %vm10541_vm0 }
 0x15d   : > { %8065 = vmatprep.mubr.msk.bf16.mxu0 %vm10570_vm4, %v3951_v40  ;;  %v2188_v58 = vrot.slane %v8484_v4, 1  ;;  %v2193_v59 = vsel %vm1741_vm3, %v2190_v38, %v2192_v13  ;;  %v4262_v40 = vsel %vm4255_vm9, %v4259_v12, %v4261_v36  ;;  %v2194_v14 = vrot.slane %v8487_v23, 1  ;;  %vm10583_vm4 = vmmov %vm10541_vm0 }
 0x15e   : > { %v2201_v4 = vsel %vm1741_vm3, %v2198_v43, %v2200_v10  ;;  %v4285_v43 = vrot.slane %v9388_v0, 3  ;;  %v2760_v0 = vshll.u32 %v9230_v49, 16 }
 0x15f   : > { %v2189_v30 = vsel %vm1741_vm3, %v2186_v3, %v2188_v58  ;;  %v2191_v16 = vsel %vm1741_vm3, %v2188_v58, %v2190_v38  ;;  %v2195_v50 = vsel %vm1741_vm3, %v2192_v13, %v2194_v14  ;;  %v2197_v24 = vsel %vm1741_vm3, %v2194_v14, %v2196_v27 }
 0x160   : > { %v2203_v58 = vsel %vm1741_vm3, %v2200_v10, %v2202_v9  ;;  %v4277_v38 = vrot.slane %v9357_v45, 3  ;;  %v4276_v13 = vsel %vm4255_vm9, %v4273_v17, %v4275_v28  ;;  %v4279_v45 = vrot.slane %v9368_v21, 3 }
 0x161   : > { %v4281_v14 = vrot.slane %v9371_v53, 3  ;;  %v2726_v27 = vrot.slane %v2724_v31, 2  ;;  %v2739_v21 = vshrl.u32 %v9215_v55, 16  ;;  %v2742_v53 = vshll.u32 %v9215_v55, 16 }
 0x162   : > { %v2750_v55 = vrot.slane %v2748_v60, 1 }
 0x163   : > { %7890 = vmatmul.mubr.msk.bf16.gmra.mrb[4].mxu1 %vm10571_vm13, %v2183_v42  ;;  %8066 = vmatmul.mubr.msk.bf16.gmra.mrb[28].mxu0 %vm10572_vm8, %v3960_v51  ;;  %v4266_v42 = vsel %vm4255_vm9, %v4263_v48, %v4265_v8  ;;  %vm10584_vm13 = vmmov %vm10541_vm0  ;;  %v4269_v51 = vrot.slane %v9329_v7, 3  ;;  %v4271_v7 = vrot.slane %v9340_v22, 3  ;;  %v2206_v22 = vrot.slane %v8495_v33, 1 }
 0x164   : > { %7893 = vmatprep.mubr.msk.bf16.mxu1 %vm10573_vm14, %v2185_v26  ;;  %8069 = vmatprep.mubr.msk.bf16.mxu0 %vm10574_vm5, %v3969_v63  ;;  %vm10585_vm8 = vmmov %vm10541_vm0  ;;  %v4268_v26 = vsel %vm4255_vm9, %v4265_v8, %v4267_v32  ;;  %v8494_v63 = vld [vmem:[#allocation2 + $0x80] sm:$0xff]   ;;  %v4280_v8 = vsel %vm4255_vm9, %v4277_v38, %v4279_v45  ;;  %v2741_v10 = vrot.slane %v2739_v21, 1  ;;  %v2762_v33 = vrot.slane %v2760_v0, 2 }
 0x165   : > { %v4270_v56 = vsel %vm4255_vm9, %v4267_v32, %v4269_v51  ;;  %vm10586_vm14 = vmmov %vm10541_vm0  ;;  %v2204_v3 = vrot.slane %v8494_v63, 1  ;;  %v4272_v6 = vsel %vm4255_vm9, %v4269_v51, %v4271_v7  ;;  %v2744_v51 = vrot.slane %v2742_v53, 2 }
 0x166   : > { %vm10587_vm5 = vmmov %vm10541_vm0  ;;  %v4287_v63 = vrot.slane %v9400_v18, 3  ;;  %v4291_v18 = vrot.slane %v9532_v52, 3 }
 0x167   : > { %v2207_v12 = vsel %vm1741_vm3, %v2204_v3, %v2206_v22 }
 0x16b   : > { %7894 = vmatmul.mubr.msk.bf16.gmra.mrb[8].mxu1 %vm10575_vm6, %v2187_v39  ;;  %8070 = vmatmul.mubr.msk.bf16.gmra.mrb[32].mxu0 %vm10576_vm12, %v3978_v35  ;;  %vm10588_vm6 = vmmov %vm10541_vm0  ;;  %v2205_v39 = vsel %vm1741_vm3, %v2202_v9, %v2204_v3  ;;  %v4274_v35 = vsel %vm4255_vm9, %v4271_v7, %v4273_v17  ;;  %v2766_v9 = vshrl.u32 %v9236_v29, 16  ;;  %v2769_v7 = vshll.u32 %v9236_v29, 16 }
 0x16c   : > { %7897 = vmatprep.mubr.msk.bf16.mxu1 %vm10577_vm11, %v2189_v30  ;;  %8075 = vmatprep.mubr.msk.bf16.mxu0 %vm10578_vm2, %v4258_v54  ;;  %vm10589_vm12 = vmmov %vm10541_vm0  ;;  %v2208_v30 = vrot.slane %v8496_v15, 1  ;;  %v2715_v54 = vshll.u32 %v9179_v47, 16  ;;  %v2721_v47 = vshrl.u32 %v9192_v20, 16  ;;  %v4289_v3 = vrot.slane %v9402_v19, 3 }
 0x16d   : > { %vm10590_vm11 = vmmov %vm10541_vm0  ;;  %v2771_v15 = vrot.slane %v2769_v7, 2 }
 0x16e   : > { %vm10591_vm2 = vmmov %vm10541_vm0  ;;  %v2209_v36 = vsel %vm1741_vm3, %v2206_v22, %v2208_v30  ;;  %v2717_v23 = vrot.slane %v2715_v54, 2  ;;  %v2723_v48 = vrot.slane %v2721_v47, 1  ;;  %vm10597_vm3 = vsmask.f32 6400 }
 0x16f   : > { %v8519_v47 = vmov 1983009808  }
 0x170   : > { %v4603_v31 = vunpack.c.l.s4 %v8519_v47 }
 0x173   : > { %7898 = vmatmul.mubr.msk.bf16.gmra.mrb[12].mxu1 %vm10579_vm10, %v2191_v16  ;;  %8076 = vmatmul.mubr.msk.bf16.vlgmr.msra.gmra.mrb[0].mxu0 %vm10580_vm1, %v4260_v37  ;;  %vm10592_vm10 = vmmov %vm10541_vm0  ;;  %v2714_v16 = vrot.slane %v2712_v46, 1  ;;  %v4278_v37 = vsel %vm4255_vm9, %v4275_v28, %v4277_v38  ;;  %v2775_v28 = vshll.u32 %v9261_v62, 16 }
 0x174   : > { %7901 = vmatprep.mubr.msk.bf16.mxu1 %vm10541_vm0, %v2193_v59  ;;  %8079 = vmatprep.mubr.msk.bf16.mxu0 %vm10581_vm7, %v4262_v40  ;;  %vm10593_vm1 = vmmov %vm10541_vm0  ;;  %v2733_v40 = vshll.u32 %v9196_v44, 16  ;;  %v2727_v44 = vor.u32 %v2726_v27, %v2723_v48 }
 0x175   : > { %vm10594_vm7 = vmmov %vm10541_vm0  ;;  %v2718_v59 = vor.u32 %v2717_v23, %v2714_v16  ;;  %v2777_v54 = vrot.slane %v2775_v28, 2 }
 0x176   : > { %v2735_v20 = vrot.slane %v2733_v40, 2  ;;  %v4604_v40 = vunpack.c.0.s8 %v4603_v31 }
 0x178   : > { %v9682_v48 = vsub.s32 %v4604_v40, %v8568_v5 }
 0x17b   : > { %7902 = vmatmul.mubr.msk.bf16.gmra.mrb[16].mxu1 %vm10582_vm15, %v2195_v50  ;;  %8080 = vmatmul.mubr.msk.bf16.gmra.mrb[4].mxu0 %vm10583_vm4, %v4264_v2  ;;  %vm10595_vm15 = vmmov %vm10541_vm0  ;;  %v2719_v50 = vsel %vm10597_vm3, %v9068_v41, %v2718_v59  ;;  %v4282_v2 = vsel %vm4255_vm9, %v4279_v45, %v4281_v14  ;;  %v2736_v41 = vor.u32 %v2735_v20, %v2732_v61 }
 0x17c   : > { %7905 = vmatprep.mubr.msk.bf16.mxu1 %vm10584_vm13, %v2197_v24  ;;  %8083 = vmatprep.mubr.msk.bf16.mxu0 %vm10585_vm8, %v4266_v42  ;;  %vm10596_vm4 = vmmov %vm10541_vm0  ;;  %v4283_v24 = vrot.slane %v9384_v11, 3  ;;  %v2751_v42 = vshll.u32 %v9220_v25, 16  ;;  %v2745_v25 = vor.u32 %v2744_v51, %v2741_v10  ;;  %v2757_v11 = vshrl.u32 %v9230_v49, 16 }
 0x17d   : > { %vm10598_vm13 = vmmov %vm10541_vm0  ;;  %v2768_v49 = vrot.slane %v2766_v9, 1 }
 0x17e   : > { %vm10599_vm8 = vmmov %vm10541_vm0 }
 0x17f   : > { %v2772_v19 = vor.u32 %v2771_v15, %v2768_v49 }
 0x183   : > { %7906 = vmatmul.mubr.msk.bf16.gmra.mrb[20].mxu1 %vm10586_vm14, %v2199_v1  ;;  %8084 = vmatmul.mubr.msk.bf16.gmra.mrb[8].mxu0 %vm10587_vm5, %v4268_v26  ;;  %vm10600_vm14 = vmmov %vm10541_vm0  ;;  %v4284_v1 = vsel %vm4255_vm9, %v4281_v14, %v4283_v24  ;;  %v2753_v26 = vrot.slane %v2751_v42, 2 }
 0x184   : > { %7909 = vmatprep.mubr.msk.bf16.mxu1 %vm10588_vm6, %v2201_v4  ;;  %8087 = vmatprep.mubr.msk.bf16.mxu0 %vm10589_vm12, %v4270_v56  ;;  %vm10601_vm5 = vmmov %vm10541_vm0  ;;  %v4286_v4 = vsel %vm4255_vm9, %v4283_v24, %v4285_v43 }
 0x185   : > { %vm10602_vm6 = vmmov %vm10597_vm3  ;;  %v2754_v56 = vor.u32 %v2753_v26, %v2750_v55 }
 0x186   : > { %v2728_v32 = vsel %vm10602_vm6, %v2718_v59, %v2727_v44  ;;  %vm10603_vm12 = vmmov %vm10597_vm3 }
 0x187   : > { %v2737_v57 = vsel %vm10603_vm12, %v2727_v44, %v2736_v41 }
 0x18b   : > { %7910 = vmatmul.mubr.msk.bf16.gmra.mrb[24].mxu1 %vm10590_vm11, %v2203_v58  ;;  %8088 = vmatmul.mubr.msk.bf16.gmra.mrb[12].mxu0 %vm10591_vm2, %v4272_v6  ;;  %vm10604_vm11 = vmmov %vm10541_vm0  ;;  %v2759_v58 = vrot.slane %v2757_v11, 1  ;;  %v4288_v6 = vsel %vm4255_vm9, %v4285_v43, %v4287_v63 }
 0x18c   : > { %7913 = vmatprep.mubr.msk.bf16.mxu1 %vm10592_vm10, %v2205_v39  ;;  %8091 = vmatprep.mubr.msk.bf16.mxu0 %vm10593_vm1, %v4274_v35  ;;  %vm10605_vm2 = vmmov %vm10541_vm0  ;;  %v4290_v35 = vsel %vm4255_vm9, %v4287_v63, %v4289_v3 }
 0x18d   : > { %vm10606_vm10 = vmmov %vm10541_vm0  ;;  %v2763_v29 = vor.u32 %v2762_v33, %v2759_v58 }
 0x18e   : > { %vm10607_vm1 = vmmov %vm10541_vm0 }
 0x18f   : > { %vm10617_vm6 = vmmov %vm10607_vm1 }
 0x190   : > { %vm10618_vm12 = vmmov %vm10607_vm1 }
 0x193   : > { %7914 = vmatmul.mubr.msk.bf16.gmra.mrb[28].mxu1 %vm10541_vm0, %v2207_v12  ;;  %8092 = vmatmul.mubr.msk.bf16.gmra.mrb[16].mxu0 %vm10594_vm7, %v4276_v13  ;;  %vm10608_vm0 = vmmov %vm10597_vm3 }
 0x194   : > { %7917 = vmatprep.mubr.msk.bf16.mxu1 %vm10595_vm15, %v2209_v36  ;;  %8095 = vmatprep.mubr.msk.bf16.mxu0 %vm10596_vm4, %v4278_v37  ;;  %v2746_v17 = vsel %vm10608_vm0, %v2736_v41, %v2745_v25  ;;  %vm10609_vm7 = vmmov %vm10608_vm0 }
 0x195   : > { %v2755_v39 = vsel %vm10609_vm7, %v2745_v25, %v2754_v56  ;;  %vm10610_vm15 = vmmov %vm10607_vm1 }
 0x196   : > { %vm10611_vm4 = vmmov %vm10607_vm1 }
 0x197   : > { %vm10612_vm3 = vmmov %vm10607_vm1 }
 0x19b   : > { %7918 = vmatmul.mubr.msk.bf16.gmra.mrb[32].mxu1 %vm10598_vm13, %v2208_v30  ;;  %8096 = vmatmul.mubr.msk.bf16.gmra.mrb[20].mxu0 %vm10599_vm8, %v4280_v8  ;;  %vm10613_vm13 = vmmov %vm10607_vm1  ;;  %v4292_v30 = vsel %vm4255_vm9, %v4289_v3, %v4291_v18 }
 0x19c   : > { %7943 = vmatprep.mubr.msk.bf16.mxu1 %vm10600_vm14, %v2719_v50  ;;  %8099 = vmatprep.mubr.msk.bf16.mxu0 %vm10601_vm5, %v4282_v2  ;;  %vm10614_vm8 = vmmov %vm10608_vm0 }
 0x19d   : > { %v2764_v22 = vsel %vm10614_vm8, %v2754_v56, %v2763_v29  ;;  %vm10615_vm14 = vmmov %vm10608_vm0 }
 0x19e   : > { %v2773_v46 = vsel %vm10615_vm14, %v2763_v29, %v2772_v19  ;;  %vm10616_vm5 = vmmov %vm10607_vm1 }
 0x19f   : > { %vm10621_vm9 = vmmov %vm10607_vm1 }
 0x1a3   : > { %7944 = vmatmul.mubr.msk.bf16.vlgmr.msra.gmra.mrb[20].mxu1 %vm10604_vm11, %v2728_v32  ;;  %8100 = vmatmul.mubr.msk.bf16.gmra.mrb[24].mxu0 %vm10605_vm2, %v4284_v1  ;;  %vm10619_vm11 = vmmov %vm10608_vm0 }
 0x1a4   : > { %7947 = vmatprep.mubr.msk.bf16.mxu1 %vm10606_vm10, %v2737_v57  ;;  %8103 = vmatprep.mubr.msk.bf16.mxu0 %vm10607_vm1, %v4286_v4  ;;  %v2778_v38 = vsel %vm10619_vm11, %v2772_v19, %v2777_v54  ;;  %vm10620_vm2 = vmmov %vm10607_vm1 }
 0x1a5   : > { %vm10622_vm10 = vmmov %vm10607_vm1  ;;  %vm10623_vm1 = vcmask 60416  }
 0x1a6   : > { %vm10624_vm0 = vmmov %vm10620_vm2 }
 0x1a7   : > { %vm10625_vm7 = vmmov %vm10623_vm1 }
 0x1a8   : > { %vm10630_vm8 = vmmov %vm10624_vm0 }
 0x1a9   : > { %vm10631_vm14 = vmmov %vm10623_vm1 }
 0x1aa   : > { %vm10635_vm11 = vmmov %vm10623_vm1 }
 0x1ab   : > { %7948 = vmatmul.mubr.msk.bf16.gmra.mrb[24].mxu1 %vm10610_vm15, %v2746_v17  ;;  %8104 = vmatmul.mubr.msk.bf16.gmra.mrb[28].mxu0 %vm10611_vm4, %v4288_v6  ;;  %vm10626_vm15 = vmmov %vm10624_vm0 }
 0x1ac   : > { %7951 = vmatprep.mubr.msk.bf16.mxu1 %vm10612_vm3, %v2755_v39  ;;  %8107 = vmatprep.mubr.msk.bf16.mxu0 %vm10613_vm13, %v4290_v35  ;;  %vm10627_vm4 = vmmov %vm10624_vm0 }
 0x1ad   : > { %vm10628_vm3 = vmmov %vm10623_vm1 }
 0x1ae   : > { %vm10629_vm13 = vmmov %vm10624_vm0 }
 0x1b3   : > { %7952 = vmatmul.mubr.msk.bf16.gmra.mrb[28].mxu1 %vm10616_vm5, %v2764_v22  ;;  %8108 = vmatmul.mubr.msk.bf16.gmra.mrb[32].mxu0 %vm10617_vm6, %v4292_v30  ;;  %vm10632_vm5 = vmmov %vm10624_vm0 }
 0x1b4   : > { %7955 = vmatprep.mubr.msk.bf16.mxu1 %vm10618_vm12, %v2773_v46  ;;  %vm10633_vm6 = vmmov %vm10624_vm0 }
 0x1b5   : > { %vm10634_vm12 = vmmov %vm10624_vm0 }
 0x1bb   : > { %7956 = vmatmul.mubr.msk.bf16.gmra.mrb[32].mxu1 %vm10620_vm2, %v2778_v38  ;;  %vm10636_vm2 = vmmov %vm10624_vm0 }
 0x22e   : > { %v7887_v52 = vpop.f32.mrb[0].mxu1 }
 0x22f   : > { %v2301_v12 = vpop.f32.mrb[1].mxu1 }
 0x230   : > { %v7888_v13 = vpop.f32.mrb[2].mxu1 }
 0x231   : > { %v2304_v36 = vpop.f32.mrb[3].mxu1 }
 0x236   : > { %v9665_v62 = vpop.f32.mrb[4].mxu1 }
 0x237   : > { %v9667_v16 = vpop.f32.mrb[5].mxu1 }
 0x238   : > { %v9669_v23 = vpop.f32.mrb[6].mxu1 }
 0x239   : > { %v9671_v37 = vpop.f32.mrb[7].mxu1 }
 0x23e   : > { %v9673_v45 = vpop.f32.mrb[8].mxu1 }
 0x23f   : > { %v9675_v59 = vpop.f32.mrb[9].mxu1 }
 0x240   : > { %v9677_v34 = vpop.f32.mrb[10].mxu1 }
 0x241   : > { %v9679_v14 = vpop.f32.mrb[11].mxu1 }
 0x246   : > { %v9684_v27 = vpop.f32.mrb[12].mxu1  ;;  %v8077_v8 = vpop.f32.mrb[0].mxu0 }
 0x247   : > { %v9686_v50 = vpop.f32.mrb[13].mxu1  ;;  %v8113_v61 = vadd.f32 %v8077_v8, %v7887_v52  ;;  %v4384_v20 = vpop.f32.mrb[1].mxu0 }
 0x248   : > { %v9688_v2 = vpop.f32.mrb[14].mxu1  ;;  %v8114_v44 = vadd.f32 %v4384_v20, %v2301_v12  ;;  %v8078_v21 = vpop.f32.mrb[2].mxu0 }
 0x249   : > { %v9690_v53 = vpop.f32.mrb[15].mxu1  ;;  %v4635_v24 = vcombine.high %v8113_v61, %v8113_v61  ;;  %v4642_v41 = vrot.slane %v8113_v61, %v9682_v48  ;;  %v8115_v60 = vadd.f32 %v8078_v21, %v7888_v13  ;;  %v4387_v42 = vpop.f32.mrb[3].mxu0 }
 0x24a   : > { %v4601_v5 = vcombine.high %v8114_v44, %v8114_v44  ;;  %v4608_v43 = vrot.slane %v8114_v44, %v9682_v48  ;;  %v8116_v32 = vadd.f32 %v4387_v42, %v2304_v36 }
 0x24b   : > { %v4649_v10 = vrot.slane %v4635_v24, %v9682_v48  ;;  %v4650_v51 = vcombine.high %v4642_v41, %v4642_v41  ;;  %v4652_v1 = vcombine.high %v8115_v60, %v8115_v60  ;;  %v4659_v57 = vrot.slane %v8115_v60, %v9682_v48 }
 0x24c   : > { %v4615_v55 = vrot.slane %v4601_v5, %v9682_v48  ;;  %v4616_v26 = vcombine.high %v4608_v43, %v4608_v43  ;;  %v6138_v4 = vmul.f32 %v4608_v43, %v4608_v43  ;;  %v4618_v25 = vcombine.high %v8116_v32, %v8116_v32 }
 0x24d   : > { %v5367_v11 = vcombine.low %v4650_v51, %v4649_v10  ;;  %v6146_v0 = vmul.f32 %v4650_v51, %v4650_v51  ;;  %v6147_v63 = vmul.f32 %v4649_v10, %v4649_v10  ;;  %v4651_v56 = vcombine.high %v4649_v10, %v4649_v10 }
 0x24e   : > { %v9697_v9 = vpop.f32.mrb[16].mxu1  ;;  %v4617_v7 = vcombine.high %v4615_v55, %v4615_v55  ;;  %v5333_v3 = vcombine.low %v4608_v43, %v4616_v26  ;;  %v6139_v17 = vmul.f32 %v4616_v26, %v4616_v26  ;;  %v6140_v58 = vmul.f32 %v4615_v55, %v4615_v55  ;;  %v8081_v33 = vpop.f32.mrb[4].mxu0 }
 0x24f   : > { %v9699_v6 = vpop.f32.mrb[17].mxu1  ;;  %v5375_v39 = vrot.slane %v5367_v11, %v9682_v48  ;;  %v6428_v49 = vcombine.low %v6146_v0, %v6147_v63  ;;  %v9703_v15 = vrot.slane %v4652_v1, %v9682_v48  ;;  %v9705_v35 = vcombine.high %v4659_v57, %v4659_v57  ;;  %v4400_v29 = vpop.f32.mrb[5].mxu0 }
 0x250   : > { %v9707_v18 = vpop.f32.mrb[18].mxu1  ;;  %v5334_v19 = vcombine.low %v4615_v55, %v4617_v7  ;;  %v5341_v22 = vrot.slane %v5333_v3, %v9682_v48  ;;  %v6141_v28 = vmul.f32 %v4617_v7, %v4617_v7  ;;  %v6394_v30 = vcombine.low %v6138_v4, %v6139_v17  ;;  %v9710_v46 = vpop.f32.mrb[6].mxu0 }
 0x251   : > { %v9712_v54 = vpop.f32.mrb[19].mxu1  ;;  %v6436_v38 = vrot.slane %v6428_v49, %v9682_v48  ;;  %v5368_v52 = vcombine.low %v4651_v56, %v4659_v57  ;;  %v5384_v12 = vcombine.low %v9705_v35, %v9703_v15  ;;  %v6148_v13 = vmul.f32 %v4651_v56, %v4651_v56  ;;  %v9717_v36 = vpop.f32.mrb[7].mxu0 }
 0x252   : > { %v5348_v47 = vrot.slane %v5334_v19, %v9682_v48  ;;  %v6395_v31 = vcombine.low %v6140_v58, %v6141_v28  ;;  %v6402_v40 = vrot.slane %v6394_v30, %v9682_v48  ;;  %v6149_v8 = vmul.f32 %v4659_v57, %v4659_v57 }
 0x253   : > { %v5382_v61 = vrot.slane %v5368_v52, %v9682_v48  ;;  %v9724_v20 = vmul.f32 %v9705_v35, %v9705_v35  ;;  %v9728_v44 = vmul.f32 %v9703_v15, %v9703_v15  ;;  %v4625_v21 = vrot.slane %v8116_v32, %v9682_v48 }
 0x254   : > { %v5349_v24 = vcombine.low %v5341_v22, %v5348_v47  ;;  %v6409_v41 = vrot.slane %v6395_v31, %v9682_v48  ;;  %v6429_v60 = vcombine.low %v6148_v13, %v6149_v8  ;;  %v4632_v42 = vrot.slane %v4618_v25, %v9682_v48 }
 0x255   : > { %v5383_v5 = vcombine.low %v5375_v39, %v5382_v61  ;;  %v6445_v43 = vcombine.low %v9724_v20, %v9728_v44  ;;  %v4633_v10 = vcombine.high %v4625_v21, %v4625_v21  ;;  %v6142_v51 = vmul.f32 %v4625_v21, %v4625_v21 }
 0x256   : > { %v7487_v32 = vpack.c.bf16 %v5349_v24, %v5349_v24  ;;  %v6069_v1 = vsel %vm10621_vm9, %v5349_v24, 0.0  ;;  %v6410_v57 = vcombine.low %v6402_v40, %v6409_v41  ;;  %v6443_v55 = vrot.slane %v6429_v60, %v9682_v48  ;;  %v9744_v26 = vpop.f32.mrb[8].mxu0  ;;  %vm10637_vm9 = vmmov %vm10623_vm1 }
 0x257   : > { %v7489_v4 = vpack.c.bf16 %v5383_v5, %v5383_v5  ;;  %v6072_v25 = vsel %vm10622_vm10, %v5383_v5, 0.0  ;;  %v4634_v11 = vcombine.high %v4632_v42, %v4632_v42  ;;  %v5350_v0 = vcombine.low %v4625_v21, %v4633_v10  ;;  %v9747_v63 = vpop.f32.mrb[9].mxu0  ;;  %vm10638_vm10 = vmmov %vm10624_vm0 }
 0x258   : > { %6037 = vst.msk [vmem:[%s9738_s24] sm:$0xf] %vm10623_vm1, %v7487_v32  ;;  %v6970_v56 = vsel %vm10624_vm0, %v6410_v57, 0.0  ;;  %v6444_v7 = vcombine.low %v6436_v38, %v6443_v55  ;;  %v6143_v3 = vmul.f32 %v4633_v10, %v4633_v10  ;;  %v6144_v17 = vmul.f32 %v4632_v42, %v4632_v42  ;;  %v9752_v58 = vpop.f32.mrb[10].mxu0  ;;  %vm10639_vm1 = vmmov %vm10624_vm0 }
 0x259   : > { %6039 = vst.msk [vmem:[%s9738_s24 + $0x8] sm:$0xf] %vm10625_vm7, %v7489_v4  ;;  %v5351_v39 = vcombine.low %v4632_v42, %v4634_v11  ;;  %v5358_v49 = vrot.slane %v5350_v0, %v9682_v48  ;;  %v6145_v35 = vmul.f32 %v4634_v11, %v4634_v11  ;;  %v8117_v19 = vadd.f32 %v8081_v33, %v9665_v62  ;;  %v9758_v22 = vpop.f32.mrb[11].mxu0  ;;  %vm10640_vm0 = vmmov %vm10628_vm3 }
 0x25a   : > { %v6973_v28 = vsel %vm10626_vm15, %v6444_v7, 0.0  ;;  %v6411_v30 = vcombine.low %v6142_v51, %v6143_v3  ;;  %v8118_v52 = vadd.f32 %v4400_v29, %v9667_v16  ;;  %v4668_v38 = vcombine.high %v9703_v15, %v9703_v15  ;;  %vm10641_vm7 = vmmov %vm10639_vm1 }
 0x25b   : > { %v5365_v13 = vrot.slane %v5351_v39, %v9682_v48  ;;  %v6412_v47 = vcombine.low %v6144_v17, %v6145_v35  ;;  %v4702_v31 = vcombine.high %v8117_v19, %v8117_v19  ;;  %v4709_v40 = vrot.slane %v8117_v19, %v9682_v48  ;;  %vm10642_vm15 = vmmov %vm10639_vm1 }
 0x25c   : > { %v6419_v8 = vrot.slane %v6411_v30, %v9682_v48  ;;  %v4669_v61 = vcombine.high %v8118_v52, %v8118_v52  ;;  %v4676_v62 = vrot.slane %v8118_v52, %v9682_v48  ;;  %v5392_v33 = vrot.slane %v5384_v12, %v9682_v48 }
 0x25d   : > { %v5366_v21 = vcombine.low %v5358_v49, %v5365_v13  ;;  %v6426_v24 = vrot.slane %v6412_v47, %v9682_v48  ;;  %v4716_v16 = vrot.slane %v4702_v31, %v9682_v48  ;;  %v4717_v29 = vcombine.high %v4709_v40, %v4709_v40 }
 0x25e   : > { %v6160_v15 = vmul.f32 %v4709_v40, %v4709_v40  ;;  %v4683_v41 = vrot.slane %v4669_v61, %v9682_v48  ;;  %v5385_v60 = vcombine.low %v4668_v38, %v4676_v62  ;;  %v6152_v42 = vmul.f32 %v4668_v38, %v4668_v38  ;;  %v9772_v5 = vpop.f32.mrb[12].mxu0 }
 0x25f   : > { %v7488_v10 = vpack.c.bf16 %v5366_v21, %v5366_v21  ;;  %v6070_v51 = vsel %vm10627_vm4, %v5366_v21, 0.0  ;;  %v6427_v32 = vcombine.low %v6419_v8, %v6426_v24  ;;  %v4718_v57 = vcombine.high %v4716_v16, %v4716_v16  ;;  %v9775_v12 = vpop.f32.mrb[13].mxu0  ;;  %vm10643_vm4 = vmmov %vm10640_vm0 }
 0x260   : > { %v6071_v55 = vadd.f32 %v6070_v51, %v6069_v1  ;;  %v5419_v4 = vcombine.low %v4709_v40, %v4717_v29  ;;  %v6161_v11 = vmul.f32 %v4717_v29, %v4717_v29  ;;  %v4684_v0 = vcombine.high %v4683_v41, %v4683_v41  ;;  %v9777_v7 = vpop.f32.mrb[14].mxu0 }
 0x261   : > { %6038 = vst.msk [vmem:[%s9738_s24 + $0x4] sm:$0xf] %vm10628_vm3, %v7488_v10  ;;  %v6971_v3 = vsel %vm10629_vm13, %v6427_v32, 0.0  ;;  %v9782_v17 = vmul.f32 %v4718_v57, %v4718_v57  ;;  %v5399_v39 = vrot.slane %v5385_v60, %v9682_v48  ;;  %v6153_v49 = vmul.f32 %v4676_v62, %v4676_v62  ;;  %v9785_v35 = vpop.f32.mrb[15].mxu0  ;;  %vm10645_vm3 = vmmov %vm10639_vm1 }
 0x262   : > { %v6972_v19 = vadd.f32 %v6971_v3, %v6970_v56  ;;  %v9788_v30 = vrot.slane %v5419_v4, %v9682_v48  ;;  %v6480_v1 = vcombine.low %v6160_v15, %v6161_v11  ;;  %v5401_v52 = vcombine.low %v4683_v41, %v4684_v0  ;;  %vm10648_vm13 = vmmov %vm10639_vm1 }
 0x263   : > { %v5400_v38 = vcombine.low %v5392_v33, %v5399_v39  ;;  %v6073_v13 = vadd.f32 %v6072_v25, %v6071_v55  ;;  %v6154_v47 = vmul.f32 %v4683_v41, %v4683_v41  ;;  %v6155_v31 = vmul.f32 %v4684_v0, %v4684_v0 }
 0x264   : > { %v9791_v40 = vrot.slane %v6480_v1, %v9682_v48  ;;  %v5409_v8 = vrot.slane %v5401_v52, %v9682_v48  ;;  %v6446_v61 = vcombine.low %v6152_v42, %v6153_v49  ;;  %v6453_v56 = vrot.slane %v6445_v43, %v9682_v48 }
 0x265   : > { %v7490_v62 = vpack.c.bf16 %v5400_v38, %v5400_v38  ;;  %v6074_v21 = vsel %vm10630_vm8, %v5400_v38, 0.0  ;;  %v6462_v24 = vcombine.low %v6154_v47, %v6155_v31  ;;  %v6974_v33 = vadd.f32 %v6973_v28, %v6972_v19  ;;  %vm10649_vm8 = vmmov %vm10640_vm0 }
 0x266   : > { %v9799_v25 = vadd.f32 %v6074_v21, %v6073_v13  ;;  %v6460_v16 = vrot.slane %v6446_v61, %v9682_v48  ;;  %v8119_v29 = vadd.f32 %v9710_v46, %v9669_v23  ;;  %v8120_v15 = vadd.f32 %v9717_v36, %v9671_v37  ;;  %v9806_v41 = vpop.f32.mrb[16].mxu0 }
 0x267   : > { %6040 = vst.msk [vmem:[%s9738_s24 + $0xc] sm:$0xf] %vm10631_vm14, %v7490_v62  ;;  %v9811_v20 = vrot.slane %v6462_v24, %v9682_v48  ;;  %v8121_v44 = vadd.f32 %v9744_v26, %v9673_v45  ;;  %v9817_v43 = vadd.f32 %v9747_v63, %v9675_v59  ;;  %v9821_v23 = vadd.f32 %v9752_v58, %v9677_v34  ;;  %v9823_v46 = vpop.f32.mrb[17].mxu0  ;;  %vm10650_vm14 = vmmov %vm10639_vm1 }
 0x268   : > { %v6461_v37 = vcombine.low %v6453_v56, %v6460_v16  ;;  %v4719_v36 = vcombine.high %v8119_v29, %v8119_v29  ;;  %v4726_v28 = vrot.slane %v8119_v29, %v9682_v48  ;;  %v4685_v60 = vcombine.high %v8120_v15, %v8120_v15  ;;  %v9826_v42 = vpop.f32.mrb[18].mxu0 }
 0x269   : > { %v4692_v10 = vrot.slane %v8120_v15, %v9682_v48  ;;  %v4769_v45 = vcombine.high %v8121_v44, %v8121_v44  ;;  %v9830_v26 = vrot.slane %v8121_v44, %v9682_v48  ;;  %v4736_v59 = vcombine.high %v9817_v43, %v9817_v43  ;;  %v9834_v34 = vpop.f32.mrb[19].mxu0 }
 0x26a   : > { %v6975_v63 = vsel %vm10632_vm5, %v6461_v37, 0.0  ;;  %v9838_v58 = vrot.slane %v4719_v36, %v9682_v48  ;;  %v4734_v51 = vcombine.high %v4726_v28, %v4726_v28  ;;  %v5435_v32 = vcombine.low %v4718_v57, %v4726_v28  ;;  %vm10657_vm5 = vmmov %vm10639_vm1 }
 0x26b   : > { %v6976_v55 = vadd.f32 %v6975_v63, %v6974_v33  ;;  %v6163_v4 = vmul.f32 %v4726_v28, %v4726_v28  ;;  %v4699_v11 = vrot.slane %v4685_v60, %v9682_v48  ;;  %v4700_v0 = vcombine.high %v4692_v10, %v4692_v10 }
 0x26c   : > { %v5436_v3 = vcombine.low %v4734_v51, %v9838_v58  ;;  %v5443_v39 = vrot.slane %v5435_v32, %v9682_v48  ;;  %v6164_v49 = vmul.f32 %v4734_v51, %v4734_v51  ;;  %v6165_v19 = vmul.f32 %v9838_v58, %v9838_v58 }
 0x26d   : > { %v6496_v1 = vcombine.low %v9782_v17, %v6163_v4  ;;  %v4701_v52 = vcombine.high %v4699_v11, %v4699_v11  ;;  %v5402_v38 = vcombine.low %v4692_v10, %v4700_v0  ;;  %v6156_v13 = vmul.f32 %v4692_v10, %v4692_v10 }
 0x26e   : > { %v5450_v57 = vrot.slane %v5436_v3, %v9682_v48  ;;  %v6497_v47 = vcombine.low %v6164_v49, %v6165_v19  ;;  %v6157_v31 = vmul.f32 %v4700_v0, %v4700_v0  ;;  %v6158_v61 = vmul.f32 %v4699_v11, %v4699_v11  ;;  %v9847_v56 = vpop.f32.mrb[20].mxu0 }
 0x26f   : > { %v6504_v62 = vrot.slane %v6496_v1, %v9682_v48  ;;  %v5416_v21 = vrot.slane %v5402_v38, %v9682_v48  ;;  %v5418_v24 = vcombine.low %v4699_v11, %v4701_v52  ;;  %v6159_v33 = vmul.f32 %v4701_v52, %v4701_v52  ;;  %v9851_v16 = vpop.f32.mrb[21].mxu0 }
 0x270   : > { %v5451_v29 = vcombine.low %v5443_v39, %v5450_v57  ;;  %v6511_v17 = vrot.slane %v6497_v47, %v9682_v48  ;;  %v6463_v15 = vcombine.low %v6156_v13, %v6157_v31  ;;  %v4783_v44 = vrot.slane %v4769_v45, %v9682_v48  ;;  %v9855_v37 = vpop.f32.mrb[22].mxu0 }
 0x271   : > { %v5417_v36 = vcombine.low %v5409_v8, %v5416_v21  ;;  %v5426_v28 = vrot.slane %v5418_v24, %v9682_v48  ;;  %v6479_v60 = vcombine.low %v6158_v61, %v6159_v33  ;;  %v4784_v10 = vcombine.high %v9830_v26, %v9830_v26  ;;  %v9860_v63 = vpop.f32.mrb[23].mxu0 }
 0x272   : > { %v7493_v51 = vpack.c.bf16 %v5451_v29, %v5451_v29  ;;  %v6080_v32 = vsel %vm10633_vm6, %v5451_v29, 0.0  ;;  %v6512_v4 = vcombine.low %v6504_v62, %v6511_v17  ;;  %v6477_v11 = vrot.slane %v6463_v15, %v9682_v48  ;;  %vm10658_vm6 = vmmov %vm10640_vm0 }
 0x273   : > { %v5434_v45 = vcombine.low %v5426_v28, %v9788_v30  ;;  %v7491_v0 = vpack.c.bf16 %v5417_v36, %v5417_v36  ;;  %v6076_v8 = vsel %vm10634_vm12, %v5417_v36, 0.0  ;;  %v6487_v3 = vrot.slane %v6479_v60, %v9682_v48  ;;  %vm10659_vm12 = vmmov %vm10639_vm1 }
 0x274   : > { %6043 = vst.msk [vmem:[%s9738_s24 + $0x18] sm:$0xf] %vm10635_vm11, %v7493_v51  ;;  %v6981_v39 = vsel %vm10636_vm2, %v6512_v4, 0.0  ;;  %v6077_v49 = vadd.f32 %v6076_v8, %v9799_v25  ;;  %v6478_v19 = vcombine.low %v9811_v20, %v6477_v11  ;;  %v4785_v1 = vcombine.high %v4783_v44, %v4783_v44  ;;  %vm10661_vm11 = vmmov %vm10639_vm1 }
 0x275   : > { %v7492_v52 = vpack.c.bf16 %v5434_v45, %v5434_v45  ;;  %6041 = vst.msk [vmem:[%s9738_s24 + $0x10] sm:$0xf] %vm10637_vm9, %v7491_v0  ;;  %v6078_v30 = vsel %vm10638_vm10, %v5434_v45, 0.0  ;;  %v6495_v38 = vcombine.low %v6487_v3, %v9791_v40  ;;  %v5486_v13 = vcombine.low %v9830_v26, %v4784_v10  ;;  %vm10662_vm2 = vmmov %vm10640_vm0 }
 0x276   : > { %v6079_v57 = vadd.f32 %v6078_v30, %v6077_v49  ;;  %v6977_v47 = vsel %vm10639_vm1, %v6478_v19, 0.0  ;;  %v5487_v31 = vcombine.low %v4783_v44, %v4785_v1  ;;  %v6174_v61 = vmul.f32 %v9830_v26, %v9830_v26  ;;  %v9880_v25 = vpop.f32.mrb[20].mxu1  ;;  %v9882_v20 = vpop.f32.mrb[24].mxu0  ;;  %vm10663_vm9 = vmmov %vm10639_vm1 }
 0x277   : > { %6042 = vst.msk [vmem:[%s9738_s24 + $0x14] sm:$0xf] %vm10640_vm0, %v7492_v52  ;;  %v6978_v62 = vadd.f32 %v6977_v47, %v6976_v55  ;;  %v6979_v21 = vsel %vm10641_vm7, %v6495_v38, 0.0  ;;  %v5494_v40 = vrot.slane %v5486_v13, %v9682_v48  ;;  %v6175_v24 = vmul.f32 %v4784_v10, %v4784_v10  ;;  %v9888_v33 = vpop.f32.mrb[21].mxu1  ;;  %v9890_v29 = vpop.f32.mrb[25].mxu0  ;;  %vm10664_vm10 = vmmov %vm10639_vm1 }
 0x278   : > { %v5501_v17 = vrot.slane %v5487_v31, %v9682_v48  ;;  %v6176_v15 = vmul.f32 %v4783_v44, %v4783_v44  ;;  %v6177_v26 = vmul.f32 %v4785_v1, %v4785_v1  ;;  %v4735_v36 = vcombine.high %v9838_v58, %v9838_v58  ;;  %v9895_v28 = vpop.f32.mrb[22].mxu1  ;;  %v9897_v60 = vpop.f32.mrb[26].mxu0  ;;  %vm10665_vm7 = vmmov %vm10639_vm1 }
 0x279   : > { %v6980_v55 = vadd.f32 %v6979_v21, %v6978_v62  ;;  %v6547_v51 = vcombine.low %v6174_v61, %v6175_v24  ;;  %v4743_v10 = vrot.slane %v9817_v43, %v9682_v48  ;;  %v4750_v4 = vrot.slane %v4736_v59, %v9682_v48  ;;  %v9905_v11 = vpop.f32.mrb[23].mxu1  ;;  %v9907_v44 = vpop.f32.mrb[27].mxu0 }
 0x27a   : > { %v5502_v45 = vcombine.low %v5494_v40, %v5501_v17  ;;  %v6548_v58 = vcombine.low %v6176_v15, %v6177_v26  ;;  %v6081_v0 = vadd.f32 %v6080_v32, %v6079_v57  ;;  %v6166_v8 = vmul.f32 %v4735_v36, %v4735_v36 }
 0x27b   : > { %v6555_v3 = vrot.slane %v6547_v51, %v9682_v48  ;;  %v4751_v49 = vcombine.high %v4743_v10, %v4743_v10  ;;  %v5452_v19 = vcombine.low %v4735_v36, %v4743_v10  ;;  %v6167_v1 = vmul.f32 %v4743_v10, %v4743_v10 }
 0x27c   : > { %v7496_v52 = vpack.c.bf16 %v5502_v45, %v5502_v45  ;;  %v9911_v30 = vsel %vm10642_vm15, %v5502_v45, 0.0  ;;  %v6562_v43 = vrot.slane %v6548_v58, %v9682_v48  ;;  %v6169_v59 = vmul.f32 %v4750_v4, %v4750_v4  ;;  %vm10666_vm15 = vmmov %vm10640_vm0 }
 0x27d   : > { %v5453_v38 = vcombine.low %v4751_v49, %v4750_v4  ;;  %v5460_v13 = vrot.slane %v5452_v19, %v9682_v48  ;;  %v6168_v47 = vmul.f32 %v4751_v49, %v4751_v49  ;;  %v6513_v31 = vcombine.low %v6166_v8, %v6167_v1 }
 0x27e   : > { %6046 = vst.msk [vmem:[%s9738_s24 + $0x24] sm:$0xf] %vm10643_vm4, %v7496_v52  ;;  %v6563_v32 = vcombine.low %v6555_v3, %v6562_v43  ;;  %v6982_v57 = vadd.f32 %v6981_v39, %v6980_v55  ;;  %v4786_v61 = vcombine.high %v9821_v23, %v9821_v23  ;;  %v4793_v62 = vrot.slane %v9821_v23, %v9682_v48  ;;  %v9921_v21 = vpop.f32.mrb[24].mxu1  ;;  %v9923_v40 = vpop.f32.mrb[28].mxu0  ;;  %vm10667_vm4 = vmmov %vm10639_vm1 }
 0x27f   : > { %v5467_v24 = vrot.slane %v5453_v38, %v9682_v48  ;;  %v6514_v17 = vcombine.low %v6168_v47, %v6169_v59  ;;  %v6521_v15 = vrot.slane %v6513_v31, %v9682_v48  ;;  %v8124_v26 = vadd.f32 %v9758_v22, %v9679_v14  ;;  %v9929_v36 = vpop.f32.mrb[25].mxu1  ;;  %v9931_v39 = vpop.f32.mrb[29].mxu0 }
 0x280   : > { %10644 = vst [vmem:[#allocation3_spill] sm:$0xff] %v9931_v39  ;;  %v9934_v55 = vsel %vm10645_vm3, %v6563_v32, 0.0  ;;  %v4800_v23 = vrot.slane %v4786_v61, %v9682_v48  ;;  %v4801_v51 = vcombine.high %v4793_v62, %v4793_v62  ;;  %v8125_v10 = vadd.f32 %v9772_v5, %v9684_v27  ;;  %v9939_v4 = vpop.f32.mrb[26].mxu1  ;;  %v9941_v45 = vpop.f32.mrb[30].mxu0  ;;  %vm10668_vm3 = vmmov %vm10639_vm1 }
 0x281   : > { %10646 = vst [vmem:[#allocation4_spill] sm:$0xff] %v9941_v45  ;;  %v5468_v58 = vcombine.low %v5460_v13, %v5467_v24  ;;  %v6528_v14 = vrot.slane %v6514_v17, %v9682_v48  ;;  %v4752_v22 = vcombine.high %v8124_v26, %v8124_v26  ;;  %v4759_v8 = vrot.slane %v8124_v26, %v9682_v48  ;;  %v9945_v3 = vpop.f32.mrb[27].mxu1  ;;  %v9947_v49 = vpop.f32.mrb[31].mxu0 }
 0x282   : > { %10647 = vst [vmem:[#allocation5_spill] sm:$0xff] %v9947_v49  ;;  %v5503_v19 = vcombine.low %v4801_v51, %v4800_v23  ;;  %v6178_v1 = vmul.f32 %v4801_v51, %v4801_v51  ;;  %v6179_v52 = vmul.f32 %v4800_v23, %v4800_v23  ;;  %v4836_v43 = vcombine.high %v8125_v10, %v8125_v10 }
 0x283   : > { %v7494_v27 = vpack.c.bf16 %v5468_v58, %v5468_v58  ;;  %v6082_v5 = vsel %vm10648_vm13, %v5468_v58, 0.0  ;;  %v6529_v59 = vcombine.low %v6521_v15, %v6528_v14  ;;  %v4766_v38 = vrot.slane %v4752_v22, %v9682_v48  ;;  %vm10669_vm13 = vmmov %vm10640_vm0 }
 0x284   : > { %v6083_v13 = vadd.f32 %v6082_v5, %v6081_v0  ;;  %v9952_v47 = vrot.slane %v5503_v19, %v9682_v48  ;;  %v6564_v31 = vcombine.low %v6178_v1, %v6179_v52  ;;  %v4767_v32 = vcombine.high %v4759_v8, %v4759_v8 }
 0x285   : > { %6044 = vst.msk [vmem:[%s9738_s24 + $0x1c] sm:$0xf] %vm10649_vm8, %v7494_v27  ;;  %v6983_v61 = vsel %vm10650_vm14, %v6529_v59, 0.0  ;;  %v4768_v62 = vcombine.high %v4766_v38, %v4766_v38  ;;  %v6170_v24 = vmul.f32 %v4759_v8, %v4759_v8  ;;  %v6172_v17 = vmul.f32 %v4766_v38, %v4766_v38  ;;  %vm10670_vm8 = vmmov %vm10639_vm1 }
 0x286   : > { %v6984_v26 = vadd.f32 %v6983_v61, %v6982_v57  ;;  %v9958_v51 = vrot.slane %v6564_v31, %v9682_v48  ;;  %v5469_v15 = vcombine.low %v4759_v8, %v4767_v32  ;;  %v6171_v58 = vmul.f32 %v4767_v32, %v4767_v32  ;;  %v9960_v14 = vpop.f32.mrb[28].mxu1  ;;  %v9962_v0 = vpop.f32.mrb[32].mxu0  ;;  %vm10671_vm14 = vmmov %vm10639_vm1 }
 0x287   : > { %10651 = vst [vmem:[#allocation6_spill] sm:$0xff] %v9962_v0  ;;  %v5470_v22 = vcombine.low %v4766_v38, %v4768_v62  ;;  %v6173_v19 = vmul.f32 %v4768_v62, %v4768_v62  ;;  %v4843_v1 = vrot.slane %v8125_v10, %v9682_v48  ;;  %v4850_v52 = vrot.slane %v4836_v43, %v9682_v48  ;;  %v9966_v27 = vpop.f32.mrb[29].mxu1  ;;  %v9968_v5 = vpop.f32.mrb[33].mxu0 }
 0x288   : > { %10652 = vst [vmem:[#allocation7_spill] sm:$0xff] %v9968_v5  ;;  %v5477_v57 = vrot.slane %v5469_v15, %v9682_v48  ;;  %v6530_v59 = vcombine.low %v6170_v24, %v6171_v58  ;;  %v8126_v8 = vadd.f32 %v9775_v12, %v9686_v50  ;;  %v4802_v31 = vcombine.high %v4800_v23, %v4800_v23  ;;  %v9973_v32 = vpop.f32.mrb[30].mxu1  ;;  %v9975_v61 = vpop.f32.mrb[34].mxu0 }
 0x289   : > { %10653 = vst [vmem:[#allocation8_spill] sm:$0xff] %v9973_v32  ;;  %10654 = vst [vmem:[#allocation9_spill] sm:$0xff] %v9975_v61  ;;  %v5484_v38 = vrot.slane %v5470_v22, %v9682_v48  ;;  %v6531_v10 = vcombine.low %v6172_v17, %v6173_v19  ;;  %v4851_v62 = vcombine.high %v4843_v1, %v4843_v1  ;;  %v9978_v0 = vpop.f32.mrb[31].mxu1  ;;  %v9980_v49 = vpop.f32.mrb[35].mxu0 }
 0x28a   : > { %v4852_v43 = vcombine.high %v4850_v52, %v4850_v52  ;;  %10655 = vst [vmem:[#allocation10_spill] sm:$0xff] %v9978_v0  ;;  %10656 = vst [vmem:[#allocation11_spill] sm:$0xff] %v9980_v49  ;;  %v6538_v15 = vrot.slane %v6530_v59, %v9682_v48  ;;  %v6188_v24 = vmul.f32 %v4843_v1, %v4843_v1 }
 0x28b   : > { %v6190_v58 = vmul.f32 %v4850_v52, %v4850_v52  ;;  %v4803_v5 = vcombine.high %v8126_v8, %v8126_v8  ;;  %v5485_v50 = vcombine.low %v5477_v57, %v5484_v38  ;;  %v6545_v12 = vrot.slane %v6531_v10, %v9682_v48 }
 0x28c   : > { %v5538_v23 = vcombine.low %v4843_v1, %v4851_v62  ;;  %v5554_v61 = vcombine.low %v4850_v52, %v4852_v43  ;;  %v6189_v45 = vmul.f32 %v4851_v62, %v4851_v62  ;;  %v6191_v22 = vmul.f32 %v4852_v43, %v4852_v43 }
 0x28d   : > { %v4810_v17 = vrot.slane %v8126_v8, %v9682_v48  ;;  %v4817_v19 = vrot.slane %v4803_v5, %v9682_v48  ;;  %v7495_v0 = vpack.c.bf16 %v5485_v50, %v5485_v50  ;;  %v6084_v49 = vsel %vm10657_vm5, %v5485_v50, 0.0  ;;  %vm10672_vm5 = vmmov %vm10640_vm0 }
 0x28e   : > { %v6546_v32 = vcombine.low %v6538_v15, %v6545_v12  ;;  %v9988_v59 = vrot.slane %v5538_v23, %v9682_v48  ;;  %v6085_v39 = vadd.f32 %v6084_v49, %v6083_v13  ;;  %v5562_v57 = vrot.slane %v5554_v61, %v9682_v48  ;;  %v9991_v1 = vpop.f32.mrb[32].mxu1 }
 0x28f   : > { %v6599_v38 = vcombine.low %v6188_v24, %v6189_v45  ;;  %v6615_v10 = vcombine.low %v6190_v58, %v6191_v22  ;;  %6045 = vst.msk [vmem:[%s9738_s24 + $0x20] sm:$0xf] %vm10658_vm6, %v7495_v0  ;;  %v4818_v8 = vcombine.high %v4810_v17, %v4810_v17  ;;  %v5504_v5 = vcombine.low %v4802_v31, %v4810_v17  ;;  %v9996_v43 = vpop.f32.mrb[33].mxu1  ;;  %vm10673_vm6 = vmmov %vm10640_vm0 }
 0x290   : > { %v6985_v52 = vsel %vm10659_vm12, %v6546_v32, 0.0  ;;  %v6180_v62 = vmul.f32 %v4802_v31, %v4802_v31  ;;  %v6181_v45 = vmul.f32 %v4810_v17, %v4810_v17  ;;  %v10004_v13 = vpop.f32.mrb[34].mxu1  ;;  %v6183_v32 = vmul.f32 %v4817_v19, %v4817_v19  ;;  %vm10674_vm12 = vmmov %vm10639_vm1 }
 0x291   : > { %v6986_v15 = vadd.f32 %v6985_v52, %v6984_v26  ;;  %v9999_v50 = vrot.slane %v6599_v38, %v9682_v48  ;;  %v10002_v49 = vrot.slane %v6615_v10, %v9682_v48  ;;  %v5518_v61 = vrot.slane %v5504_v5, %v9682_v48  ;;  %v10007_v58 = vpop.f32.mrb[35].mxu1 }
 0x292   : > { %v5520_v0 = vcombine.low %v4818_v8, %v4817_v19  ;;  %v6182_v24 = vmul.f32 %v4818_v8, %v4818_v8  ;;  %10660 = vst [vmem:[#allocation12_spill] sm:$0xff] %v10007_v58  ;;  %v6565_v31 = vcombine.low %v6180_v62, %v6181_v45  ;;  %v8127_v26 = vadd.f32 %v9777_v7, %v9688_v2 }
 0x293   : > { %v8128_v12 = vadd.f32 %v9785_v35, %v9690_v53  ;;  %v4819_v23 = vcombine.high %v4817_v19, %v4817_v19  ;;  %v5519_v22 = vcombine.low %v9952_v47, %v5518_v61  ;;  %v6087_v10 = vadd.f32 %v9911_v30, %v6085_v39 }
 0x294   : > { %v6581_v17 = vcombine.low %v6182_v24, %v6183_v32  ;;  %v5528_v38 = vrot.slane %v5520_v0, %v9682_v48  ;;  %v6579_v52 = vrot.slane %v6565_v31, %v9682_v48  ;;  %v4853_v8 = vcombine.high %v8127_v26, %v8127_v26 }
 0x295   : > { %v4860_v5 = vrot.slane %v8127_v26, %v9682_v48  ;;  %v4820_v62 = vcombine.high %v8128_v12, %v8128_v12  ;;  %v7497_v45 = vpack.c.bf16 %v5519_v22, %v5519_v22  ;;  %v6088_v2 = vsel %vm10661_vm11, %v5519_v22, 0.0  ;;  %vm10675_vm11 = vmmov %vm10639_vm1 }
 0x296   : > { %v4827_v53 = vrot.slane %v8128_v12, %v9682_v48  ;;  %v6184_v7 = vmul.f32 %v4819_v23, %v4819_v23  ;;  %v6580_v35 = vcombine.low %v9958_v51, %v6579_v52  ;;  %v4867_v47 = vrot.slane %v4853_v8, %v9682_v48 }
 0x297   : > { %v4868_v19 = vcombine.high %v4860_v5, %v4860_v5  ;;  %v6192_v61 = vmul.f32 %v4860_v5, %v4860_v5  ;;  %6047 = vst.msk [vmem:[%s9738_s24 + $0x28] sm:$0xf] %vm10662_vm2, %v7497_v45  ;;  %v4834_v30 = vrot.slane %v4820_v62, %v9682_v48  ;;  %v6089_v0 = vadd.f32 %v6088_v2, %v6087_v10  ;;  %vm10676_vm2 = vmmov %vm10639_vm1 }
 0x298   : > { %v5521_v39 = vcombine.low %v4819_v23, %v4827_v53  ;;  %v6185_v24 = vmul.f32 %v4827_v53, %v4827_v53  ;;  %v6989_v32 = vsel %vm10663_vm9, %v6580_v35, 0.0  ;;  %v10026_v31 = vcombine.high %v4867_v47, %v4867_v47  ;;  %vm10677_vm9 = vmmov %vm10640_vm0 }
 0x299   : > { %v5555_v26 = vcombine.low %v4860_v5, %v4868_v19  ;;  %v6193_v12 = vmul.f32 %v4868_v19, %v4868_v19  ;;  %v4835_v22 = vcombine.high %v4834_v30, %v4834_v30  ;;  %v6186_v52 = vmul.f32 %v4834_v30, %v4834_v30 }
 0x29a   : > { %v5535_v51 = vrot.slane %v5521_v39, %v9682_v48  ;;  %v6582_v8 = vcombine.low %v6184_v7, %v6185_v24  ;;  %v10032_v45 = vmul.f32 %v10026_v31, %v10026_v31  ;;  %v6589_v10 = vrot.slane %v6581_v17, %v9682_v48 }
 0x29b   : > { %v5569_v58 = vrot.slane %v5555_v26, %v9682_v48  ;;  %v6616_v23 = vcombine.low %v6192_v61, %v6193_v12  ;;  %v5537_v2 = vcombine.low %v4834_v30, %v4835_v22  ;;  %v6187_v53 = vmul.f32 %v4835_v22, %v4835_v22 }
 0x29c   : > { %v5536_v62 = vcombine.low %v5528_v38, %v5535_v51  ;;  %v6596_v5 = vrot.slane %v6582_v8, %v9682_v48  ;;  %v6988_v7 = vadd.f32 %v9934_v55, %v6986_v15  ;;  %v8129_v19 = vadd.f32 %v9806_v41, %v9697_v9 }
 0x29d   : > { %v5570_v35 = vcombine.low %v5562_v57, %v5569_v58  ;;  %v6630_v47 = vrot.slane %v6616_v23, %v9682_v48  ;;  %v5545_v39 = vrot.slane %v5537_v2, %v9682_v48  ;;  %v6598_v55 = vcombine.low %v6186_v52, %v6187_v53 }
 0x29e   : > { %v7498_v61 = vpack.c.bf16 %v5536_v62, %v5536_v62  ;;  %v6090_v17 = vsel %vm10664_vm10, %v5536_v62, 0.0  ;;  %v6597_v38 = vcombine.low %v6589_v10, %v6596_v5  ;;  %v6990_v15 = vadd.f32 %v6989_v32, %v6988_v7  ;;  %vm10678_vm10 = vmmov %vm10639_vm1 }
 0x29f   : > { %v7500_v30 = vpack.c.bf16 %v5570_v35, %v5570_v35  ;;  %v6094_v24 = vsel %vm10639_vm1, %v5570_v35, 0.0  ;;  %v6631_v26 = vcombine.low %v10002_v49, %v6630_v47  ;;  %v6091_v57 = vadd.f32 %v6090_v17, %v6089_v0 }
 0x2a0   : > { %v5553_v58 = vcombine.low %v5545_v39, %v9988_v59  ;;  %6048 = vst.msk [vmem:[%s9738_s24 + $0x2c] sm:$0xf] %vm10640_vm0, %v7498_v61  ;;  %v6991_v9 = vsel %vm10665_vm7, %v6597_v38, 0.0  ;;  %v4903_v12 = vcombine.high %v8129_v19, %v8129_v19  ;;  %v4910_v22 = vrot.slane %v8129_v19, %v9682_v48  ;;  %vm10679_vm7 = vmmov %vm10639_vm1 }
 0x2a1   : > { %6050 = vst.msk [vmem:[%s9738_s24 + $0x34] sm:$0xf] %vm10666_vm15, %v7500_v30  ;;  %v6995_v41 = vsel %vm10667_vm4, %v6631_v26, 0.0  ;;  %v8130_v49 = vadd.f32 %v9823_v46, %v9699_v6  ;;  %v6606_v51 = vrot.slane %v6598_v55, %v9682_v48  ;;  %v6992_v52 = vadd.f32 %v6991_v9, %v6990_v15  ;;  %vm10680_vm15 = vmmov %vm10639_vm1 }
 0x2a2   : > { %v7499_v0 = vpack.c.bf16 %v5553_v58, %v5553_v58  ;;  %v6092_v59 = vsel %vm10668_vm3, %v5553_v58, 0.0  ;;  %v4917_v32 = vrot.slane %v4903_v12, %v9682_v48  ;;  %v4918_v23 = vcombine.high %v4910_v22, %v4910_v22  ;;  %vm10681_vm4 = vmmov %vm10639_vm1 }
 0x2a3   : > { %v6093_v8 = vadd.f32 %v6092_v59, %v6091_v57  ;;  %v6202_v10 = vmul.f32 %v4910_v22, %v4910_v22  ;;  %v6614_v62 = vcombine.low %v6606_v51, %v9999_v50  ;;  %v4870_v2 = vcombine.high %v8130_v49, %v8130_v49  ;;  %vm10682_vm3 = vmmov %vm10640_vm0 }
 0x2a4   : > { %6049 = vst.msk [vmem:[%s9738_s24 + $0x30] sm:$0xf] %vm10669_vm13, %v7499_v0  ;;  %v4877_v53 = vrot.slane %v8130_v49, %v9682_v48  ;;  %v8131_v6 = vadd.f32 %v9826_v42, %v9707_v18  ;;  %v4919_v5 = vcombine.high %v4917_v32, %v4917_v32  ;;  %v5605_v35 = vcombine.low %v4910_v22, %v4918_v23  ;;  %vm10683_vm13 = vmmov %vm10639_vm1 }
 0x2a5   : > { %v6095_v46 = vadd.f32 %v6094_v24, %v6093_v8  ;;  %v6203_v47 = vmul.f32 %v4918_v23, %v4918_v23  ;;  %v6993_v7 = vsel %vm10670_vm8, %v6614_v62, 0.0  ;;  %v6204_v19 = vmul.f32 %v4917_v32, %v4917_v32  ;;  %vm10684_vm8 = vmmov %vm10640_vm0 }
 0x2a6   : > { %v4884_v39 = vrot.slane %v4870_v2, %v9682_v48  ;;  %v4885_v61 = vcombine.high %v4877_v53, %v4877_v53  ;;  %v6994_v17 = vadd.f32 %v6993_v7, %v6992_v52  ;;  %v5606_v38 = vcombine.low %v4917_v32, %v4919_v5 }
 0x2a7   : > { %v5613_v50 = vrot.slane %v5605_v35, %v9682_v48  ;;  %v6205_v30 = vmul.f32 %v4919_v5, %v4919_v5  ;;  %v6666_v26 = vcombine.low %v6202_v10, %v6203_v47  ;;  %v5571_v57 = vcombine.low %v10026_v31, %v4877_v53 }
 0x2a8   : > { %v5572_v58 = vcombine.low %v4885_v61, %v4884_v39  ;;  %v6195_v18 = vmul.f32 %v4877_v53, %v4877_v53  ;;  %v6996_v42 = vadd.f32 %v6995_v41, %v6994_v17  ;;  %v5620_v24 = vrot.slane %v5606_v38, %v9682_v48 }
 0x2a9   : > { %v6667_v55 = vcombine.low %v6204_v19, %v6205_v30  ;;  %v6196_v15 = vmul.f32 %v4885_v61, %v4885_v61  ;;  %v6674_v9 = vrot.slane %v6666_v26, %v9682_v48  ;;  %v5579_v12 = vrot.slane %v5571_v57, %v9682_v48 }
 0x2aa   : > { %v5586_v22 = vrot.slane %v5572_v58, %v9682_v48  ;;  %v6197_v49 = vmul.f32 %v4884_v39, %v4884_v39  ;;  %v5621_v0 = vcombine.low %v5613_v50, %v5620_v24  ;;  %v6632_v31 = vcombine.low %v10032_v45, %v6195_v18 }
 0x2ab   : > { %v6681_v59 = vrot.slane %v6667_v55, %v9682_v48  ;;  %v4920_v51 = vcombine.high %v8131_v6, %v8131_v6  ;;  %v4927_v8 = vrot.slane %v8131_v6, %v9682_v48  ;;  %v8132_v32 = vadd.f32 %v9834_v34, %v9712_v54 }
 0x2ac   : > { %v5587_v41 = vcombine.low %v5579_v12, %v5586_v22  ;;  %v6633_v52 = vcombine.low %v6196_v15, %v6197_v49  ;;  %v7503_v23 = vpack.c.bf16 %v5621_v0, %v5621_v0  ;;  %v6640_v62 = vrot.slane %v6632_v31, %v9682_v48 }
 0x2ad   : > { %v6682_v10 = vcombine.low %v6674_v9, %v6681_v59  ;;  %v4934_v45 = vrot.slane %v4920_v51, %v9682_v48  ;;  %v4935_v47 = vcombine.high %v4927_v8, %v4927_v8  ;;  %v6206_v7 = vmul.f32 %v4927_v8, %v4927_v8 }
 0x2ae   : > { %v7501_v2 = vpack.c.bf16 %v5587_v41, %v5587_v41  ;;  %v6096_v53 = vsel %vm10671_vm14, %v5587_v41, 0.0  ;;  %v6647_v5 = vrot.slane %v6633_v52, %v9682_v48  ;;  %6053 = vst.msk [vmem:[%s9738_s24 + $0x40] sm:$0xf] %vm10672_vm5, %v7503_v23  ;;  %v4886_v19 = vcombine.high %v4884_v39, %v4884_v39  ;;  %vm10685_vm14 = vmmov %vm10639_vm1 }
 0x2af   : > { %v6097_v35 = vadd.f32 %v6096_v53, %v6095_v46  ;;  %v4936_v54 = vcombine.high %v4934_v45, %v4934_v45  ;;  %v6208_v34 = vmul.f32 %v4934_v45, %v4934_v45  ;;  %v5622_v61 = vcombine.low %v4927_v8, %v4935_v47  ;;  %vm10686_vm5 = vmmov %vm10639_vm1 }
 0x2b0   : > { %6051 = vst.msk [vmem:[%s9738_s24 + $0x38] sm:$0xf] %vm10673_vm6, %v7501_v2  ;;  %v6648_v6 = vcombine.low %v6640_v62, %v6647_v5  ;;  %v6207_v17 = vmul.f32 %v4935_v47, %v4935_v47  ;;  %v4887_v38 = vcombine.high %v8132_v32, %v8132_v32  ;;  %v4894_v50 = vrot.slane %v8132_v32, %v9682_v48  ;;  %vm10687_vm6 = vmmov %vm10640_vm0 }
 0x2b1   : > { %v5623_v26 = vcombine.low %v4934_v45, %v4936_v54  ;;  %v6209_v57 = vmul.f32 %v4936_v54, %v4936_v54  ;;  %v6198_v58 = vmul.f32 %v4886_v19, %v4886_v19  ;;  %v5630_v46 = vrot.slane %v5622_v61, %v9682_v48 }
 0x2b2   : > { %v6997_v30 = vsel %vm10674_vm12, %v6648_v6, 0.0  ;;  %v6683_v24 = vcombine.low %v6206_v7, %v6207_v17  ;;  %v4901_v55 = vrot.slane %v4887_v38, %v9682_v48  ;;  %v4902_v39 = vcombine.high %v4894_v50, %v4894_v50  ;;  %vm10688_vm12 = vmmov %vm10639_vm1 }
 0x2b3   : > { %v6998_v18 = vadd.f32 %v6997_v30, %v6996_v42  ;;  %v5637_v15 = vrot.slane %v5623_v26, %v9682_v48  ;;  %v6684_v9 = vcombine.low %v6208_v34, %v6209_v57  ;;  %v5588_v12 = vcombine.low %v4886_v19, %v4894_v50 }
 0x2b4   : > { %v6691_v22 = vrot.slane %v6683_v24, %v9682_v48  ;;  %v6199_v49 = vmul.f32 %v4894_v50, %v4894_v50  ;;  %v6201_v59 = vmul.f32 %v4901_v55, %v4901_v55  ;;  %v8133_v31 = vadd.f32 %v9847_v56, %v9880_v25 }
 0x2b5   : > { %v5638_v51 = vcombine.low %v5630_v46, %v5637_v15  ;;  %v6698_v42 = vrot.slane %v6684_v9, %v9682_v48  ;;  %v5589_v41 = vcombine.low %v4902_v39, %v4901_v55  ;;  %v5596_v52 = vrot.slane %v5588_v12, %v9682_v48 }
 0x2b6   : > { %v6100_v8 = vsel %vm10675_vm11, %v5621_v0, 0.0  ;;  %v6200_v32 = vmul.f32 %v4902_v39, %v4902_v39  ;;  %v6649_v23 = vcombine.low %v6198_v58, %v6199_v49  ;;  %v4971_v62 = vcombine.high %v8133_v31, %v8133_v31  ;;  %vm10689_vm11 = vmmov %vm10639_vm1 }
 0x2b7   : > { %v7001_v2 = vsel %vm10676_vm2, %v6682_v10, 0.0  ;;  %v7504_v53 = vpack.c.bf16 %v5638_v51, %v5638_v51  ;;  %v6699_v5 = vcombine.low %v6691_v22, %v6698_v42  ;;  %v5603_v45 = vrot.slane %v5589_v41, %v9682_v48  ;;  %vm10690_vm2 = vmmov %vm10639_vm1 }
 0x2b8   : > { %v6650_v47 = vcombine.low %v6200_v32, %v6201_v59  ;;  %v6657_v56 = vrot.slane %v6649_v23, %v9682_v48  ;;  %v10099_v25 = vrot.slane %v8133_v31, %v9682_v48  ;;  %v4985_v7 = vrot.slane %v4971_v62, %v9682_v48 }
 0x2b9   : > { %6054 = vst.msk [vmem:[%s9738_s24 + $0x44] sm:$0xf] %vm10677_vm9, %v7504_v53  ;;  %v6102_v0 = vsel %vm10678_vm10, %v5638_v51, 0.0  ;;  %v5604_v6 = vcombine.low %v5596_v52, %v5603_v45  ;;  %v8134_v10 = vadd.f32 %v9851_v16, %v9888_v33  ;;  %v8135_v54 = vadd.f32 %v9855_v37, %v9895_v28  ;;  %vm10691_vm9 = vmmov %vm10640_vm0 }
 0x2ba   : > { %v6664_v34 = vrot.slane %v6650_v47, %v9682_v48  ;;  %v4986_v19 = vcombine.high %v4985_v7, %v4985_v7  ;;  %v6218_v61 = vmul.f32 %v4985_v7, %v4985_v7  ;;  %v8136_v17 = vadd.f32 %v9860_v63, %v9905_v11  ;;  %vm10692_vm10 = vmmov %vm10639_vm1 }
 0x2bb   : > { %v7502_v38 = vpack.c.bf16 %v5604_v6, %v5604_v6  ;;  %v6098_v50 = vsel %vm10639_vm1, %v5604_v6, 0.0  ;;  %v4937_v30 = vcombine.high %v8134_v10, %v8134_v10  ;;  %v4944_v26 = vrot.slane %v8134_v10, %v9682_v48  ;;  %vm10693_vm1 = vmmov %vm10640_vm0 }
 0x2bc   : > { %v6099_v57 = vadd.f32 %v6098_v50, %v6097_v35  ;;  %v6665_v58 = vcombine.low %v6657_v56, %v6664_v34  ;;  %v5673_v46 = vcombine.low %v4985_v7, %v4986_v19  ;;  %v6219_v16 = vmul.f32 %v4986_v19, %v4986_v19 }
 0x2bd   : > { %6052 = vst.msk [vmem:[%s9738_s24 + $0x3c] sm:$0xf] %vm10640_vm0, %v7502_v38  ;;  %v4951_v37 = vrot.slane %v4937_v30, %v9682_v48  ;;  %v4952_v33 = vcombine.high %v4944_v26, %v4944_v26  ;;  %v4987_v28 = vcombine.high %v8135_v54, %v8135_v54  ;;  %v4994_v24 = vrot.slane %v8135_v54, %v9682_v48  ;;  %vm10695_vm0 = vmmov %vm10690_vm2 }
 0x2be   : > { %v6101_v55 = vadd.f32 %v6100_v8, %v6099_v57  ;;  %v6999_v63 = vsel %vm10679_vm7, %v6665_v58, 0.0  ;;  %v10121_v11 = vmul.f32 %v10099_v25, %v10099_v25  ;;  %v6734_v15 = vcombine.low %v6218_v61, %v6219_v16  ;;  %vm10696_vm7 = vmmov %vm10695_vm0 }
 0x2bf   : > { %v7000_v35 = vadd.f32 %v6999_v63, %v6998_v18  ;;  %v5639_v9 = vcombine.low %v4952_v33, %v4951_v37  ;;  %v6210_v39 = vmul.f32 %v4952_v33, %v4952_v33  ;;  %v6211_v12 = vmul.f32 %v4951_v37, %v4951_v37 }
 0x2c0   : > { %v7003_v22 = vsel %vm10680_vm15, %v6699_v5, 0.0  ;;  %v5681_v49 = vrot.slane %v5673_v46, %v9682_v48  ;;  %v5001_v59 = vrot.slane %v4987_v28, %v9682_v48  ;;  %v5002_v31 = vcombine.high %v4994_v24, %v4994_v24  ;;  %vm10697_vm15 = vmmov %vm10693_vm1 }
 0x2c1   : > { %v7002_v51 = vadd.f32 %v7001_v2, %v7000_v35  ;;  %v10127_v42 = vrot.slane %v6734_v15, %v9682_v48  ;;  %v6220_v41 = vmul.f32 %v4994_v24, %v4994_v24  ;;  %v4953_v52 = vcombine.high %v4951_v37, %v4951_v37 }
 0x2c2   : > { %v6700_v8 = vcombine.low %v6210_v39, %v6211_v12  ;;  %v5003_v32 = vcombine.high %v5001_v59, %v5001_v59  ;;  %v5674_v23 = vcombine.low %v4994_v24, %v5002_v31  ;;  %v6221_v18 = vmul.f32 %v5002_v31, %v5002_v31 }
 0x2c3   : > { %v5647_v62 = vrot.slane %v5639_v9, %v9682_v48  ;;  %v4954_v53 = vcombine.high %v8136_v17, %v8136_v17  ;;  %v4961_v5 = vrot.slane %v8136_v17, %v9682_v48  ;;  %v6103_v45 = vadd.f32 %v6102_v0, %v6101_v55 }
 0x2c4   : > { %v5688_v47 = vrot.slane %v5674_v23, %v9682_v48  ;;  %v5690_v56 = vcombine.low %v5001_v59, %v5003_v32  ;;  %v6223_v7 = vmul.f32 %v5003_v32, %v5003_v32  ;;  %v6735_v2 = vcombine.low %v6220_v41, %v6221_v18 }
 0x2c5   : > { %v6222_v6 = vmul.f32 %v5001_v59, %v5001_v59  ;;  %v4968_v10 = vrot.slane %v4954_v53, %v9682_v48  ;;  %v4969_v54 = vcombine.high %v4961_v5, %v4961_v5  ;;  %v5640_v34 = vcombine.low %v4953_v52, %v4961_v5 }
 0x2c6   : > { %v6708_v19 = vrot.slane %v6700_v8, %v9682_v48  ;;  %v5689_v61 = vcombine.low %v5681_v49, %v5688_v47  ;;  %v6749_v38 = vrot.slane %v6735_v2, %v9682_v48  ;;  %v6212_v50 = vmul.f32 %v4953_v52, %v4953_v52 }
 0x2c7   : > { %v10136_v17 = vrot.slane %v5690_v56, %v9682_v48  ;;  %v4970_v0 = vcombine.high %v4968_v10, %v4968_v10  ;;  %v5654_v30 = vrot.slane %v5640_v34, %v9682_v48  ;;  %v5656_v26 = vcombine.low %v4969_v54, %v4968_v10 }
 0x2c8   : > { %v7507_v57 = vpack.c.bf16 %v5689_v61, %v5689_v61  ;;  %v6750_v58 = vcombine.low %v10127_v42, %v6749_v38  ;;  %v6751_v46 = vcombine.low %v6222_v6, %v6223_v7  ;;  %v6213_v16 = vmul.f32 %v4961_v5, %v4961_v5 }
 0x2c9   : > { %v6108_v37 = vsel %vm10681_vm4, %v5689_v61, 0.0  ;;  %v5655_v33 = vcombine.low %v5647_v62, %v5654_v30  ;;  %v5657_v28 = vcombine.low %v4970_v0, %v10099_v25  ;;  %v6214_v24 = vmul.f32 %v4969_v54, %v4969_v54  ;;  %vm10698_vm4 = vmmov %vm10693_vm1 }
 0x2ca   : > { %6057 = vst.msk [vmem:[%s9738_s24 + $0x50] sm:$0xf] %vm10682_vm3, %v7507_v57  ;;  %v5664_v55 = vrot.slane %v5656_v26, %v9682_v48  ;;  %v6215_v63 = vmul.f32 %v4968_v10, %v4968_v10  ;;  %v6216_v15 = vmul.f32 %v4970_v0, %v4970_v0  ;;  %v6701_v35 = vcombine.low %v6212_v50, %v6213_v16  ;;  %vm10701_vm3 = vmmov %vm10695_vm0 }
 0x2cb   : > { %v5671_v9 = vrot.slane %v5657_v28, %v9682_v48  ;;  %v7505_v39 = vpack.c.bf16 %v5655_v33, %v5655_v33  ;;  %v6104_v12 = vsel %vm10683_vm13, %v5655_v33, 0.0  ;;  %v7004_v49 = vadd.f32 %v7003_v22, %v7002_v51  ;;  %vm10702_vm13 = vmmov %vm10695_vm0 }
 0x2cc   : > { %v6105_v59 = vadd.f32 %v6104_v12, %v6103_v45  ;;  %v6715_v31 = vrot.slane %v6701_v35, %v9682_v48  ;;  %v6717_v42 = vcombine.low %v6214_v24, %v6215_v63  ;;  %v6718_v25 = vcombine.low %v6216_v15, %v10121_v11 }
 0x2cd   : > { %v5672_v41 = vcombine.low %v5664_v55, %v5671_v9  ;;  %6055 = vst.msk [vmem:[%s9738_s24 + $0x48] sm:$0xf] %vm10684_vm8, %v7505_v39  ;;  %v8137_v52 = vadd.f32 %v9882_v20, %v9921_v21  ;;  %v8138_v8 = vadd.f32 %v9890_v29, %v9929_v36  ;;  %v8139_v32 = vadd.f32 %v9897_v60, %v9939_v4  ;;  %vm10703_vm8 = vmmov %vm10695_vm0 }
 0x2ce   : > { %v6716_v22 = vcombine.low %v6708_v19, %v6715_v31  ;;  %v6725_v51 = vrot.slane %v6717_v42, %v9682_v48  ;;  %v6732_v23 = vrot.slane %v6718_v25, %v9682_v48  ;;  %v8140_v11 = vadd.f32 %v9907_v44, %v9945_v3 }
 0x2cf   : > { %v7506_v18 = vpack.c.bf16 %v5672_v41, %v5672_v41  ;;  %v6106_v62 = vsel %vm10685_vm14, %v5672_v41, 0.0  ;;  %v5038_v53 = vcombine.high %v8137_v52, %v8137_v52  ;;  %v10163_v20 = vrot.slane %v8137_v52, %v9682_v48  ;;  %vm10704_vm14 = vmmov %vm10695_vm0 }
 0x2d0   : > { %v6107_v21 = vadd.f32 %v6106_v62, %v6105_v59  ;;  %v6733_v29 = vcombine.low %v6725_v51, %v6732_v23  ;;  %v7005_v36 = vsel %vm10686_vm5, %v6716_v22, 0.0  ;;  %v5004_v60 = vcombine.high %v8138_v8, %v8138_v8  ;;  %vm10707_vm5 = vmmov %vm10695_vm0 }
 0x2d1   : > { %v6759_v4 = vrot.slane %v6751_v46, %v9682_v48  ;;  %6056 = vst.msk [vmem:[%s9738_s24 + $0x4c] sm:$0xf] %vm10687_vm6, %v7506_v18  ;;  %v7006_v5 = vadd.f32 %v7005_v36, %v7004_v49  ;;  %v5052_v45 = vrot.slane %v5038_v53, %v9682_v48  ;;  %v5053_v44 = vcombine.high %v10163_v20, %v10163_v20  ;;  %vm10708_vm6 = vmmov %vm10693_vm1 }
 0x2d2   : > { %v7007_v3 = vsel %vm10688_vm12, %v6733_v29, 0.0  ;;  %v5011_v47 = vrot.slane %v8138_v8, %v9682_v48  ;;  %v5018_v56 = vrot.slane %v5004_v60, %v9682_v48  ;;  %v6109_v7 = vadd.f32 %v6108_v37, %v6107_v21  ;;  %vm10709_vm12 = vmmov %vm10695_vm0 }
 0x2d3   : > { %v7008_v2 = vadd.f32 %v7007_v3, %v7006_v5  ;;  %v5725_v6 = vcombine.low %v5053_v44, %v5052_v45  ;;  %v6232_v10 = vmul.f32 %v5053_v44, %v5053_v44  ;;  %v6233_v54 = vmul.f32 %v5052_v45, %v5052_v45 }
 0x2d4   : > { %v7009_v34 = vsel %vm10689_vm11, %v6750_v58, 0.0  ;;  %v5019_v19 = vcombine.high %v5011_v47, %v5011_v47  ;;  %v5020_v61 = vcombine.high %v5018_v56, %v5018_v56  ;;  %v5054_v38 = vcombine.high %v8139_v32, %v8139_v32  ;;  %vm10710_vm11 = vmmov %vm10693_vm1 }
 0x2d5   : > { %v10178_v50 = vmul.f32 %v10163_v20, %v10163_v20  ;;  %v6224_v0 = vmul.f32 %v5011_v47, %v5011_v47  ;;  %v7010_v30 = vadd.f32 %v7009_v34, %v7008_v2  ;;  %v5061_v26 = vrot.slane %v8139_v32, %v9682_v48 }
 0x2d6   : > { %v5739_v57 = vrot.slane %v5725_v6, %v9682_v48  ;;  %v5691_v46 = vcombine.low %v5011_v47, %v5019_v19  ;;  %v6225_v16 = vmul.f32 %v5019_v19, %v5019_v19  ;;  %v5068_v37 = vrot.slane %v5054_v38, %v9682_v48 }
 0x2d7   : > { %v6786_v33 = vcombine.low %v6232_v10, %v6233_v54  ;;  %v6226_v28 = vmul.f32 %v5020_v61, %v5020_v61  ;;  %v5069_v58 = vcombine.high %v5061_v26, %v5061_v26  ;;  %v5021_v24 = vcombine.high %v8140_v11, %v8140_v11 }
 0x2d8   : > { %v5705_v55 = vrot.slane %v5691_v46, %v9682_v48  ;;  %v6752_v63 = vcombine.low %v6224_v0, %v6225_v16  ;;  %v5070_v15 = vcombine.high %v5068_v37, %v5068_v37  ;;  %v6234_v35 = vmul.f32 %v5061_v26, %v5061_v26 }
 0x2d9   : > { %v5741_v9 = vcombine.low %v5061_v26, %v5069_v58  ;;  %v6235_v39 = vmul.f32 %v5069_v58, %v5069_v58  ;;  %v5028_v12 = vrot.slane %v8140_v11, %v9682_v48  ;;  %v5035_v49 = vrot.slane %v5021_v24, %v9682_v48  ;;  %v10694_v26 = vld [vmem:[#allocation3_spill] sm:$0xff] }
 0x2da   : > { %v5706_v59 = vcombine.low %v10136_v17, %v5705_v55  ;;  %v6766_v31 = vrot.slane %v6752_v63, %v9682_v48  ;;  %v5742_v42 = vcombine.low %v5068_v37, %v5070_v15  ;;  %v6237_v25 = vmul.f32 %v5070_v15, %v5070_v15 }
 0x2db   : > { %v5749_v41 = vrot.slane %v5741_v9, %v9682_v48  ;;  %v6236_v52 = vmul.f32 %v5068_v37, %v5068_v37  ;;  %v5036_v8 = vcombine.high %v5028_v12, %v5028_v12  ;;  %v5037_v32 = vcombine.high %v5035_v49, %v5035_v49  ;;  %v10699_v9 = vld [vmem:[#allocation8_spill] sm:$0xff] }
 0x2dc   : > { %v7508_v22 = vpack.c.bf16 %v5706_v59, %v5706_v59  ;;  %v6110_v51 = vsel %vm10690_vm2, %v5706_v59, 0.0  ;;  %v6767_v23 = vcombine.low %v6759_v4, %v6766_v31  ;;  %v5756_v11 = vrot.slane %v5742_v42, %v9682_v48  ;;  %vm10714_vm2 = vmmov %vm10695_vm0 }
 0x2dd   : > { %v6111_v18 = vadd.f32 %v6110_v51, %v6109_v7  ;;  %v6802_v62 = vcombine.low %v6234_v35, %v6235_v39  ;;  %v6803_v53 = vcombine.low %v6236_v52, %v6237_v25  ;;  %v5707_v17 = vcombine.low %v5020_v61, %v5028_v12  ;;  %v10700_v39 = vld [vmem:[#allocation4_spill] sm:$0xff] }
 0x2de   : > { %6058 = vst.msk [vmem:[%s9738_s24 + $0x54] sm:$0xf] %vm10691_vm9, %v7508_v22  ;;  %v7011_v21 = vsel %vm10692_vm10, %v6767_v23, 0.0  ;;  %v5757_v29 = vcombine.low %v5749_v41, %v5756_v11  ;;  %v5708_v36 = vcombine.low %v5036_v8, %v5035_v49  ;;  %v5724_v60 = vcombine.low %v5037_v32, %v10163_v20  ;;  %vm10715_vm9 = vmmov %vm10695_vm0 }
 0x2df   : > { %v6800_v5 = vrot.slane %v6786_v33, %v9682_v48  ;;  %v7012_v45 = vadd.f32 %v7011_v21, %v7010_v30  ;;  %v6817_v4 = vrot.slane %v6803_v53, %v9682_v48  ;;  %v5715_v44 = vrot.slane %v5707_v17, %v9682_v48  ;;  %vm10716_vm10 = vmmov %vm10695_vm0 }
 0x2e0   : > { %v7511_v3 = vpack.c.bf16 %v5757_v29, %v5757_v29  ;;  %v5722_v47 = vrot.slane %v5708_v36, %v9682_v48  ;;  %v5732_v56 = vrot.slane %v5724_v60, %v9682_v48  ;;  %v6227_v7 = vmul.f32 %v5028_v12, %v5028_v12 }
 0x2e1   : > { %v6810_v2 = vrot.slane %v6802_v62, %v9682_v48  ;;  %v6228_v6 = vmul.f32 %v5036_v8, %v5036_v8  ;;  %v6229_v10 = vmul.f32 %v5035_v49, %v5035_v49  ;;  %v6230_v54 = vmul.f32 %v5037_v32, %v5037_v32 }
 0x2e2   : > { %6061 = vst.msk [vmem:[%s9738_s24 + $0x60] sm:$0xf] %vm10693_vm1, %v7511_v3  ;;  %v5723_v20 = vcombine.low %v5715_v44, %v5722_v47  ;;  %v5740_v34 = vcombine.low %v5732_v56, %v5739_v57  ;;  %v6768_v19 = vcombine.low %v6226_v28, %v6227_v7  ;;  %v8141_v61 = vadd.f32 %v9923_v40, %v9960_v14 }
 0x2e3   : > { %v6818_v38 = vcombine.low %v6810_v2, %v6817_v4  ;;  %v6769_v0 = vcombine.low %v6228_v6, %v6229_v10  ;;  %v6785_v30 = vcombine.low %v6230_v54, %v10178_v50  ;;  %v8142_v46 = vadd.f32 %v10694_v26, %v9966_v27 }
 0x2e4   : > { %v7509_v16 = vpack.c.bf16 %v5723_v20, %v5723_v20  ;;  %v7510_v37 = vpack.c.bf16 %v5740_v34, %v5740_v34  ;;  %v6112_v33 = vsel %vm10695_vm0, %v5723_v20, 0.0  ;;  %v6114_v58 = vsel %vm10696_vm7, %v5740_v34, 0.0 }
 0x2e5   : > { %v6113_v24 = vadd.f32 %v6112_v33, %v6111_v18  ;;  %v6776_v57 = vrot.slane %v6768_v19, %v9682_v48  ;;  %v6783_v28 = vrot.slane %v6769_v0, %v9682_v48  ;;  %v6793_v40 = vrot.slane %v6785_v30, %v9682_v48  ;;  %v10706_v0 = vld [vmem:[#allocation5_spill] sm:$0xff] }
 0x2e6   : > { %6059 = vst.msk [vmem:[%s9738_s24 + $0x58] sm:$0xf] %vm10697_vm15, %v7509_v16  ;;  %v5105_v14 = vcombine.high %v8141_v61, %v8141_v61  ;;  %v10218_v27 = vrot.slane %v8141_v61, %v9682_v48  ;;  %v5071_v50 = vcombine.high %v8142_v46, %v8142_v46  ;;  %v5078_v55 = vrot.slane %v8142_v46, %v9682_v48  ;;  %vm10720_vm15 = vmmov %vm10695_vm0 }
 0x2e7   : > { %6060 = vst.msk [vmem:[%s9738_s24 + $0x5c] sm:$0xf] %vm10698_vm4, %v7510_v37  ;;  %v6115_v63 = vadd.f32 %v6114_v58, %v6113_v24  ;;  %v6784_v15 = vcombine.low %v6776_v57, %v6783_v28  ;;  %v6801_v35 = vcombine.low %v6793_v40, %v6800_v5  ;;  %v8143_v12 = vadd.f32 %v10700_v39, %v10699_v9  ;;  %vm10721_vm4 = vmmov %vm10693_vm1 }
 0x2e8   : > { %v5119_v49 = vrot.slane %v5105_v14, %v9682_v48  ;;  %v5120_v59 = vcombine.high %v10218_v27, %v10218_v27  ;;  %v5085_v31 = vrot.slane %v5071_v50, %v9682_v48  ;;  %v6116_v42 = vsel %vm10701_vm3, %v5757_v29, 0.0  ;;  %vm10722_vm3 = vmmov %vm10695_vm0 }
 0x2e9   : > { %v7013_v25 = vsel %vm10702_vm13, %v6784_v15, 0.0  ;;  %v7015_v41 = vsel %vm10703_vm8, %v6801_v35, 0.0  ;;  %v5086_v52 = vcombine.high %v5078_v55, %v5078_v55  ;;  %v7017_v8 = vsel %vm10704_vm14, %v6818_v38, 0.0  ;;  %v10705_v38 = vld [vmem:[#allocation10_spill] sm:$0xff]  ;;  %vm10723_vm13 = vmmov %vm10695_vm0 }
 0x2ea   : > { %v7014_v32 = vadd.f32 %v7013_v25, %v7012_v45  ;;  %v6246_v22 = vmul.f32 %v5120_v59, %v5120_v59  ;;  %v6238_v51 = vmul.f32 %v5078_v55, %v5078_v55  ;;  %v6247_v23 = vmul.f32 %v5119_v49, %v5119_v49  ;;  %vm10724_vm8 = vmmov %vm10693_vm1 }
 0x2eb   : > { %v5087_v11 = vcombine.high %v5085_v31, %v5085_v31  ;;  %v5758_v18 = vcombine.low %v5078_v55, %v5086_v52  ;;  %v6239_v62 = vmul.f32 %v5086_v52, %v5086_v52  ;;  %v10233_v17 = vmul.f32 %v10218_v27, %v10218_v27  ;;  %vm10725_vm14 = vmmov %vm10693_vm1 }
 0x2ec   : > { %v7016_v53 = vadd.f32 %v7015_v41, %v7014_v32  ;;  %v5121_v21 = vcombine.high %v5119_v49, %v5119_v49  ;;  %v5122_v29 = vcombine.high %v8143_v12, %v8143_v12  ;;  %v6240_v60 = vmul.f32 %v5085_v31, %v5085_v31  ;;  %v10711_v32 = vld [vmem:[#allocation6_spill] sm:$0xff] }
 0x2ed   : > { %v5759_v36 = vcombine.low %v5085_v31, %v5087_v11  ;;  %v6241_v5 = vmul.f32 %v5087_v11, %v5087_v11  ;;  %v6819_v4 = vcombine.low %v6238_v51, %v6239_v62  ;;  %v5792_v44 = vcombine.low %v5120_v59, %v5119_v49  ;;  %v10712_v51 = vld [vmem:[#allocation7_spill] sm:$0xff]  ;;  %v10713_v11 = vld [vmem:[#allocation9_spill] sm:$0xff] }
 0x2ee   : > { %v5129_v45 = vrot.slane %v8143_v12, %v9682_v48  ;;  %v5136_v3 = vrot.slane %v5122_v29, %v9682_v48  ;;  %v6248_v47 = vmul.f32 %v5121_v21, %v5121_v21  ;;  %v6853_v56 = vcombine.low %v6246_v22, %v6247_v23 }
 0x2ef   : > { %v5766_v7 = vrot.slane %v5758_v18, %v9682_v48  ;;  %v5773_v2 = vrot.slane %v5759_v36, %v9682_v48  ;;  %v6820_v6 = vcombine.low %v6240_v60, %v6241_v5  ;;  %v6827_v10 = vrot.slane %v6819_v4, %v9682_v48 }
 0x2f0   : > { %v5137_v54 = vcombine.high %v5136_v3, %v5136_v3  ;;  %v5793_v20 = vcombine.low %v5121_v21, %v5129_v45  ;;  %v6249_v34 = vmul.f32 %v5129_v45, %v5129_v45  ;;  %v8144_v30 = vadd.f32 %v10706_v0, %v10705_v38 }
 0x2f1   : > { %v5774_v19 = vcombine.low %v5766_v7, %v5773_v2  ;;  %v6834_v61 = vrot.slane %v6820_v6, %v9682_v48  ;;  %v6117_v26 = vadd.f32 %v6116_v42, %v6115_v63  ;;  %v5800_v46 = vrot.slane %v5792_v44, %v9682_v48 }
 0x2f2   : > { %v5807_v16 = vrot.slane %v5793_v20, %v9682_v48  ;;  %v5809_v37 = vcombine.low %v5136_v3, %v5137_v54  ;;  %v6854_v33 = vcombine.low %v6248_v47, %v6249_v34  ;;  %v5088_v28 = vcombine.high %v8144_v30, %v8144_v30 }
 0x2f3   : > { %v7512_v58 = vpack.c.bf16 %v5774_v19, %v5774_v19  ;;  %v6118_v24 = vsel %vm10707_vm5, %v5774_v19, 0.0  ;;  %v6835_v57 = vcombine.low %v6827_v10, %v6834_v61  ;;  %v6251_v14 = vmul.f32 %v5137_v54, %v5137_v54  ;;  %vm10726_vm5 = vmmov %vm10695_vm0 }
 0x2f4   : > { %v5808_v40 = vcombine.low %v5800_v46, %v5807_v16  ;;  %v6861_v50 = vrot.slane %v6853_v56, %v9682_v48  ;;  %v6868_v55 = vrot.slane %v6854_v33, %v9682_v48  ;;  %v6250_v63 = vmul.f32 %v5136_v3, %v5136_v3 }
 0x2f5   : > { %6062 = vst.msk [vmem:[%s9738_s24 + $0x64] sm:$0xf] %vm10708_vm6, %v7512_v58  ;;  %v5095_v15 = vrot.slane %v8144_v30, %v9682_v48  ;;  %v5102_v35 = vrot.slane %v5088_v28, %v9682_v48  ;;  %v6119_v9 = vadd.f32 %v6118_v24, %v6117_v26  ;;  %v7019_v39 = vsel %vm10709_vm12, %v6835_v57, 0.0  ;;  %vm10727_vm6 = vmmov %vm10695_vm0 }
 0x2f6   : > { %v5817_v12 = vrot.slane %v5809_v37, %v9682_v48  ;;  %v7514_v49 = vpack.c.bf16 %v5808_v40, %v5808_v40  ;;  %v6869_v59 = vcombine.low %v6861_v50, %v6868_v55  ;;  %v7018_v41 = vadd.f32 %v7017_v8, %v7016_v53  ;;  %vm10728_vm12 = vmmov %vm10695_vm0 }
 0x2f7   : > { %v5103_v31 = vcombine.high %v5095_v15, %v5095_v15  ;;  %v5104_v42 = vcombine.high %v5102_v35, %v5102_v35  ;;  %v6243_v25 = vmul.f32 %v5102_v35, %v5102_v35  ;;  %v6870_v52 = vcombine.low %v6250_v63, %v6251_v14 }
 0x2f8   : > { %6064 = vst.msk [vmem:[%s9738_s24 + $0x6c] sm:$0xf] %vm10710_vm11, %v7514_v49  ;;  %v8145_v22 = vadd.f32 %v10711_v32, %v9991_v1  ;;  %v8146_v23 = vadd.f32 %v10712_v51, %v9996_v43  ;;  %v8147_v18 = vadd.f32 %v10713_v11, %v10004_v13  ;;  %v7020_v60 = vadd.f32 %v7019_v39, %v7018_v41  ;;  %v10719_v39 = vld [vmem:[#allocation11_spill] sm:$0xff]  ;;  %vm10729_vm11 = vmmov %vm10693_vm1 }
 0x2f9   : > { %v5775_v62 = vcombine.low %v5103_v31, %v5102_v35  ;;  %v5776_v21 = vcombine.low %v5104_v42, %v10218_v27  ;;  %v6242_v29 = vmul.f32 %v5103_v31, %v5103_v31  ;;  %v6244_v36 = vmul.f32 %v5104_v42, %v5104_v42 }
 0x2fa   : > { %v5172_v5 = vcombine.high %v8145_v22, %v8145_v22  ;;  %v10264_v8 = vrot.slane %v8145_v22, %v9682_v48  ;;  %v5138_v53 = vcombine.high %v8146_v23, %v8146_v23  ;;  %v6122_v13 = vsel %vm10714_vm2, %v5808_v40, 0.0  ;;  %vm10730_vm2 = vmmov %vm10695_vm0 }
 0x2fb   : > { %v5783_v4 = vrot.slane %v5775_v62, %v9682_v48  ;;  %v5790_v1 = vrot.slane %v5776_v21, %v9682_v48  ;;  %v6836_v44 = vcombine.low %v6242_v29, %v6243_v25  ;;  %v6837_v43 = vcombine.low %v6244_v36, %v10233_v17 }
 0x2fc   : > { %v10271_v45 = vrot.slane %v5172_v5, %v9682_v48  ;;  %v10275_v27 = vcombine.high %v10264_v8, %v10264_v8  ;;  %v5145_v3 = vrot.slane %v8146_v23, %v9682_v48  ;;  %v5152_v2 = vrot.slane %v5138_v53, %v9682_v48 }
 0x2fd   : > { %v5791_v47 = vcombine.low %v5783_v4, %v5790_v1  ;;  %v6844_v56 = vrot.slane %v6836_v44, %v9682_v48  ;;  %v6851_v7 = vrot.slane %v6837_v43, %v9682_v48  ;;  %v6878_v17 = vrot.slane %v6870_v52, %v9682_v48 }
 0x2fe   : > { %v5188_v6 = vcombine.high %v10271_v45, %v10271_v45  ;;  %v10286_v10 = vmul.f32 %v10275_v27, %v10275_v27  ;;  %v10290_v54 = vmul.f32 %v10271_v45, %v10271_v45  ;;  %v5153_v61 = vcombine.high %v5145_v3, %v5145_v3 }
 0x2ff   : > { %v7513_v20 = vpack.c.bf16 %v5791_v47, %v5791_v47  ;;  %v6120_v34 = vsel %vm10715_vm9, %v5791_v47, 0.0  ;;  %v6852_v19 = vcombine.low %v6844_v56, %v6851_v7  ;;  %v7023_v38 = vsel %vm10716_vm10, %v6869_v59, 0.0  ;;  %vm10731_vm9 = vmmov %vm10695_vm0 }
 0x300   : > { %v6121_v0 = vadd.f32 %v6120_v34, %v6119_v9  ;;  %v5844_v30 = vcombine.low %v10275_v27, %v10271_v45  ;;  %v10298_v26 = vmul.f32 %v10264_v8, %v10264_v8  ;;  %v6262_v16 = vmul.f32 %v5188_v6, %v5188_v6  ;;  %v10718_v9 = vld [vmem:[#allocation12_spill] sm:$0xff] }
 0x301   : > { %6063 = vst.msk [vmem:[%s9738_s24 + $0x68] sm:$0xf] %vm10693_vm1, %v7513_v20  ;;  %v7021_v46 = vsel %vm10695_vm0, %v6852_v19, 0.0  ;;  %v5154_v37 = vcombine.high %v5152_v2, %v5152_v2  ;;  %v5810_v33 = vcombine.low %v5145_v3, %v5153_v61  ;;  %v6252_v57 = vmul.f32 %v5145_v3, %v5145_v3 }
 0x302   : > { %v6123_v58 = vadd.f32 %v6122_v13, %v6121_v0  ;;  %v7022_v24 = vadd.f32 %v7021_v46, %v7020_v60  ;;  %v6253_v28 = vmul.f32 %v5153_v61, %v5153_v61  ;;  %v6905_v40 = vcombine.low %v10286_v10, %v10290_v54 }
 0x303   : > { %v5824_v14 = vrot.slane %v5810_v33, %v9682_v48  ;;  %v5826_v50 = vcombine.low %v5152_v2, %v5154_v37  ;;  %v6255_v55 = vmul.f32 %v5154_v37, %v5154_v37  ;;  %vm10717_vm7 = vcmask 1045504  }
 0x304   : > { %v7024_v63 = vadd.f32 %v7023_v38, %v7022_v24  ;;  %v6871_v15 = vcombine.low %v6252_v57, %v6253_v28  ;;  %v4564_v35 = vsel %vm10717_vm7, %v8147_v18, 0.0  ;;  %v8148_v49 = vadd.f32 %v10719_v39, %v10718_v9 }
 0x305   : > { %v5825_v59 = vcombine.low %v5817_v12, %v5824_v14  ;;  %v5834_v31 = vrot.slane %v5826_v50, %v9682_v48  ;;  %v6254_v42 = vmul.f32 %v5152_v2, %v5152_v2  ;;  %v5189_v25 = vcombine.high %v4564_v35, %v4564_v35 }
 0x306   : > { %v6885_v41 = vrot.slane %v6871_v15, %v9682_v48  ;;  %v5196_v52 = vrot.slane %v4564_v35, %v9682_v48  ;;  %v5155_v32 = vcombine.high %v8148_v49, %v8148_v49  ;;  %v5162_v22 = vrot.slane %v8148_v49, %v9682_v48 }
 0x307   : > { %v7515_v51 = vpack.c.bf16 %v5825_v59, %v5825_v59  ;;  %v6124_v23 = vsel %vm10720_vm15, %v5825_v59, 0.0  ;;  %v6887_v11 = vcombine.low %v6254_v42, %v6255_v55  ;;  %v5203_v18 = vrot.slane %v5189_v25, %v9682_v48 }
 0x308   : > { %v6125_v62 = vadd.f32 %v6124_v23, %v6123_v58  ;;  %v6886_v12 = vcombine.low %v6878_v17, %v6885_v41  ;;  %v5204_v21 = vcombine.high %v5196_v52, %v5196_v52  ;;  %v5860_v29 = vcombine.low %v5188_v6, %v5196_v52 }
 0x309   : > { %6065 = vst.msk [vmem:[%s9738_s24 + $0x70] sm:$0xf] %vm10721_vm4, %v7515_v51  ;;  %v6263_v36 = vmul.f32 %v5196_v52, %v5196_v52  ;;  %v6265_v60 = vmul.f32 %v5203_v18, %v5203_v18  ;;  %v5169_v5 = vrot.slane %v5155_v32, %v9682_v48  ;;  %v5170_v53 = vcombine.high %v5162_v22, %v5162_v22 }
 0x30a   : > { %v7025_v4 = vsel %vm10722_vm3, %v6886_v12, 0.0  ;;  %v5861_v1 = vcombine.low %v5204_v21, %v5203_v18  ;;  %v5868_v44 = vrot.slane %v5860_v29, %v9682_v48  ;;  %v6264_v43 = vmul.f32 %v5204_v21, %v5204_v21 }
 0x30b   : > { %v7026_v13 = vadd.f32 %v7025_v4, %v7024_v63  ;;  %v6921_v45 = vcombine.low %v6262_v16, %v6263_v36  ;;  %v5171_v27 = vcombine.high %v5169_v5, %v5169_v5  ;;  %v5827_v3 = vcombine.low %v5162_v22, %v5170_v53 }
 0x30c   : > { %v5875_v47 = vrot.slane %v5861_v1, %v9682_v48  ;;  %v6922_v56 = vcombine.low %v6264_v43, %v6265_v60  ;;  %v6256_v7 = vmul.f32 %v5162_v22, %v5162_v22  ;;  %v6257_v2 = vmul.f32 %v5170_v53, %v5170_v53 }
 0x30d   : > { %v6929_v17 = vrot.slane %v6921_v45, %v9682_v48  ;;  %v5841_v6 = vrot.slane %v5827_v3, %v9682_v48  ;;  %v5843_v10 = vcombine.low %v5171_v27, %v10264_v8  ;;  %v6258_v54 = vmul.f32 %v5171_v27, %v5171_v27 }
 0x30e   : > { %v6895_v20 = vrot.slane %v6887_v11, %v9682_v48  ;;  %v5876_v34 = vcombine.low %v5868_v44, %v5875_v47  ;;  %v6936_v19 = vrot.slane %v6922_v56, %v9682_v48  ;;  %v6888_v61 = vcombine.low %v6256_v7, %v6257_v2 }
 0x30f   : > { %v5858_v38 = vrot.slane %v5844_v30, %v9682_v48  ;;  %v5842_v0 = vcombine.low %v5834_v31, %v5841_v6  ;;  %v5851_v46 = vrot.slane %v5843_v10, %v9682_v48  ;;  %v6904_v16 = vcombine.low %v6258_v54, %v10298_v26 }
 0x310   : > { %v6919_v37 = vrot.slane %v6905_v40, %v9682_v48  ;;  %v7518_v33 = vpack.c.bf16 %v5876_v34, %v5876_v34  ;;  %v6937_v8 = vcombine.low %v6929_v17, %v6936_v19  ;;  %v6902_v58 = vrot.slane %v6888_v61, %v9682_v48 }
 0x311   : > { %v5859_v24 = vcombine.low %v5851_v46, %v5858_v38  ;;  %v7516_v57 = vpack.c.bf16 %v5842_v0, %v5842_v0  ;;  %v6126_v28 = vsel %vm10723_vm13, %v5842_v0, 0.0  ;;  %v6912_v14 = vrot.slane %v6904_v16, %v9682_v48 }
 0x312   : > { %6068 = vst.msk [vmem:[%s9738_s24 + $0x7c] sm:$0xf] %vm10724_vm8, %v7518_v33  ;;  %v6127_v30 = vadd.f32 %v6126_v28, %v6125_v62  ;;  %v6903_v50 = vcombine.low %v6895_v20, %v6902_v58  ;;  %v6130_v35 = vsel %vm10728_vm12, %v5876_v34, 0.0  ;;  %v7031_v59 = vsel %vm10731_vm9, %v6937_v8, 0.0 }
 0x313   : > { %v7517_v55 = vpack.c.bf16 %v5859_v24, %v5859_v24  ;;  %6066 = vst.msk [vmem:[%s9738_s24 + $0x74] sm:$0xf] %vm10725_vm14, %v7516_v57  ;;  %v6128_v26 = vsel %vm10726_vm5, %v5859_v24, 0.0  ;;  %v6920_v40 = vcombine.low %v6912_v14, %v6919_v37  ;;  %vm7039_vm10 = vcmask 1040384  }
 0x314   : > { %v6129_v63 = vadd.f32 %v6128_v26, %v6127_v30  ;;  %v7027_v15 = vsel %vm10727_vm6, %v6903_v50, 0.0  ;;  %vm10732_vm1 = vcmask 58368  }
 0x315   : > { %6067 = vst.msk [vmem:[%s9738_s24 + $0x78] sm:$0xf] %vm10729_vm11, %v7517_v55  ;;  %v7028_v9 = vadd.f32 %v7027_v15, %v7026_v13  ;;  %v7029_v48 = vsel %vm10730_vm2, %v6920_v40, 0.0 }
 0x316   : > { %v6131_v39 = vadd.f32 %v6130_v35, %v6129_v63 }
 0x317   : > { %v7030_v49 = vadd.f32 %v7029_v48, %v7028_v9 }
 0x318   : > { %v6132_v31 = vrot.slane %v6131_v39, 4 }
 0x319   : > { %v7032_v42 = vadd.f32 %v7031_v59, %v7030_v49 }
 0x31a   : > { %v6133_v25 = vadd.f32 %v6132_v31, %v6131_v39 }
 0x31b   : > { %v7033_v41 = vrot.slane %v7032_v42, 4 }
 0x31c   : > { %v6134_v52 = vrot.slane %v6133_v25, 2 }
 0x31d   : > { %v7034_v32 = vadd.f32 %v7033_v41, %v7032_v42 }
 0x31e   : > { %v6135_v22 = vadd.f32 %v6134_v52, %v6133_v25 }
 0x31f   : > { %v7035_v51 = vrot.slane %v7034_v32, 2 }
 0x320   : > { %v6136_v23 = vrot.slane %v6135_v22, 1 }
 0x321   : > { %v7036_v11 = vadd.f32 %v7035_v51, %v7034_v32 }
 0x322   : > { %v6137_v62 = vadd.f32 %v6136_v23, %v6135_v22 }
 0x323   : > { %v7037_v18 = vrot.slane %v7036_v11, 1 }
 0x325   : > { %v7038_v12 = vadd.f32 %v7037_v18, %v7036_v11 }
 0x327   : > { %v7040_v21 = vsel %vm7039_vm10, %v6137_v62, %v7038_v12 }
 0x328   : > { %7041 = vst.msk [vmem:[%s208_s27] sm:$0x3] %vm10732_vm1, %v7040_v21 }
 0x329 PF: > { %s15_s15 = sadd.s32 1, %s8516_s15  }
 0x32a   : > { %p12_p4 = scmp.ge.s32.totalorder %s15_s15, 4  }
 0x32c   :  { %14 = sbr.rel (!%p12_p4) target bundleno = 1 (0x1), region = 82 }

</bundles_post_ra>
